<compile_context>
chip_gen: v5e
topology: v5e:2x2
jax: 0.10.0
libtpu: 0.0.40
codegen_flags: <defaults>
</compile_context>

<pallas_src>
import functools

import jax
import jax.numpy as jnp
import numpy as np
from jax import lax
from jax.experimental import pallas as pl
from jax.experimental.pallas import tpu as pltpu


# ----------------------------------------------------------------------------- kernel
def sim_kernel(x_ref, prev_ref, mask_ref,
               wp_ref, bp_ref, wb_ref, bb_ref,
               w11_ref, b11_ref, w12_ref, b12_ref,
               w21_ref, b21_ref, w22_ref, b22_ref,
               wo_ref, bo_ref,
               xbody_ref, out_ref,
               scr_ref,
               *, img_w, cin, cm, cin_p, cm_p, mxu_dtype):
    lanes = mask_ref.shape[1]                  # B_blk * H * W (static)
    masks = mask_ref[...]                      # (9, L) f32, loaded once, reused by all convs
    m = [masks[t:t + 1, :] for t in range(9)]

    # Zero the tap-padding rows of the scratch so uninitialized VMEM can never reach the MXU
    # (finite garbage * 0-weight is fine, NaN * 0 is not).  These Python loops are statically
    # empty when Cin / Cm are already multiples of 8 (the production case), so they cost
    # nothing there.  Done every step (no reliance on step 0 running on this core).
    pad_rows = set()
    if cin != cin_p:
        for t in range(9):
            pad_rows.add((t * cin_p + cin, (t + 1) * cin_p))
    if cm != cm_p:
        for t in range(18):
            pad_rows.add((t * cm_p + cm, (t + 1) * cm_p))
    for lo, hi in sorted(pad_rows):
        scr_ref[lo:hi, :] = jnp.zeros((hi - lo, lanes), jnp.float32)

    def stack(a, base, stride):
        # Write the 9 rolled+masked taps of `a` (C, L) into scratch rows
        # [base + t*stride, base + t*stride + C).  Tap (dy, dx) needs
        # shifted[p] = a[p + dy*W + dx]  ->  roll by -(dy*W + dx), chained as roll(dy) then
        # roll(dx) so the XLU rotations are small and overlap with the MXU.
        c = a.shape[0]
        for iy, dy in enumerate((-1, 0, 1)):
            sy = (-dy * img_w) % lanes
            ay = a if sy == 0 else pltpu.roll(a, sy, axis=1)
            for ix, dx in enumerate((-1, 0, 1)):
                t = iy * 3 + ix
                sx = (-dx) % lanes
                at = ay if sx == 0 else pltpu.roll(ay, sx, axis=1)
                if not (dy == 0 and dx == 0):
                    at = at * m[t]             # implicit zero padding (also kills cross-image leaks)
                r0 = base + t * stride
                scr_ref[r0:r0 + c, :] = at

    def contract(w_ref_, b_ref_, k_rows, relu):
        # ONE MXU contraction over all stacked taps; bf16 operands, f32 accumulation.
        acc = jnp.dot(w_ref_[...], scr_ref[0:k_rows, :].astype(mxu_dtype),
                      preferred_element_type=jnp.float32)
        acc = acc + b_ref_[...]                # (Cout, L) + (Cout, 1), f32
        return jnp.maximum(acc, 0.0) if relu else acc

    x = x_ref[0].astype(jnp.float32)           # (Cin, L)
    prev = prev_ref[0].astype(jnp.float32)     # (Cm,  L)

    # proj: conv3x3(Cin -> Cm) + ReLU
    stack(x, 0, cin_p)
    h = contract(wp_ref, bp_ref, 9 * cin_p, relu=True)

    # body conv on concat([h, prev_feats]): both halves stacked -> one K = 18*Cm_p contraction.
    stack(h, 0, cm_p)
    stack(prev, 9 * cm_p, cm_p)
    b0 = contract(wb_ref, bb_ref, 18 * cm_p, relu=True)

    # ResBlock 1: x + conv(relu(conv(x)))
    stack(b0, 0, cm_p)
    t1 = contract(w11_ref, b11_ref, 9 * cm_p, relu=True)
    stack(t1, 0, cm_p)
    r1 = b0 + contract(w12_ref, b12_ref, 9 * cm_p, relu=False)

    # ResBlock 2
    stack(r1, 0, cm_p)
    t2 = contract(w21_ref, b21_ref, 9 * cm_p, relu=True)
    stack(t2, 0, cm_p)
    r2 = r1 + contract(w22_ref, b22_ref, 9 * cm_p, relu=False)

    # out: conv3x3(Cm -> Co) + ReLU
    stack(r2, 0, cm_p)
    o = contract(wo_ref, bo_ref, 9 * cm_p, relu=True)

    xbody_ref[0] = r2.astype(xbody_ref.dtype)  # lane-dense (Cm, L) store
    out_ref[0] = o.astype(out_ref.dtype)       # lane-dense (Co, L) store


# ---------------------------------------------------------------------------- wrapper
def _pack_weight(w, cin_p, dtype):
    """PyTorch OIHW (Cout, Cin, 3, 3) -> tap-stacked (Cout, 9*cin_p).

    Column t*cin_p + c multiplies scratch row t*cin_p + c (input channel c rolled by tap
    t = ky*3 + kx).  Padded input-channel columns are zero."""
    cout, cin = w.shape[0], w.shape[1]
    wt = jnp.transpose(w, (2, 3, 0, 1)).reshape(9, cout, cin)
    if cin_p != cin:
        wt = jnp.pad(wt, ((0, 0), (0, 0), (0, cin_p - cin)))
    return jnp.transpose(wt, (1, 0, 2)).reshape(cout, 9 * cin_p).astype(dtype)


def _tap_masks(h, w, b_blk):
    m = np.zeros((9, h, w), np.float32)
    for t in range(9):
        dy, dx = t // 3 - 1, t % 3 - 1
        m[t, max(0, -dy):h - max(0, dy), max(0, -dx):w - max(0, dx)] = 1.0
    return np.tile(m.reshape(9, h * w), (1, b_blk))


def _const_index_map(ndim):
    def idx(g):
        return (0,) * ndim
    return idx


def _pick_bblk(n, hw, scr_rows, cm_p, vmem_budget_bytes=20 << 20, max_lanes=8192):
    """Largest batch fold that fits the per-step VMEM budget while keeping >=2 grid steps."""
    per_lane_bytes = 4 * (scr_rows + 10 * cm_p + 32)   # scratch + live intermediates + slack
    lane_cap = max(hw, min(max_lanes, vmem_budget_bytes // per_lane_bytes))
    best = 1
    for b in range(1, n + 1):
        if n % b:
            continue
        if b * hw > lane_cap:
            continue
        if n >= 2 and n // b < 2:
            continue        # keep the parallel grid axis >= 2 so both v7x TCs get work
        best = b
    return best


def sim_forward(x, prev_feats, p, *, use_bf16=True, b_blk=None):
    """x: (N, Cin, H, W); prev_feats: (N, Cm, H, W); p: dict of conv weights/biases."""
    N, Cin, H, W = x.shape
    Cm = prev_feats.shape[1]
    Co = p["w_out"].shape[0]
    HW = H * W

    rup = lambda c: ((c + 7) // 8) * 8
    Cin_p, Cm_p = rup(Cin), rup(Cm)
    scr_rows = max(9 * Cin_p, 18 * Cm_p)

    if b_blk is None:
        b_blk = _pick_bblk(N, HW, scr_rows, Cm_p)
    assert N % b_blk == 0
    G = N // b_blk
    L = b_blk * HW

    # Fold B_blk images into the lane axis: (N, C, H, W) -> (G, C, B_blk*HW).  No channel pad.
    def fold(a):
        c = a.shape[1]
        return a.reshape(G, b_blk, c, HW).transpose(0, 2, 1, 3).reshape(G, c, L)

    x_f = fold(x)
    prev_f = fold(prev_feats)

    wdt = jnp.bfloat16 if use_bf16 else jnp.float32
    bias = lambda b: b.astype(jnp.float32).reshape(-1, 1)

    weights = [
        _pack_weight(p["w_proj"], Cin_p, wdt), bias(p["b_proj"]),
        jnp.concatenate([_pack_weight(p["w_body"][:, :Cm], Cm_p, wdt),     # h half
                         _pack_weight(p["w_body"][:, Cm:], Cm_p, wdt)],    # prev_feats half
                        axis=1),
        bias(p["b_body"]),
        _pack_weight(p["w_r11"], Cm_p, wdt), bias(p["b_r11"]),
        _pack_weight(p["w_r12"], Cm_p, wdt), bias(p["b_r12"]),
        _pack_weight(p["w_r21"], Cm_p, wdt), bias(p["b_r21"]),
        _pack_weight(p["w_r22"], Cm_p, wdt), bias(p["b_r22"]),
        _pack_weight(p["w_out"], Cm_p, wdt), bias(p["b_out"]),
    ]
    masks = jnp.asarray(_tap_masks(H, W, b_blk))
    consts = [masks] + weights
    inputs = [x_f, prev_f] + consts

    kernel = functools.partial(sim_kernel, img_w=W, cin=Cin, cm=Cm,
                               cin_p=Cin_p, cm_p=Cm_p, mxu_dtype=wdt)

    act_specs = [pl.BlockSpec((1, Cin, L), lambda g: (g, 0, 0)),
                 pl.BlockSpec((1, Cm, L), lambda g: (g, 0, 0))]
    out_shape = (jax.ShapeDtypeStruct((G, Cm, L), x.dtype),
                 jax.ShapeDtypeStruct((G, Co, L), x.dtype))
    out_specs = [pl.BlockSpec((1, Cm, L), lambda g: (g, 0, 0)),
                 pl.BlockSpec((1, Co, L), lambda g: (g, 0, 0))]

    def call(single_buffer_consts):
        buffered = getattr(pl, "Buffered", None)
        if single_buffer_consts and buffered is not None:
            const_spec = lambda a: pl.BlockSpec(a.shape, _const_index_map(a.ndim),
                                                pipeline_mode=buffered(1))
        else:
            const_spec = lambda a: pl.BlockSpec(a.shape, _const_index_map(a.ndim))
        in_specs = act_specs + [const_spec(a) for a in consts]
        return pl.pallas_call(
            kernel,
            out_shape=out_shape,
            grid_spec=pltpu.PrefetchScalarGridSpec(
                num_scalar_prefetch=0,
                grid=(G,),
                in_specs=in_specs,
                out_specs=out_specs,
                scratch_shapes=[pltpu.VMEM((scr_rows, L), jnp.float32)]),
            compiler_params=pltpu.CompilerParams(
                dimension_semantics=("parallel",),
                vmem_limit_bytes=48 * 1024 * 1024),
        )(*inputs)

    try:
        xbody_f, out_f = call(True)     # single-buffered constant operands
    except Exception:
        xbody_f, out_f = call(False)    # fallback: default double-buffering

    def unfold(a):
        c = a.shape[1]
        return a.reshape(G, c, b_blk, HW).transpose(0, 2, 1, 3).reshape(N, c, H, W)

    return unfold(xbody_f), unfold(out_f)


# -------------------------------------------------------------------------- reference
def _conv_ref(x, w, b):
    dn = lax.conv_dimension_numbers(x.shape, w.shape, ("NCHW", "OIHW", "NCHW"))
    y = lax.conv_general_dilated(x, w, (1, 1), ((1, 1), (1, 1)),
                                 dimension_numbers=dn,
                                 precision=lax.Precision.HIGHEST)
    return y + b[None, :, None, None]


def sim_ref(x, prev_feats, p):
    h = jnp.maximum(_conv_ref(x, p["w_proj"], p["b_proj"]), 0.0)
    cat = jnp.concatenate([h, prev_feats], axis=1)
    b0 = jnp.maximum(_conv_ref(cat, p["w_body"], p["b_body"]), 0.0)
    t1 = jnp.maximum(_conv_ref(b0, p["w_r11"], p["b_r11"]), 0.0)
    r1 = b0 + _conv_ref(t1, p["w_r12"], p["b_r12"])
    t2 = jnp.maximum(_conv_ref(r1, p["w_r21"], p["b_r21"]), 0.0)
    r2 = r1 + _conv_ref(t2, p["w_r22"], p["b_r22"])
    o = jnp.maximum(_conv_ref(r2, p["w_out"], p["b_out"]), 0.0)
    return r2, o


# -------------------------------------------------------------------------------- test
def _make_params(key, cin, cm, co):
    ks = jax.random.split(key, 16)
    wi = lambda k, o, i: jax.random.normal(k, (o, i, 3, 3), jnp.float32) * 0.1
    bi = lambda k, c: jax.random.normal(k, (c,), jnp.float32) * 0.1
    return {
        "w_proj": wi(ks[0], cm, cin), "b_proj": bi(ks[1], cm),
        "w_body": wi(ks[2], cm, 2 * cm), "b_body": bi(ks[3], cm),
        "w_r11": wi(ks[4], cm, cm), "b_r11": bi(ks[5], cm),
        "w_r12": wi(ks[6], cm, cm), "b_r12": bi(ks[7], cm),
        "w_r21": wi(ks[8], cm, cm), "b_r21": bi(ks[9], cm),
        "w_r22": wi(ks[10], cm, cm), "b_r22": bi(ks[11], cm),
        "w_out": wi(ks[12], co, cm), "b_out": bi(ks[13], co),
    }


def _check(key, n, cin, cm, co, h, w, use_bf16, atol, mean_atol):
    kp, kx, kprev = jax.random.split(key, 3)
    params = _make_params(kp, cin, cm, co)
    x = jax.random.normal(kx, (n, cin, h, w), jnp.float32)
    prev = jax.random.normal(kprev, (n, cm, h, w), jnp.float32)

    xbody, out = jax.block_until_ready(sim_forward(x, prev, params, use_bf16=use_bf16))
    xbody_r, out_r = sim_ref(x, prev, params)

    assert xbody.shape == (n, cm, h, w) and out.shape == (n, co, h, w)
    err = max(float(jnp.max(jnp.abs(xbody - xbody_r))),
              float(jnp.max(jnp.abs(out - out_r))))
    merr = max(float(jnp.mean(jnp.abs(xbody - xbody_r))),
               float(jnp.mean(jnp.abs(out - out_r))))
    # Tolerance derivation: bf16 MXU operands (~0.4% relative rounding) across 7 chained
    # 36-144 term contractions with activations up to ~4 gives a worst-element bound ~5e-2
    # (observed ~1e-2) and mean error a few 1e-3.  A tap/shift/mask/packing regression
    # produces errors on the activation scale (>= 0.1-1), far above both thresholds.
    assert err < atol and merr < mean_atol, f"max={err} mean={merr} (atol={atol})"


if __name__ == "__main__":
    key = jax.random.PRNGKey(0)
    k1, k2 = jax.random.split(key)
    # Config A: nominal small shapes; B_blk=1 keeps the parallel grid length 2 (v7x: 1 step/TC).
    _check(k1, n=2, cin=4, cm=4, co=4, h=16, w=16, use_bf16=True, atol=7e-2, mean_atol=1.5e-2)
    # Config B: batch folding (B_blk=2 images per lane slab, grid=2) plus channel counts that
    # are NOT multiples of 8 -> exercises in-kernel tap padding, exact-channel outputs, and the
    # cross-image mask correctness at slab boundaries.
    _check(k2, n=4, cin=3, cm=8, co=5, h=16, w=16, use_bf16=True, atol=7e-2, mean_atol=1.5e-2)
    print("KERNEL_OK")
</pallas_src>

<mosaic_0001>
module attributes {stable_mosaic.version = 11 : i64} {
  func.func @sim_kernel(%arg0: i32, %arg1: memref<1x4x256xf32, #tpu.memory_space<vmem>>, %arg2: memref<1x4x256xf32, #tpu.memory_space<vmem>>, %arg3: memref<9x256xf32, #tpu.memory_space<vmem>>, %arg4: memref<4x72xbf16, #tpu.memory_space<vmem>>, %arg5: memref<4x1xf32, #tpu.memory_space<vmem>>, %arg6: memref<4x144xbf16, #tpu.memory_space<vmem>>, %arg7: memref<4x1xf32, #tpu.memory_space<vmem>>, %arg8: memref<4x72xbf16, #tpu.memory_space<vmem>>, %arg9: memref<4x1xf32, #tpu.memory_space<vmem>>, %arg10: memref<4x72xbf16, #tpu.memory_space<vmem>>, %arg11: memref<4x1xf32, #tpu.memory_space<vmem>>, %arg12: memref<4x72xbf16, #tpu.memory_space<vmem>>, %arg13: memref<4x1xf32, #tpu.memory_space<vmem>>, %arg14: memref<4x72xbf16, #tpu.memory_space<vmem>>, %arg15: memref<4x1xf32, #tpu.memory_space<vmem>>, %arg16: memref<4x72xbf16, #tpu.memory_space<vmem>>, %arg17: memref<4x1xf32, #tpu.memory_space<vmem>>, %arg18: memref<1x4x256xf32, #tpu.memory_space<vmem>>, %arg19: memref<1x4x256xf32, #tpu.memory_space<vmem>>, %arg20: memref<144x256xf32, #tpu.memory_space<vmem>>) attributes {dimension_semantics = [#tpu.dimension_semantics<parallel>], iteration_bounds = array<i64: 2>, scalar_prefetch = 0 : i64, scratch_operands = 1 : i64, tpu.core_type = #tpu.core_type<tc>, window_params = [{transform_indices = @transform_0, window_bounds = array<i64: 1, 4, 256>}, {transform_indices = @transform_1, window_bounds = array<i64: 1, 4, 256>}, {pipeline_mode = #tpu.pipeline_mode<synchronous>, transform_indices = @transform_2, window_bounds = array<i64: 9, 256>}, {pipeline_mode = #tpu.pipeline_mode<synchronous>, transform_indices = @transform_3, window_bounds = array<i64: 4, 72>}, {pipeline_mode = #tpu.pipeline_mode<synchronous>, transform_indices = @transform_4, window_bounds = array<i64: 4, 1>}, {pipeline_mode = #tpu.pipeline_mode<synchronous>, transform_indices = @transform_5, window_bounds = array<i64: 4, 144>}, {pipeline_mode = #tpu.pipeline_mode<synchronous>, transform_indices = @transform_6, window_bounds = array<i64: 4, 1>}, {pipeline_mode = #tpu.pipeline_mode<synchronous>, transform_indices = @transform_7, window_bounds = array<i64: 4, 72>}, {pipeline_mode = #tpu.pipeline_mode<synchronous>, transform_indices = @transform_8, window_bounds = array<i64: 4, 1>}, {pipeline_mode = #tpu.pipeline_mode<synchronous>, transform_indices = @transform_9, window_bounds = array<i64: 4, 72>}, {pipeline_mode = #tpu.pipeline_mode<synchronous>, transform_indices = @transform_10, window_bounds = array<i64: 4, 1>}, {pipeline_mode = #tpu.pipeline_mode<synchronous>, transform_indices = @transform_11, window_bounds = array<i64: 4, 72>}, {pipeline_mode = #tpu.pipeline_mode<synchronous>, transform_indices = @transform_12, window_bounds = array<i64: 4, 1>}, {pipeline_mode = #tpu.pipeline_mode<synchronous>, transform_indices = @transform_13, window_bounds = array<i64: 4, 72>}, {pipeline_mode = #tpu.pipeline_mode<synchronous>, transform_indices = @transform_14, window_bounds = array<i64: 4, 1>}, {pipeline_mode = #tpu.pipeline_mode<synchronous>, transform_indices = @transform_15, window_bounds = array<i64: 4, 72>}, {pipeline_mode = #tpu.pipeline_mode<synchronous>, transform_indices = @transform_16, window_bounds = array<i64: 4, 1>}, {transform_indices = @transform_17, window_bounds = array<i64: 1, 4, 256>}, {transform_indices = @transform_18, window_bounds = array<i64: 1, 4, 256>}]} {
    %c0 = arith.constant 0 : index
    %c0_0 = arith.constant 0 : index
    %0 = vector.load %arg3[%c0, %c0_0] : memref<9x256xf32, #tpu.memory_space<vmem>>, vector<9x256xf32>
    %1 = vector.extract_strided_slice %0 {offsets = [0, 0], sizes = [1, 256], strides = [1, 1]} : vector<9x256xf32> to vector<1x256xf32>
    %2 = vector.extract_strided_slice %0 {offsets = [1, 0], sizes = [1, 256], strides = [1, 1]} : vector<9x256xf32> to vector<1x256xf32>
    %3 = vector.extract_strided_slice %0 {offsets = [2, 0], sizes = [1, 256], strides = [1, 1]} : vector<9x256xf32> to vector<1x256xf32>
    %4 = vector.extract_strided_slice %0 {offsets = [3, 0], sizes = [1, 256], strides = [1, 1]} : vector<9x256xf32> to vector<1x256xf32>
    %5 = vector.extract_strided_slice %0 {offsets = [5, 0], sizes = [1, 256], strides = [1, 1]} : vector<9x256xf32> to vector<1x256xf32>
    %6 = vector.extract_strided_slice %0 {offsets = [6, 0], sizes = [1, 256], strides = [1, 1]} : vector<9x256xf32> to vector<1x256xf32>
    %7 = vector.extract_strided_slice %0 {offsets = [7, 0], sizes = [1, 256], strides = [1, 1]} : vector<9x256xf32> to vector<1x256xf32>
    %8 = vector.extract_strided_slice %0 {offsets = [8, 0], sizes = [1, 256], strides = [1, 1]} : vector<9x256xf32> to vector<1x256xf32>
    %cst = arith.constant 0.000000e+00 : f32
    %9 = vector.broadcast %cst : f32 to vector<4x256xf32>
    %c4 = arith.constant 4 : index
    %c0_1 = arith.constant 0 : index
    %10 = vector.load %arg20[%c4, %c0_1] : memref<144x256xf32, #tpu.memory_space<vmem>>, vector<4x256xf32>
    tpu.vector_store %arg20[%c4, %c0_1], %9 {strides = array<i32>} : memref<144x256xf32, #tpu.memory_space<vmem>>, vector<4x256xf32>,
    %cst_2 = arith.constant 0.000000e+00 : f32
    %11 = vector.broadcast %cst_2 : f32 to vector<4x256xf32>
    %c12 = arith.constant 12 : index
    %c0_3 = arith.constant 0 : index
    %12 = vector.load %arg20[%c12, %c0_3] : memref<144x256xf32, #tpu.memory_space<vmem>>, vector<4x256xf32>
    tpu.vector_store %arg20[%c12, %c0_3], %11 {strides = array<i32>} : memref<144x256xf32, #tpu.memory_space<vmem>>, vector<4x256xf32>,
    %cst_4 = arith.constant 0.000000e+00 : f32
    %13 = vector.broadcast %cst_4 : f32 to vector<4x256xf32>
    %c20 = arith.constant 20 : index
    %c0_5 = arith.constant 0 : index
    %14 = vector.load %arg20[%c20, %c0_5] : memref<144x256xf32, #tpu.memory_space<vmem>>, vector<4x256xf32>
    tpu.vector_store %arg20[%c20, %c0_5], %13 {strides = array<i32>} : memref<144x256xf32, #tpu.memory_space<vmem>>, vector<4x256xf32>,
    %cst_6 = arith.constant 0.000000e+00 : f32
    %15 = vector.broadcast %cst_6 : f32 to vector<4x256xf32>
    %c28 = arith.constant 28 : index
    %c0_7 = arith.constant 0 : index
    %16 = vector.load %arg20[%c28, %c0_7] : memref<144x256xf32, #tpu.memory_space<vmem>>, vector<4x256xf32>
    tpu.vector_store %arg20[%c28, %c0_7], %15 {strides = array<i32>} : memref<144x256xf32, #tpu.memory_space<vmem>>, vector<4x256xf32>,
    %cst_8 = arith.constant 0.000000e+00 : f32
    %17 = vector.broadcast %cst_8 : f32 to vector<4x256xf32>
    %c36 = arith.constant 36 : index
    %c0_9 = arith.constant 0 : index
    %18 = vector.load %arg20[%c36, %c0_9] : memref<144x256xf32, #tpu.memory_space<vmem>>, vector<4x256xf32>
    tpu.vector_store %arg20[%c36, %c0_9], %17 {strides = array<i32>} : memref<144x256xf32, #tpu.memory_space<vmem>>, vector<4x256xf32>,
    %cst_10 = arith.constant 0.000000e+00 : f32
    %19 = vector.broadcast %cst_10 : f32 to vector<4x256xf32>
    %c44 = arith.constant 44 : index
    %c0_11 = arith.constant 0 : index
    %20 = vector.load %arg20[%c44, %c0_11] : memref<144x256xf32, #tpu.memory_space<vmem>>, vector<4x256xf32>
    tpu.vector_store %arg20[%c44, %c0_11], %19 {strides = array<i32>} : memref<144x256xf32, #tpu.memory_space<vmem>>, vector<4x256xf32>,
    %cst_12 = arith.constant 0.000000e+00 : f32
    %21 = vector.broadcast %cst_12 : f32 to vector<4x256xf32>
    %c52 = arith.constant 52 : index
    %c0_13 = arith.constant 0 : index
    %22 = vector.load %arg20[%c52, %c0_13] : memref<144x256xf32, #tpu.memory_space<vmem>>, vector<4x256xf32>
    tpu.vector_store %arg20[%c52, %c0_13], %21 {strides = array<i32>} : memref<144x256xf32, #tpu.memory_space<vmem>>, vector<4x256xf32>,
    %cst_14 = arith.constant 0.000000e+00 : f32
    %23 = vector.broadcast %cst_14 : f32 to vector<4x256xf32>
    %c60 = arith.constant 60 : index
    %c0_15 = arith.constant 0 : index
    %24 = vector.load %arg20[%c60, %c0_15] : memref<144x256xf32, #tpu.memory_space<vmem>>, vector<4x256xf32>
    tpu.vector_store %arg20[%c60, %c0_15], %23 {strides = array<i32>} : memref<144x256xf32, #tpu.memory_space<vmem>>, vector<4x256xf32>,
    %cst_16 = arith.constant 0.000000e+00 : f32
    %25 = vector.broadcast %cst_16 : f32 to vector<4x256xf32>
    %c68 = arith.constant 68 : index
    %c0_17 = arith.constant 0 : index
    %26 = vector.load %arg20[%c68, %c0_17] : memref<144x256xf32, #tpu.memory_space<vmem>>, vector<4x256xf32>
    tpu.vector_store %arg20[%c68, %c0_17], %25 {strides = array<i32>} : memref<144x256xf32, #tpu.memory_space<vmem>>, vector<4x256xf32>,
    %cst_18 = arith.constant 0.000000e+00 : f32
    %27 = vector.broadcast %cst_18 : f32 to vector<4x256xf32>
    %c76 = arith.constant 76 : index
    %c0_19 = arith.constant 0 : index
    %28 = vector.load %arg20[%c76, %c0_19] : memref<144x256xf32, #tpu.memory_space<vmem>>, vector<4x256xf32>
    tpu.vector_store %arg20[%c76, %c0_19], %27 {strides = array<i32>} : memref<144x256xf32, #tpu.memory_space<vmem>>, vector<4x256xf32>,
    %cst_20 = arith.constant 0.000000e+00 : f32
    %29 = vector.broadcast %cst_20 : f32 to vector<4x256xf32>
    %c84 = arith.constant 84 : index
    %c0_21 = arith.constant 0 : index
    %30 = vector.load %arg20[%c84, %c0_21] : memref<144x256xf32, #tpu.memory_space<vmem>>, vector<4x256xf32>
    tpu.vector_store %arg20[%c84, %c0_21], %29 {strides = array<i32>} : memref<144x256xf32, #tpu.memory_space<vmem>>, vector<4x256xf32>,
    %cst_22 = arith.constant 0.000000e+00 : f32
    %31 = vector.broadcast %cst_22 : f32 to vector<4x256xf32>
    %c92 = arith.constant 92 : index
    %c0_23 = arith.constant 0 : index
    %32 = vector.load %arg20[%c92, %c0_23] : memref<144x256xf32, #tpu.memory_space<vmem>>, vector<4x256xf32>
    tpu.vector_store %arg20[%c92, %c0_23], %31 {strides = array<i32>} : memref<144x256xf32, #tpu.memory_space<vmem>>, vector<4x256xf32>,
    %cst_24 = arith.constant 0.000000e+00 : f32
    %33 = vector.broadcast %cst_24 : f32 to vector<4x256xf32>
    %c100 = arith.constant 100 : index
    %c0_25 = arith.constant 0 : index
    %34 = vector.load %arg20[%c100, %c0_25] : memref<144x256xf32, #tpu.memory_space<vmem>>, vector<4x256xf32>
    tpu.vector_store %arg20[%c100, %c0_25], %33 {strides = array<i32>} : memref<144x256xf32, #tpu.memory_space<vmem>>, vector<4x256xf32>,
    %cst_26 = arith.constant 0.000000e+00 : f32
    %35 = vector.broadcast %cst_26 : f32 to vector<4x256xf32>
    %c108 = arith.constant 108 : index
    %c0_27 = arith.constant 0 : index
    %36 = vector.load %arg20[%c108, %c0_27] : memref<144x256xf32, #tpu.memory_space<vmem>>, vector<4x256xf32>
    tpu.vector_store %arg20[%c108, %c0_27], %35 {strides = array<i32>} : memref<144x256xf32, #tpu.memory_space<vmem>>, vector<4x256xf32>,
    %cst_28 = arith.constant 0.000000e+00 : f32
    %37 = vector.broadcast %cst_28 : f32 to vector<4x256xf32>
    %c116 = arith.constant 116 : index
    %c0_29 = arith.constant 0 : index
    %38 = vector.load %arg20[%c116, %c0_29] : memref<144x256xf32, #tpu.memory_space<vmem>>, vector<4x256xf32>
    tpu.vector_store %arg20[%c116, %c0_29], %37 {strides = array<i32>} : memref<144x256xf32, #tpu.memory_space<vmem>>, vector<4x256xf32>,
    %cst_30 = arith.constant 0.000000e+00 : f32
    %39 = vector.broadcast %cst_30 : f32 to vector<4x256xf32>
    %c124 = arith.constant 124 : index
    %c0_31 = arith.constant 0 : index
    %40 = vector.load %arg20[%c124, %c0_31] : memref<144x256xf32, #tpu.memory_space<vmem>>, vector<4x256xf32>
    tpu.vector_store %arg20[%c124, %c0_31], %39 {strides = array<i32>} : memref<144x256xf32, #tpu.memory_space<vmem>>, vector<4x256xf32>,
    %cst_32 = arith.constant 0.000000e+00 : f32
    %41 = vector.broadcast %cst_32 : f32 to vector<4x256xf32>
    %c132 = arith.constant 132 : index
    %c0_33 = arith.constant 0 : index
    %42 = vector.load %arg20[%c132, %c0_33] : memref<144x256xf32, #tpu.memory_space<vmem>>, vector<4x256xf32>
    tpu.vector_store %arg20[%c132, %c0_33], %41 {strides = array<i32>} : memref<144x256xf32, #tpu.memory_space<vmem>>, vector<4x256xf32>,
    %cst_34 = arith.constant 0.000000e+00 : f32
    %43 = vector.broadcast %cst_34 : f32 to vector<4x256xf32>
    %c140 = arith.constant 140 : index
    %c0_35 = arith.constant 0 : index
    %44 = vector.load %arg20[%c140, %c0_35] : memref<144x256xf32, #tpu.memory_space<vmem>>, vector<4x256xf32>
    tpu.vector_store %arg20[%c140, %c0_35], %43 {strides = array<i32>} : memref<144x256xf32, #tpu.memory_space<vmem>>, vector<4x256xf32>,
    %c0_36 = arith.constant 0 : index
    %c0_37 = arith.constant 0 : index
    %c0_38 = arith.constant 0 : index
    %45 = vector.load %arg1[%c0_36, %c0_37, %c0_38] : memref<1x4x256xf32, #tpu.memory_space<vmem>>, vector<1x4x256xf32>
    %46 = vector.shape_cast %45 : vector<1x4x256xf32> to vector<4x256xf32>
    %c0_39 = arith.constant 0 : index
    %c0_40 = arith.constant 0 : index
    %c0_41 = arith.constant 0 : index
    %47 = vector.load %arg2[%c0_39, %c0_40, %c0_41] : memref<1x4x256xf32, #tpu.memory_space<vmem>>, vector<1x4x256xf32>
    %48 = vector.shape_cast %47 : vector<1x4x256xf32> to vector<4x256xf32>
    %c16_i32 = arith.constant 16 : i32
    %49 = tpu.dynamic_rotate %46 by %c16_i32 dim 1 : vector<4x256xf32>, i32 -> vector<4x256xf32>
    %c1_i32 = arith.constant 1 : i32
    %50 = tpu.dynamic_rotate %49 by %c1_i32 dim 1 : vector<4x256xf32>, i32 -> vector<4x256xf32>
    %51 = vector.broadcast %1 : vector<1x256xf32> to vector<4x256xf32>
    %52 = arith.mulf %50, %51 : vector<4x256xf32>
    %c0_42 = arith.constant 0 : index
    %c0_43 = arith.constant 0 : index
    %53 = vector.load %arg20[%c0_42, %c0_43] : memref<144x256xf32, #tpu.memory_space<vmem>>, vector<4x256xf32>
    tpu.vector_store %arg20[%c0_42, %c0_43], %52 {strides = array<i32>} : memref<144x256xf32, #tpu.memory_space<vmem>>, vector<4x256xf32>,
    %54 = vector.broadcast %2 : vector<1x256xf32> to vector<4x256xf32>
    %55 = arith.mulf %49, %54 : vector<4x256xf32>
    %c8 = arith.constant 8 : index
    %c0_44 = arith.constant 0 : index
    %56 = vector.load %arg20[%c8, %c0_44] : memref<144x256xf32, #tpu.memory_space<vmem>>, vector<4x256xf32>
    tpu.vector_store %arg20[%c8, %c0_44], %55 {strides = array<i32>} : memref<144x256xf32, #tpu.memory_space<vmem>>, vector<4x256xf32>,
    %c255_i32 = arith.constant 255 : i32
    %57 = tpu.dynamic_rotate %49 by %c255_i32 dim 1 : vector<4x256xf32>, i32 -> vector<4x256xf32>
    %58 = vector.broadcast %3 : vector<1x256xf32> to vector<4x256xf32>
    %59 = arith.mulf %57, %58 : vector<4x256xf32>
    %c16 = arith.constant 16 : index
    %c0_45 = arith.constant 0 : index
    %60 = vector.load %arg20[%c16, %c0_45] : memref<144x256xf32, #tpu.memory_space<vmem>>, vector<4x256xf32>
    tpu.vector_store %arg20[%c16, %c0_45], %59 {strides = array<i32>} : memref<144x256xf32, #tpu.memory_space<vmem>>, vector<4x256xf32>,
    %c1_i32_46 = arith.constant 1 : i32
    %61 = tpu.dynamic_rotate %46 by %c1_i32_46 dim 1 : vector<4x256xf32>, i32 -> vector<4x256xf32>
    %62 = vector.broadcast %4 : vector<1x256xf32> to vector<4x256xf32>
    %63 = arith.mulf %61, %62 : vector<4x256xf32>
    %c24 = arith.constant 24 : index
    %c0_47 = arith.constant 0 : index
    %64 = vector.load %arg20[%c24, %c0_47] : memref<144x256xf32, #tpu.memory_space<vmem>>, vector<4x256xf32>
    tpu.vector_store %arg20[%c24, %c0_47], %63 {strides = array<i32>} : memref<144x256xf32, #tpu.memory_space<vmem>>, vector<4x256xf32>,
    %c32 = arith.constant 32 : index
    %c0_48 = arith.constant 0 : index
    %65 = vector.load %arg20[%c32, %c0_48] : memref<144x256xf32, #tpu.memory_space<vmem>>, vector<4x256xf32>
    tpu.vector_store %arg20[%c32, %c0_48], %46 {strides = array<i32>} : memref<144x256xf32, #tpu.memory_space<vmem>>, vector<4x256xf32>,
    %c255_i32_49 = arith.constant 255 : i32
    %66 = tpu.dynamic_rotate %46 by %c255_i32_49 dim 1 : vector<4x256xf32>, i32 -> vector<4x256xf32>
    %67 = vector.broadcast %5 : vector<1x256xf32> to vector<4x256xf32>
    %68 = arith.mulf %66, %67 : vector<4x256xf32>
    %c40 = arith.constant 40 : index
    %c0_50 = arith.constant 0 : index
    %69 = vector.load %arg20[%c40, %c0_50] : memref<144x256xf32, #tpu.memory_space<vmem>>, vector<4x256xf32>
    tpu.vector_store %arg20[%c40, %c0_50], %68 {strides = array<i32>} : memref<144x256xf32, #tpu.memory_space<vmem>>, vector<4x256xf32>,
    %c240_i32 = arith.constant 240 : i32
    %70 = tpu.dynamic_rotate %46 by %c240_i32 dim 1 : vector<4x256xf32>, i32 -> vector<4x256xf32>
    %c1_i32_51 = arith.constant 1 : i32
    %71 = tpu.dynamic_rotate %70 by %c1_i32_51 dim 1 : vector<4x256xf32>, i32 -> vector<4x256xf32>
    %72 = vector.broadcast %6 : vector<1x256xf32> to vector<4x256xf32>
    %73 = arith.mulf %71, %72 : vector<4x256xf32>
    %c48 = arith.constant 48 : index
    %c0_52 = arith.constant 0 : index
    %74 = vector.load %arg20[%c48, %c0_52] : memref<144x256xf32, #tpu.memory_space<vmem>>, vector<4x256xf32>
    tpu.vector_store %arg20[%c48, %c0_52], %73 {strides = array<i32>} : memref<144x256xf32, #tpu.memory_space<vmem>>, vector<4x256xf32>,
    %75 = vector.broadcast %7 : vector<1x256xf32> to vector<4x256xf32>
    %76 = arith.mulf %70, %75 : vector<4x256xf32>
    %c56 = arith.constant 56 : index
    %c0_53 = arith.constant 0 : index
    %77 = vector.load %arg20[%c56, %c0_53] : memref<144x256xf32, #tpu.memory_space<vmem>>, vector<4x256xf32>
    tpu.vector_store %arg20[%c56, %c0_53], %76 {strides = array<i32>} : memref<144x256xf32, #tpu.memory_space<vmem>>, vector<4x256xf32>,
    %c255_i32_54 = arith.constant 255 : i32
    %78 = tpu.dynamic_rotate %70 by %c255_i32_54 dim 1 : vector<4x256xf32>, i32 -> vector<4x256xf32>
    %79 = vector.broadcast %8 : vector<1x256xf32> to vector<4x256xf32>
    %80 = arith.mulf %78, %79 : vector<4x256xf32>
    %c64 = arith.constant 64 : index
    %c0_55 = arith.constant 0 : index
    %81 = vector.load %arg20[%c64, %c0_55] : memref<144x256xf32, #tpu.memory_space<vmem>>, vector<4x256xf32>
    tpu.vector_store %arg20[%c64, %c0_55], %80 {strides = array<i32>} : memref<144x256xf32, #tpu.memory_space<vmem>>, vector<4x256xf32>,
    %c0_56 = arith.constant 0 : index
    %c0_57 = arith.constant 0 : index
    %82 = vector.load %arg4[%c0_56, %c0_57] : memref<4x72xbf16, #tpu.memory_space<vmem>>, vector<4x72xbf16>
    %c0_58 = arith.constant 0 : index
    %c0_59 = arith.constant 0 : index
    %83 = vector.load %arg20[%c0_58, %c0_59] : memref<144x256xf32, #tpu.memory_space<vmem>>, vector<72x256xf32>
    %84 = arith.truncf %83 : vector<72x256xf32> to vector<72x256xbf16>
    %cst_60 = arith.constant dense<0.000000e+00> : vector<4x256xf32>
    %85 = tpu.matmul %82, %84, %cst_60 {dimension_numbers = #tpu.dot_dimension_numbers<[1], [0], [0], [1], [0, 0, 1, 1], [], []>} : vector<4x72xbf16>, vector<72x256xbf16>, vector<4x256xf32> -> vector<4x256xf32>
    %c0_61 = arith.constant 0 : index
    %c0_62 = arith.constant 0 : index
    %86 = vector.load %arg5[%c0_61, %c0_62] : memref<4x1xf32, #tpu.memory_space<vmem>>, vector<4x1xf32>
    %87 = vector.broadcast %86 : vector<4x1xf32> to vector<4x256xf32>
    %88 = arith.addf %85, %87 : vector<4x256xf32>
    %cst_63 = arith.constant 0.000000e+00 : f32
    %89 = vector.broadcast %cst_63 : f32 to vector<4x256xf32>
    %90 = arith.maximumf %88, %89 : vector<4x256xf32>
    %c16_i32_64 = arith.constant 16 : i32
    %91 = tpu.dynamic_rotate %90 by %c16_i32_64 dim 1 : vector<4x256xf32>, i32 -> vector<4x256xf32>
    %c1_i32_65 = arith.constant 1 : i32
    %92 = tpu.dynamic_rotate %91 by %c1_i32_65 dim 1 : vector<4x256xf32>, i32 -> vector<4x256xf32>
    %93 = vector.broadcast %1 : vector<1x256xf32> to vector<4x256xf32>
    %94 = arith.mulf %92, %93 : vector<4x256xf32>
    %c0_66 = arith.constant 0 : index
    %c0_67 = arith.constant 0 : index
    %95 = vector.load %arg20[%c0_66, %c0_67] : memref<144x256xf32, #tpu.memory_space<vmem>>, vector<4x256xf32>
    tpu.vector_store %arg20[%c0_66, %c0_67], %94 {strides = array<i32>} : memref<144x256xf32, #tpu.memory_space<vmem>>, vector<4x256xf32>,
    %96 = vector.broadcast %2 : vector<1x256xf32> to vector<4x256xf32>
    %97 = arith.mulf %91, %96 : vector<4x256xf32>
    %c8_68 = arith.constant 8 : index
    %c0_69 = arith.constant 0 : index
    %98 = vector.load %arg20[%c8_68, %c0_69] : memref<144x256xf32, #tpu.memory_space<vmem>>, vector<4x256xf32>
    tpu.vector_store %arg20[%c8_68, %c0_69], %97 {strides = array<i32>} : memref<144x256xf32, #tpu.memory_space<vmem>>, vector<4x256xf32>,
    %c255_i32_70 = arith.constant 255 : i32
    %99 = tpu.dynamic_rotate %91 by %c255_i32_70 dim 1 : vector<4x256xf32>, i32 -> vector<4x256xf32>
    %100 = vector.broadcast %3 : vector<1x256xf32> to vector<4x256xf32>
    %101 = arith.mulf %99, %100 : vector<4x256xf32>
    %c16_71 = arith.constant 16 : index
    %c0_72 = arith.constant 0 : index
    %102 = vector.load %arg20[%c16_71, %c0_72] : memref<144x256xf32, #tpu.memory_space<vmem>>, vector<4x256xf32>
    tpu.vector_store %arg20[%c16_71, %c0_72], %101 {strides = array<i32>} : memref<144x256xf32, #tpu.memory_space<vmem>>, vector<4x256xf32>,
    %c1_i32_73 = arith.constant 1 : i32
    %103 = tpu.dynamic_rotate %90 by %c1_i32_73 dim 1 : vector<4x256xf32>, i32 -> vector<4x256xf32>
    %104 = vector.broadcast %4 : vector<1x256xf32> to vector<4x256xf32>
    %105 = arith.mulf %103, %104 : vector<4x256xf32>
    %c24_74 = arith.constant 24 : index
    %c0_75 = arith.constant 0 : index
    %106 = vector.load %arg20[%c24_74, %c0_75] : memref<144x256xf32, #tpu.memory_space<vmem>>, vector<4x256xf32>
    tpu.vector_store %arg20[%c24_74, %c0_75], %105 {strides = array<i32>} : memref<144x256xf32, #tpu.memory_space<vmem>>, vector<4x256xf32>,
    %c32_76 = arith.constant 32 : index
    %c0_77 = arith.constant 0 : index
    %107 = vector.load %arg20[%c32_76, %c0_77] : memref<144x256xf32, #tpu.memory_space<vmem>>, vector<4x256xf32>
    tpu.vector_store %arg20[%c32_76, %c0_77], %90 {strides = array<i32>} : memref<144x256xf32, #tpu.memory_space<vmem>>, vector<4x256xf32>,
    %c255_i32_78 = arith.constant 255 : i32
    %108 = tpu.dynamic_rotate %90 by %c255_i32_78 dim 1 : vector<4x256xf32>, i32 -> vector<4x256xf32>
    %109 = vector.broadcast %5 : vector<1x256xf32> to vector<4x256xf32>
    %110 = arith.mulf %108, %109 : vector<4x256xf32>
    %c40_79 = arith.constant 40 : index
    %c0_80 = arith.constant 0 : index
    %111 = vector.load %arg20[%c40_79, %c0_80] : memref<144x256xf32, #tpu.memory_space<vmem>>, vector<4x256xf32>
    tpu.vector_store %arg20[%c40_79, %c0_80], %110 {strides = array<i32>} : memref<144x256xf32, #tpu.memory_space<vmem>>, vector<4x256xf32>,
    %c240_i32_81 = arith.constant 240 : i32
    %112 = tpu.dynamic_rotate %90 by %c240_i32_81 dim 1 : vector<4x256xf32>, i32 -> vector<4x256xf32>
    %c1_i32_82 = arith.constant 1 : i32
    %113 = tpu.dynamic_rotate %112 by %c1_i32_82 dim 1 : vector<4x256xf32>, i32 -> vector<4x256xf32>
    %114 = vector.broadcast %6 : vector<1x256xf32> to vector<4x256xf32>
    %115 = arith.mulf %113, %114 : vector<4x256xf32>
    %c48_83 = arith.constant 48 : index
    %c0_84 = arith.constant 0 : index
    %116 = vector.load %arg20[%c48_83, %c0_84] : memref<144x256xf32, #tpu.memory_space<vmem>>, vector<4x256xf32>
    tpu.vector_store %arg20[%c48_83, %c0_84], %115 {strides = array<i32>} : memref<144x256xf32, #tpu.memory_space<vmem>>, vector<4x256xf32>,
    %117 = vector.broadcast %7 : vector<1x256xf32> to vector<4x256xf32>
    %118 = arith.mulf %112, %117 : vector<4x256xf32>
    %c56_85 = arith.constant 56 : index
    %c0_86 = arith.constant 0 : index
    %119 = vector.load %arg20[%c56_85, %c0_86] : memref<144x256xf32, #tpu.memory_space<vmem>>, vector<4x256xf32>
    tpu.vector_store %arg20[%c56_85, %c0_86], %118 {strides = array<i32>} : memref<144x256xf32, #tpu.memory_space<vmem>>, vector<4x256xf32>,
    %c255_i32_87 = arith.constant 255 : i32
    %120 = tpu.dynamic_rotate %112 by %c255_i32_87 dim 1 : vector<4x256xf32>, i32 -> vector<4x256xf32>
    %121 = vector.broadcast %8 : vector<1x256xf32> to vector<4x256xf32>
    %122 = arith.mulf %120, %121 : vector<4x256xf32>
    %c64_88 = arith.constant 64 : index
    %c0_89 = arith.constant 0 : index
    %123 = vector.load %arg20[%c64_88, %c0_89] : memref<144x256xf32, #tpu.memory_space<vmem>>, vector<4x256xf32>
    tpu.vector_store %arg20[%c64_88, %c0_89], %122 {strides = array<i32>} : memref<144x256xf32, #tpu.memory_space<vmem>>, vector<4x256xf32>,
    %c16_i32_90 = arith.constant 16 : i32
    %124 = tpu.dynamic_rotate %48 by %c16_i32_90 dim 1 : vector<4x256xf32>, i32 -> vector<4x256xf32>
    %c1_i32_91 = arith.constant 1 : i32
    %125 = tpu.dynamic_rotate %124 by %c1_i32_91 dim 1 : vector<4x256xf32>, i32 -> vector<4x256xf32>
    %126 = vector.broadcast %1 : vector<1x256xf32> to vector<4x256xf32>
    %127 = arith.mulf %125, %126 : vector<4x256xf32>
    %c72 = arith.constant 72 : index
    %c0_92 = arith.constant 0 : index
    %128 = vector.load %arg20[%c72, %c0_92] : memref<144x256xf32, #tpu.memory_space<vmem>>, vector<4x256xf32>
    tpu.vector_store %arg20[%c72, %c0_92], %127 {strides = array<i32>} : memref<144x256xf32, #tpu.memory_space<vmem>>, vector<4x256xf32>,
    %129 = vector.broadcast %2 : vector<1x256xf32> to vector<4x256xf32>
    %130 = arith.mulf %124, %129 : vector<4x256xf32>
    %c80 = arith.constant 80 : index
    %c0_93 = arith.constant 0 : index
    %131 = vector.load %arg20[%c80, %c0_93] : memref<144x256xf32, #tpu.memory_space<vmem>>, vector<4x256xf32>
    tpu.vector_store %arg20[%c80, %c0_93], %130 {strides = array<i32>} : memref<144x256xf32, #tpu.memory_space<vmem>>, vector<4x256xf32>,
    %c255_i32_94 = arith.constant 255 : i32
    %132 = tpu.dynamic_rotate %124 by %c255_i32_94 dim 1 : vector<4x256xf32>, i32 -> vector<4x256xf32>
    %133 = vector.broadcast %3 : vector<1x256xf32> to vector<4x256xf32>
    %134 = arith.mulf %132, %133 : vector<4x256xf32>
    %c88 = arith.constant 88 : index
    %c0_95 = arith.constant 0 : index
    %135 = vector.load %arg20[%c88, %c0_95] : memref<144x256xf32, #tpu.memory_space<vmem>>, vector<4x256xf32>
    tpu.vector_store %arg20[%c88, %c0_95], %134 {strides = array<i32>} : memref<144x256xf32, #tpu.memory_space<vmem>>, vector<4x256xf32>,
    %c1_i32_96 = arith.constant 1 : i32
    %136 = tpu.dynamic_rotate %48 by %c1_i32_96 dim 1 : vector<4x256xf32>, i32 -> vector<4x256xf32>
    %137 = vector.broadcast %4 : vector<1x256xf32> to vector<4x256xf32>
    %138 = arith.mulf %136, %137 : vector<4x256xf32>
    %c96 = arith.constant 96 : index
    %c0_97 = arith.constant 0 : index
    %139 = vector.load %arg20[%c96, %c0_97] : memref<144x256xf32, #tpu.memory_space<vmem>>, vector<4x256xf32>
    tpu.vector_store %arg20[%c96, %c0_97], %138 {strides = array<i32>} : memref<144x256xf32, #tpu.memory_space<vmem>>, vector<4x256xf32>,
    %c104 = arith.constant 104 : index
    %c0_98 = arith.constant 0 : index
    %140 = vector.load %arg20[%c104, %c0_98] : memref<144x256xf32, #tpu.memory_space<vmem>>, vector<4x256xf32>
    tpu.vector_store %arg20[%c104, %c0_98], %48 {strides = array<i32>} : memref<144x256xf32, #tpu.memory_space<vmem>>, vector<4x256xf32>,
    %c255_i32_99 = arith.constant 255 : i32
    %141 = tpu.dynamic_rotate %48 by %c255_i32_99 dim 1 : vector<4x256xf32>, i32 -> vector<4x256xf32>
    %142 = vector.broadcast %5 : vector<1x256xf32> to vector<4x256xf32>
    %143 = arith.mulf %141, %142 : vector<4x256xf32>
    %c112 = arith.constant 112 : index
    %c0_100 = arith.constant 0 : index
    %144 = vector.load %arg20[%c112, %c0_100] : memref<144x256xf32, #tpu.memory_space<vmem>>, vector<4x256xf32>
    tpu.vector_store %arg20[%c112, %c0_100], %143 {strides = array<i32>} : memref<144x256xf32, #tpu.memory_space<vmem>>, vector<4x256xf32>,
    %c240_i32_101 = arith.constant 240 : i32
    %145 = tpu.dynamic_rotate %48 by %c240_i32_101 dim 1 : vector<4x256xf32>, i32 -> vector<4x256xf32>
    %c1_i32_102 = arith.constant 1 : i32
    %146 = tpu.dynamic_rotate %145 by %c1_i32_102 dim 1 : vector<4x256xf32>, i32 -> vector<4x256xf32>
    %147 = vector.broadcast %6 : vector<1x256xf32> to vector<4x256xf32>
    %148 = arith.mulf %146, %147 : vector<4x256xf32>
    %c120 = arith.constant 120 : index
    %c0_103 = arith.constant 0 : index
    %149 = vector.load %arg20[%c120, %c0_103] : memref<144x256xf32, #tpu.memory_space<vmem>>, vector<4x256xf32>
    tpu.vector_store %arg20[%c120, %c0_103], %148 {strides = array<i32>} : memref<144x256xf32, #tpu.memory_space<vmem>>, vector<4x256xf32>,
    %150 = vector.broadcast %7 : vector<1x256xf32> to vector<4x256xf32>
    %151 = arith.mulf %145, %150 : vector<4x256xf32>
    %c128 = arith.constant 128 : index
    %c0_104 = arith.constant 0 : index
    %152 = vector.load %arg20[%c128, %c0_104] : memref<144x256xf32, #tpu.memory_space<vmem>>, vector<4x256xf32>
    tpu.vector_store %arg20[%c128, %c0_104], %151 {strides = array<i32>} : memref<144x256xf32, #tpu.memory_space<vmem>>, vector<4x256xf32>,
    %c255_i32_105 = arith.constant 255 : i32
    %153 = tpu.dynamic_rotate %145 by %c255_i32_105 dim 1 : vector<4x256xf32>, i32 -> vector<4x256xf32>
    %154 = vector.broadcast %8 : vector<1x256xf32> to vector<4x256xf32>
    %155 = arith.mulf %153, %154 : vector<4x256xf32>
    %c136 = arith.constant 136 : index
    %c0_106 = arith.constant 0 : index
    %156 = vector.load %arg20[%c136, %c0_106] : memref<144x256xf32, #tpu.memory_space<vmem>>, vector<4x256xf32>
    tpu.vector_store %arg20[%c136, %c0_106], %155 {strides = array<i32>} : memref<144x256xf32, #tpu.memory_space<vmem>>, vector<4x256xf32>,
    %c0_107 = arith.constant 0 : index
    %c0_108 = arith.constant 0 : index
    %157 = vector.load %arg6[%c0_107, %c0_108] : memref<4x144xbf16, #tpu.memory_space<vmem>>, vector<4x144xbf16>
    %c0_109 = arith.constant 0 : index
    %c0_110 = arith.constant 0 : index
    %158 = vector.load %arg20[%c0_109, %c0_110] : memref<144x256xf32, #tpu.memory_space<vmem>>, vector<144x256xf32>
    %159 = arith.truncf %158 : vector<144x256xf32> to vector<144x256xbf16>
    %cst_111 = arith.constant dense<0.000000e+00> : vector<4x256xf32>
    %160 = tpu.matmul %157, %159, %cst_111 {dimension_numbers = #tpu.dot_dimension_numbers<[1], [0], [0], [1], [0, 0, 1, 1], [], []>} : vector<4x144xbf16>, vector<144x256xbf16>, vector<4x256xf32> -> vector<4x256xf32>
    %c0_112 = arith.constant 0 : index
    %c0_113 = arith.constant 0 : index
    %161 = vector.load %arg7[%c0_112, %c0_113] : memref<4x1xf32, #tpu.memory_space<vmem>>, vector<4x1xf32>
    %162 = vector.broadcast %161 : vector<4x1xf32> to vector<4x256xf32>
    %163 = arith.addf %160, %162 : vector<4x256xf32>
    %cst_114 = arith.constant 0.000000e+00 : f32
    %164 = vector.broadcast %cst_114 : f32 to vector<4x256xf32>
    %165 = arith.maximumf %163, %164 : vector<4x256xf32>
    %c16_i32_115 = arith.constant 16 : i32
    %166 = tpu.dynamic_rotate %165 by %c16_i32_115 dim 1 : vector<4x256xf32>, i32 -> vector<4x256xf32>
    %c1_i32_116 = arith.constant 1 : i32
    %167 = tpu.dynamic_rotate %166 by %c1_i32_116 dim 1 : vector<4x256xf32>, i32 -> vector<4x256xf32>
    %168 = vector.broadcast %1 : vector<1x256xf32> to vector<4x256xf32>
    %169 = arith.mulf %167, %168 : vector<4x256xf32>
    %c0_117 = arith.constant 0 : index
    %c0_118 = arith.constant 0 : index
    %170 = vector.load %arg20[%c0_117, %c0_118] : memref<144x256xf32, #tpu.memory_space<vmem>>, vector<4x256xf32>
    tpu.vector_store %arg20[%c0_117, %c0_118], %169 {strides = array<i32>} : memref<144x256xf32, #tpu.memory_space<vmem>>, vector<4x256xf32>,
    %171 = vector.broadcast %2 : vector<1x256xf32> to vector<4x256xf32>
    %172 = arith.mulf %166, %171 : vector<4x256xf32>
    %c8_119 = arith.constant 8 : index
    %c0_120 = arith.constant 0 : index
    %173 = vector.load %arg20[%c8_119, %c0_120] : memref<144x256xf32, #tpu.memory_space<vmem>>, vector<4x256xf32>
    tpu.vector_store %arg20[%c8_119, %c0_120], %172 {strides = array<i32>} : memref<144x256xf32, #tpu.memory_space<vmem>>, vector<4x256xf32>,
    %c255_i32_121 = arith.constant 255 : i32
    %174 = tpu.dynamic_rotate %166 by %c255_i32_121 dim 1 : vector<4x256xf32>, i32 -> vector<4x256xf32>
    %175 = vector.broadcast %3 : vector<1x256xf32> to vector<4x256xf32>
    %176 = arith.mulf %174, %175 : vector<4x256xf32>
    %c16_122 = arith.constant 16 : index
    %c0_123 = arith.constant 0 : index
    %177 = vector.load %arg20[%c16_122, %c0_123] : memref<144x256xf32, #tpu.memory_space<vmem>>, vector<4x256xf32>
    tpu.vector_store %arg20[%c16_122, %c0_123], %176 {strides = array<i32>} : memref<144x256xf32, #tpu.memory_space<vmem>>, vector<4x256xf32>,
    %c1_i32_124 = arith.constant 1 : i32
    %178 = tpu.dynamic_rotate %165 by %c1_i32_124 dim 1 : vector<4x256xf32>, i32 -> vector<4x256xf32>
    %179 = vector.broadcast %4 : vector<1x256xf32> to vector<4x256xf32>
    %180 = arith.mulf %178, %179 : vector<4x256xf32>
    %c24_125 = arith.constant 24 : index
    %c0_126 = arith.constant 0 : index
    %181 = vector.load %arg20[%c24_125, %c0_126] : memref<144x256xf32, #tpu.memory_space<vmem>>, vector<4x256xf32>
    tpu.vector_store %arg20[%c24_125, %c0_126], %180 {strides = array<i32>} : memref<144x256xf32, #tpu.memory_space<vmem>>, vector<4x256xf32>,
    %c32_127 = arith.constant 32 : index
    %c0_128 = arith.constant 0 : index
    %182 = vector.load %arg20[%c32_127, %c0_128] : memref<144x256xf32, #tpu.memory_space<vmem>>, vector<4x256xf32>
    tpu.vector_store %arg20[%c32_127, %c0_128], %165 {strides = array<i32>} : memref<144x256xf32, #tpu.memory_space<vmem>>, vector<4x256xf32>,
    %c255_i32_129 = arith.constant 255 : i32
    %183 = tpu.dynamic_rotate %165 by %c255_i32_129 dim 1 : vector<4x256xf32>, i32 -> vector<4x256xf32>
    %184 = vector.broadcast %5 : vector<1x256xf32> to vector<4x256xf32>
    %185 = arith.mulf %183, %184 : vector<4x256xf32>
    %c40_130 = arith.constant 40 : index
    %c0_131 = arith.constant 0 : index
    %186 = vector.load %arg20[%c40_130, %c0_131] : memref<144x256xf32, #tpu.memory_space<vmem>>, vector<4x256xf32>
    tpu.vector_store %arg20[%c40_130, %c0_131], %185 {strides = array<i32>} : memref<144x256xf32, #tpu.memory_space<vmem>>, vector<4x256xf32>,
    %c240_i32_132 = arith.constant 240 : i32
    %187 = tpu.dynamic_rotate %165 by %c240_i32_132 dim 1 : vector<4x256xf32>, i32 -> vector<4x256xf32>
    %c1_i32_133 = arith.constant 1 : i32
    %188 = tpu.dynamic_rotate %187 by %c1_i32_133 dim 1 : vector<4x256xf32>, i32 -> vector<4x256xf32>
    %189 = vector.broadcast %6 : vector<1x256xf32> to vector<4x256xf32>
    %190 = arith.mulf %188, %189 : vector<4x256xf32>
    %c48_134 = arith.constant 48 : index
    %c0_135 = arith.constant 0 : index
    %191 = vector.load %arg20[%c48_134, %c0_135] : memref<144x256xf32, #tpu.memory_space<vmem>>, vector<4x256xf32>
    tpu.vector_store %arg20[%c48_134, %c0_135], %190 {strides = array<i32>} : memref<144x256xf32, #tpu.memory_space<vmem>>, vector<4x256xf32>,
    %192 = vector.broadcast %7 : vector<1x256xf32> to vector<4x256xf32>
    %193 = arith.mulf %187, %192 : vector<4x256xf32>
    %c56_136 = arith.constant 56 : index
    %c0_137 = arith.constant 0 : index
    %194 = vector.load %arg20[%c56_136, %c0_137] : memref<144x256xf32, #tpu.memory_space<vmem>>, vector<4x256xf32>
    tpu.vector_store %arg20[%c56_136, %c0_137], %193 {strides = array<i32>} : memref<144x256xf32, #tpu.memory_space<vmem>>, vector<4x256xf32>,
    %c255_i32_138 = arith.constant 255 : i32
    %195 = tpu.dynamic_rotate %187 by %c255_i32_138 dim 1 : vector<4x256xf32>, i32 -> vector<4x256xf32>
    %196 = vector.broadcast %8 : vector<1x256xf32> to vector<4x256xf32>
    %197 = arith.mulf %195, %196 : vector<4x256xf32>
    %c64_139 = arith.constant 64 : index
    %c0_140 = arith.constant 0 : index
    %198 = vector.load %arg20[%c64_139, %c0_140] : memref<144x256xf32, #tpu.memory_space<vmem>>, vector<4x256xf32>
    tpu.vector_store %arg20[%c64_139, %c0_140], %197 {strides = array<i32>} : memref<144x256xf32, #tpu.memory_space<vmem>>, vector<4x256xf32>,
    %c0_141 = arith.constant 0 : index
    %c0_142 = arith.constant 0 : index
    %199 = vector.load %arg8[%c0_141, %c0_142] : memref<4x72xbf16, #tpu.memory_space<vmem>>, vector<4x72xbf16>
    %c0_143 = arith.constant 0 : index
    %c0_144 = arith.constant 0 : index
    %200 = vector.load %arg20[%c0_143, %c0_144] : memref<144x256xf32, #tpu.memory_space<vmem>>, vector<72x256xf32>
    %201 = arith.truncf %200 : vector<72x256xf32> to vector<72x256xbf16>
    %cst_145 = arith.constant dense<0.000000e+00> : vector<4x256xf32>
    %202 = tpu.matmul %199, %201, %cst_145 {dimension_numbers = #tpu.dot_dimension_numbers<[1], [0], [0], [1], [0, 0, 1, 1], [], []>} : vector<4x72xbf16>, vector<72x256xbf16>, vector<4x256xf32> -> vector<4x256xf32>
    %c0_146 = arith.constant 0 : index
    %c0_147 = arith.constant 0 : index
    %203 = vector.load %arg9[%c0_146, %c0_147] : memref<4x1xf32, #tpu.memory_space<vmem>>, vector<4x1xf32>
    %204 = vector.broadcast %203 : vector<4x1xf32> to vector<4x256xf32>
    %205 = arith.addf %202, %204 : vector<4x256xf32>
    %cst_148 = arith.constant 0.000000e+00 : f32
    %206 = vector.broadcast %cst_148 : f32 to vector<4x256xf32>
    %207 = arith.maximumf %205, %206 : vector<4x256xf32>
    %c16_i32_149 = arith.constant 16 : i32
    %208 = tpu.dynamic_rotate %207 by %c16_i32_149 dim 1 : vector<4x256xf32>, i32 -> vector<4x256xf32>
    %c1_i32_150 = arith.constant 1 : i32
    %209 = tpu.dynamic_rotate %208 by %c1_i32_150 dim 1 : vector<4x256xf32>, i32 -> vector<4x256xf32>
    %210 = vector.broadcast %1 : vector<1x256xf32> to vector<4x256xf32>
    %211 = arith.mulf %209, %210 : vector<4x256xf32>
    %c0_151 = arith.constant 0 : index
    %c0_152 = arith.constant 0 : index
    %212 = vector.load %arg20[%c0_151, %c0_152] : memref<144x256xf32, #tpu.memory_space<vmem>>, vector<4x256xf32>
    tpu.vector_store %arg20[%c0_151, %c0_152], %211 {strides = array<i32>} : memref<144x256xf32, #tpu.memory_space<vmem>>, vector<4x256xf32>,
    %213 = vector.broadcast %2 : vector<1x256xf32> to vector<4x256xf32>
    %214 = arith.mulf %208, %213 : vector<4x256xf32>
    %c8_153 = arith.constant 8 : index
    %c0_154 = arith.constant 0 : index
    %215 = vector.load %arg20[%c8_153, %c0_154] : memref<144x256xf32, #tpu.memory_space<vmem>>, vector<4x256xf32>
    tpu.vector_store %arg20[%c8_153, %c0_154], %214 {strides = array<i32>} : memref<144x256xf32, #tpu.memory_space<vmem>>, vector<4x256xf32>,
    %c255_i32_155 = arith.constant 255 : i32
    %216 = tpu.dynamic_rotate %208 by %c255_i32_155 dim 1 : vector<4x256xf32>, i32 -> vector<4x256xf32>
    %217 = vector.broadcast %3 : vector<1x256xf32> to vector<4x256xf32>
    %218 = arith.mulf %216, %217 : vector<4x256xf32>
    %c16_156 = arith.constant 16 : index
    %c0_157 = arith.constant 0 : index
    %219 = vector.load %arg20[%c16_156, %c0_157] : memref<144x256xf32, #tpu.memory_space<vmem>>, vector<4x256xf32>
    tpu.vector_store %arg20[%c16_156, %c0_157], %218 {strides = array<i32>} : memref<144x256xf32, #tpu.memory_space<vmem>>, vector<4x256xf32>,
    %c1_i32_158 = arith.constant 1 : i32
    %220 = tpu.dynamic_rotate %207 by %c1_i32_158 dim 1 : vector<4x256xf32>, i32 -> vector<4x256xf32>
    %221 = vector.broadcast %4 : vector<1x256xf32> to vector<4x256xf32>
    %222 = arith.mulf %220, %221 : vector<4x256xf32>
    %c24_159 = arith.constant 24 : index
    %c0_160 = arith.constant 0 : index
    %223 = vector.load %arg20[%c24_159, %c0_160] : memref<144x256xf32, #tpu.memory_space<vmem>>, vector<4x256xf32>
    tpu.vector_store %arg20[%c24_159, %c0_160], %222 {strides = array<i32>} : memref<144x256xf32, #tpu.memory_space<vmem>>, vector<4x256xf32>,
    %c32_161 = arith.constant 32 : index
    %c0_162 = arith.constant 0 : index
    %224 = vector.load %arg20[%c32_161, %c0_162] : memref<144x256xf32, #tpu.memory_space<vmem>>, vector<4x256xf32>
    tpu.vector_store %arg20[%c32_161, %c0_162], %207 {strides = array<i32>} : memref<144x256xf32, #tpu.memory_space<vmem>>, vector<4x256xf32>,
    %c255_i32_163 = arith.constant 255 : i32
    %225 = tpu.dynamic_rotate %207 by %c255_i32_163 dim 1 : vector<4x256xf32>, i32 -> vector<4x256xf32>
    %226 = vector.broadcast %5 : vector<1x256xf32> to vector<4x256xf32>
    %227 = arith.mulf %225, %226 : vector<4x256xf32>
    %c40_164 = arith.constant 40 : index
    %c0_165 = arith.constant 0 : index
    %228 = vector.load %arg20[%c40_164, %c0_165] : memref<144x256xf32, #tpu.memory_space<vmem>>, vector<4x256xf32>
    tpu.vector_store %arg20[%c40_164, %c0_165], %227 {strides = array<i32>} : memref<144x256xf32, #tpu.memory_space<vmem>>, vector<4x256xf32>,
    %c240_i32_166 = arith.constant 240 : i32
    %229 = tpu.dynamic_rotate %207 by %c240_i32_166 dim 1 : vector<4x256xf32>, i32 -> vector<4x256xf32>
    %c1_i32_167 = arith.constant 1 : i32
    %230 = tpu.dynamic_rotate %229 by %c1_i32_167 dim 1 : vector<4x256xf32>, i32 -> vector<4x256xf32>
    %231 = vector.broadcast %6 : vector<1x256xf32> to vector<4x256xf32>
    %232 = arith.mulf %230, %231 : vector<4x256xf32>
    %c48_168 = arith.constant 48 : index
    %c0_169 = arith.constant 0 : index
    %233 = vector.load %arg20[%c48_168, %c0_169] : memref<144x256xf32, #tpu.memory_space<vmem>>, vector<4x256xf32>
    tpu.vector_store %arg20[%c48_168, %c0_169], %232 {strides = array<i32>} : memref<144x256xf32, #tpu.memory_space<vmem>>, vector<4x256xf32>,
    %234 = vector.broadcast %7 : vector<1x256xf32> to vector<4x256xf32>
    %235 = arith.mulf %229, %234 : vector<4x256xf32>
    %c56_170 = arith.constant 56 : index
    %c0_171 = arith.constant 0 : index
    %236 = vector.load %arg20[%c56_170, %c0_171] : memref<144x256xf32, #tpu.memory_space<vmem>>, vector<4x256xf32>
    tpu.vector_store %arg20[%c56_170, %c0_171], %235 {strides = array<i32>} : memref<144x256xf32, #tpu.memory_space<vmem>>, vector<4x256xf32>,
    %c255_i32_172 = arith.constant 255 : i32
    %237 = tpu.dynamic_rotate %229 by %c255_i32_172 dim 1 : vector<4x256xf32>, i32 -> vector<4x256xf32>
    %238 = vector.broadcast %8 : vector<1x256xf32> to vector<4x256xf32>
    %239 = arith.mulf %237, %238 : vector<4x256xf32>
    %c64_173 = arith.constant 64 : index
    %c0_174 = arith.constant 0 : index
    %240 = vector.load %arg20[%c64_173, %c0_174] : memref<144x256xf32, #tpu.memory_space<vmem>>, vector<4x256xf32>
    tpu.vector_store %arg20[%c64_173, %c0_174], %239 {strides = array<i32>} : memref<144x256xf32, #tpu.memory_space<vmem>>, vector<4x256xf32>,
    %c0_175 = arith.constant 0 : index
    %c0_176 = arith.constant 0 : index
    %241 = vector.load %arg10[%c0_175, %c0_176] : memref<4x72xbf16, #tpu.memory_space<vmem>>, vector<4x72xbf16>
    %c0_177 = arith.constant 0 : index
    %c0_178 = arith.constant 0 : index
    %242 = vector.load %arg20[%c0_177, %c0_178] : memref<144x256xf32, #tpu.memory_space<vmem>>, vector<72x256xf32>
    %243 = arith.truncf %242 : vector<72x256xf32> to vector<72x256xbf16>
    %cst_179 = arith.constant dense<0.000000e+00> : vector<4x256xf32>
    %244 = tpu.matmul %241, %243, %cst_179 {dimension_numbers = #tpu.dot_dimension_numbers<[1], [0], [0], [1], [0, 0, 1, 1], [], []>} : vector<4x72xbf16>, vector<72x256xbf16>, vector<4x256xf32> -> vector<4x256xf32>
    %c0_180 = arith.constant 0 : index
    %c0_181 = arith.constant 0 : index
    %245 = vector.load %arg11[%c0_180, %c0_181] : memref<4x1xf32, #tpu.memory_space<vmem>>, vector<4x1xf32>
    %246 = vector.broadcast %245 : vector<4x1xf32> to vector<4x256xf32>
    %247 = arith.addf %244, %246 : vector<4x256xf32>
    %248 = arith.addf %165, %247 : vector<4x256xf32>
    %c16_i32_182 = arith.constant 16 : i32
    %249 = tpu.dynamic_rotate %248 by %c16_i32_182 dim 1 : vector<4x256xf32>, i32 -> vector<4x256xf32>
    %c1_i32_183 = arith.constant 1 : i32
    %250 = tpu.dynamic_rotate %249 by %c1_i32_183 dim 1 : vector<4x256xf32>, i32 -> vector<4x256xf32>
    %251 = vector.broadcast %1 : vector<1x256xf32> to vector<4x256xf32>
    %252 = arith.mulf %250, %251 : vector<4x256xf32>
    %c0_184 = arith.constant 0 : index
    %c0_185 = arith.constant 0 : index
    %253 = vector.load %arg20[%c0_184, %c0_185] : memref<144x256xf32, #tpu.memory_space<vmem>>, vector<4x256xf32>
    tpu.vector_store %arg20[%c0_184, %c0_185], %252 {strides = array<i32>} : memref<144x256xf32, #tpu.memory_space<vmem>>, vector<4x256xf32>,
    %254 = vector.broadcast %2 : vector<1x256xf32> to vector<4x256xf32>
    %255 = arith.mulf %249, %254 : vector<4x256xf32>
    %c8_186 = arith.constant 8 : index
    %c0_187 = arith.constant 0 : index
    %256 = vector.load %arg20[%c8_186, %c0_187] : memref<144x256xf32, #tpu.memory_space<vmem>>, vector<4x256xf32>
    tpu.vector_store %arg20[%c8_186, %c0_187], %255 {strides = array<i32>} : memref<144x256xf32, #tpu.memory_space<vmem>>, vector<4x256xf32>,
    %c255_i32_188 = arith.constant 255 : i32
    %257 = tpu.dynamic_rotate %249 by %c255_i32_188 dim 1 : vector<4x256xf32>, i32 -> vector<4x256xf32>
    %258 = vector.broadcast %3 : vector<1x256xf32> to vector<4x256xf32>
    %259 = arith.mulf %257, %258 : vector<4x256xf32>
    %c16_189 = arith.constant 16 : index
    %c0_190 = arith.constant 0 : index
    %260 = vector.load %arg20[%c16_189, %c0_190] : memref<144x256xf32, #tpu.memory_space<vmem>>, vector<4x256xf32>
    tpu.vector_store %arg20[%c16_189, %c0_190], %259 {strides = array<i32>} : memref<144x256xf32, #tpu.memory_space<vmem>>, vector<4x256xf32>,
    %c1_i32_191 = arith.constant 1 : i32
    %261 = tpu.dynamic_rotate %248 by %c1_i32_191 dim 1 : vector<4x256xf32>, i32 -> vector<4x256xf32>
    %262 = vector.broadcast %4 : vector<1x256xf32> to vector<4x256xf32>
    %263 = arith.mulf %261, %262 : vector<4x256xf32>
    %c24_192 = arith.constant 24 : index
    %c0_193 = arith.constant 0 : index
    %264 = vector.load %arg20[%c24_192, %c0_193] : memref<144x256xf32, #tpu.memory_space<vmem>>, vector<4x256xf32>
    tpu.vector_store %arg20[%c24_192, %c0_193], %263 {strides = array<i32>} : memref<144x256xf32, #tpu.memory_space<vmem>>, vector<4x256xf32>,
    %c32_194 = arith.constant 32 : index
    %c0_195 = arith.constant 0 : index
    %265 = vector.load %arg20[%c32_194, %c0_195] : memref<144x256xf32, #tpu.memory_space<vmem>>, vector<4x256xf32>
    tpu.vector_store %arg20[%c32_194, %c0_195], %248 {strides = array<i32>} : memref<144x256xf32, #tpu.memory_space<vmem>>, vector<4x256xf32>,
    %c255_i32_196 = arith.constant 255 : i32
    %266 = tpu.dynamic_rotate %248 by %c255_i32_196 dim 1 : vector<4x256xf32>, i32 -> vector<4x256xf32>
    %267 = vector.broadcast %5 : vector<1x256xf32> to vector<4x256xf32>
    %268 = arith.mulf %266, %267 : vector<4x256xf32>
    %c40_197 = arith.constant 40 : index
    %c0_198 = arith.constant 0 : index
    %269 = vector.load %arg20[%c40_197, %c0_198] : memref<144x256xf32, #tpu.memory_space<vmem>>, vector<4x256xf32>
    tpu.vector_store %arg20[%c40_197, %c0_198], %268 {strides = array<i32>} : memref<144x256xf32, #tpu.memory_space<vmem>>, vector<4x256xf32>,
    %c240_i32_199 = arith.constant 240 : i32
    %270 = tpu.dynamic_rotate %248 by %c240_i32_199 dim 1 : vector<4x256xf32>, i32 -> vector<4x256xf32>
    %c1_i32_200 = arith.constant 1 : i32
    %271 = tpu.dynamic_rotate %270 by %c1_i32_200 dim 1 : vector<4x256xf32>, i32 -> vector<4x256xf32>
    %272 = vector.broadcast %6 : vector<1x256xf32> to vector<4x256xf32>
    %273 = arith.mulf %271, %272 : vector<4x256xf32>
    %c48_201 = arith.constant 48 : index
    %c0_202 = arith.constant 0 : index
    %274 = vector.load %arg20[%c48_201, %c0_202] : memref<144x256xf32, #tpu.memory_space<vmem>>, vector<4x256xf32>
    tpu.vector_store %arg20[%c48_201, %c0_202], %273 {strides = array<i32>} : memref<144x256xf32, #tpu.memory_space<vmem>>, vector<4x256xf32>,
    %275 = vector.broadcast %7 : vector<1x256xf32> to vector<4x256xf32>
    %276 = arith.mulf %270, %275 : vector<4x256xf32>
    %c56_203 = arith.constant 56 : index
    %c0_204 = arith.constant 0 : index
    %277 = vector.load %arg20[%c56_203, %c0_204] : memref<144x256xf32, #tpu.memory_space<vmem>>, vector<4x256xf32>
    tpu.vector_store %arg20[%c56_203, %c0_204], %276 {strides = array<i32>} : memref<144x256xf32, #tpu.memory_space<vmem>>, vector<4x256xf32>,
    %c255_i32_205 = arith.constant 255 : i32
    %278 = tpu.dynamic_rotate %270 by %c255_i32_205 dim 1 : vector<4x256xf32>, i32 -> vector<4x256xf32>
    %279 = vector.broadcast %8 : vector<1x256xf32> to vector<4x256xf32>
    %280 = arith.mulf %278, %279 : vector<4x256xf32>
    %c64_206 = arith.constant 64 : index
    %c0_207 = arith.constant 0 : index
    %281 = vector.load %arg20[%c64_206, %c0_207] : memref<144x256xf32, #tpu.memory_space<vmem>>, vector<4x256xf32>
    tpu.vector_store %arg20[%c64_206, %c0_207], %280 {strides = array<i32>} : memref<144x256xf32, #tpu.memory_space<vmem>>, vector<4x256xf32>,
    %c0_208 = arith.constant 0 : index
    %c0_209 = arith.constant 0 : index
    %282 = vector.load %arg12[%c0_208, %c0_209] : memref<4x72xbf16, #tpu.memory_space<vmem>>, vector<4x72xbf16>
    %c0_210 = arith.constant 0 : index
    %c0_211 = arith.constant 0 : index
    %283 = vector.load %arg20[%c0_210, %c0_211] : memref<144x256xf32, #tpu.memory_space<vmem>>, vector<72x256xf32>
    %284 = arith.truncf %283 : vector<72x256xf32> to vector<72x256xbf16>
    %cst_212 = arith.constant dense<0.000000e+00> : vector<4x256xf32>
    %285 = tpu.matmul %282, %284, %cst_212 {dimension_numbers = #tpu.dot_dimension_numbers<[1], [0], [0], [1], [0, 0, 1, 1], [], []>} : vector<4x72xbf16>, vector<72x256xbf16>, vector<4x256xf32> -> vector<4x256xf32>
    %c0_213 = arith.constant 0 : index
    %c0_214 = arith.constant 0 : index
    %286 = vector.load %arg13[%c0_213, %c0_214] : memref<4x1xf32, #tpu.memory_space<vmem>>, vector<4x1xf32>
    %287 = vector.broadcast %286 : vector<4x1xf32> to vector<4x256xf32>
    %288 = arith.addf %285, %287 : vector<4x256xf32>
    %cst_215 = arith.constant 0.000000e+00 : f32
    %289 = vector.broadcast %cst_215 : f32 to vector<4x256xf32>
    %290 = arith.maximumf %288, %289 : vector<4x256xf32>
    %c16_i32_216 = arith.constant 16 : i32
    %291 = tpu.dynamic_rotate %290 by %c16_i32_216 dim 1 : vector<4x256xf32>, i32 -> vector<4x256xf32>
    %c1_i32_217 = arith.constant 1 : i32
    %292 = tpu.dynamic_rotate %291 by %c1_i32_217 dim 1 : vector<4x256xf32>, i32 -> vector<4x256xf32>
    %293 = vector.broadcast %1 : vector<1x256xf32> to vector<4x256xf32>
    %294 = arith.mulf %292, %293 : vector<4x256xf32>
    %c0_218 = arith.constant 0 : index
    %c0_219 = arith.constant 0 : index
    %295 = vector.load %arg20[%c0_218, %c0_219] : memref<144x256xf32, #tpu.memory_space<vmem>>, vector<4x256xf32>
    tpu.vector_store %arg20[%c0_218, %c0_219], %294 {strides = array<i32>} : memref<144x256xf32, #tpu.memory_space<vmem>>, vector<4x256xf32>,
    %296 = vector.broadcast %2 : vector<1x256xf32> to vector<4x256xf32>
    %297 = arith.mulf %291, %296 : vector<4x256xf32>
    %c8_220 = arith.constant 8 : index
    %c0_221 = arith.constant 0 : index
    %298 = vector.load %arg20[%c8_220, %c0_221] : memref<144x256xf32, #tpu.memory_space<vmem>>, vector<4x256xf32>
    tpu.vector_store %arg20[%c8_220, %c0_221], %297 {strides = array<i32>} : memref<144x256xf32, #tpu.memory_space<vmem>>, vector<4x256xf32>,
    %c255_i32_222 = arith.constant 255 : i32
    %299 = tpu.dynamic_rotate %291 by %c255_i32_222 dim 1 : vector<4x256xf32>, i32 -> vector<4x256xf32>
    %300 = vector.broadcast %3 : vector<1x256xf32> to vector<4x256xf32>
    %301 = arith.mulf %299, %300 : vector<4x256xf32>
    %c16_223 = arith.constant 16 : index
    %c0_224 = arith.constant 0 : index
    %302 = vector.load %arg20[%c16_223, %c0_224] : memref<144x256xf32, #tpu.memory_space<vmem>>, vector<4x256xf32>
    tpu.vector_store %arg20[%c16_223, %c0_224], %301 {strides = array<i32>} : memref<144x256xf32, #tpu.memory_space<vmem>>, vector<4x256xf32>,
    %c1_i32_225 = arith.constant 1 : i32
    %303 = tpu.dynamic_rotate %290 by %c1_i32_225 dim 1 : vector<4x256xf32>, i32 -> vector<4x256xf32>
    %304 = vector.broadcast %4 : vector<1x256xf32> to vector<4x256xf32>
    %305 = arith.mulf %303, %304 : vector<4x256xf32>
    %c24_226 = arith.constant 24 : index
    %c0_227 = arith.constant 0 : index
    %306 = vector.load %arg20[%c24_226, %c0_227] : memref<144x256xf32, #tpu.memory_space<vmem>>, vector<4x256xf32>
    tpu.vector_store %arg20[%c24_226, %c0_227], %305 {strides = array<i32>} : memref<144x256xf32, #tpu.memory_space<vmem>>, vector<4x256xf32>,
    %c32_228 = arith.constant 32 : index
    %c0_229 = arith.constant 0 : index
    %307 = vector.load %arg20[%c32_228, %c0_229] : memref<144x256xf32, #tpu.memory_space<vmem>>, vector<4x256xf32>
    tpu.vector_store %arg20[%c32_228, %c0_229], %290 {strides = array<i32>} : memref<144x256xf32, #tpu.memory_space<vmem>>, vector<4x256xf32>,
    %c255_i32_230 = arith.constant 255 : i32
    %308 = tpu.dynamic_rotate %290 by %c255_i32_230 dim 1 : vector<4x256xf32>, i32 -> vector<4x256xf32>
    %309 = vector.broadcast %5 : vector<1x256xf32> to vector<4x256xf32>
    %310 = arith.mulf %308, %309 : vector<4x256xf32>
    %c40_231 = arith.constant 40 : index
    %c0_232 = arith.constant 0 : index
    %311 = vector.load %arg20[%c40_231, %c0_232] : memref<144x256xf32, #tpu.memory_space<vmem>>, vector<4x256xf32>
    tpu.vector_store %arg20[%c40_231, %c0_232], %310 {strides = array<i32>} : memref<144x256xf32, #tpu.memory_space<vmem>>, vector<4x256xf32>,
    %c240_i32_233 = arith.constant 240 : i32
    %312 = tpu.dynamic_rotate %290 by %c240_i32_233 dim 1 : vector<4x256xf32>, i32 -> vector<4x256xf32>
    %c1_i32_234 = arith.constant 1 : i32
    %313 = tpu.dynamic_rotate %312 by %c1_i32_234 dim 1 : vector<4x256xf32>, i32 -> vector<4x256xf32>
    %314 = vector.broadcast %6 : vector<1x256xf32> to vector<4x256xf32>
    %315 = arith.mulf %313, %314 : vector<4x256xf32>
    %c48_235 = arith.constant 48 : index
    %c0_236 = arith.constant 0 : index
    %316 = vector.load %arg20[%c48_235, %c0_236] : memref<144x256xf32, #tpu.memory_space<vmem>>, vector<4x256xf32>
    tpu.vector_store %arg20[%c48_235, %c0_236], %315 {strides = array<i32>} : memref<144x256xf32, #tpu.memory_space<vmem>>, vector<4x256xf32>,
    %317 = vector.broadcast %7 : vector<1x256xf32> to vector<4x256xf32>
    %318 = arith.mulf %312, %317 : vector<4x256xf32>
    %c56_237 = arith.constant 56 : index
    %c0_238 = arith.constant 0 : index
    %319 = vector.load %arg20[%c56_237, %c0_238] : memref<144x256xf32, #tpu.memory_space<vmem>>, vector<4x256xf32>
    tpu.vector_store %arg20[%c56_237, %c0_238], %318 {strides = array<i32>} : memref<144x256xf32, #tpu.memory_space<vmem>>, vector<4x256xf32>,
    %c255_i32_239 = arith.constant 255 : i32
    %320 = tpu.dynamic_rotate %312 by %c255_i32_239 dim 1 : vector<4x256xf32>, i32 -> vector<4x256xf32>
    %321 = vector.broadcast %8 : vector<1x256xf32> to vector<4x256xf32>
    %322 = arith.mulf %320, %321 : vector<4x256xf32>
    %c64_240 = arith.constant 64 : index
    %c0_241 = arith.constant 0 : index
    %323 = vector.load %arg20[%c64_240, %c0_241] : memref<144x256xf32, #tpu.memory_space<vmem>>, vector<4x256xf32>
    tpu.vector_store %arg20[%c64_240, %c0_241], %322 {strides = array<i32>} : memref<144x256xf32, #tpu.memory_space<vmem>>, vector<4x256xf32>,
    %c0_242 = arith.constant 0 : index
    %c0_243 = arith.constant 0 : index
    %324 = vector.load %arg14[%c0_242, %c0_243] : memref<4x72xbf16, #tpu.memory_space<vmem>>, vector<4x72xbf16>
    %c0_244 = arith.constant 0 : index
    %c0_245 = arith.constant 0 : index
    %325 = vector.load %arg20[%c0_244, %c0_245] : memref<144x256xf32, #tpu.memory_space<vmem>>, vector<72x256xf32>
    %326 = arith.truncf %325 : vector<72x256xf32> to vector<72x256xbf16>
    %cst_246 = arith.constant dense<0.000000e+00> : vector<4x256xf32>
    %327 = tpu.matmul %324, %326, %cst_246 {dimension_numbers = #tpu.dot_dimension_numbers<[1], [0], [0], [1], [0, 0, 1, 1], [], []>} : vector<4x72xbf16>, vector<72x256xbf16>, vector<4x256xf32> -> vector<4x256xf32>
    %c0_247 = arith.constant 0 : index
    %c0_248 = arith.constant 0 : index
    %328 = vector.load %arg15[%c0_247, %c0_248] : memref<4x1xf32, #tpu.memory_space<vmem>>, vector<4x1xf32>
    %329 = vector.broadcast %328 : vector<4x1xf32> to vector<4x256xf32>
    %330 = arith.addf %327, %329 : vector<4x256xf32>
    %331 = arith.addf %248, %330 : vector<4x256xf32>
    %c16_i32_249 = arith.constant 16 : i32
    %332 = tpu.dynamic_rotate %331 by %c16_i32_249 dim 1 : vector<4x256xf32>, i32 -> vector<4x256xf32>
    %c1_i32_250 = arith.constant 1 : i32
    %333 = tpu.dynamic_rotate %332 by %c1_i32_250 dim 1 : vector<4x256xf32>, i32 -> vector<4x256xf32>
    %334 = vector.broadcast %1 : vector<1x256xf32> to vector<4x256xf32>
    %335 = arith.mulf %333, %334 : vector<4x256xf32>
    %c0_251 = arith.constant 0 : index
    %c0_252 = arith.constant 0 : index
    %336 = vector.load %arg20[%c0_251, %c0_252] : memref<144x256xf32, #tpu.memory_space<vmem>>, vector<4x256xf32>
    tpu.vector_store %arg20[%c0_251, %c0_252], %335 {strides = array<i32>} : memref<144x256xf32, #tpu.memory_space<vmem>>, vector<4x256xf32>,
    %337 = vector.broadcast %2 : vector<1x256xf32> to vector<4x256xf32>
    %338 = arith.mulf %332, %337 : vector<4x256xf32>
    %c8_253 = arith.constant 8 : index
    %c0_254 = arith.constant 0 : index
    %339 = vector.load %arg20[%c8_253, %c0_254] : memref<144x256xf32, #tpu.memory_space<vmem>>, vector<4x256xf32>
    tpu.vector_store %arg20[%c8_253, %c0_254], %338 {strides = array<i32>} : memref<144x256xf32, #tpu.memory_space<vmem>>, vector<4x256xf32>,
    %c255_i32_255 = arith.constant 255 : i32
    %340 = tpu.dynamic_rotate %332 by %c255_i32_255 dim 1 : vector<4x256xf32>, i32 -> vector<4x256xf32>
    %341 = vector.broadcast %3 : vector<1x256xf32> to vector<4x256xf32>
    %342 = arith.mulf %340, %341 : vector<4x256xf32>
    %c16_256 = arith.constant 16 : index
    %c0_257 = arith.constant 0 : index
    %343 = vector.load %arg20[%c16_256, %c0_257] : memref<144x256xf32, #tpu.memory_space<vmem>>, vector<4x256xf32>
    tpu.vector_store %arg20[%c16_256, %c0_257], %342 {strides = array<i32>} : memref<144x256xf32, #tpu.memory_space<vmem>>, vector<4x256xf32>,
    %c1_i32_258 = arith.constant 1 : i32
    %344 = tpu.dynamic_rotate %331 by %c1_i32_258 dim 1 : vector<4x256xf32>, i32 -> vector<4x256xf32>
    %345 = vector.broadcast %4 : vector<1x256xf32> to vector<4x256xf32>
    %346 = arith.mulf %344, %345 : vector<4x256xf32>
    %c24_259 = arith.constant 24 : index
    %c0_260 = arith.constant 0 : index
    %347 = vector.load %arg20[%c24_259, %c0_260] : memref<144x256xf32, #tpu.memory_space<vmem>>, vector<4x256xf32>
    tpu.vector_store %arg20[%c24_259, %c0_260], %346 {strides = array<i32>} : memref<144x256xf32, #tpu.memory_space<vmem>>, vector<4x256xf32>,
    %c32_261 = arith.constant 32 : index
    %c0_262 = arith.constant 0 : index
    %348 = vector.load %arg20[%c32_261, %c0_262] : memref<144x256xf32, #tpu.memory_space<vmem>>, vector<4x256xf32>
    tpu.vector_store %arg20[%c32_261, %c0_262], %331 {strides = array<i32>} : memref<144x256xf32, #tpu.memory_space<vmem>>, vector<4x256xf32>,
    %c255_i32_263 = arith.constant 255 : i32
    %349 = tpu.dynamic_rotate %331 by %c255_i32_263 dim 1 : vector<4x256xf32>, i32 -> vector<4x256xf32>
    %350 = vector.broadcast %5 : vector<1x256xf32> to vector<4x256xf32>
    %351 = arith.mulf %349, %350 : vector<4x256xf32>
    %c40_264 = arith.constant 40 : index
    %c0_265 = arith.constant 0 : index
    %352 = vector.load %arg20[%c40_264, %c0_265] : memref<144x256xf32, #tpu.memory_space<vmem>>, vector<4x256xf32>
    tpu.vector_store %arg20[%c40_264, %c0_265], %351 {strides = array<i32>} : memref<144x256xf32, #tpu.memory_space<vmem>>, vector<4x256xf32>,
    %c240_i32_266 = arith.constant 240 : i32
    %353 = tpu.dynamic_rotate %331 by %c240_i32_266 dim 1 : vector<4x256xf32>, i32 -> vector<4x256xf32>
    %c1_i32_267 = arith.constant 1 : i32
    %354 = tpu.dynamic_rotate %353 by %c1_i32_267 dim 1 : vector<4x256xf32>, i32 -> vector<4x256xf32>
    %355 = vector.broadcast %6 : vector<1x256xf32> to vector<4x256xf32>
    %356 = arith.mulf %354, %355 : vector<4x256xf32>
    %c48_268 = arith.constant 48 : index
    %c0_269 = arith.constant 0 : index
    %357 = vector.load %arg20[%c48_268, %c0_269] : memref<144x256xf32, #tpu.memory_space<vmem>>, vector<4x256xf32>
    tpu.vector_store %arg20[%c48_268, %c0_269], %356 {strides = array<i32>} : memref<144x256xf32, #tpu.memory_space<vmem>>, vector<4x256xf32>,
    %358 = vector.broadcast %7 : vector<1x256xf32> to vector<4x256xf32>
    %359 = arith.mulf %353, %358 : vector<4x256xf32>
    %c56_270 = arith.constant 56 : index
    %c0_271 = arith.constant 0 : index
    %360 = vector.load %arg20[%c56_270, %c0_271] : memref<144x256xf32, #tpu.memory_space<vmem>>, vector<4x256xf32>
    tpu.vector_store %arg20[%c56_270, %c0_271], %359 {strides = array<i32>} : memref<144x256xf32, #tpu.memory_space<vmem>>, vector<4x256xf32>,
    %c255_i32_272 = arith.constant 255 : i32
    %361 = tpu.dynamic_rotate %353 by %c255_i32_272 dim 1 : vector<4x256xf32>, i32 -> vector<4x256xf32>
    %362 = vector.broadcast %8 : vector<1x256xf32> to vector<4x256xf32>
    %363 = arith.mulf %361, %362 : vector<4x256xf32>
    %c64_273 = arith.constant 64 : index
    %c0_274 = arith.constant 0 : index
    %364 = vector.load %arg20[%c64_273, %c0_274] : memref<144x256xf32, #tpu.memory_space<vmem>>, vector<4x256xf32>
    tpu.vector_store %arg20[%c64_273, %c0_274], %363 {strides = array<i32>} : memref<144x256xf32, #tpu.memory_space<vmem>>, vector<4x256xf32>,
    %c0_275 = arith.constant 0 : index
    %c0_276 = arith.constant 0 : index
    %365 = vector.load %arg16[%c0_275, %c0_276] : memref<4x72xbf16, #tpu.memory_space<vmem>>, vector<4x72xbf16>
    %c0_277 = arith.constant 0 : index
    %c0_278 = arith.constant 0 : index
    %366 = vector.load %arg20[%c0_277, %c0_278] : memref<144x256xf32, #tpu.memory_space<vmem>>, vector<72x256xf32>
    %367 = arith.truncf %366 : vector<72x256xf32> to vector<72x256xbf16>
    %cst_279 = arith.constant dense<0.000000e+00> : vector<4x256xf32>
    %368 = tpu.matmul %365, %367, %cst_279 {dimension_numbers = #tpu.dot_dimension_numbers<[1], [0], [0], [1], [0, 0, 1, 1], [], []>} : vector<4x72xbf16>, vector<72x256xbf16>, vector<4x256xf32> -> vector<4x256xf32>
    %c0_280 = arith.constant 0 : index
    %c0_281 = arith.constant 0 : index
    %369 = vector.load %arg17[%c0_280, %c0_281] : memref<4x1xf32, #tpu.memory_space<vmem>>, vector<4x1xf32>
    %370 = vector.broadcast %369 : vector<4x1xf32> to vector<4x256xf32>
    %371 = arith.addf %368, %370 : vector<4x256xf32>
    %cst_282 = arith.constant 0.000000e+00 : f32
    %372 = vector.broadcast %cst_282 : f32 to vector<4x256xf32>
    %373 = arith.maximumf %371, %372 : vector<4x256xf32>
    %c0_283 = arith.constant 0 : index
    %c0_284 = arith.constant 0 : index
    %c0_285 = arith.constant 0 : index
    %374 = vector.load %arg18[%c0_283, %c0_284, %c0_285] : memref<1x4x256xf32, #tpu.memory_space<vmem>>, vector<1x4x256xf32>
    %375 = vector.shape_cast %374 : vector<1x4x256xf32> to vector<4x256xf32>
    %376 = vector.shape_cast %331 : vector<4x256xf32> to vector<1x4x256xf32>
    tpu.vector_store %arg18[%c0_283, %c0_284, %c0_285], %376 {strides = array<i32>} : memref<1x4x256xf32, #tpu.memory_space<vmem>>, vector<1x4x256xf32>,
    %c0_286 = arith.constant 0 : index
    %c0_287 = arith.constant 0 : index
    %c0_288 = arith.constant 0 : index
    %377 = vector.load %arg19[%c0_286, %c0_287, %c0_288] : memref<1x4x256xf32, #tpu.memory_space<vmem>>, vector<1x4x256xf32>
    %378 = vector.shape_cast %377 : vector<1x4x256xf32> to vector<4x256xf32>
    %379 = vector.shape_cast %373 : vector<4x256xf32> to vector<1x4x256xf32>
    tpu.vector_store %arg19[%c0_286, %c0_287, %c0_288], %379 {strides = array<i32>} : memref<1x4x256xf32, #tpu.memory_space<vmem>>, vector<1x4x256xf32>,
    return
  }
  func.func @transform_0(%arg0: i32) -> (i32, i32, i32) {
    %c0_i32 = arith.constant 0 : i32
    %c0_i32_0 = arith.constant 0 : i32
    %c0_i32_1 = arith.constant 0 : i32
    return %arg0, %c0_i32, %c0_i32_0 : i32, i32, i32
  }
  func.func @transform_1(%arg0: i32) -> (i32, i32, i32) {
    %c0_i32 = arith.constant 0 : i32
    %c0_i32_0 = arith.constant 0 : i32
    %c0_i32_1 = arith.constant 0 : i32
    return %arg0, %c0_i32, %c0_i32_0 : i32, i32, i32
  }
  func.func @transform_2(%arg0: i32) -> (i32, i32) {
    %c0_i32 = arith.constant 0 : i32
    %c0_i32_0 = arith.constant 0 : i32
    %c0_i32_1 = arith.constant 0 : i32
    return %c0_i32, %c0_i32_0 : i32, i32
  }
  func.func @transform_3(%arg0: i32) -> (i32, i32) {
    %c0_i32 = arith.constant 0 : i32
    %c0_i32_0 = arith.constant 0 : i32
    %c0_i32_1 = arith.constant 0 : i32
    return %c0_i32, %c0_i32_0 : i32, i32
  }
  func.func @transform_4(%arg0: i32) -> (i32, i32) {
    %c0_i32 = arith.constant 0 : i32
    %c0_i32_0 = arith.constant 0 : i32
    %c0_i32_1 = arith.constant 0 : i32
    return %c0_i32, %c0_i32_0 : i32, i32
  }
  func.func @transform_5(%arg0: i32) -> (i32, i32) {
    %c0_i32 = arith.constant 0 : i32
    %c0_i32_0 = arith.constant 0 : i32
    %c0_i32_1 = arith.constant 0 : i32
    return %c0_i32, %c0_i32_0 : i32, i32
  }
  func.func @transform_6(%arg0: i32) -> (i32, i32) {
    %c0_i32 = arith.constant 0 : i32
    %c0_i32_0 = arith.constant 0 : i32
    %c0_i32_1 = arith.constant 0 : i32
    return %c0_i32, %c0_i32_0 : i32, i32
  }
  func.func @transform_7(%arg0: i32) -> (i32, i32) {
    %c0_i32 = arith.constant 0 : i32
    %c0_i32_0 = arith.constant 0 : i32
    %c0_i32_1 = arith.constant 0 : i32
    return %c0_i32, %c0_i32_0 : i32, i32
  }
  func.func @transform_8(%arg0: i32) -> (i32, i32) {
    %c0_i32 = arith.constant 0 : i32
    %c0_i32_0 = arith.constant 0 : i32
    %c0_i32_1 = arith.constant 0 : i32
    return %c0_i32, %c0_i32_0 : i32, i32
  }
  func.func @transform_9(%arg0: i32) -> (i32, i32) {
    %c0_i32 = arith.constant 0 : i32
    %c0_i32_0 = arith.constant 0 : i32
    %c0_i32_1 = arith.constant 0 : i32
    return %c0_i32, %c0_i32_0 : i32, i32
  }
  func.func @transform_10(%arg0: i32) -> (i32, i32) {
    %c0_i32 = arith.constant 0 : i32
    %c0_i32_0 = arith.constant 0 : i32
    %c0_i32_1 = arith.constant 0 : i32
    return %c0_i32, %c0_i32_0 : i32, i32
  }
  func.func @transform_11(%arg0: i32) -> (i32, i32) {
    %c0_i32 = arith.constant 0 : i32
    %c0_i32_0 = arith.constant 0 : i32
    %c0_i32_1 = arith.constant 0 : i32
    return %c0_i32, %c0_i32_0 : i32, i32
  }
  func.func @transform_12(%arg0: i32) -> (i32, i32) {
    %c0_i32 = arith.constant 0 : i32
    %c0_i32_0 = arith.constant 0 : i32
    %c0_i32_1 = arith.constant 0 : i32
    return %c0_i32, %c0_i32_0 : i32, i32
  }
  func.func @transform_13(%arg0: i32) -> (i32, i32) {
    %c0_i32 = arith.constant 0 : i32
    %c0_i32_0 = arith.constant 0 : i32
    %c0_i32_1 = arith.constant 0 : i32
    return %c0_i32, %c0_i32_0 : i32, i32
  }
  func.func @transform_14(%arg0: i32) -> (i32, i32) {
    %c0_i32 = arith.constant 0 : i32
    %c0_i32_0 = arith.constant 0 : i32
    %c0_i32_1 = arith.constant 0 : i32
    return %c0_i32, %c0_i32_0 : i32, i32
  }
  func.func @transform_15(%arg0: i32) -> (i32, i32) {
    %c0_i32 = arith.constant 0 : i32
    %c0_i32_0 = arith.constant 0 : i32
    %c0_i32_1 = arith.constant 0 : i32
    return %c0_i32, %c0_i32_0 : i32, i32
  }
  func.func @transform_16(%arg0: i32) -> (i32, i32) {
    %c0_i32 = arith.constant 0 : i32
    %c0_i32_0 = arith.constant 0 : i32
    %c0_i32_1 = arith.constant 0 : i32
    return %c0_i32, %c0_i32_0 : i32, i32
  }
  func.func @transform_17(%arg0: i32) -> (i32, i32, i32) {
    %c0_i32 = arith.constant 0 : i32
    %c0_i32_0 = arith.constant 0 : i32
    %c0_i32_1 = arith.constant 0 : i32
    return %arg0, %c0_i32, %c0_i32_0 : i32, i32, i32
  }
  func.func @transform_18(%arg0: i32) -> (i32, i32, i32) {
    %c0_i32 = arith.constant 0 : i32
    %c0_i32_0 = arith.constant 0 : i32
    %c0_i32_1 = arith.constant 0 : i32
    return %arg0, %c0_i32, %c0_i32_0 : i32, i32, i32
  }
}

module attributes {stable_mosaic.version = 11 : i64} {
  func.func @sim_kernel(%arg0: i32, %arg1: memref<1x4x256xf32, #tpu.memory_space<vmem>>, %arg2: memref<1x4x256xf32, #tpu.memory_space<vmem>>, %arg3: memref<9x256xf32, #tpu.memory_space<vmem>>, %arg4: memref<4x72xbf16, #tpu.memory_space<vmem>>, %arg5: memref<4x1xf32, #tpu.memory_space<vmem>>, %arg6: memref<4x144xbf16, #tpu.memory_space<vmem>>, %arg7: memref<4x1xf32, #tpu.memory_space<vmem>>, %arg8: memref<4x72xbf16, #tpu.memory_space<vmem>>, %arg9: memref<4x1xf32, #tpu.memory_space<vmem>>, %arg10: memref<4x72xbf16, #tpu.memory_space<vmem>>, %arg11: memref<4x1xf32, #tpu.memory_space<vmem>>, %arg12: memref<4x72xbf16, #tpu.memory_space<vmem>>, %arg13: memref<4x1xf32, #tpu.memory_space<vmem>>, %arg14: memref<4x72xbf16, #tpu.memory_space<vmem>>, %arg15: memref<4x1xf32, #tpu.memory_space<vmem>>, %arg16: memref<4x72xbf16, #tpu.memory_space<vmem>>, %arg17: memref<4x1xf32, #tpu.memory_space<vmem>>, %arg18: memref<1x4x256xf32, #tpu.memory_space<vmem>>, %arg19: memref<1x4x256xf32, #tpu.memory_space<vmem>>, %arg20: memref<144x256xf32, #tpu.memory_space<vmem>>) attributes {dimension_semantics = [#tpu.dimension_semantics<parallel>], iteration_bounds = array<i64: 2>, scalar_prefetch = 0 : i64, scratch_operands = 1 : i64, tpu.core_type = #tpu.core_type<tc>, window_params = [{transform_indices = @transform_0, window_bounds = array<i64: 1, 4, 256>}, {transform_indices = @transform_1, window_bounds = array<i64: 1, 4, 256>}, {pipeline_mode = #tpu.pipeline_mode<synchronous>, transform_indices = @transform_2, window_bounds = array<i64: 9, 256>}, {pipeline_mode = #tpu.pipeline_mode<synchronous>, transform_indices = @transform_3, window_bounds = array<i64: 4, 72>}, {pipeline_mode = #tpu.pipeline_mode<synchronous>, transform_indices = @transform_4, window_bounds = array<i64: 4, 1>}, {pipeline_mode = #tpu.pipeline_mode<synchronous>, transform_indices = @transform_5, window_bounds = array<i64: 4, 144>}, {pipeline_mode = #tpu.pipeline_mode<synchronous>, transform_indices = @transform_6, window_bounds = array<i64: 4, 1>}, {pipeline_mode = #tpu.pipeline_mode<synchronous>, transform_indices = @transform_7, window_bounds = array<i64: 4, 72>}, {pipeline_mode = #tpu.pipeline_mode<synchronous>, transform_indices = @transform_8, window_bounds = array<i64: 4, 1>}, {pipeline_mode = #tpu.pipeline_mode<synchronous>, transform_indices = @transform_9, window_bounds = array<i64: 4, 72>}, {pipeline_mode = #tpu.pipeline_mode<synchronous>, transform_indices = @transform_10, window_bounds = array<i64: 4, 1>}, {pipeline_mode = #tpu.pipeline_mode<synchronous>, transform_indices = @transform_11, window_bounds = array<i64: 4, 72>}, {pipeline_mode = #tpu.pipeline_mode<synchronous>, transform_indices = @transform_12, window_bounds = array<i64: 4, 1>}, {pipeline_mode = #tpu.pipeline_mode<synchronous>, transform_indices = @transform_13, window_bounds = array<i64: 4, 72>}, {pipeline_mode = #tpu.pipeline_mode<synchronous>, transform_indices = @transform_14, window_bounds = array<i64: 4, 1>}, {pipeline_mode = #tpu.pipeline_mode<synchronous>, transform_indices = @transform_15, window_bounds = array<i64: 4, 72>}, {pipeline_mode = #tpu.pipeline_mode<synchronous>, transform_indices = @transform_16, window_bounds = array<i64: 4, 1>}, {transform_indices = @transform_17, window_bounds = array<i64: 1, 4, 256>}, {transform_indices = @transform_18, window_bounds = array<i64: 1, 4, 256>}]} {
    %c0 = arith.constant 0 : index
    %c0_0 = arith.constant 0 : index
    %0 = vector.load %arg3[%c0, %c0_0] : memref<9x256xf32, #tpu.memory_space<vmem>>, vector<9x256xf32>
    %1 = vector.extract_strided_slice %0 {offsets = [0, 0], sizes = [1, 256], strides = [1, 1]} : vector<9x256xf32> to vector<1x256xf32>
    %2 = vector.extract_strided_slice %0 {offsets = [1, 0], sizes = [1, 256], strides = [1, 1]} : vector<9x256xf32> to vector<1x256xf32>
    %3 = vector.extract_strided_slice %0 {offsets = [2, 0], sizes = [1, 256], strides = [1, 1]} : vector<9x256xf32> to vector<1x256xf32>
    %4 = vector.extract_strided_slice %0 {offsets = [3, 0], sizes = [1, 256], strides = [1, 1]} : vector<9x256xf32> to vector<1x256xf32>
    %5 = vector.extract_strided_slice %0 {offsets = [5, 0], sizes = [1, 256], strides = [1, 1]} : vector<9x256xf32> to vector<1x256xf32>
    %6 = vector.extract_strided_slice %0 {offsets = [6, 0], sizes = [1, 256], strides = [1, 1]} : vector<9x256xf32> to vector<1x256xf32>
    %7 = vector.extract_strided_slice %0 {offsets = [7, 0], sizes = [1, 256], strides = [1, 1]} : vector<9x256xf32> to vector<1x256xf32>
    %8 = vector.extract_strided_slice %0 {offsets = [8, 0], sizes = [1, 256], strides = [1, 1]} : vector<9x256xf32> to vector<1x256xf32>
    %cst = arith.constant 0.000000e+00 : f32
    %9 = vector.broadcast %cst : f32 to vector<4x256xf32>
    %c4 = arith.constant 4 : index
    %c0_1 = arith.constant 0 : index
    %10 = vector.load %arg20[%c4, %c0_1] : memref<144x256xf32, #tpu.memory_space<vmem>>, vector<4x256xf32>
    tpu.vector_store %arg20[%c4, %c0_1], %9 {strides = array<i32>} : memref<144x256xf32, #tpu.memory_space<vmem>>, vector<4x256xf32>,
    %cst_2 = arith.constant 0.000000e+00 : f32
    %11 = vector.broadcast %cst_2 : f32 to vector<4x256xf32>
    %c12 = arith.constant 12 : index
    %c0_3 = arith.constant 0 : index
    %12 = vector.load %arg20[%c12, %c0_3] : memref<144x256xf32, #tpu.memory_space<vmem>>, vector<4x256xf32>
    tpu.vector_store %arg20[%c12, %c0_3], %11 {strides = array<i32>} : memref<144x256xf32, #tpu.memory_space<vmem>>, vector<4x256xf32>,
    %cst_4 = arith.constant 0.000000e+00 : f32
    %13 = vector.broadcast %cst_4 : f32 to vector<4x256xf32>
    %c20 = arith.constant 20 : index
    %c0_5 = arith.constant 0 : index
    %14 = vector.load %arg20[%c20, %c0_5] : memref<144x256xf32, #tpu.memory_space<vmem>>, vector<4x256xf32>
    tpu.vector_store %arg20[%c20, %c0_5], %13 {strides = array<i32>} : memref<144x256xf32, #tpu.memory_space<vmem>>, vector<4x256xf32>,
    %cst_6 = arith.constant 0.000000e+00 : f32
    %15 = vector.broadcast %cst_6 : f32 to vector<4x256xf32>
    %c28 = arith.constant 28 : index
    %c0_7 = arith.constant 0 : index
    %16 = vector.load %arg20[%c28, %c0_7] : memref<144x256xf32, #tpu.memory_space<vmem>>, vector<4x256xf32>
    tpu.vector_store %arg20[%c28, %c0_7], %15 {strides = array<i32>} : memref<144x256xf32, #tpu.memory_space<vmem>>, vector<4x256xf32>,
    %cst_8 = arith.constant 0.000000e+00 : f32
    %17 = vector.broadcast %cst_8 : f32 to vector<4x256xf32>
    %c36 = arith.constant 36 : index
    %c0_9 = arith.constant 0 : index
    %18 = vector.load %arg20[%c36, %c0_9] : memref<144x256xf32, #tpu.memory_space<vmem>>, vector<4x256xf32>
    tpu.vector_store %arg20[%c36, %c0_9], %17 {strides = array<i32>} : memref<144x256xf32, #tpu.memory_space<vmem>>, vector<4x256xf32>,
    %cst_10 = arith.constant 0.000000e+00 : f32
    %19 = vector.broadcast %cst_10 : f32 to vector<4x256xf32>
    %c44 = arith.constant 44 : index
    %c0_11 = arith.constant 0 : index
    %20 = vector.load %arg20[%c44, %c0_11] : memref<144x256xf32, #tpu.memory_space<vmem>>, vector<4x256xf32>
    tpu.vector_store %arg20[%c44, %c0_11], %19 {strides = array<i32>} : memref<144x256xf32, #tpu.memory_space<vmem>>, vector<4x256xf32>,
    %cst_12 = arith.constant 0.000000e+00 : f32
    %21 = vector.broadcast %cst_12 : f32 to vector<4x256xf32>
    %c52 = arith.constant 52 : index
    %c0_13 = arith.constant 0 : index
    %22 = vector.load %arg20[%c52, %c0_13] : memref<144x256xf32, #tpu.memory_space<vmem>>, vector<4x256xf32>
    tpu.vector_store %arg20[%c52, %c0_13], %21 {strides = array<i32>} : memref<144x256xf32, #tpu.memory_space<vmem>>, vector<4x256xf32>,
    %cst_14 = arith.constant 0.000000e+00 : f32
    %23 = vector.broadcast %cst_14 : f32 to vector<4x256xf32>
    %c60 = arith.constant 60 : index
    %c0_15 = arith.constant 0 : index
    %24 = vector.load %arg20[%c60, %c0_15] : memref<144x256xf32, #tpu.memory_space<vmem>>, vector<4x256xf32>
    tpu.vector_store %arg20[%c60, %c0_15], %23 {strides = array<i32>} : memref<144x256xf32, #tpu.memory_space<vmem>>, vector<4x256xf32>,
    %cst_16 = arith.constant 0.000000e+00 : f32
    %25 = vector.broadcast %cst_16 : f32 to vector<4x256xf32>
    %c68 = arith.constant 68 : index
    %c0_17 = arith.constant 0 : index
    %26 = vector.load %arg20[%c68, %c0_17] : memref<144x256xf32, #tpu.memory_space<vmem>>, vector<4x256xf32>
    tpu.vector_store %arg20[%c68, %c0_17], %25 {strides = array<i32>} : memref<144x256xf32, #tpu.memory_space<vmem>>, vector<4x256xf32>,
    %cst_18 = arith.constant 0.000000e+00 : f32
    %27 = vector.broadcast %cst_18 : f32 to vector<4x256xf32>
    %c76 = arith.constant 76 : index
    %c0_19 = arith.constant 0 : index
    %28 = vector.load %arg20[%c76, %c0_19] : memref<144x256xf32, #tpu.memory_space<vmem>>, vector<4x256xf32>
    tpu.vector_store %arg20[%c76, %c0_19], %27 {strides = array<i32>} : memref<144x256xf32, #tpu.memory_space<vmem>>, vector<4x256xf32>,
    %cst_20 = arith.constant 0.000000e+00 : f32
    %29 = vector.broadcast %cst_20 : f32 to vector<4x256xf32>
    %c84 = arith.constant 84 : index
    %c0_21 = arith.constant 0 : index
    %30 = vector.load %arg20[%c84, %c0_21] : memref<144x256xf32, #tpu.memory_space<vmem>>, vector<4x256xf32>
    tpu.vector_store %arg20[%c84, %c0_21], %29 {strides = array<i32>} : memref<144x256xf32, #tpu.memory_space<vmem>>, vector<4x256xf32>,
    %cst_22 = arith.constant 0.000000e+00 : f32
    %31 = vector.broadcast %cst_22 : f32 to vector<4x256xf32>
    %c92 = arith.constant 92 : index
    %c0_23 = arith.constant 0 : index
    %32 = vector.load %arg20[%c92, %c0_23] : memref<144x256xf32, #tpu.memory_space<vmem>>, vector<4x256xf32>
    tpu.vector_store %arg20[%c92, %c0_23], %31 {strides = array<i32>} : memref<144x256xf32, #tpu.memory_space<vmem>>, vector<4x256xf32>,
    %cst_24 = arith.constant 0.000000e+00 : f32
    %33 = vector.broadcast %cst_24 : f32 to vector<4x256xf32>
    %c100 = arith.constant 100 : index
    %c0_25 = arith.constant 0 : index
    %34 = vector.load %arg20[%c100, %c0_25] : memref<144x256xf32, #tpu.memory_space<vmem>>, vector<4x256xf32>
    tpu.vector_store %arg20[%c100, %c0_25], %33 {strides = array<i32>} : memref<144x256xf32, #tpu.memory_space<vmem>>, vector<4x256xf32>,
    %cst_26 = arith.constant 0.000000e+00 : f32
    %35 = vector.broadcast %cst_26 : f32 to vector<4x256xf32>
    %c108 = arith.constant 108 : index
    %c0_27 = arith.constant 0 : index
    %36 = vector.load %arg20[%c108, %c0_27] : memref<144x256xf32, #tpu.memory_space<vmem>>, vector<4x256xf32>
    tpu.vector_store %arg20[%c108, %c0_27], %35 {strides = array<i32>} : memref<144x256xf32, #tpu.memory_space<vmem>>, vector<4x256xf32>,
    %cst_28 = arith.constant 0.000000e+00 : f32
    %37 = vector.broadcast %cst_28 : f32 to vector<4x256xf32>
    %c116 = arith.constant 116 : index
    %c0_29 = arith.constant 0 : index
    %38 = vector.load %arg20[%c116, %c0_29] : memref<144x256xf32, #tpu.memory_space<vmem>>, vector<4x256xf32>
    tpu.vector_store %arg20[%c116, %c0_29], %37 {strides = array<i32>} : memref<144x256xf32, #tpu.memory_space<vmem>>, vector<4x256xf32>,
    %cst_30 = arith.constant 0.000000e+00 : f32
    %39 = vector.broadcast %cst_30 : f32 to vector<4x256xf32>
    %c124 = arith.constant 124 : index
    %c0_31 = arith.constant 0 : index
    %40 = vector.load %arg20[%c124, %c0_31] : memref<144x256xf32, #tpu.memory_space<vmem>>, vector<4x256xf32>
    tpu.vector_store %arg20[%c124, %c0_31], %39 {strides = array<i32>} : memref<144x256xf32, #tpu.memory_space<vmem>>, vector<4x256xf32>,
    %cst_32 = arith.constant 0.000000e+00 : f32
    %41 = vector.broadcast %cst_32 : f32 to vector<4x256xf32>
    %c132 = arith.constant 132 : index
    %c0_33 = arith.constant 0 : index
    %42 = vector.load %arg20[%c132, %c0_33] : memref<144x256xf32, #tpu.memory_space<vmem>>, vector<4x256xf32>
    tpu.vector_store %arg20[%c132, %c0_33], %41 {strides = array<i32>} : memref<144x256xf32, #tpu.memory_space<vmem>>, vector<4x256xf32>,
    %cst_34 = arith.constant 0.000000e+00 : f32
    %43 = vector.broadcast %cst_34 : f32 to vector<4x256xf32>
    %c140 = arith.constant 140 : index
    %c0_35 = arith.constant 0 : index
    %44 = vector.load %arg20[%c140, %c0_35] : memref<144x256xf32, #tpu.memory_space<vmem>>, vector<4x256xf32>
    tpu.vector_store %arg20[%c140, %c0_35], %43 {strides = array<i32>} : memref<144x256xf32, #tpu.memory_space<vmem>>, vector<4x256xf32>,
    %c0_36 = arith.constant 0 : index
    %c0_37 = arith.constant 0 : index
    %c0_38 = arith.constant 0 : index
    %45 = vector.load %arg1[%c0_36, %c0_37, %c0_38] : memref<1x4x256xf32, #tpu.memory_space<vmem>>, vector<1x4x256xf32>
    %46 = vector.shape_cast %45 : vector<1x4x256xf32> to vector<4x256xf32>
    %c0_39 = arith.constant 0 : index
    %c0_40 = arith.constant 0 : index
    %c0_41 = arith.constant 0 : index
    %47 = vector.load %arg2[%c0_39, %c0_40, %c0_41] : memref<1x4x256xf32, #tpu.memory_space<vmem>>, vector<1x4x256xf32>
    %48 = vector.shape_cast %47 : vector<1x4x256xf32> to vector<4x256xf32>
    %c16_i32 = arith.constant 16 : i32
    %49 = tpu.dynamic_rotate %46 by %c16_i32 dim 1 : vector<4x256xf32>, i32 -> vector<4x256xf32>
    %c1_i32 = arith.constant 1 : i32
    %50 = tpu.dynamic_rotate %49 by %c1_i32 dim 1 : vector<4x256xf32>, i32 -> vector<4x256xf32>
    %51 = vector.broadcast %1 : vector<1x256xf32> to vector<4x256xf32>
    %52 = arith.mulf %50, %51 : vector<4x256xf32>
    %c0_42 = arith.constant 0 : index
    %c0_43 = arith.constant 0 : index
    %53 = vector.load %arg20[%c0_42, %c0_43] : memref<144x256xf32, #tpu.memory_space<vmem>>, vector<4x256xf32>
    tpu.vector_store %arg20[%c0_42, %c0_43], %52 {strides = array<i32>} : memref<144x256xf32, #tpu.memory_space<vmem>>, vector<4x256xf32>,
    %54 = vector.broadcast %2 : vector<1x256xf32> to vector<4x256xf32>
    %55 = arith.mulf %49, %54 : vector<4x256xf32>
    %c8 = arith.constant 8 : index
    %c0_44 = arith.constant 0 : index
    %56 = vector.load %arg20[%c8, %c0_44] : memref<144x256xf32, #tpu.memory_space<vmem>>, vector<4x256xf32>
    tpu.vector_store %arg20[%c8, %c0_44], %55 {strides = array<i32>} : memref<144x256xf32, #tpu.memory_space<vmem>>, vector<4x256xf32>,
    %c255_i32 = arith.constant 255 : i32
    %57 = tpu.dynamic_rotate %49 by %c255_i32 dim 1 : vector<4x256xf32>, i32 -> vector<4x256xf32>
    %58 = vector.broadcast %3 : vector<1x256xf32> to vector<4x256xf32>
    %59 = arith.mulf %57, %58 : vector<4x256xf32>
    %c16 = arith.constant 16 : index
    %c0_45 = arith.constant 0 : index
    %60 = vector.load %arg20[%c16, %c0_45] : memref<144x256xf32, #tpu.memory_space<vmem>>, vector<4x256xf32>
    tpu.vector_store %arg20[%c16, %c0_45], %59 {strides = array<i32>} : memref<144x256xf32, #tpu.memory_space<vmem>>, vector<4x256xf32>,
    %c1_i32_46 = arith.constant 1 : i32
    %61 = tpu.dynamic_rotate %46 by %c1_i32_46 dim 1 : vector<4x256xf32>, i32 -> vector<4x256xf32>
    %62 = vector.broadcast %4 : vector<1x256xf32> to vector<4x256xf32>
    %63 = arith.mulf %61, %62 : vector<4x256xf32>
    %c24 = arith.constant 24 : index
    %c0_47 = arith.constant 0 : index
    %64 = vector.load %arg20[%c24, %c0_47] : memref<144x256xf32, #tpu.memory_space<vmem>>, vector<4x256xf32>
    tpu.vector_store %arg20[%c24, %c0_47], %63 {strides = array<i32>} : memref<144x256xf32, #tpu.memory_space<vmem>>, vector<4x256xf32>,
    %c32 = arith.constant 32 : index
    %c0_48 = arith.constant 0 : index
    %65 = vector.load %arg20[%c32, %c0_48] : memref<144x256xf32, #tpu.memory_space<vmem>>, vector<4x256xf32>
    tpu.vector_store %arg20[%c32, %c0_48], %46 {strides = array<i32>} : memref<144x256xf32, #tpu.memory_space<vmem>>, vector<4x256xf32>,
    %c255_i32_49 = arith.constant 255 : i32
    %66 = tpu.dynamic_rotate %46 by %c255_i32_49 dim 1 : vector<4x256xf32>, i32 -> vector<4x256xf32>
    %67 = vector.broadcast %5 : vector<1x256xf32> to vector<4x256xf32>
    %68 = arith.mulf %66, %67 : vector<4x256xf32>
    %c40 = arith.constant 40 : index
    %c0_50 = arith.constant 0 : index
    %69 = vector.load %arg20[%c40, %c0_50] : memref<144x256xf32, #tpu.memory_space<vmem>>, vector<4x256xf32>
    tpu.vector_store %arg20[%c40, %c0_50], %68 {strides = array<i32>} : memref<144x256xf32, #tpu.memory_space<vmem>>, vector<4x256xf32>,
    %c240_i32 = arith.constant 240 : i32
    %70 = tpu.dynamic_rotate %46 by %c240_i32 dim 1 : vector<4x256xf32>, i32 -> vector<4x256xf32>
    %c1_i32_51 = arith.constant 1 : i32
    %71 = tpu.dynamic_rotate %70 by %c1_i32_51 dim 1 : vector<4x256xf32>, i32 -> vector<4x256xf32>
    %72 = vector.broadcast %6 : vector<1x256xf32> to vector<4x256xf32>
    %73 = arith.mulf %71, %72 : vector<4x256xf32>
    %c48 = arith.constant 48 : index
    %c0_52 = arith.constant 0 : index
    %74 = vector.load %arg20[%c48, %c0_52] : memref<144x256xf32, #tpu.memory_space<vmem>>, vector<4x256xf32>
    tpu.vector_store %arg20[%c48, %c0_52], %73 {strides = array<i32>} : memref<144x256xf32, #tpu.memory_space<vmem>>, vector<4x256xf32>,
    %75 = vector.broadcast %7 : vector<1x256xf32> to vector<4x256xf32>
    %76 = arith.mulf %70, %75 : vector<4x256xf32>
    %c56 = arith.constant 56 : index
    %c0_53 = arith.constant 0 : index
    %77 = vector.load %arg20[%c56, %c0_53] : memref<144x256xf32, #tpu.memory_space<vmem>>, vector<4x256xf32>
    tpu.vector_store %arg20[%c56, %c0_53], %76 {strides = array<i32>} : memref<144x256xf32, #tpu.memory_space<vmem>>, vector<4x256xf32>,
    %c255_i32_54 = arith.constant 255 : i32
    %78 = tpu.dynamic_rotate %70 by %c255_i32_54 dim 1 : vector<4x256xf32>, i32 -> vector<4x256xf32>
    %79 = vector.broadcast %8 : vector<1x256xf32> to vector<4x256xf32>
    %80 = arith.mulf %78, %79 : vector<4x256xf32>
    %c64 = arith.constant 64 : index
    %c0_55 = arith.constant 0 : index
    %81 = vector.load %arg20[%c64, %c0_55] : memref<144x256xf32, #tpu.memory_space<vmem>>, vector<4x256xf32>
    tpu.vector_store %arg20[%c64, %c0_55], %80 {strides = array<i32>} : memref<144x256xf32, #tpu.memory_space<vmem>>, vector<4x256xf32>,
    %c0_56 = arith.constant 0 : index
    %c0_57 = arith.constant 0 : index
    %82 = vector.load %arg4[%c0_56, %c0_57] : memref<4x72xbf16, #tpu.memory_space<vmem>>, vector<4x72xbf16>
    %c0_58 = arith.constant 0 : index
    %c0_59 = arith.constant 0 : index
    %83 = vector.load %arg20[%c0_58, %c0_59] : memref<144x256xf32, #tpu.memory_space<vmem>>, vector<72x256xf32>
    %84 = arith.truncf %83 : vector<72x256xf32> to vector<72x256xbf16>
    %cst_60 = arith.constant dense<0.000000e+00> : vector<4x256xf32>
    %85 = tpu.matmul %82, %84, %cst_60 {dimension_numbers = #tpu.dot_dimension_numbers<[1], [0], [0], [1], [0, 0, 1, 1], [], []>} : vector<4x72xbf16>, vector<72x256xbf16>, vector<4x256xf32> -> vector<4x256xf32>
    %c0_61 = arith.constant 0 : index
    %c0_62 = arith.constant 0 : index
    %86 = vector.load %arg5[%c0_61, %c0_62] : memref<4x1xf32, #tpu.memory_space<vmem>>, vector<4x1xf32>
    %87 = vector.broadcast %86 : vector<4x1xf32> to vector<4x256xf32>
    %88 = arith.addf %85, %87 : vector<4x256xf32>
    %cst_63 = arith.constant 0.000000e+00 : f32
    %89 = vector.broadcast %cst_63 : f32 to vector<4x256xf32>
    %90 = arith.maximumf %88, %89 : vector<4x256xf32>
    %c16_i32_64 = arith.constant 16 : i32
    %91 = tpu.dynamic_rotate %90 by %c16_i32_64 dim 1 : vector<4x256xf32>, i32 -> vector<4x256xf32>
    %c1_i32_65 = arith.constant 1 : i32
    %92 = tpu.dynamic_rotate %91 by %c1_i32_65 dim 1 : vector<4x256xf32>, i32 -> vector<4x256xf32>
    %93 = vector.broadcast %1 : vector<1x256xf32> to vector<4x256xf32>
    %94 = arith.mulf %92, %93 : vector<4x256xf32>
    %c0_66 = arith.constant 0 : index
    %c0_67 = arith.constant 0 : index
    %95 = vector.load %arg20[%c0_66, %c0_67] : memref<144x256xf32, #tpu.memory_space<vmem>>, vector<4x256xf32>
    tpu.vector_store %arg20[%c0_66, %c0_67], %94 {strides = array<i32>} : memref<144x256xf32, #tpu.memory_space<vmem>>, vector<4x256xf32>,
    %96 = vector.broadcast %2 : vector<1x256xf32> to vector<4x256xf32>
    %97 = arith.mulf %91, %96 : vector<4x256xf32>
    %c8_68 = arith.constant 8 : index
    %c0_69 = arith.constant 0 : index
    %98 = vector.load %arg20[%c8_68, %c0_69] : memref<144x256xf32, #tpu.memory_space<vmem>>, vector<4x256xf32>
    tpu.vector_store %arg20[%c8_68, %c0_69], %97 {strides = array<i32>} : memref<144x256xf32, #tpu.memory_space<vmem>>, vector<4x256xf32>,
    %c255_i32_70 = arith.constant 255 : i32
    %99 = tpu.dynamic_rotate %91 by %c255_i32_70 dim 1 : vector<4x256xf32>, i32 -> vector<4x256xf32>
    %100 = vector.broadcast %3 : vector<1x256xf32> to vector<4x256xf32>
    %101 = arith.mulf %99, %100 : vector<4x256xf32>
    %c16_71 = arith.constant 16 : index
    %c0_72 = arith.constant 0 : index
    %102 = vector.load %arg20[%c16_71, %c0_72] : memref<144x256xf32, #tpu.memory_space<vmem>>, vector<4x256xf32>
    tpu.vector_store %arg20[%c16_71, %c0_72], %101 {strides = array<i32>} : memref<144x256xf32, #tpu.memory_space<vmem>>, vector<4x256xf32>,
    %c1_i32_73 = arith.constant 1 : i32
    %103 = tpu.dynamic_rotate %90 by %c1_i32_73 dim 1 : vector<4x256xf32>, i32 -> vector<4x256xf32>
    %104 = vector.broadcast %4 : vector<1x256xf32> to vector<4x256xf32>
    %105 = arith.mulf %103, %104 : vector<4x256xf32>
    %c24_74 = arith.constant 24 : index
    %c0_75 = arith.constant 0 : index
    %106 = vector.load %arg20[%c24_74, %c0_75] : memref<144x256xf32, #tpu.memory_space<vmem>>, vector<4x256xf32>
    tpu.vector_store %arg20[%c24_74, %c0_75], %105 {strides = array<i32>} : memref<144x256xf32, #tpu.memory_space<vmem>>, vector<4x256xf32>,
    %c32_76 = arith.constant 32 : index
    %c0_77 = arith.constant 0 : index
    %107 = vector.load %arg20[%c32_76, %c0_77] : memref<144x256xf32, #tpu.memory_space<vmem>>, vector<4x256xf32>
    tpu.vector_store %arg20[%c32_76, %c0_77], %90 {strides = array<i32>} : memref<144x256xf32, #tpu.memory_space<vmem>>, vector<4x256xf32>,
    %c255_i32_78 = arith.constant 255 : i32
    %108 = tpu.dynamic_rotate %90 by %c255_i32_78 dim 1 : vector<4x256xf32>, i32 -> vector<4x256xf32>
    %109 = vector.broadcast %5 : vector<1x256xf32> to vector<4x256xf32>
    %110 = arith.mulf %108, %109 : vector<4x256xf32>
    %c40_79 = arith.constant 40 : index
    %c0_80 = arith.constant 0 : index
    %111 = vector.load %arg20[%c40_79, %c0_80] : memref<144x256xf32, #tpu.memory_space<vmem>>, vector<4x256xf32>
    tpu.vector_store %arg20[%c40_79, %c0_80], %110 {strides = array<i32>} : memref<144x256xf32, #tpu.memory_space<vmem>>, vector<4x256xf32>,
    %c240_i32_81 = arith.constant 240 : i32
    %112 = tpu.dynamic_rotate %90 by %c240_i32_81 dim 1 : vector<4x256xf32>, i32 -> vector<4x256xf32>
    %c1_i32_82 = arith.constant 1 : i32
    %113 = tpu.dynamic_rotate %112 by %c1_i32_82 dim 1 : vector<4x256xf32>, i32 -> vector<4x256xf32>
    %114 = vector.broadcast %6 : vector<1x256xf32> to vector<4x256xf32>
    %115 = arith.mulf %113, %114 : vector<4x256xf32>
    %c48_83 = arith.constant 48 : index
    %c0_84 = arith.constant 0 : index
    %116 = vector.load %arg20[%c48_83, %c0_84] : memref<144x256xf32, #tpu.memory_space<vmem>>, vector<4x256xf32>
    tpu.vector_store %arg20[%c48_83, %c0_84], %115 {strides = array<i32>} : memref<144x256xf32, #tpu.memory_space<vmem>>, vector<4x256xf32>,
    %117 = vector.broadcast %7 : vector<1x256xf32> to vector<4x256xf32>
    %118 = arith.mulf %112, %117 : vector<4x256xf32>
    %c56_85 = arith.constant 56 : index
    %c0_86 = arith.constant 0 : index
    %119 = vector.load %arg20[%c56_85, %c0_86] : memref<144x256xf32, #tpu.memory_space<vmem>>, vector<4x256xf32>
    tpu.vector_store %arg20[%c56_85, %c0_86], %118 {strides = array<i32>} : memref<144x256xf32, #tpu.memory_space<vmem>>, vector<4x256xf32>,
    %c255_i32_87 = arith.constant 255 : i32
    %120 = tpu.dynamic_rotate %112 by %c255_i32_87 dim 1 : vector<4x256xf32>, i32 -> vector<4x256xf32>
    %121 = vector.broadcast %8 : vector<1x256xf32> to vector<4x256xf32>
    %122 = arith.mulf %120, %121 : vector<4x256xf32>
    %c64_88 = arith.constant 64 : index
    %c0_89 = arith.constant 0 : index
    %123 = vector.load %arg20[%c64_88, %c0_89] : memref<144x256xf32, #tpu.memory_space<vmem>>, vector<4x256xf32>
    tpu.vector_store %arg20[%c64_88, %c0_89], %122 {strides = array<i32>} : memref<144x256xf32, #tpu.memory_space<vmem>>, vector<4x256xf32>,
    %c16_i32_90 = arith.constant 16 : i32
    %124 = tpu.dynamic_rotate %48 by %c16_i32_90 dim 1 : vector<4x256xf32>, i32 -> vector<4x256xf32>
    %c1_i32_91 = arith.constant 1 : i32
    %125 = tpu.dynamic_rotate %124 by %c1_i32_91 dim 1 : vector<4x256xf32>, i32 -> vector<4x256xf32>
    %126 = vector.broadcast %1 : vector<1x256xf32> to vector<4x256xf32>
    %127 = arith.mulf %125, %126 : vector<4x256xf32>
    %c72 = arith.constant 72 : index
    %c0_92 = arith.constant 0 : index
    %128 = vector.load %arg20[%c72, %c0_92] : memref<144x256xf32, #tpu.memory_space<vmem>>, vector<4x256xf32>
    tpu.vector_store %arg20[%c72, %c0_92], %127 {strides = array<i32>} : memref<144x256xf32, #tpu.memory_space<vmem>>, vector<4x256xf32>,
    %129 = vector.broadcast %2 : vector<1x256xf32> to vector<4x256xf32>
    %130 = arith.mulf %124, %129 : vector<4x256xf32>
    %c80 = arith.constant 80 : index
    %c0_93 = arith.constant 0 : index
    %131 = vector.load %arg20[%c80, %c0_93] : memref<144x256xf32, #tpu.memory_space<vmem>>, vector<4x256xf32>
    tpu.vector_store %arg20[%c80, %c0_93], %130 {strides = array<i32>} : memref<144x256xf32, #tpu.memory_space<vmem>>, vector<4x256xf32>,
    %c255_i32_94 = arith.constant 255 : i32
    %132 = tpu.dynamic_rotate %124 by %c255_i32_94 dim 1 : vector<4x256xf32>, i32 -> vector<4x256xf32>
    %133 = vector.broadcast %3 : vector<1x256xf32> to vector<4x256xf32>
    %134 = arith.mulf %132, %133 : vector<4x256xf32>
    %c88 = arith.constant 88 : index
    %c0_95 = arith.constant 0 : index
    %135 = vector.load %arg20[%c88, %c0_95] : memref<144x256xf32, #tpu.memory_space<vmem>>, vector<4x256xf32>
    tpu.vector_store %arg20[%c88, %c0_95], %134 {strides = array<i32>} : memref<144x256xf32, #tpu.memory_space<vmem>>, vector<4x256xf32>,
    %c1_i32_96 = arith.constant 1 : i32
    %136 = tpu.dynamic_rotate %48 by %c1_i32_96 dim 1 : vector<4x256xf32>, i32 -> vector<4x256xf32>
    %137 = vector.broadcast %4 : vector<1x256xf32> to vector<4x256xf32>
    %138 = arith.mulf %136, %137 : vector<4x256xf32>
    %c96 = arith.constant 96 : index
    %c0_97 = arith.constant 0 : index
    %139 = vector.load %arg20[%c96, %c0_97] : memref<144x256xf32, #tpu.memory_space<vmem>>, vector<4x256xf32>
    tpu.vector_store %arg20[%c96, %c0_97], %138 {strides = array<i32>} : memref<144x256xf32, #tpu.memory_space<vmem>>, vector<4x256xf32>,
    %c104 = arith.constant 104 : index
    %c0_98 = arith.constant 0 : index
    %140 = vector.load %arg20[%c104, %c0_98] : memref<144x256xf32, #tpu.memory_space<vmem>>, vector<4x256xf32>
    tpu.vector_store %arg20[%c104, %c0_98], %48 {strides = array<i32>} : memref<144x256xf32, #tpu.memory_space<vmem>>, vector<4x256xf32>,
    %c255_i32_99 = arith.constant 255 : i32
    %141 = tpu.dynamic_rotate %48 by %c255_i32_99 dim 1 : vector<4x256xf32>, i32 -> vector<4x256xf32>
    %142 = vector.broadcast %5 : vector<1x256xf32> to vector<4x256xf32>
    %143 = arith.mulf %141, %142 : vector<4x256xf32>
    %c112 = arith.constant 112 : index
    %c0_100 = arith.constant 0 : index
    %144 = vector.load %arg20[%c112, %c0_100] : memref<144x256xf32, #tpu.memory_space<vmem>>, vector<4x256xf32>
    tpu.vector_store %arg20[%c112, %c0_100], %143 {strides = array<i32>} : memref<144x256xf32, #tpu.memory_space<vmem>>, vector<4x256xf32>,
    %c240_i32_101 = arith.constant 240 : i32
    %145 = tpu.dynamic_rotate %48 by %c240_i32_101 dim 1 : vector<4x256xf32>, i32 -> vector<4x256xf32>
    %c1_i32_102 = arith.constant 1 : i32
    %146 = tpu.dynamic_rotate %145 by %c1_i32_102 dim 1 : vector<4x256xf32>, i32 -> vector<4x256xf32>
    %147 = vector.broadcast %6 : vector<1x256xf32> to vector<4x256xf32>
    %148 = arith.mulf %146, %147 : vector<4x256xf32>
    %c120 = arith.constant 120 : index
    %c0_103 = arith.constant 0 : index
    %149 = vector.load %arg20[%c120, %c0_103] : memref<144x256xf32, #tpu.memory_space<vmem>>, vector<4x256xf32>
    tpu.vector_store %arg20[%c120, %c0_103], %148 {strides = array<i32>} : memref<144x256xf32, #tpu.memory_space<vmem>>, vector<4x256xf32>,
    %150 = vector.broadcast %7 : vector<1x256xf32> to vector<4x256xf32>
    %151 = arith.mulf %145, %150 : vector<4x256xf32>
    %c128 = arith.constant 128 : index
    %c0_104 = arith.constant 0 : index
    %152 = vector.load %arg20[%c128, %c0_104] : memref<144x256xf32, #tpu.memory_space<vmem>>, vector<4x256xf32>
    tpu.vector_store %arg20[%c128, %c0_104], %151 {strides = array<i32>} : memref<144x256xf32, #tpu.memory_space<vmem>>, vector<4x256xf32>,
    %c255_i32_105 = arith.constant 255 : i32
    %153 = tpu.dynamic_rotate %145 by %c255_i32_105 dim 1 : vector<4x256xf32>, i32 -> vector<4x256xf32>
    %154 = vector.broadcast %8 : vector<1x256xf32> to vector<4x256xf32>
    %155 = arith.mulf %153, %154 : vector<4x256xf32>
    %c136 = arith.constant 136 : index
    %c0_106 = arith.constant 0 : index
    %156 = vector.load %arg20[%c136, %c0_106] : memref<144x256xf32, #tpu.memory_space<vmem>>, vector<4x256xf32>
    tpu.vector_store %arg20[%c136, %c0_106], %155 {strides = array<i32>} : memref<144x256xf32, #tpu.memory_space<vmem>>, vector<4x256xf32>,
    %c0_107 = arith.constant 0 : index
    %c0_108 = arith.constant 0 : index
    %157 = vector.load %arg6[%c0_107, %c0_108] : memref<4x144xbf16, #tpu.memory_space<vmem>>, vector<4x144xbf16>
    %c0_109 = arith.constant 0 : index
    %c0_110 = arith.constant 0 : index
    %158 = vector.load %arg20[%c0_109, %c0_110] : memref<144x256xf32, #tpu.memory_space<vmem>>, vector<144x256xf32>
    %159 = arith.truncf %158 : vector<144x256xf32> to vector<144x256xbf16>
    %cst_111 = arith.constant dense<0.000000e+00> : vector<4x256xf32>
    %160 = tpu.matmul %157, %159, %cst_111 {dimension_numbers = #tpu.dot_dimension_numbers<[1], [0], [0], [1], [0, 0, 1, 1], [], []>} : vector<4x144xbf16>, vector<144x256xbf16>, vector<4x256xf32> -> vector<4x256xf32>
    %c0_112 = arith.constant 0 : index
    %c0_113 = arith.constant 0 : index
    %161 = vector.load %arg7[%c0_112, %c0_113] : memref<4x1xf32, #tpu.memory_space<vmem>>, vector<4x1xf32>
    %162 = vector.broadcast %161 : vector<4x1xf32> to vector<4x256xf32>
    %163 = arith.addf %160, %162 : vector<4x256xf32>
    %cst_114 = arith.constant 0.000000e+00 : f32
    %164 = vector.broadcast %cst_114 : f32 to vector<4x256xf32>
    %165 = arith.maximumf %163, %164 : vector<4x256xf32>
    %c16_i32_115 = arith.constant 16 : i32
    %166 = tpu.dynamic_rotate %165 by %c16_i32_115 dim 1 : vector<4x256xf32>, i32 -> vector<4x256xf32>
    %c1_i32_116 = arith.constant 1 : i32
    %167 = tpu.dynamic_rotate %166 by %c1_i32_116 dim 1 : vector<4x256xf32>, i32 -> vector<4x256xf32>
    %168 = vector.broadcast %1 : vector<1x256xf32> to vector<4x256xf32>
    %169 = arith.mulf %167, %168 : vector<4x256xf32>
    %c0_117 = arith.constant 0 : index
    %c0_118 = arith.constant 0 : index
    %170 = vector.load %arg20[%c0_117, %c0_118] : memref<144x256xf32, #tpu.memory_space<vmem>>, vector<4x256xf32>
    tpu.vector_store %arg20[%c0_117, %c0_118], %169 {strides = array<i32>} : memref<144x256xf32, #tpu.memory_space<vmem>>, vector<4x256xf32>,
    %171 = vector.broadcast %2 : vector<1x256xf32> to vector<4x256xf32>
    %172 = arith.mulf %166, %171 : vector<4x256xf32>
    %c8_119 = arith.constant 8 : index
    %c0_120 = arith.constant 0 : index
    %173 = vector.load %arg20[%c8_119, %c0_120] : memref<144x256xf32, #tpu.memory_space<vmem>>, vector<4x256xf32>
    tpu.vector_store %arg20[%c8_119, %c0_120], %172 {strides = array<i32>} : memref<144x256xf32, #tpu.memory_space<vmem>>, vector<4x256xf32>,
    %c255_i32_121 = arith.constant 255 : i32
    %174 = tpu.dynamic_rotate %166 by %c255_i32_121 dim 1 : vector<4x256xf32>, i32 -> vector<4x256xf32>
    %175 = vector.broadcast %3 : vector<1x256xf32> to vector<4x256xf32>
    %176 = arith.mulf %174, %175 : vector<4x256xf32>
    %c16_122 = arith.constant 16 : index
    %c0_123 = arith.constant 0 : index
    %177 = vector.load %arg20[%c16_122, %c0_123] : memref<144x256xf32, #tpu.memory_space<vmem>>, vector<4x256xf32>
    tpu.vector_store %arg20[%c16_122, %c0_123], %176 {strides = array<i32>} : memref<144x256xf32, #tpu.memory_space<vmem>>, vector<4x256xf32>,
    %c1_i32_124 = arith.constant 1 : i32
    %178 = tpu.dynamic_rotate %165 by %c1_i32_124 dim 1 : vector<4x256xf32>, i32 -> vector<4x256xf32>
    %179 = vector.broadcast %4 : vector<1x256xf32> to vector<4x256xf32>
    %180 = arith.mulf %178, %179 : vector<4x256xf32>
    %c24_125 = arith.constant 24 : index
    %c0_126 = arith.constant 0 : index
    %181 = vector.load %arg20[%c24_125, %c0_126] : memref<144x256xf32, #tpu.memory_space<vmem>>, vector<4x256xf32>
    tpu.vector_store %arg20[%c24_125, %c0_126], %180 {strides = array<i32>} : memref<144x256xf32, #tpu.memory_space<vmem>>, vector<4x256xf32>,
    %c32_127 = arith.constant 32 : index
    %c0_128 = arith.constant 0 : index
    %182 = vector.load %arg20[%c32_127, %c0_128] : memref<144x256xf32, #tpu.memory_space<vmem>>, vector<4x256xf32>
    tpu.vector_store %arg20[%c32_127, %c0_128], %165 {strides = array<i32>} : memref<144x256xf32, #tpu.memory_space<vmem>>, vector<4x256xf32>,
    %c255_i32_129 = arith.constant 255 : i32
    %183 = tpu.dynamic_rotate %165 by %c255_i32_129 dim 1 : vector<4x256xf32>, i32 -> vector<4x256xf32>
    %184 = vector.broadcast %5 : vector<1x256xf32> to vector<4x256xf32>
    %185 = arith.mulf %183, %184 : vector<4x256xf32>
    %c40_130 = arith.constant 40 : index
    %c0_131 = arith.constant 0 : index
    %186 = vector.load %arg20[%c40_130, %c0_131] : memref<144x256xf32, #tpu.memory_space<vmem>>, vector<4x256xf32>
    tpu.vector_store %arg20[%c40_130, %c0_131], %185 {strides = array<i32>} : memref<144x256xf32, #tpu.memory_space<vmem>>, vector<4x256xf32>,
    %c240_i32_132 = arith.constant 240 : i32
    %187 = tpu.dynamic_rotate %165 by %c240_i32_132 dim 1 : vector<4x256xf32>, i32 -> vector<4x256xf32>
    %c1_i32_133 = arith.constant 1 : i32
    %188 = tpu.dynamic_rotate %187 by %c1_i32_133 dim 1 : vector<4x256xf32>, i32 -> vector<4x256xf32>
    %189 = vector.broadcast %6 : vector<1x256xf32> to vector<4x256xf32>
    %190 = arith.mulf %188, %189 : vector<4x256xf32>
    %c48_134 = arith.constant 48 : index
    %c0_135 = arith.constant 0 : index
    %191 = vector.load %arg20[%c48_134, %c0_135] : memref<144x256xf32, #tpu.memory_space<vmem>>, vector<4x256xf32>
    tpu.vector_store %arg20[%c48_134, %c0_135], %190 {strides = array<i32>} : memref<144x256xf32, #tpu.memory_space<vmem>>, vector<4x256xf32>,
    %192 = vector.broadcast %7 : vector<1x256xf32> to vector<4x256xf32>
    %193 = arith.mulf %187, %192 : vector<4x256xf32>
    %c56_136 = arith.constant 56 : index
    %c0_137 = arith.constant 0 : index
    %194 = vector.load %arg20[%c56_136, %c0_137] : memref<144x256xf32, #tpu.memory_space<vmem>>, vector<4x256xf32>
    tpu.vector_store %arg20[%c56_136, %c0_137], %193 {strides = array<i32>} : memref<144x256xf32, #tpu.memory_space<vmem>>, vector<4x256xf32>,
    %c255_i32_138 = arith.constant 255 : i32
    %195 = tpu.dynamic_rotate %187 by %c255_i32_138 dim 1 : vector<4x256xf32>, i32 -> vector<4x256xf32>
    %196 = vector.broadcast %8 : vector<1x256xf32> to vector<4x256xf32>
    %197 = arith.mulf %195, %196 : vector<4x256xf32>
    %c64_139 = arith.constant 64 : index
    %c0_140 = arith.constant 0 : index
    %198 = vector.load %arg20[%c64_139, %c0_140] : memref<144x256xf32, #tpu.memory_space<vmem>>, vector<4x256xf32>
    tpu.vector_store %arg20[%c64_139, %c0_140], %197 {strides = array<i32>} : memref<144x256xf32, #tpu.memory_space<vmem>>, vector<4x256xf32>,
    %c0_141 = arith.constant 0 : index
    %c0_142 = arith.constant 0 : index
    %199 = vector.load %arg8[%c0_141, %c0_142] : memref<4x72xbf16, #tpu.memory_space<vmem>>, vector<4x72xbf16>
    %c0_143 = arith.constant 0 : index
    %c0_144 = arith.constant 0 : index
    %200 = vector.load %arg20[%c0_143, %c0_144] : memref<144x256xf32, #tpu.memory_space<vmem>>, vector<72x256xf32>
    %201 = arith.truncf %200 : vector<72x256xf32> to vector<72x256xbf16>
    %cst_145 = arith.constant dense<0.000000e+00> : vector<4x256xf32>
    %202 = tpu.matmul %199, %201, %cst_145 {dimension_numbers = #tpu.dot_dimension_numbers<[1], [0], [0], [1], [0, 0, 1, 1], [], []>} : vector<4x72xbf16>, vector<72x256xbf16>, vector<4x256xf32> -> vector<4x256xf32>
    %c0_146 = arith.constant 0 : index
    %c0_147 = arith.constant 0 : index
    %203 = vector.load %arg9[%c0_146, %c0_147] : memref<4x1xf32, #tpu.memory_space<vmem>>, vector<4x1xf32>
    %204 = vector.broadcast %203 : vector<4x1xf32> to vector<4x256xf32>
    %205 = arith.addf %202, %204 : vector<4x256xf32>
    %cst_148 = arith.constant 0.000000e+00 : f32
    %206 = vector.broadcast %cst_148 : f32 to vector<4x256xf32>
    %207 = arith.maximumf %205, %206 : vector<4x256xf32>
    %c16_i32_149 = arith.constant 16 : i32
    %208 = tpu.dynamic_rotate %207 by %c16_i32_149 dim 1 : vector<4x256xf32>, i32 -> vector<4x256xf32>
    %c1_i32_150 = arith.constant 1 : i32
    %209 = tpu.dynamic_rotate %208 by %c1_i32_150 dim 1 : vector<4x256xf32>, i32 -> vector<4x256xf32>
    %210 = vector.broadcast %1 : vector<1x256xf32> to vector<4x256xf32>
    %211 = arith.mulf %209, %210 : vector<4x256xf32>
    %c0_151 = arith.constant 0 : index
    %c0_152 = arith.constant 0 : index
    %212 = vector.load %arg20[%c0_151, %c0_152] : memref<144x256xf32, #tpu.memory_space<vmem>>, vector<4x256xf32>
    tpu.vector_store %arg20[%c0_151, %c0_152], %211 {strides = array<i32>} : memref<144x256xf32, #tpu.memory_space<vmem>>, vector<4x256xf32>,
    %213 = vector.broadcast %2 : vector<1x256xf32> to vector<4x256xf32>
    %214 = arith.mulf %208, %213 : vector<4x256xf32>
    %c8_153 = arith.constant 8 : index
    %c0_154 = arith.constant 0 : index
    %215 = vector.load %arg20[%c8_153, %c0_154] : memref<144x256xf32, #tpu.memory_space<vmem>>, vector<4x256xf32>
    tpu.vector_store %arg20[%c8_153, %c0_154], %214 {strides = array<i32>} : memref<144x256xf32, #tpu.memory_space<vmem>>, vector<4x256xf32>,
    %c255_i32_155 = arith.constant 255 : i32
    %216 = tpu.dynamic_rotate %208 by %c255_i32_155 dim 1 : vector<4x256xf32>, i32 -> vector<4x256xf32>
    %217 = vector.broadcast %3 : vector<1x256xf32> to vector<4x256xf32>
    %218 = arith.mulf %216, %217 : vector<4x256xf32>
    %c16_156 = arith.constant 16 : index
    %c0_157 = arith.constant 0 : index
    %219 = vector.load %arg20[%c16_156, %c0_157] : memref<144x256xf32, #tpu.memory_space<vmem>>, vector<4x256xf32>
    tpu.vector_store %arg20[%c16_156, %c0_157], %218 {strides = array<i32>} : memref<144x256xf32, #tpu.memory_space<vmem>>, vector<4x256xf32>,
    %c1_i32_158 = arith.constant 1 : i32
    %220 = tpu.dynamic_rotate %207 by %c1_i32_158 dim 1 : vector<4x256xf32>, i32 -> vector<4x256xf32>
    %221 = vector.broadcast %4 : vector<1x256xf32> to vector<4x256xf32>
    %222 = arith.mulf %220, %221 : vector<4x256xf32>
    %c24_159 = arith.constant 24 : index
    %c0_160 = arith.constant 0 : index
    %223 = vector.load %arg20[%c24_159, %c0_160] : memref<144x256xf32, #tpu.memory_space<vmem>>, vector<4x256xf32>
    tpu.vector_store %arg20[%c24_159, %c0_160], %222 {strides = array<i32>} : memref<144x256xf32, #tpu.memory_space<vmem>>, vector<4x256xf32>,
    %c32_161 = arith.constant 32 : index
    %c0_162 = arith.constant 0 : index
    %224 = vector.load %arg20[%c32_161, %c0_162] : memref<144x256xf32, #tpu.memory_space<vmem>>, vector<4x256xf32>
    tpu.vector_store %arg20[%c32_161, %c0_162], %207 {strides = array<i32>} : memref<144x256xf32, #tpu.memory_space<vmem>>, vector<4x256xf32>,
    %c255_i32_163 = arith.constant 255 : i32
    %225 = tpu.dynamic_rotate %207 by %c255_i32_163 dim 1 : vector<4x256xf32>, i32 -> vector<4x256xf32>
    %226 = vector.broadcast %5 : vector<1x256xf32> to vector<4x256xf32>
    %227 = arith.mulf %225, %226 : vector<4x256xf32>
    %c40_164 = arith.constant 40 : index
    %c0_165 = arith.constant 0 : index
    %228 = vector.load %arg20[%c40_164, %c0_165] : memref<144x256xf32, #tpu.memory_space<vmem>>, vector<4x256xf32>
    tpu.vector_store %arg20[%c40_164, %c0_165], %227 {strides = array<i32>} : memref<144x256xf32, #tpu.memory_space<vmem>>, vector<4x256xf32>,
    %c240_i32_166 = arith.constant 240 : i32
    %229 = tpu.dynamic_rotate %207 by %c240_i32_166 dim 1 : vector<4x256xf32>, i32 -> vector<4x256xf32>
    %c1_i32_167 = arith.constant 1 : i32
    %230 = tpu.dynamic_rotate %229 by %c1_i32_167 dim 1 : vector<4x256xf32>, i32 -> vector<4x256xf32>
    %231 = vector.broadcast %6 : vector<1x256xf32> to vector<4x256xf32>
    %232 = arith.mulf %230, %231 : vector<4x256xf32>
    %c48_168 = arith.constant 48 : index
    %c0_169 = arith.constant 0 : index
    %233 = vector.load %arg20[%c48_168, %c0_169] : memref<144x256xf32, #tpu.memory_space<vmem>>, vector<4x256xf32>
    tpu.vector_store %arg20[%c48_168, %c0_169], %232 {strides = array<i32>} : memref<144x256xf32, #tpu.memory_space<vmem>>, vector<4x256xf32>,
    %234 = vector.broadcast %7 : vector<1x256xf32> to vector<4x256xf32>
    %235 = arith.mulf %229, %234 : vector<4x256xf32>
    %c56_170 = arith.constant 56 : index
    %c0_171 = arith.constant 0 : index
    %236 = vector.load %arg20[%c56_170, %c0_171] : memref<144x256xf32, #tpu.memory_space<vmem>>, vector<4x256xf32>
    tpu.vector_store %arg20[%c56_170, %c0_171], %235 {strides = array<i32>} : memref<144x256xf32, #tpu.memory_space<vmem>>, vector<4x256xf32>,
    %c255_i32_172 = arith.constant 255 : i32
    %237 = tpu.dynamic_rotate %229 by %c255_i32_172 dim 1 : vector<4x256xf32>, i32 -> vector<4x256xf32>
    %238 = vector.broadcast %8 : vector<1x256xf32> to vector<4x256xf32>
    %239 = arith.mulf %237, %238 : vector<4x256xf32>
    %c64_173 = arith.constant 64 : index
    %c0_174 = arith.constant 0 : index
    %240 = vector.load %arg20[%c64_173, %c0_174] : memref<144x256xf32, #tpu.memory_space<vmem>>, vector<4x256xf32>
    tpu.vector_store %arg20[%c64_173, %c0_174], %239 {strides = array<i32>} : memref<144x256xf32, #tpu.memory_space<vmem>>, vector<4x256xf32>,
    %c0_175 = arith.constant 0 : index
    %c0_176 = arith.constant 0 : index
    %241 = vector.load %arg10[%c0_175, %c0_176] : memref<4x72xbf16, #tpu.memory_space<vmem>>, vector<4x72xbf16>
    %c0_177 = arith.constant 0 : index
    %c0_178 = arith.constant 0 : index
    %242 = vector.load %arg20[%c0_177, %c0_178] : memref<144x256xf32, #tpu.memory_space<vmem>>, vector<72x256xf32>
    %243 = arith.truncf %242 : vector<72x256xf32> to vector<72x256xbf16>
    %cst_179 = arith.constant dense<0.000000e+00> : vector<4x256xf32>
    %244 = tpu.matmul %241, %243, %cst_179 {dimension_numbers = #tpu.dot_dimension_numbers<[1], [0], [0], [1], [0, 0, 1, 1], [], []>} : vector<4x72xbf16>, vector<72x256xbf16>, vector<4x256xf32> -> vector<4x256xf32>
    %c0_180 = arith.constant 0 : index
    %c0_181 = arith.constant 0 : index
    %245 = vector.load %arg11[%c0_180, %c0_181] : memref<4x1xf32, #tpu.memory_space<vmem>>, vector<4x1xf32>
    %246 = vector.broadcast %245 : vector<4x1xf32> to vector<4x256xf32>
    %247 = arith.addf %244, %246 : vector<4x256xf32>
    %248 = arith.addf %165, %247 : vector<4x256xf32>
    %c16_i32_182 = arith.constant 16 : i32
    %249 = tpu.dynamic_rotate %248 by %c16_i32_182 dim 1 : vector<4x256xf32>, i32 -> vector<4x256xf32>
    %c1_i32_183 = arith.constant 1 : i32
    %250 = tpu.dynamic_rotate %249 by %c1_i32_183 dim 1 : vector<4x256xf32>, i32 -> vector<4x256xf32>
    %251 = vector.broadcast %1 : vector<1x256xf32> to vector<4x256xf32>
    %252 = arith.mulf %250, %251 : vector<4x256xf32>
    %c0_184 = arith.constant 0 : index
    %c0_185 = arith.constant 0 : index
    %253 = vector.load %arg20[%c0_184, %c0_185] : memref<144x256xf32, #tpu.memory_space<vmem>>, vector<4x256xf32>
    tpu.vector_store %arg20[%c0_184, %c0_185], %252 {strides = array<i32>} : memref<144x256xf32, #tpu.memory_space<vmem>>, vector<4x256xf32>,
    %254 = vector.broadcast %2 : vector<1x256xf32> to vector<4x256xf32>
    %255 = arith.mulf %249, %254 : vector<4x256xf32>
    %c8_186 = arith.constant 8 : index
    %c0_187 = arith.constant 0 : index
    %256 = vector.load %arg20[%c8_186, %c0_187] : memref<144x256xf32, #tpu.memory_space<vmem>>, vector<4x256xf32>
    tpu.vector_store %arg20[%c8_186, %c0_187], %255 {strides = array<i32>} : memref<144x256xf32, #tpu.memory_space<vmem>>, vector<4x256xf32>,
    %c255_i32_188 = arith.constant 255 : i32
    %257 = tpu.dynamic_rotate %249 by %c255_i32_188 dim 1 : vector<4x256xf32>, i32 -> vector<4x256xf32>
    %258 = vector.broadcast %3 : vector<1x256xf32> to vector<4x256xf32>
    %259 = arith.mulf %257, %258 : vector<4x256xf32>
    %c16_189 = arith.constant 16 : index
    %c0_190 = arith.constant 0 : index
    %260 = vector.load %arg20[%c16_189, %c0_190] : memref<144x256xf32, #tpu.memory_space<vmem>>, vector<4x256xf32>
    tpu.vector_store %arg20[%c16_189, %c0_190], %259 {strides = array<i32>} : memref<144x256xf32, #tpu.memory_space<vmem>>, vector<4x256xf32>,
    %c1_i32_191 = arith.constant 1 : i32
    %261 = tpu.dynamic_rotate %248 by %c1_i32_191 dim 1 : vector<4x256xf32>, i32 -> vector<4x256xf32>
    %262 = vector.broadcast %4 : vector<1x256xf32> to vector<4x256xf32>
    %263 = arith.mulf %261, %262 : vector<4x256xf32>
    %c24_192 = arith.constant 24 : index
    %c0_193 = arith.constant 0 : index
    %264 = vector.load %arg20[%c24_192, %c0_193] : memref<144x256xf32, #tpu.memory_space<vmem>>, vector<4x256xf32>
    tpu.vector_store %arg20[%c24_192, %c0_193], %263 {strides = array<i32>} : memref<144x256xf32, #tpu.memory_space<vmem>>, vector<4x256xf32>,
    %c32_194 = arith.constant 32 : index
    %c0_195 = arith.constant 0 : index
    %265 = vector.load %arg20[%c32_194, %c0_195] : memref<144x256xf32, #tpu.memory_space<vmem>>, vector<4x256xf32>
    tpu.vector_store %arg20[%c32_194, %c0_195], %248 {strides = array<i32>} : memref<144x256xf32, #tpu.memory_space<vmem>>, vector<4x256xf32>,
    %c255_i32_196 = arith.constant 255 : i32
    %266 = tpu.dynamic_rotate %248 by %c255_i32_196 dim 1 : vector<4x256xf32>, i32 -> vector<4x256xf32>
    %267 = vector.broadcast %5 : vector<1x256xf32> to vector<4x256xf32>
    %268 = arith.mulf %266, %267 : vector<4x256xf32>
    %c40_197 = arith.constant 40 : index
    %c0_198 = arith.constant 0 : index
    %269 = vector.load %arg20[%c40_197, %c0_198] : memref<144x256xf32, #tpu.memory_space<vmem>>, vector<4x256xf32>
    tpu.vector_store %arg20[%c40_197, %c0_198], %268 {strides = array<i32>} : memref<144x256xf32, #tpu.memory_space<vmem>>, vector<4x256xf32>,
    %c240_i32_199 = arith.constant 240 : i32
    %270 = tpu.dynamic_rotate %248 by %c240_i32_199 dim 1 : vector<4x256xf32>, i32 -> vector<4x256xf32>
    %c1_i32_200 = arith.constant 1 : i32
    %271 = tpu.dynamic_rotate %270 by %c1_i32_200 dim 1 : vector<4x256xf32>, i32 -> vector<4x256xf32>
    %272 = vector.broadcast %6 : vector<1x256xf32> to vector<4x256xf32>
    %273 = arith.mulf %271, %272 : vector<4x256xf32>
    %c48_201 = arith.constant 48 : index
    %c0_202 = arith.constant 0 : index
    %274 = vector.load %arg20[%c48_201, %c0_202] : memref<144x256xf32, #tpu.memory_space<vmem>>, vector<4x256xf32>
    tpu.vector_store %arg20[%c48_201, %c0_202], %273 {strides = array<i32>} : memref<144x256xf32, #tpu.memory_space<vmem>>, vector<4x256xf32>,
    %275 = vector.broadcast %7 : vector<1x256xf32> to vector<4x256xf32>
    %276 = arith.mulf %270, %275 : vector<4x256xf32>
    %c56_203 = arith.constant 56 : index
    %c0_204 = arith.constant 0 : index
    %277 = vector.load %arg20[%c56_203, %c0_204] : memref<144x256xf32, #tpu.memory_space<vmem>>, vector<4x256xf32>
    tpu.vector_store %arg20[%c56_203, %c0_204], %276 {strides = array<i32>} : memref<144x256xf32, #tpu.memory_space<vmem>>, vector<4x256xf32>,
    %c255_i32_205 = arith.constant 255 : i32
    %278 = tpu.dynamic_rotate %270 by %c255_i32_205 dim 1 : vector<4x256xf32>, i32 -> vector<4x256xf32>
    %279 = vector.broadcast %8 : vector<1x256xf32> to vector<4x256xf32>
    %280 = arith.mulf %278, %279 : vector<4x256xf32>
    %c64_206 = arith.constant 64 : index
    %c0_207 = arith.constant 0 : index
    %281 = vector.load %arg20[%c64_206, %c0_207] : memref<144x256xf32, #tpu.memory_space<vmem>>, vector<4x256xf32>
    tpu.vector_store %arg20[%c64_206, %c0_207], %280 {strides = array<i32>} : memref<144x256xf32, #tpu.memory_space<vmem>>, vector<4x256xf32>,
    %c0_208 = arith.constant 0 : index
    %c0_209 = arith.constant 0 : index
    %282 = vector.load %arg12[%c0_208, %c0_209] : memref<4x72xbf16, #tpu.memory_space<vmem>>, vector<4x72xbf16>
    %c0_210 = arith.constant 0 : index
    %c0_211 = arith.constant 0 : index
    %283 = vector.load %arg20[%c0_210, %c0_211] : memref<144x256xf32, #tpu.memory_space<vmem>>, vector<72x256xf32>
    %284 = arith.truncf %283 : vector<72x256xf32> to vector<72x256xbf16>
    %cst_212 = arith.constant dense<0.000000e+00> : vector<4x256xf32>
    %285 = tpu.matmul %282, %284, %cst_212 {dimension_numbers = #tpu.dot_dimension_numbers<[1], [0], [0], [1], [0, 0, 1, 1], [], []>} : vector<4x72xbf16>, vector<72x256xbf16>, vector<4x256xf32> -> vector<4x256xf32>
    %c0_213 = arith.constant 0 : index
    %c0_214 = arith.constant 0 : index
    %286 = vector.load %arg13[%c0_213, %c0_214] : memref<4x1xf32, #tpu.memory_space<vmem>>, vector<4x1xf32>
    %287 = vector.broadcast %286 : vector<4x1xf32> to vector<4x256xf32>
    %288 = arith.addf %285, %287 : vector<4x256xf32>
    %cst_215 = arith.constant 0.000000e+00 : f32
    %289 = vector.broadcast %cst_215 : f32 to vector<4x256xf32>
    %290 = arith.maximumf %288, %289 : vector<4x256xf32>
    %c16_i32_216 = arith.constant 16 : i32
    %291 = tpu.dynamic_rotate %290 by %c16_i32_216 dim 1 : vector<4x256xf32>, i32 -> vector<4x256xf32>
    %c1_i32_217 = arith.constant 1 : i32
    %292 = tpu.dynamic_rotate %291 by %c1_i32_217 dim 1 : vector<4x256xf32>, i32 -> vector<4x256xf32>
    %293 = vector.broadcast %1 : vector<1x256xf32> to vector<4x256xf32>
    %294 = arith.mulf %292, %293 : vector<4x256xf32>
    %c0_218 = arith.constant 0 : index
    %c0_219 = arith.constant 0 : index
    %295 = vector.load %arg20[%c0_218, %c0_219] : memref<144x256xf32, #tpu.memory_space<vmem>>, vector<4x256xf32>
    tpu.vector_store %arg20[%c0_218, %c0_219], %294 {strides = array<i32>} : memref<144x256xf32, #tpu.memory_space<vmem>>, vector<4x256xf32>,
    %296 = vector.broadcast %2 : vector<1x256xf32> to vector<4x256xf32>
    %297 = arith.mulf %291, %296 : vector<4x256xf32>
    %c8_220 = arith.constant 8 : index
    %c0_221 = arith.constant 0 : index
    %298 = vector.load %arg20[%c8_220, %c0_221] : memref<144x256xf32, #tpu.memory_space<vmem>>, vector<4x256xf32>
    tpu.vector_store %arg20[%c8_220, %c0_221], %297 {strides = array<i32>} : memref<144x256xf32, #tpu.memory_space<vmem>>, vector<4x256xf32>,
    %c255_i32_222 = arith.constant 255 : i32
    %299 = tpu.dynamic_rotate %291 by %c255_i32_222 dim 1 : vector<4x256xf32>, i32 -> vector<4x256xf32>
    %300 = vector.broadcast %3 : vector<1x256xf32> to vector<4x256xf32>
    %301 = arith.mulf %299, %300 : vector<4x256xf32>
    %c16_223 = arith.constant 16 : index
    %c0_224 = arith.constant 0 : index
    %302 = vector.load %arg20[%c16_223, %c0_224] : memref<144x256xf32, #tpu.memory_space<vmem>>, vector<4x256xf32>
    tpu.vector_store %arg20[%c16_223, %c0_224], %301 {strides = array<i32>} : memref<144x256xf32, #tpu.memory_space<vmem>>, vector<4x256xf32>,
    %c1_i32_225 = arith.constant 1 : i32
    %303 = tpu.dynamic_rotate %290 by %c1_i32_225 dim 1 : vector<4x256xf32>, i32 -> vector<4x256xf32>
    %304 = vector.broadcast %4 : vector<1x256xf32> to vector<4x256xf32>
    %305 = arith.mulf %303, %304 : vector<4x256xf32>
    %c24_226 = arith.constant 24 : index
    %c0_227 = arith.constant 0 : index
    %306 = vector.load %arg20[%c24_226, %c0_227] : memref<144x256xf32, #tpu.memory_space<vmem>>, vector<4x256xf32>
    tpu.vector_store %arg20[%c24_226, %c0_227], %305 {strides = array<i32>} : memref<144x256xf32, #tpu.memory_space<vmem>>, vector<4x256xf32>,
    %c32_228 = arith.constant 32 : index
    %c0_229 = arith.constant 0 : index
    %307 = vector.load %arg20[%c32_228, %c0_229] : memref<144x256xf32, #tpu.memory_space<vmem>>, vector<4x256xf32>
    tpu.vector_store %arg20[%c32_228, %c0_229], %290 {strides = array<i32>} : memref<144x256xf32, #tpu.memory_space<vmem>>, vector<4x256xf32>,
    %c255_i32_230 = arith.constant 255 : i32
    %308 = tpu.dynamic_rotate %290 by %c255_i32_230 dim 1 : vector<4x256xf32>, i32 -> vector<4x256xf32>
    %309 = vector.broadcast %5 : vector<1x256xf32> to vector<4x256xf32>
    %310 = arith.mulf %308, %309 : vector<4x256xf32>
    %c40_231 = arith.constant 40 : index
    %c0_232 = arith.constant 0 : index
    %311 = vector.load %arg20[%c40_231, %c0_232] : memref<144x256xf32, #tpu.memory_space<vmem>>, vector<4x256xf32>
    tpu.vector_store %arg20[%c40_231, %c0_232], %310 {strides = array<i32>} : memref<144x256xf32, #tpu.memory_space<vmem>>, vector<4x256xf32>,
    %c240_i32_233 = arith.constant 240 : i32
    %312 = tpu.dynamic_rotate %290 by %c240_i32_233 dim 1 : vector<4x256xf32>, i32 -> vector<4x256xf32>
    %c1_i32_234 = arith.constant 1 : i32
    %313 = tpu.dynamic_rotate %312 by %c1_i32_234 dim 1 : vector<4x256xf32>, i32 -> vector<4x256xf32>
    %314 = vector.broadcast %6 : vector<1x256xf32> to vector<4x256xf32>
    %315 = arith.mulf %313, %314 : vector<4x256xf32>
    %c48_235 = arith.constant 48 : index
    %c0_236 = arith.constant 0 : index
    %316 = vector.load %arg20[%c48_235, %c0_236] : memref<144x256xf32, #tpu.memory_space<vmem>>, vector<4x256xf32>
    tpu.vector_store %arg20[%c48_235, %c0_236], %315 {strides = array<i32>} : memref<144x256xf32, #tpu.memory_space<vmem>>, vector<4x256xf32>,
    %317 = vector.broadcast %7 : vector<1x256xf32> to vector<4x256xf32>
    %318 = arith.mulf %312, %317 : vector<4x256xf32>
    %c56_237 = arith.constant 56 : index
    %c0_238 = arith.constant 0 : index
    %319 = vector.load %arg20[%c56_237, %c0_238] : memref<144x256xf32, #tpu.memory_space<vmem>>, vector<4x256xf32>
    tpu.vector_store %arg20[%c56_237, %c0_238], %318 {strides = array<i32>} : memref<144x256xf32, #tpu.memory_space<vmem>>, vector<4x256xf32>,
    %c255_i32_239 = arith.constant 255 : i32
    %320 = tpu.dynamic_rotate %312 by %c255_i32_239 dim 1 : vector<4x256xf32>, i32 -> vector<4x256xf32>
    %321 = vector.broadcast %8 : vector<1x256xf32> to vector<4x256xf32>
    %322 = arith.mulf %320, %321 : vector<4x256xf32>
    %c64_240 = arith.constant 64 : index
    %c0_241 = arith.constant 0 : index
    %323 = vector.load %arg20[%c64_240, %c0_241] : memref<144x256xf32, #tpu.memory_space<vmem>>, vector<4x256xf32>
    tpu.vector_store %arg20[%c64_240, %c0_241], %322 {strides = array<i32>} : memref<144x256xf32, #tpu.memory_space<vmem>>, vector<4x256xf32>,
    %c0_242 = arith.constant 0 : index
    %c0_243 = arith.constant 0 : index
    %324 = vector.load %arg14[%c0_242, %c0_243] : memref<4x72xbf16, #tpu.memory_space<vmem>>, vector<4x72xbf16>
    %c0_244 = arith.constant 0 : index
    %c0_245 = arith.constant 0 : index
    %325 = vector.load %arg20[%c0_244, %c0_245] : memref<144x256xf32, #tpu.memory_space<vmem>>, vector<72x256xf32>
    %326 = arith.truncf %325 : vector<72x256xf32> to vector<72x256xbf16>
    %cst_246 = arith.constant dense<0.000000e+00> : vector<4x256xf32>
    %327 = tpu.matmul %324, %326, %cst_246 {dimension_numbers = #tpu.dot_dimension_numbers<[1], [0], [0], [1], [0, 0, 1, 1], [], []>} : vector<4x72xbf16>, vector<72x256xbf16>, vector<4x256xf32> -> vector<4x256xf32>
    %c0_247 = arith.constant 0 : index
    %c0_248 = arith.constant 0 : index
    %328 = vector.load %arg15[%c0_247, %c0_248] : memref<4x1xf32, #tpu.memory_space<vmem>>, vector<4x1xf32>
    %329 = vector.broadcast %328 : vector<4x1xf32> to vector<4x256xf32>
    %330 = arith.addf %327, %329 : vector<4x256xf32>
    %331 = arith.addf %248, %330 : vector<4x256xf32>
    %c16_i32_249 = arith.constant 16 : i32
    %332 = tpu.dynamic_rotate %331 by %c16_i32_249 dim 1 : vector<4x256xf32>, i32 -> vector<4x256xf32>
    %c1_i32_250 = arith.constant 1 : i32
    %333 = tpu.dynamic_rotate %332 by %c1_i32_250 dim 1 : vector<4x256xf32>, i32 -> vector<4x256xf32>
    %334 = vector.broadcast %1 : vector<1x256xf32> to vector<4x256xf32>
    %335 = arith.mulf %333, %334 : vector<4x256xf32>
    %c0_251 = arith.constant 0 : index
    %c0_252 = arith.constant 0 : index
    %336 = vector.load %arg20[%c0_251, %c0_252] : memref<144x256xf32, #tpu.memory_space<vmem>>, vector<4x256xf32>
    tpu.vector_store %arg20[%c0_251, %c0_252], %335 {strides = array<i32>} : memref<144x256xf32, #tpu.memory_space<vmem>>, vector<4x256xf32>,
    %337 = vector.broadcast %2 : vector<1x256xf32> to vector<4x256xf32>
    %338 = arith.mulf %332, %337 : vector<4x256xf32>
    %c8_253 = arith.constant 8 : index
    %c0_254 = arith.constant 0 : index
    %339 = vector.load %arg20[%c8_253, %c0_254] : memref<144x256xf32, #tpu.memory_space<vmem>>, vector<4x256xf32>
    tpu.vector_store %arg20[%c8_253, %c0_254], %338 {strides = array<i32>} : memref<144x256xf32, #tpu.memory_space<vmem>>, vector<4x256xf32>,
    %c255_i32_255 = arith.constant 255 : i32
    %340 = tpu.dynamic_rotate %332 by %c255_i32_255 dim 1 : vector<4x256xf32>, i32 -> vector<4x256xf32>
    %341 = vector.broadcast %3 : vector<1x256xf32> to vector<4x256xf32>
    %342 = arith.mulf %340, %341 : vector<4x256xf32>
    %c16_256 = arith.constant 16 : index
    %c0_257 = arith.constant 0 : index
    %343 = vector.load %arg20[%c16_256, %c0_257] : memref<144x256xf32, #tpu.memory_space<vmem>>, vector<4x256xf32>
    tpu.vector_store %arg20[%c16_256, %c0_257], %342 {strides = array<i32>} : memref<144x256xf32, #tpu.memory_space<vmem>>, vector<4x256xf32>,
    %c1_i32_258 = arith.constant 1 : i32
    %344 = tpu.dynamic_rotate %331 by %c1_i32_258 dim 1 : vector<4x256xf32>, i32 -> vector<4x256xf32>
    %345 = vector.broadcast %4 : vector<1x256xf32> to vector<4x256xf32>
    %346 = arith.mulf %344, %345 : vector<4x256xf32>
    %c24_259 = arith.constant 24 : index
    %c0_260 = arith.constant 0 : index
    %347 = vector.load %arg20[%c24_259, %c0_260] : memref<144x256xf32, #tpu.memory_space<vmem>>, vector<4x256xf32>
    tpu.vector_store %arg20[%c24_259, %c0_260], %346 {strides = array<i32>} : memref<144x256xf32, #tpu.memory_space<vmem>>, vector<4x256xf32>,
    %c32_261 = arith.constant 32 : index
    %c0_262 = arith.constant 0 : index
    %348 = vector.load %arg20[%c32_261, %c0_262] : memref<144x256xf32, #tpu.memory_space<vmem>>, vector<4x256xf32>
    tpu.vector_store %arg20[%c32_261, %c0_262], %331 {strides = array<i32>} : memref<144x256xf32, #tpu.memory_space<vmem>>, vector<4x256xf32>,
    %c255_i32_263 = arith.constant 255 : i32
    %349 = tpu.dynamic_rotate %331 by %c255_i32_263 dim 1 : vector<4x256xf32>, i32 -> vector<4x256xf32>
    %350 = vector.broadcast %5 : vector<1x256xf32> to vector<4x256xf32>
    %351 = arith.mulf %349, %350 : vector<4x256xf32>
    %c40_264 = arith.constant 40 : index
    %c0_265 = arith.constant 0 : index
    %352 = vector.load %arg20[%c40_264, %c0_265] : memref<144x256xf32, #tpu.memory_space<vmem>>, vector<4x256xf32>
    tpu.vector_store %arg20[%c40_264, %c0_265], %351 {strides = array<i32>} : memref<144x256xf32, #tpu.memory_space<vmem>>, vector<4x256xf32>,
    %c240_i32_266 = arith.constant 240 : i32
    %353 = tpu.dynamic_rotate %331 by %c240_i32_266 dim 1 : vector<4x256xf32>, i32 -> vector<4x256xf32>
    %c1_i32_267 = arith.constant 1 : i32
    %354 = tpu.dynamic_rotate %353 by %c1_i32_267 dim 1 : vector<4x256xf32>, i32 -> vector<4x256xf32>
    %355 = vector.broadcast %6 : vector<1x256xf32> to vector<4x256xf32>
    %356 = arith.mulf %354, %355 : vector<4x256xf32>
    %c48_268 = arith.constant 48 : index
    %c0_269 = arith.constant 0 : index
    %357 = vector.load %arg20[%c48_268, %c0_269] : memref<144x256xf32, #tpu.memory_space<vmem>>, vector<4x256xf32>
    tpu.vector_store %arg20[%c48_268, %c0_269], %356 {strides = array<i32>} : memref<144x256xf32, #tpu.memory_space<vmem>>, vector<4x256xf32>,
    %358 = vector.broadcast %7 : vector<1x256xf32> to vector<4x256xf32>
    %359 = arith.mulf %353, %358 : vector<4x256xf32>
    %c56_270 = arith.constant 56 : index
    %c0_271 = arith.constant 0 : index
    %360 = vector.load %arg20[%c56_270, %c0_271] : memref<144x256xf32, #tpu.memory_space<vmem>>, vector<4x256xf32>
    tpu.vector_store %arg20[%c56_270, %c0_271], %359 {strides = array<i32>} : memref<144x256xf32, #tpu.memory_space<vmem>>, vector<4x256xf32>,
    %c255_i32_272 = arith.constant 255 : i32
    %361 = tpu.dynamic_rotate %353 by %c255_i32_272 dim 1 : vector<4x256xf32>, i32 -> vector<4x256xf32>
    %362 = vector.broadcast %8 : vector<1x256xf32> to vector<4x256xf32>
    %363 = arith.mulf %361, %362 : vector<4x256xf32>
    %c64_273 = arith.constant 64 : index
    %c0_274 = arith.constant 0 : index
    %364 = vector.load %arg20[%c64_273, %c0_274] : memref<144x256xf32, #tpu.memory_space<vmem>>, vector<4x256xf32>
    tpu.vector_store %arg20[%c64_273, %c0_274], %363 {strides = array<i32>} : memref<144x256xf32, #tpu.memory_space<vmem>>, vector<4x256xf32>,
    %c0_275 = arith.constant 0 : index
    %c0_276 = arith.constant 0 : index
    %365 = vector.load %arg16[%c0_275, %c0_276] : memref<4x72xbf16, #tpu.memory_space<vmem>>, vector<4x72xbf16>
    %c0_277 = arith.constant 0 : index
    %c0_278 = arith.constant 0 : index
    %366 = vector.load %arg20[%c0_277, %c0_278] : memref<144x256xf32, #tpu.memory_space<vmem>>, vector<72x256xf32>
    %367 = arith.truncf %366 : vector<72x256xf32> to vector<72x256xbf16>
    %cst_279 = arith.constant dense<0.000000e+00> : vector<4x256xf32>
    %368 = tpu.matmul %365, %367, %cst_279 {dimension_numbers = #tpu.dot_dimension_numbers<[1], [0], [0], [1], [0, 0, 1, 1], [], []>} : vector<4x72xbf16>, vector<72x256xbf16>, vector<4x256xf32> -> vector<4x256xf32>
    %c0_280 = arith.constant 0 : index
    %c0_281 = arith.constant 0 : index
    %369 = vector.load %arg17[%c0_280, %c0_281] : memref<4x1xf32, #tpu.memory_space<vmem>>, vector<4x1xf32>
    %370 = vector.broadcast %369 : vector<4x1xf32> to vector<4x256xf32>
    %371 = arith.addf %368, %370 : vector<4x256xf32>
    %cst_282 = arith.constant 0.000000e+00 : f32
    %372 = vector.broadcast %cst_282 : f32 to vector<4x256xf32>
    %373 = arith.maximumf %371, %372 : vector<4x256xf32>
    %c0_283 = arith.constant 0 : index
    %c0_284 = arith.constant 0 : index
    %c0_285 = arith.constant 0 : index
    %374 = vector.load %arg18[%c0_283, %c0_284, %c0_285] : memref<1x4x256xf32, #tpu.memory_space<vmem>>, vector<1x4x256xf32>
    %375 = vector.shape_cast %374 : vector<1x4x256xf32> to vector<4x256xf32>
    %376 = vector.shape_cast %331 : vector<4x256xf32> to vector<1x4x256xf32>
    tpu.vector_store %arg18[%c0_283, %c0_284, %c0_285], %376 {strides = array<i32>} : memref<1x4x256xf32, #tpu.memory_space<vmem>>, vector<1x4x256xf32>,
    %c0_286 = arith.constant 0 : index
    %c0_287 = arith.constant 0 : index
    %c0_288 = arith.constant 0 : index
    %377 = vector.load %arg19[%c0_286, %c0_287, %c0_288] : memref<1x4x256xf32, #tpu.memory_space<vmem>>, vector<1x4x256xf32>
    %378 = vector.shape_cast %377 : vector<1x4x256xf32> to vector<4x256xf32>
    %379 = vector.shape_cast %373 : vector<4x256xf32> to vector<1x4x256xf32>
    tpu.vector_store %arg19[%c0_286, %c0_287, %c0_288], %379 {strides = array<i32>} : memref<1x4x256xf32, #tpu.memory_space<vmem>>, vector<1x4x256xf32>,
    return
  }
  func.func @transform_0(%arg0: i32) -> (i32, i32, i32) {
    %c0_i32 = arith.constant 0 : i32
    %c0_i32_0 = arith.constant 0 : i32
    %c0_i32_1 = arith.constant 0 : i32
    return %arg0, %c0_i32, %c0_i32_0 : i32, i32, i32
  }
  func.func @transform_1(%arg0: i32) -> (i32, i32, i32) {
    %c0_i32 = arith.constant 0 : i32
    %c0_i32_0 = arith.constant 0 : i32
    %c0_i32_1 = arith.constant 0 : i32
    return %arg0, %c0_i32, %c0_i32_0 : i32, i32, i32
  }
  func.func @transform_2(%arg0: i32) -> (i32, i32) {
    %c0_i32 = arith.constant 0 : i32
    %c0_i32_0 = arith.constant 0 : i32
    %c0_i32_1 = arith.constant 0 : i32
    return %c0_i32, %c0_i32_0 : i32, i32
  }
  func.func @transform_3(%arg0: i32) -> (i32, i32) {
    %c0_i32 = arith.constant 0 : i32
    %c0_i32_0 = arith.constant 0 : i32
    %c0_i32_1 = arith.constant 0 : i32
    return %c0_i32, %c0_i32_0 : i32, i32
  }
  func.func @transform_4(%arg0: i32) -> (i32, i32) {
    %c0_i32 = arith.constant 0 : i32
    %c0_i32_0 = arith.constant 0 : i32
    %c0_i32_1 = arith.constant 0 : i32
    return %c0_i32, %c0_i32_0 : i32, i32
  }
  func.func @transform_5(%arg0: i32) -> (i32, i32) {
    %c0_i32 = arith.constant 0 : i32
    %c0_i32_0 = arith.constant 0 : i32
    %c0_i32_1 = arith.constant 0 : i32
    return %c0_i32, %c0_i32_0 : i32, i32
  }
  func.func @transform_6(%arg0: i32) -> (i32, i32) {
    %c0_i32 = arith.constant 0 : i32
    %c0_i32_0 = arith.constant 0 : i32
    %c0_i32_1 = arith.constant 0 : i32
    return %c0_i32, %c0_i32_0 : i32, i32
  }
  func.func @transform_7(%arg0: i32) -> (i32, i32) {
    %c0_i32 = arith.constant 0 : i32
    %c0_i32_0 = arith.constant 0 : i32
    %c0_i32_1 = arith.constant 0 : i32
    return %c0_i32, %c0_i32_0 : i32, i32
  }
  func.func @transform_8(%arg0: i32) -> (i32, i32) {
    %c0_i32 = arith.constant 0 : i32
    %c0_i32_0 = arith.constant 0 : i32
    %c0_i32_1 = arith.constant 0 : i32
    return %c0_i32, %c0_i32_0 : i32, i32
  }
  func.func @transform_9(%arg0: i32) -> (i32, i32) {
    %c0_i32 = arith.constant 0 : i32
    %c0_i32_0 = arith.constant 0 : i32
    %c0_i32_1 = arith.constant 0 : i32
    return %c0_i32, %c0_i32_0 : i32, i32
  }
  func.func @transform_10(%arg0: i32) -> (i32, i32) {
    %c0_i32 = arith.constant 0 : i32
    %c0_i32_0 = arith.constant 0 : i32
    %c0_i32_1 = arith.constant 0 : i32
    return %c0_i32, %c0_i32_0 : i32, i32
  }
  func.func @transform_11(%arg0: i32) -> (i32, i32) {
    %c0_i32 = arith.constant 0 : i32
    %c0_i32_0 = arith.constant 0 : i32
    %c0_i32_1 = arith.constant 0 : i32
    return %c0_i32, %c0_i32_0 : i32, i32
  }
  func.func @transform_12(%arg0: i32) -> (i32, i32) {
    %c0_i32 = arith.constant 0 : i32
    %c0_i32_0 = arith.constant 0 : i32
    %c0_i32_1 = arith.constant 0 : i32
    return %c0_i32, %c0_i32_0 : i32, i32
  }
  func.func @transform_13(%arg0: i32) -> (i32, i32) {
    %c0_i32 = arith.constant 0 : i32
    %c0_i32_0 = arith.constant 0 : i32
    %c0_i32_1 = arith.constant 0 : i32
    return %c0_i32, %c0_i32_0 : i32, i32
  }
  func.func @transform_14(%arg0: i32) -> (i32, i32) {
    %c0_i32 = arith.constant 0 : i32
    %c0_i32_0 = arith.constant 0 : i32
    %c0_i32_1 = arith.constant 0 : i32
    return %c0_i32, %c0_i32_0 : i32, i32
  }
  func.func @transform_15(%arg0: i32) -> (i32, i32) {
    %c0_i32 = arith.constant 0 : i32
    %c0_i32_0 = arith.constant 0 : i32
    %c0_i32_1 = arith.constant 0 : i32
    return %c0_i32, %c0_i32_0 : i32, i32
  }
  func.func @transform_16(%arg0: i32) -> (i32, i32) {
    %c0_i32 = arith.constant 0 : i32
    %c0_i32_0 = arith.constant 0 : i32
    %c0_i32_1 = arith.constant 0 : i32
    return %c0_i32, %c0_i32_0 : i32, i32
  }
  func.func @transform_17(%arg0: i32) -> (i32, i32, i32) {
    %c0_i32 = arith.constant 0 : i32
    %c0_i32_0 = arith.constant 0 : i32
    %c0_i32_1 = arith.constant 0 : i32
    return %arg0, %c0_i32, %c0_i32_0 : i32, i32, i32
  }
  func.func @transform_18(%arg0: i32) -> (i32, i32, i32) {
    %c0_i32 = arith.constant 0 : i32
    %c0_i32_0 = arith.constant 0 : i32
    %c0_i32_1 = arith.constant 0 : i32
    return %arg0, %c0_i32, %c0_i32_0 : i32, i32, i32
  }
}

</mosaic_0001>

<bundles_post_ra>
// kernel: tpu_custom_call.1
= control target key start
LH: loop header
LB: loop body
LE: loop exit
PB: predicated region body
PF: predicated region fallthrough
CT: control target
= control target key end

     0   :  { %s3503_s0 = inlined_call_operand.hbm [shape: f32[2,4,256], index: 0, kind: input, shape index: {}]   ;;  %s3504_s1 = inlined_call_operand.hbm [shape: f32[2,4,256], index: 1, kind: input, shape index: {}]   ;;  %s3505_s2 = inlined_call_operand.hbm [shape: f32[9,256], index: 2, kind: input, shape index: {}]   ;;  %s3506_s3 = inlined_call_operand.vmem [shape: bf16[4,72], index: 3, kind: input, shape index: {}]   ;;  %s3507_s4 = inlined_call_operand.vmem [shape: f32[4,1], index: 4, kind: input, shape index: {}]   ;;  %s3508_s5 = inlined_call_operand.vmem [shape: bf16[4,144], index: 5, kind: input, shape index: {}]   ;;  %s3509_s6 = inlined_call_operand.vmem [shape: f32[4,1], index: 6, kind: input, shape index: {}]   ;;  %s3510_s7 = inlined_call_operand.vmem [shape: bf16[4,72], index: 7, kind: input, shape index: {}]   ;;  %s3511_s8 = inlined_call_operand.vmem [shape: f32[4,1], index: 8, kind: input, shape index: {}]   ;;  %s3512_s9 = inlined_call_operand.vmem [shape: bf16[4,72], index: 9, kind: input, shape index: {}]   ;;  %s3513_s10 = inlined_call_operand.vmem [shape: f32[4,1], index: 10, kind: input, shape index: {}]   ;;  %s3514_s11 = inlined_call_operand.vmem [shape: bf16[4,72], index: 11, kind: input, shape index: {}]   ;;  %s3515_s12 = inlined_call_operand.vmem [shape: f32[4,1], index: 12, kind: input, shape index: {}]   ;;  %s3516_s13 = inlined_call_operand.vmem [shape: bf16[4,72], index: 13, kind: input, shape index: {}]   ;;  %s3517_s14 = inlined_call_operand.vmem [shape: f32[4,1], index: 14, kind: input, shape index: {}]   ;;  %s3518_s15 = inlined_call_operand.vmem [shape: bf16[4,72], index: 15, kind: input, shape index: {}]   ;;  %s3519_s16 = inlined_call_operand.vmem [shape: f32[4,1], index: 16, kind: input, shape index: {}]   ;;  %s3520_s17 = inlined_call_operand.hbm [shape: f32[2,4,256], index: 17, kind: output, shape index: {0}]   ;;  %s3521_s18 = inlined_call_operand.hbm [shape: f32[2,4,256], index: 18, kind: output, shape index: {1}]  }
   0x1   :  { %3534 = sst [smem:[#allocation24_spill]] %s3503_s0 }
   0x2   :  { %3535 = sst [smem:[#allocation25_spill]] %s3504_s1 }
   0x3   :  { %3536 = sst [smem:[#allocation26_spill]] %s3505_s2 }
   0x4   :  { %3537 = sst [smem:[#allocation27_spill]] %s3512_s9 }
   0x5   :  { %3538 = sst [smem:[#allocation28_spill]] %s3514_s11 }
   0x6   :  { %3539 = sst [smem:[#allocation29_spill]] %s3515_s12 }
   0x7   :  { %3540 = sst [smem:[#allocation30_spill]] %s3516_s13 }
   0x8   :  { %3541 = sst [smem:[#allocation31_spill]] %s3517_s14 }
   0x9   :  { %3542 = sst [smem:[#allocation32_spill]] %s3518_s15 }
   0xa   :  { %3543 = sst [smem:[#allocation33_spill]] %s3519_s16 }
   0xb   :  { %3544 = sst [smem:[#allocation34_spill]] %s3520_s17 }
   0xc   :  { %3545 = sst [smem:[#allocation35_spill]] %s3521_s18 }
   0xd   :  { %24 = vsyncpa [#allocation4], 0 }
   0xe   :  { %26 = vsyncpa [#allocation4 + $0x1], 0 }
   0xf   :  { %27 = vsyncpa [#allocation7], 0 }
  0x10   :  { %29 = vsyncpa [#allocation7 + $0x1], 0 }
  0x11   :  { %30 = vsyncpa [#allocation5], 0 }
  0x12   :  { %32 = vsyncpa [#allocation5 + $0x1], 0 }
  0x13   :  { %33 = vsyncpa [#allocation11], 0 }
  0x14   :  { %35 = vsyncpa [#allocation11 + $0x1], 0  ;;  %s2601_s27 = smov 0   ;;  %s2603_s28 = smov 0  }
  0x15   :  { %s2605_s29 = smov 0   ;;  %s2607_s30 = smov 0  }
  0x16 LB: > { %3546 = sst [smem:[#allocation17_spill]] %s2483_s27  ;;  %s2625_s21 = sadd.s32 4294967295, %s2495_s30   ;;  %s2495_s30 = sphi %s2607_s30, %s3577_s30   ;;  %s2491_s29 = sphi %s2605_s29, %s3582_s29   ;;  %s2487_s28 = sphi %s2603_s28, %s3581_s28   ;;  %s2483_s27 = sphi %s2601_s27, %s3580_s27  }
  0x17   : > { %3547 = sst [smem:[#allocation18_spill]] %s2491_s29  ;;  %p2176_p0 = scmp.ge.s32.totalorder %s2495_s30, 1 }
  0x18   : > { %3548 = sst [smem:[#allocation19_spill]] %s2495_s30  ;;  %p62_p1 = scmp.eq.s32.totalorder %s2625_s21, 0 }
  0x19   : > { %s3549_s1 = sld [smem:[#allocation26_spill]]  ;;  %p465_p2 = scmp.lt.s32.totalorder %s2495_s30, 3 }
  0x1a   : > { %s2497_s2 = smov [#allocation8]   ;;  %s2498_s24 = smov 256  }
  0x1b   : > { %p2630_p3 = pnand %p2176_p0, %p465_p2  ;;  %s478_s23 = sshll.u32 %s2497_s2, 4  ;;  %s479_s23 = int_to_ptr.vmem [resolvable:$true] %s478_s23 }
  0x1c   : > { %s2499_s25 = smov 16   ;;  %s2175_s26 = sadd.s32 4294967294, %s2495_s30  }
  0x1d   : > { %p2229_p4 = pneg %p2630_p3  ;;  %s2641_s0 = sadd.s32 1, %s2495_s30  }
  0x1e   : > { %3551 = sst [smem:[#allocation20_spill]] %s2641_s0  ;;  %s48_s19 = sadd.s32 1, %s2491_s29 }
  0x1f   : > { %s476_s20 = sshll.u32 %s3549_s1, 4  ;;  %p2230_p6 = pnand %p2229_p4, %p62_p1  ;;  %s477_s20 = int_to_ptr.hbm [resolvable:$true] %s476_s20 }
  0x20   : > { %s45_s1 = ssub.s32 %s2495_s30, %s2641_s0  ;;  %p55_p7 = scmp.ne.s32.totalorder %s2491_s29, %s2487_s28 }
  0x21   : > { %2232 = dma.hbm_to_vmem [thread:$0]  (!%p2230_p6), %s477_s20, 512, %s479_s23, [#allocation7], %s2498_s24, %s2498_s24, %s2499_s25  }
  0x22   : > { %p46_p8 = scmp.eq.s32.totalorder %s45_s1, 0  ;;  %p56_p9 = scmp.eq.s32.totalorder %s2495_s30, 0 }
  0x23   : > { %p61_p10 = scmp.ne.s32.totalorder %s2487_s28, %s2483_s27  ;;  %p426_p11 = scmp.eq.s32.totalorder %s2625_s21, 1 }
  0x24   : > { %s2653_s2 = scalar_select %p46_p8, %s2491_s29, %s48_s19  }
  0x25   : > { %p2655_p12 = por %p56_p9, %p55_p7  ;;  %p2661_p13 = por %p62_p1, %p61_p10 }
  0x26   : > { %3552 = sst [smem:[#allocation21_spill]] %s2653_s2  ;;  %p2665_p0 = por %p426_p11, %p55_p7 }
  0x27   : > { %p432_p2 = scmp.eq.s32.totalorder %s2175_s26, 1  ;;  %p2248_p4 = scmp.lt.s32.totalorder %s2495_s30, 2 }
  0x28   : > { %s3555_s23 = scalar_select %p2665_p0, 1, 0 }
  0x29   : > { %s534_s24 = sand.u32 1, %s2491_s29   ;;  %p2671_p6 = por %p432_p2, %p61_p10 }
  0x2a   : > { %3556 = sst [smem:[#allocation22_spill]] %s3555_s23  ;;  %s2179_s19 = sshll.u32 %s534_s24, 3 }
  0x2b   : > { %s3557_s25 = scalar_select %p2671_p6, 1, 0 }
  0x2c   : > { %s2213_s1 = sshll.u32 %s2495_s30, 3  ;;  %s3559_s27 = sld [smem:[#allocation24_spill]] }
  0x2d   : > { %3558 = sst [smem:[#allocation23_spill]] %s3557_s25  ;;  %s538_s13 = scalar_lea.vmem [#allocation3], %s2179_s19 }
  0x2e   : > { %s547_s14 = sshll.u32 %s538_s13, 4  ;;  %p2681_p7 = pnand %p2248_p4, %p2655_p12  ;;  %s548_s14 = int_to_ptr.vmem [resolvable:$true] %s547_s14 }
  0x2f   : > { %s3562_s11 = sld [smem:[#allocation25_spill]]  ;;  %s554_s12 = sand.u32 1, %s2495_s30  }
  0x30   : > { %s535_s9 = scalar_lea.sflag [#allocation4], %s534_s24  ;;  %p2333_p9 = pneg %p2681_p7 }
  0x32   : > { %s3560_s17 = smov %s3559_s27  ;;  %s543_s15 = scalar_lea.hbm %s3559_s27, %s2213_s1 }
  0x33   : > { %s545_s16 = sshll.u32 %s543_s15, 4  ;;  %s2336_s27 = scalar_lea.hbm %s3560_s17, 16  ;;  %s546_s16 = int_to_ptr.hbm [resolvable:$true] %s545_s16 }
  0x34   : > { %s2329_s0 = sshra.s32 %s546_s16, 4  ;;  %s2330_s0 = int_to_ptr.hbm [resolvable:$true] %s2329_s0 }
  0x35   : > { %s563_s25 = scalar_lea.hbm %s3562_s11, %s2213_s1  ;;  %s2331_s15 = scalar_lea.hbm %s2330_s0, 8 }
  0x36   : > { %p2332_p8 = scmp.ne.s32.totalorder %s2330_s0, %s2331_s15  ;;  %p2337_p12 = scmp.lt.s32.totalorder %s2330_s0, %s3560_s17 }
  0x37   : > { %p2338_p2 = scmp.lt.s32.totalorder %s2336_s27, %s2331_s15 }
  0x38   : > { %p2334_p10 = pnand %p2333_p9, %p2332_p8 }
  0x39   : > { %p2339_p4 = por %p2338_p2, %p2337_p12 }
  0x3a   : > { %p2335_p11 = pneg %p2334_p10 }
  0x3c   : > { %p2340_p5 = pnand %p2339_p4, %p2335_p11 }
  0x3e   : > { %2343 = shalt.err (!%p2340_p5)
}
  0x3f   : > { %2236 = dma.hbm_to_vmem [thread:$0]  (!%p2681_p7), %s546_s16, 128, %s548_s14, %s535_s9  }
  0x40   : > { %s565_s23 = sshll.u32 %s563_s25, 4  ;;  %s558_s24 = scalar_lea.vmem [#allocation6], %s2179_s19  ;;  %s566_s23 = int_to_ptr.hbm [resolvable:$true] %s565_s23 }
  0x41   : > { %s567_s1 = sshll.u32 %s558_s24, 4  ;;  %s555_s30 = scalar_lea.sflag [#allocation7], %s554_s12  ;;  %s568_s1 = int_to_ptr.vmem [resolvable:$true] %s567_s1 }
  0x42   : > { %s2359_s13 = sshra.s32 %s566_s23, 4  ;;  %s2366_s27 = scalar_lea.hbm %s3562_s11, 16  ;;  %s2360_s13 = int_to_ptr.hbm [resolvable:$true] %s2359_s13 }
  0x43   : > { %s2361_s18 = scalar_lea.hbm %s2360_s13, 8  ;;  %p2367_p5 = scmp.lt.s32.totalorder %s2360_s13, %s3562_s11 }
  0x44   : > { %p2362_p8 = scmp.ne.s32.totalorder %s2360_s13, %s2361_s18  ;;  %p2368_p11 = scmp.lt.s32.totalorder %s2366_s27, %s2361_s18 }
  0x46   : > { %p2364_p10 = pnand %p2362_p8, %p2333_p9  ;;  %p2369_p2 = por %p2368_p11, %p2367_p5 }
  0x48   : > { %p2365_p12 = pneg %p2364_p10 }
  0x4a   : > { %p2370_p4 = pnand %p2369_p2, %p2365_p12 }
  0x4c   : > { %2373 = shalt.err (!%p2370_p4)
}
  0x4d   : > { %2239 = dma.hbm_to_vmem [thread:$0]  (!%p2681_p7), %s566_s23, 128, %s568_s1, %s555_s30  }
  0x4e   : > { %576 = sbr.rel (%p2630_p3) target bundleno = 2998 (0xbb6), region = 88  ;;  %s2716_s12 = sand.u32 (!%p2630_p3), 1, %s2487_s28  }
  0x4f   : > { %s2719_s14 = sshll.u32 (!%p2630_p3), %s2716_s12, 3  ;;  %s579_s16 = scalar_lea.sflag (!%p2630_p3), [#allocation4], %s2716_s12 }
  0x50   : > { %s582_s25 = scalar_lea.vmem (!%p2630_p3), [#allocation3], %s2719_s14 }
  0x53   : > { %2462 = dma.done.wait (%p2661_p13), %s579_s16, 128  }
  0x54   : > { %2464 = vsyncadd (%p2661_p13), %s579_s16, 4294967168  ;;  %s588_s30 = sand.u32 1, %s2625_s21   ;;  %s592_s19 = scalar_lea.vmem [#allocation6], %s2719_s14 }
  0x55   : > { %s589_s22 = scalar_lea.sflag [#allocation7], %s588_s30 }
  0x56   : > { %2466 = dma.done.wait (%p2661_p13), %s589_s22, 128  }
  0x57   : > { %2468 = vsyncadd (%p2661_p13), %s589_s22, 4294967168 }
  0x58   : > { %2470 = dma.done.wait (%p62_p1), [#allocation7], 512  }
  0x59   : > { %2472 = vsyncadd (%p62_p1), [#allocation7], 4294966784  ;;  %v702_v0 = vld [vmem:[%s582_s25] sm:$0xff]  ;;  %s2500_s26 = smov 16   ;;  %v703_v9 = vld [vmem:[%s592_s19] sm:$0xff]  ;;  %s2501_s20 = smov 112   ;;  %v714_v20 = vlaneseq }
  0x5a   : > { %705 = vst [vmem:[#allocation1] ss:$2 sm:$0xff] %v702_v0  ;;  %s2502_s2 = smov 127   ;;  %v2503_v23 = vmov 0.0   ;;  %v2762_v24 = vld [vmem:[#allocation8] sm:$0xff]  ;;  %v2764_v25 = vld [vmem:[#allocation8 + $0x8] sm:$0xff] }
  0x5b   : > { %v2760_v22 = vand.u32 127, %v714_v20  ;;  %682 = vst [vmem:[#allocation2 + $0x20] sm:$0xf0] %v2503_v23  ;;  %v2768_v26 = vperm.slane %v2762_v24, 1  ;;  %v2771_v27 = vperm.slane %v2764_v25, 1  ;;  %v2782_v34 = vperm.slane %v2764_v25, 7 }
  0x5c   : > { %666 = vst [vmem:[#allocation2 + $0xb0] sm:$0xf0] %v2503_v23  ;;  %v2785_v35 = vperm.slane %v2762_v24, 7  ;;  %s2504_s23 = smov 1   ;;  %v2807_v42 = vld [vmem:[#allocation8 + $0x10] ss:$0 sm:$0xff] }
  0x5d   : > { %667 = vst [vmem:[#allocation2 + $0xd0] sm:$0xf0] %v2503_v23  ;;  %vm716_vm0 = vcmp.lt.s32.totalorder %v2760_v22, 16  ;;  %vm801_vm1 = vcmp.lt.s32.totalorder %v2760_v22, 112  ;;  %vm742_vm2 = vcmp.lt.s32.totalorder %v2760_v22, 127  ;;  %v2818_v50 = vperm.slane %v2762_v24, 5 }
  0x5e   : > { %668 = vst [vmem:[#allocation2 + $0x10] sm:$0xf0] %v2503_v23  ;;  %v2809_v43 = vld [vmem:[#allocation8 + $0x18] ss:$0 sm:$0xff]  ;;  %v2821_v51 = vperm.slane %v2764_v25, 5  ;;  %vm873_vm3 = vcmask 1043456  }
  0x5f   : > { %669 = vst [vmem:[#allocation2 + $0x48] sm:$0xf0] %v2503_v23  ;;  %vm723_vm4 = vcmp.lt.s32.totalorder %v2760_v22, 1  ;;  %v2831_v62 = vperm.slane %v2762_v24, 6  ;;  %vm869_vm5 = vcmask 588800   ;;  %vm1164_vm6 = vcmask 130048  }
  0x60   : > { %670 = vst [vmem:[#allocation2 + $0x108] sm:$0xf0] %v2503_v23  ;;  %s3563_s13 = sld [smem:[#allocation27_spill]]  ;;  %s653_s1 = scalar_lea.vmem [#allocation9], %s2719_s14 }
  0x61   : > { %v706_v1 = vld.sshfl [vmem:[#allocation1] sm:$0xff pattern:$0x75316420]  ;;  %v707_v2 = vld.sshfl [vmem:[#allocation1 + $0x8] sm:$0xff pattern:$0x75316420] }
  0x62   : > { %710 = vrot.lane.b32.xlu1 %v706_v1, %s2500_s26  ;;  %751 = vst [vmem:[#allocation1] ss:$2 sm:$0xff] %v702_v0  ;;  %v2838_v1 = vperm.slane %v2764_v25, 2  ;;  %s3564_s15 = sld [smem:[#allocation29_spill]]  ;;  %s2022_s25 = sshll.u32 %s653_s1, 4  ;;  %s2023_s25 = int_to_ptr.vmem [resolvable:$true] %s2022_s25 }
  0x63   : > { %671 = vst [vmem:[#allocation2 + $0x68] sm:$0xf0] %v2503_v23  ;;  %s3565_s9 = sld [smem:[#allocation28_spill]]  ;;  %s2004_s22 = scalar_lea.sflag [#allocation5], %s2716_s12 }
  0x64   : > { %672 = vst [vmem:[#allocation2 + $0x30] sm:$0xf0] %v2503_v23  ;;  %s3566_s30 = sld [smem:[#allocation31_spill]] }
  0x65   : > { %673 = vst [vmem:[#allocation2 + $0x18] sm:$0xf0] %v2503_v23  ;;  %s3567_s24 = sld [smem:[#allocation30_spill]] }
  0x66   : > { %674 = vst [vmem:[#allocation2 + $0x80] sm:$0xf0] %v2503_v23  ;;  %s3569_s18 = sld [smem:[#allocation32_spill]] }
  0x67   : > { %675 = vst [vmem:[#allocation2 + $0x110] sm:$0xf0] %v2503_v23 }
  0x68   : > { %676 = vst [vmem:[#allocation2 + $0x118] sm:$0xf0] %v2503_v23 }
  0x69   : > { %v2738_v3 = vld.sshfl [vmem:[#allocation1] sm:$0xff pattern:$0x75316420]  ;;  %v2740_v4 = vld.sshfl [vmem:[#allocation1 + $0x8] sm:$0xff pattern:$0x75316420] }
  0x6a   : > { %712 = vrot.lane.b32.xlu1 %v707_v2, %s2500_s26  ;;  %768 = vst [vmem:[#allocation1] ss:$2 sm:$0xff] %v702_v0  ;;  %v2841_v2 = vperm.slane %v2764_v25, 6 }
  0x6b   : > { %677 = vst [vmem:[#allocation2 + $0x98] sm:$0xf0] %v2503_v23 }
  0x6c   : > { %678 = vst [vmem:[#allocation2 + $0xf8] sm:$0xf0] %v2503_v23 }
  0x6d   : > { %679 = vst [vmem:[#allocation2 + $0x38] sm:$0xf0] %v2503_v23 }
  0x6e   : > { %680 = vst [vmem:[#allocation2 + $0x8] sm:$0xf0] %v2503_v23 }
  0x6f   : > { %681 = vst [vmem:[#allocation2 + $0x78] sm:$0xf0] %v2503_v23 }
  0x70   : > { %683 = vst [vmem:[#allocation2 + $0xc8] sm:$0xf0] %v2503_v23 }
  0x71   : > { %v769_v5 = vld.sshfl [vmem:[#allocation1] sm:$0xff pattern:$0x75316420]  ;;  %v770_v6 = vld.sshfl [vmem:[#allocation1 + $0x8] sm:$0xff pattern:$0x75316420] }
  0x72   : > { %775 = vst [vmem:[#allocation1] ss:$2 sm:$0xff] %v702_v0 }
  0x73   : > { %773 = vst [vmem:[#allocation2 + $0x80] sm:$0xf] %v769_v5 }
  0x74   : > { %774 = vst [vmem:[#allocation2 + $0x110] sm:$0xf] %v770_v6 }
  0x75   : > { %684 = vst [vmem:[#allocation2 + $0x90] sm:$0xf0] %v2503_v23 }
  0x76   : > { %685 = vst [vmem:[#allocation2 + $0xa0] sm:$0xf0] %v2503_v23 }
  0x77   : > { %686 = vst [vmem:[#allocation2 + $0x70] sm:$0xf0] %v2503_v23 }
  0x78   : > { %687 = vst [vmem:[#allocation2 + $0x58] sm:$0xf0] %v2503_v23 }
  0x79   : > { %v2743_v7 = vld.sshfl [vmem:[#allocation1] sm:$0xff pattern:$0x75316420]  ;;  %v777_v8 = vld.sshfl [vmem:[#allocation1 + $0x8] sm:$0xff pattern:$0x75316420] }
  0x7a   : > { %792 = vst [vmem:[#allocation1] ss:$2 sm:$0xff] %v702_v0  ;;  %v2835_v0 = vperm.slane %v2762_v24, 2 }
  0x7b   : > { %688 = vst [vmem:[#allocation2 + $0xe0] sm:$0xf0] %v2503_v23 }
  0x7c   : > { %689 = vst [vmem:[#allocation2 + $0x60] sm:$0xf0] %v2503_v23 }
  0x7d   : > { %690 = vst [vmem:[#allocation2 + $0xa8] sm:$0xf0] %v2503_v23 }
  0x7e   : > { %691 = vst [vmem:[#allocation2 + $0x88] sm:$0xf0] %v2503_v23 }
  0x7f   : > { %692 = vst [vmem:[#allocation2 + $0xd8] sm:$0xf0] %v2503_v23 }
  0x80   : > { %693 = vst [vmem:[#allocation2 + $0xc0] sm:$0xf0] %v2503_v23 }
  0x81   : > { %v793_v10 = vld.sshfl [vmem:[#allocation1] sm:$0xff pattern:$0x75316420]  ;;  %v794_v11 = vld.sshfl [vmem:[#allocation1 + $0x8] sm:$0xff pattern:$0x75316420] }
  0x82   : > { %797 = vrot.lane.b32.xlu0 %v793_v10, %s2501_s20  ;;  %991 = vst [vmem:[#allocation1] ss:$2 sm:$0xff] %v703_v9 }
  0x83   : > { %694 = vst [vmem:[#allocation2 + $0x50] sm:$0xf0] %v2503_v23 }
  0x84   : > { %695 = vst [vmem:[#allocation2 + $0xf0] sm:$0xf0] %v2503_v23 }
  0x85   : > { %696 = vst [vmem:[#allocation2 + $0xb8] sm:$0xf0] %v2503_v23 }
  0x86   : > { %697 = vst [vmem:[#allocation2 + $0x28] sm:$0xf0] %v2503_v23 }
  0x87   : > { %698 = vst [vmem:[#allocation2 + $0x100] sm:$0xf0] %v2503_v23 }
  0x88   : > { %699 = vst [vmem:[#allocation2] sm:$0xf0] %v2503_v23 }
  0x89   : > { %v2746_v12 = vld.sshfl [vmem:[#allocation1] sm:$0xff pattern:$0x75316420]  ;;  %v2748_v13 = vld.sshfl [vmem:[#allocation1 + $0x8] sm:$0xff pattern:$0x75316420] }
  0x8a   : > { %799 = vrot.lane.b32.xlu0 %v794_v11, %s2501_s20  ;;  %1026 = vst [vmem:[#allocation1] ss:$2 sm:$0xff] %v703_v9 }
  0x8b   : > { %700 = vst [vmem:[#allocation2 + $0x40] sm:$0xf0] %v2503_v23 }
  0x8c   : > { %701 = vst [vmem:[#allocation2 + $0xe8] sm:$0xf0] %v2503_v23 }
  0x91   : > { %v2751_v14 = vld.sshfl [vmem:[#allocation1] sm:$0xff pattern:$0x75316420]  ;;  %v2753_v15 = vld.sshfl [vmem:[#allocation1 + $0x8] sm:$0xff pattern:$0x75316420] }
  0x92   : > { %1041 = vst [vmem:[#allocation1] ss:$2 sm:$0xff] %v703_v9  ;;  %782 = vrot.lane.b32.xlu0 %v777_v8, %s2502_s2 }
  0x99   : > { %v1042_v16 = vld.sshfl [vmem:[#allocation1] sm:$0xff pattern:$0x75316420]  ;;  %v1043_v17 = vld.sshfl [vmem:[#allocation1 + $0x8] sm:$0xff pattern:$0x75316420] }
  0x9a   : > { %1048 = vst [vmem:[#allocation1] ss:$2 sm:$0xff] %v703_v9 }
  0x9b   : > { %1046 = vst [vmem:[#allocation2 + $0xd8] sm:$0xf] %v1042_v16 }
  0x9c   : > { %1047 = vst [vmem:[#allocation2 + $0xc0] sm:$0xf] %v1043_v17  ;;  %v863_v17 = vld [vmem:[%s3507_s4] sm:$0xf] }
  0xa1   : > { %v2756_v18 = vld.sshfl [vmem:[#allocation1] sm:$0xff pattern:$0x75316420]  ;;  %v2758_v19 = vld.sshfl [vmem:[#allocation1 + $0x8] sm:$0xff pattern:$0x75316420] }
  0xa2   : > { %1063 = vst [vmem:[#allocation1] ss:$2 sm:$0xff] %v703_v9 }
  0xa9   : > { %v1065_v16 = vld.sshfl [vmem:[#allocation1 + $0x8] sm:$0xff pattern:$0x75316420] }
  0xd4   : > { %v711_v21 = vpop.permute.xlu1 %710 }
  0xdc   : > { %v713_v28 = vpop.permute.xlu1 %712 }
  0xdd   : > { %v718_v29 = vsel %vm716_vm0, %v713_v28, %v711_v21  ;;  %v717_v30 = vsel %vm716_vm0, %v711_v21, %v713_v28  ;;  %v1064_v28 = vld.sshfl [vmem:[#allocation1] sm:$0xff pattern:$0x75316420] }
  0xde   : > { %738 = vrot.lane.b32.xlu1 %v718_v29, %s2502_s2  ;;  %v734_v31 = vmul.f32 %v2768_v26, %v718_v29  ;;  %v735_v32 = vmul.f32 %v2771_v27, %v717_v30 }
  0xe0   : > { %736 = vst [vmem:[#allocation2 + $0x10] sm:$0xf] %v734_v31  ;;  %v2865_v31 = vperm.slane %v2764_v25, 3 }
  0xe1   : > { %737 = vst [vmem:[#allocation2 + $0x48] sm:$0xf] %v735_v32 }
  0xf4   : > { %v798_v33 = vpop.permute.xlu0 %797 }
  0xfc   : > { %v800_v36 = vpop.permute.xlu0 %799 }
  0xfd   : > { %v803_v37 = vsel %vm801_vm1, %v800_v36, %v798_v33  ;;  %v802_v38 = vsel %vm801_vm1, %v798_v33, %v800_v36 }
  0xfe   : > { %806 = vrot.lane.b32.xlu1 %v803_v37, %s2504_s23  ;;  %v819_v39 = vmul.f32 %v2782_v34, %v803_v37  ;;  %804 = vrot.lane.b32.xlu0 %v802_v38, %s2504_s23  ;;  %v818_v40 = vmul.f32 %v2785_v35, %v802_v38 }
  0xff   : > { %822 = vrot.lane.b32.xlu2 %v802_v38, %s2502_s2 }
 0x100   : > { %821 = vst [vmem:[#allocation2 + $0x78] sm:$0xf] %v819_v39 }
 0x101   : > { %820 = vst [vmem:[#allocation2 + $0x8] sm:$0xf] %v818_v40 }
 0x104   : > { %v783_v49 = vpop.permute.xlu0 %782 }
 0x106   : > { %758 = vrot.lane.b32.xlu1 %v2740_v4, %s2504_s23  ;;  %756 = vrot.lane.b32.xlu0 %v2738_v3, %s2504_s23 }
 0x107   : > { %824 = vrot.lane.b32.xlu2 %v803_v37, %s2502_s2 }
 0x10e   : > { %721 = vrot.lane.b32.xlu0 %v717_v30, %s2504_s23 }
 0x10f   : > { %780 = vrot.lane.b32.xlu2 %v2743_v7, %s2502_s2 }
 0x116   : > { %1070 = vrot.lane.b32.xlu0 %v1065_v16, %s2501_s20 }
 0x117   : > { %740 = vrot.lane.b32.xlu2 %v717_v30, %s2502_s2  ;;  %v2862_v30 = vperm.slane %v2762_v24, 3 }
 0x11f   : > { %719 = vrot.lane.b32.xlu2 %v718_v29, %s2504_s23  ;;  %v2505_v29 = vmov 0  }
 0x120   : > { %2292 = vset.pattern.permute.xlu1 %v2505_v29  ;;  %2293 = vset.pattern.permute.xlu0 %v2505_v29 }
 0x121   : > { %866 = vperm.xlu1 %2292, %v863_v17   ;;  %2294 = vset.pattern.permute.xlu2 %v2505_v29 }
 0x127   : > { %1068 = vrot.lane.b32.xlu2 %v1064_v28, %s2501_s20 }
 0x129   : > { %996 = vrot.lane.b32.xlu1 %v2746_v12, %s2500_s26 }
 0x12f   : > { %998 = vrot.lane.b32.xlu2 %v2748_v13, %s2500_s26  ;;  %v844_v13 = vld [vmem:[#allocation2 + $0x110] sm:$0xff] }
 0x131   : > { %1053 = vrot.lane.b32.xlu1 %v2756_v18, %s2502_s2 }
 0x137   : > { %1055 = vrot.lane.b32.xlu2 %v2758_v19, %s2502_s2  ;;  %v834_v19 = vld [vmem:[%s3506_s3] sm:$0x3] }
 0x13f   : > { %1031 = vrot.lane.b32.xlu2 %v2751_v14, %s2504_s23 }
 0x150   : > { %v739_v52 = vpop.permute.xlu1 %738 }
 0x159   : > { %v823_v41 = vpop.permute.xlu2 %822 }
 0x161   : > { %v825_v44 = vpop.permute.xlu2 %824 }
 0x162   : > { %v826_v45 = vsel %vm742_vm2, %v823_v41, %v825_v44  ;;  %v827_v46 = vsel %vm742_vm2, %v825_v44, %v823_v41  ;;  %v849_v41 = vld [vmem:[#allocation2 + $0x8] sm:$0xff] }
 0x163   : > { %v830_v47 = vmul.f32 %v2807_v42, %v826_v45  ;;  %v831_v48 = vmul.f32 %v2809_v43, %v827_v46  ;;  %v843_v45 = vld [vmem:[#allocation2 + $0x80] sm:$0xff] }
 0x165   : > { %832 = vst [vmem:[#allocation2 + $0x20] sm:$0xf] %v830_v47 }
 0x166   : > { %833 = vst [vmem:[#allocation2 + $0xc8] sm:$0xf] %v831_v48  ;;  %v850_v48 = vld [vmem:[#allocation2 + $0x78] sm:$0xff] }
 0x169   : > { %v781_v53 = vpop.permute.xlu2 %780 }
 0x16a   : > { %v784_v54 = vsel %vm742_vm2, %v781_v53, %v783_v49  ;;  %v785_v55 = vsel %vm742_vm2, %v783_v49, %v781_v53  ;;  %v2878_v49 = vperm.slane %v2762_v24, 0 }
 0x16b   : > { %v788_v56 = vmul.f32 %v2818_v50, %v784_v54  ;;  %v789_v57 = vmul.f32 %v2821_v51, %v785_v55 }
 0x16c   : > { %v851_v58 = vld [vmem:[#allocation2 + $0x20] sm:$0xff] }
 0x16d   : > { %790 = vst [vmem:[#allocation2 + $0x118] sm:$0xf] %v788_v56  ;;  %v861_v59 = vpack.c.bf16 %v851_v58, %v851_v58  ;;  %v852_v60 = vld [vmem:[#allocation2 + $0xc8] sm:$0xff] }
 0x16e   : > { %791 = vst [vmem:[#allocation2 + $0x98] sm:$0xf] %v789_v57  ;;  %v862_v61 = vpack.c.bf16 %v852_v60, %v852_v60 }
 0x16f   : > { %v875_v63 = vsel %vm873_vm3, %v861_v59, 0 }
 0x170   : > { %883 = vmatpush.bf16.msra.mxu0 %v875_v63  ;;  %v878_v3 = vsel %vm873_vm3, %v862_v61, 0  ;;  %v807_v4 = vpop.permute.xlu1 %806  ;;  %v805_v5 = vpop.permute.xlu0 %804 }
 0x171   : > { %896 = vmatpush.bf16.msra.mxu1 %v878_v3  ;;  %v741_v6 = vpop.permute.xlu2 %740  ;;  %v808_v7 = vsel %vm723_vm4, %v805_v5, %v807_v4  ;;  %v809_v8 = vsel %vm723_vm4, %v807_v4, %v805_v5 }
 0x172   : > { %v743_v9 = vsel %vm742_vm2, %v739_v52, %v741_v6  ;;  %v744_v10 = vsel %vm742_vm2, %v741_v6, %v739_v52  ;;  %v812_v11 = vmul.f32 %v2831_v62, %v809_v8  ;;  %v813_v23 = vmul.f32 %v2841_v2, %v808_v7  ;;  %v837_v7 = vld [vmem:[#allocation2 + $0x10] sm:$0xff] }
 0x173   : > { %v747_v20 = vmul.f32 %v2835_v0, %v743_v9  ;;  %v748_v21 = vmul.f32 %v2838_v1, %v744_v10  ;;  %v2881_v52 = vperm.slane %v2764_v25, 0  ;;  %v838_v10 = vld [vmem:[#allocation2 + $0x48] sm:$0xff] }
 0x174   : > { %814 = vst [vmem:[#allocation2 + $0xf8] sm:$0xf] %v812_v11  ;;  %v845_v46 = vld [vmem:[#allocation2 + $0x118] sm:$0xff] }
 0x175   : > { %749 = vst [vmem:[#allocation2 + $0x108] sm:$0xf] %v747_v20  ;;  %v857_v56 = vpack.c.bf16 %v845_v46, %v843_v45  ;;  %v846_v57 = vld [vmem:[#allocation2 + $0x98] sm:$0xff] }
 0x176   : > { %750 = vst [vmem:[#allocation2 + $0x68] sm:$0xf] %v748_v21  ;;  %v858_v25 = vpack.c.bf16 %v846_v57, %v844_v13 }
 0x177   : > { %815 = vst [vmem:[#allocation2 + $0x38] sm:$0xf] %v813_v23 }
 0x178   : > { %v759_v32 = vpop.permute.xlu1 %758  ;;  %v757_v33 = vpop.permute.xlu0 %756 }
 0x179   : > { %v760_v36 = vsel %vm723_vm4, %v757_v33, %v759_v32  ;;  %v761_v37 = vsel %vm723_vm4, %v759_v32, %v757_v33  ;;  %v720_v54 = vpop.permute.xlu2 %719 }
 0x17a   : > { %v764_v38 = vmul.f32 %v2862_v30, %v761_v37  ;;  %v765_v39 = vmul.f32 %v2865_v31, %v760_v36 }
 0x17b   : > { %v847_v40 = vld [vmem:[#allocation2 + $0xf8] sm:$0xff] }
 0x17c   : > { %766 = vst [vmem:[#allocation2 + $0x30] sm:$0xf] %v764_v38  ;;  %v859_v44 = vpack.c.bf16 %v849_v41, %v847_v40  ;;  %v839_v60 = vld [vmem:[#allocation2 + $0x108] sm:$0xff] }
 0x17d   : > { %767 = vst [vmem:[#allocation2 + $0x18] sm:$0xf] %v765_v39  ;;  %v840_v3 = vld [vmem:[#allocation2 + $0x68] sm:$0xff] }
 0x17e   : > { %884 = vmatpush.bf16.msra.mxu0 %v859_v44  ;;  %v848_v47 = vld [vmem:[#allocation2 + $0x38] sm:$0xff] }
 0x17f   : > { %v860_v53 = vpack.c.bf16 %v850_v48, %v848_v47 }
 0x180   : > { %v722_v55 = vpop.permute.xlu0 %721 }
 0x181   : > { %897 = vmatpush.bf16.msra.mxu1 %v860_v53  ;;  %v724_v58 = vsel %vm723_vm4, %v720_v54, %v722_v55  ;;  %v725_v12 = vsel %vm723_vm4, %v722_v55, %v720_v54  ;;  %v1069_v18 = vpop.permute.xlu2 %1068 }
 0x182   : > { %v728_v59 = vmul.f32 %v2878_v49, %v725_v12  ;;  %v729_v24 = vmul.f32 %v2881_v52, %v724_v58  ;;  %885 = vmatpush.bf16.msra.mxu0 %v857_v56 }
 0x183   : > { %v841_v61 = vld [vmem:[#allocation2 + $0x30] sm:$0xff] }
 0x184   : > { %730 = vst [vmem:[#allocation2 + $0xb0] sm:$0xf] %v728_v59  ;;  %v855_v63 = vpack.c.bf16 %v841_v61, %v839_v60  ;;  %v842_v4 = vld [vmem:[#allocation2 + $0x18] sm:$0xff] }
 0x185   : > { %731 = vst [vmem:[#allocation2 + $0xd0] sm:$0xf] %v729_v24  ;;  %898 = vmatpush.bf16.msra.mxu1 %v858_v25  ;;  %v856_v5 = vpack.c.bf16 %v842_v4, %v840_v3 }
 0x186   : > { %886 = vmatpush.bf16.msra.mxu0 %v855_v63 }
 0x188   : > { %v1071_v16 = vpop.permute.xlu0 %1070 }
 0x189   : > { %899 = vmatpush.bf16.msra.mxu1 %v856_v5  ;;  %v1072_v17 = vsel %vm801_vm1, %v1069_v18, %v1071_v16  ;;  %v1073_v20 = vsel %vm801_vm1, %v1071_v16, %v1069_v18  ;;  %v999_v29 = vpop.permute.xlu2 %998 }
 0x18a   : > { %1074 = vrot.lane.b32.xlu0 %v1072_v17, %s2504_s23  ;;  %v1084_v14 = vmul.f32 %v1072_v17, %v2785_v35  ;;  %v1085_v21 = vmul.f32 %v1073_v20, %v2782_v34 }
 0x18b   : > { %v835_v6 = vld [vmem:[#allocation2 + $0xb0] sm:$0xff] }
 0x18c   : > { %v853_v8 = vpack.c.bf16 %v837_v7, %v835_v6  ;;  %v836_v9 = vld [vmem:[#allocation2 + $0xd0] sm:$0xff]  ;;  %1086 = vst [vmem:[#allocation2 + $0x100] sm:$0xf] %v1084_v14 }
 0x18d   : > { %v854_v11 = vpack.c.bf16 %v838_v10, %v836_v9  ;;  %1087 = vst [vmem:[#allocation2] sm:$0xf] %v1085_v21 }
 0x18e   : > { %887 = vmatpush.bf16.msra.mxu0 %v853_v8 }
 0x18f   : > { %900 = vmatpush.bf16.msra.mxu1 %v854_v11 }
 0x191   : > { %2191 = vmatmul.msk.bf16.vlgmr.msra.gmra.mxu0 %vm869_vm5, %v834_v19 }
 0x192   : > { %2192 = vmatmul.msk.bf16.vlgmr.msra.gmra.mxu1 %vm869_vm5, %v834_v19 }
 0x193   : > { %v867_v23 = vpop.permute.xlu1 %866 }
 0x19b   : > { %v997_v28 = vpop.permute.xlu1 %996 }
 0x19c   : > { %v1000_v32 = vsel %vm716_vm0, %v997_v28, %v999_v29  ;;  %v1001_v36 = vsel %vm716_vm0, %v999_v29, %v997_v28 }
 0x19d   : > { %v1013_v33 = vmul.f32 %v1000_v32, %v2771_v27  ;;  %v1012_v37 = vmul.f32 %v1001_v36, %v2768_v26 }
 0x19f   : > { %1015 = vst [vmem:[#allocation2 + $0x58] sm:$0xf] %v1013_v33 }
 0x1a0   : > { %1014 = vst [vmem:[#allocation2 + $0x70] sm:$0xf] %v1012_v37 }
 0x1a3   : > { %v1054_v48 = vpop.permute.xlu1 %1053 }
 0x1fc   : > { %v1075_v57 = vpop.permute.xlu0 %1074 }
 0x20e   : > { %v889_v38 = vpop.f32.mrf.mxu0 }
 0x20f   : > { %v890_v39 = vadd.f32 %v889_v38, %v867_v23  ;;  %v902_v40 = vpop.f32.mrf.mxu1 }
 0x210   : > { %v903_v41 = vadd.f32 %v902_v40, %v867_v23 }
 0x211   : > { %v2913_v44 = vmax.f32 %v890_v39, 0.0 }
 0x212   : > { %v2915_v45 = vmax.f32 %v903_v41, 0.0  ;;  %v1125_v41 = vld [vmem:[#allocation2 + $0xd8] sm:$0xff] }
 0x213   : > { %948 = vst [vmem:[#allocation2 + $0x80] sm:$0xf] %v2913_v44  ;;  %908 = vrot.lane.b32.xlu2 %v2913_v44, %s2500_s26  ;;  %960 = vrot.lane.b32.xlu0 %v2913_v44, %s2501_s20 }
 0x214   : > { %949 = vst [vmem:[#allocation2 + $0x110] sm:$0xf] %v2915_v45  ;;  %962 = vrot.lane.b32.xlu1 %v2915_v45, %s2501_s20 }
 0x216   : > { %v891_v46 = vpop.f32.mrf.mxu0 }
 0x217   : > { %v904_v47 = vpop.f32.mrf.mxu1 }
 0x21b   : > { %1018 = vrot.lane.b32.xlu2 %v1000_v32, %s2502_s2  ;;  %1033 = vrot.lane.b32.xlu0 %v2753_v15, %s2504_s23  ;;  %v1056_v15 = vpop.permute.xlu2 %1055 }
 0x21c   : > { %1076 = vrot.lane.b32.xlu1 %v1073_v20, %s2504_s23  ;;  %v1057_v53 = vsel %vm742_vm2, %v1054_v48, %v1056_v15  ;;  %v1058_v54 = vsel %vm742_vm2, %v1056_v15, %v1054_v48 }
 0x21d   : > { %v1059_v55 = vmul.f32 %v1057_v53, %v2818_v50  ;;  %v1060_v56 = vmul.f32 %v1058_v54, %v2821_v51 }
 0x21f   : > { %1061 = vst [vmem:[#allocation2 + $0x50] sm:$0xf] %v1059_v55 }
 0x220   : > { %1062 = vst [vmem:[#allocation2 + $0xf0] sm:$0xf] %v1060_v56 }
 0x223   : > { %1002 = vrot.lane.b32.xlu2 %v1001_v36, %s2504_s23  ;;  %910 = vrot.lane.b32.xlu0 %v2915_v45, %s2500_s26  ;;  %v1032_v13 = vpop.permute.xlu2 %1031 }
 0x224   : > { %1016 = vrot.lane.b32.xlu1 %v1001_v36, %s2502_s2 }
 0x226   : > { %v1127_v36 = vld [vmem:[#allocation2 + $0x50] sm:$0xff] }
 0x22b   : > { %1090 = vrot.lane.b32.xlu2 %v1073_v20, %s2502_s2  ;;  %1004 = vrot.lane.b32.xlu0 %v1000_v32, %s2504_s23 }
 0x22c   : > { %1088 = vrot.lane.b32.xlu1 %v1072_v17, %s2502_s2 }
 0x233   : > { %950 = vrot.lane.b32.xlu2 %v2913_v44, %s2502_s2  ;;  %952 = vrot.lane.b32.xlu0 %v2915_v45, %s2502_s2 }
 0x26d   : > { %v909_v58 = vpop.permute.xlu2 %908 }
 0x275   : > { %v1019_v24 = vpop.permute.xlu2 %1018 }
 0x27d   : > { %v1003_v18 = vpop.permute.xlu2 %1002 }
 0x285   : > { %v961_v12 = vpop.permute.xlu0 %960  ;;  %v1091_v39 = vpop.permute.xlu2 %1090 }
 0x286   : > { %v963_v59 = vpop.permute.xlu1 %962 }
 0x287   : > { %v965_v25 = vsel %vm801_vm1, %v963_v59, %v961_v12  ;;  %v964_v60 = vsel %vm801_vm1, %v961_v12, %v963_v59 }
 0x288   : > { %982 = vrot.lane.b32.xlu1 %v965_v25, %s2502_s2  ;;  %v977_v61 = vmul.f32 %v965_v25, %v2782_v34  ;;  %980 = vrot.lane.b32.xlu0 %v964_v60, %s2502_s2  ;;  %v976_v63 = vmul.f32 %v964_v60, %v2785_v35 }
 0x28a   : > { %979 = vst [vmem:[#allocation2 + $0x78] sm:$0xf] %v977_v61 }
 0x28b   : > { %978 = vst [vmem:[#allocation2 + $0x8] sm:$0xf] %v976_v63 }
 0x28d   : > { %v1034_v3 = vpop.permute.xlu0 %1033 }
 0x28e   : > { %v1077_v4 = vpop.permute.xlu1 %1076  ;;  %v1035_v5 = vsel %vm723_vm4, %v1032_v13, %v1034_v3  ;;  %v1036_v6 = vsel %vm723_vm4, %v1034_v3, %v1032_v13 }
 0x28f   : > { %v1078_v7 = vsel %vm723_vm4, %v1075_v57, %v1077_v4  ;;  %v1079_v8 = vsel %vm723_vm4, %v1077_v4, %v1075_v57  ;;  %v1037_v9 = vmul.f32 %v1036_v6, %v2862_v30  ;;  %v1038_v19 = vmul.f32 %v1035_v5, %v2865_v31  ;;  %v1131_v5 = vld [vmem:[#allocation2 + $0x100] sm:$0xff] }
 0x290   : > { %v1080_v10 = vmul.f32 %v1079_v8, %v2831_v62  ;;  %v1081_v11 = vmul.f32 %v1078_v7, %v2841_v2  ;;  %968 = vrot.lane.b32.xlu1 %v965_v25, %s2504_s23  ;;  %966 = vrot.lane.b32.xlu0 %v964_v60, %s2504_s23  ;;  %v1153_v60 = vld [vmem:[%s3509_s6] sm:$0xf]  ;;  %v1132_v8 = vld [vmem:[#allocation2] sm:$0xff] }
 0x291   : > { %1039 = vst [vmem:[#allocation2 + $0xa8] sm:$0xf] %v1037_v9 }
 0x292   : > { %1082 = vst [vmem:[#allocation2 + $0xb8] sm:$0xf] %v1080_v10  ;;  %v1128_v10 = vld [vmem:[#allocation2 + $0xf0] sm:$0xff] }
 0x293   : > { %1083 = vst [vmem:[#allocation2 + $0x28] sm:$0xf] %v1081_v11 }
 0x294   : > { %1040 = vst [vmem:[#allocation2 + $0x88] sm:$0xf] %v1038_v19 }
 0x295   : > { %v911_v16 = vpop.permute.xlu0 %910 }
 0x296   : > { %v1017_v17 = vpop.permute.xlu1 %1016  ;;  %v913_v14 = vsel %vm716_vm0, %v911_v16, %v909_v58  ;;  %v912_v20 = vsel %vm716_vm0, %v909_v58, %v911_v16  ;;  %v1119_v58 = vld [vmem:[#allocation2 + $0x70] sm:$0xff]  ;;  %v1126_v16 = vld [vmem:[#allocation2 + $0xc0] sm:$0xff] }
 0x297   : > { %v1020_v21 = vsel %vm742_vm2, %v1017_v17, %v1019_v24  ;;  %v1021_v23 = vsel %vm742_vm2, %v1019_v24, %v1017_v17  ;;  %v924_v28 = vmul.f32 %v913_v14, %v2768_v26  ;;  %930 = vrot.lane.b32.xlu2 %v912_v20, %s2502_s2  ;;  %v925_v33 = vmul.f32 %v912_v20, %v2771_v27  ;;  %v951_v24 = vpop.permute.xlu2 %950 }
 0x298   : > { %v1022_v29 = vmul.f32 %v1020_v21, %v2835_v0  ;;  %v1023_v32 = vmul.f32 %v1021_v23, %v2838_v1  ;;  %938 = vrot.lane.b32.xlu0 %v2913_v44, %s2504_s23  ;;  %928 = vrot.lane.b32.xlu1 %v913_v14, %s2502_s2  ;;  %v1123_v40 = vld [vmem:[#allocation2 + $0xa8] sm:$0xff]  ;;  %v1098_v23 = vld [vmem:[%s3508_s5] sm:$0xf] }
 0x299   : > { %926 = vst [vmem:[#allocation2 + $0x10] sm:$0xf] %v924_v28  ;;  %v1129_v37 = vld [vmem:[#allocation2 + $0xb8] sm:$0xff]  ;;  %v1147_v48 = vpack.c.bf16 %v1125_v41, %v1123_v40 }
 0x29a   : > { %1024 = vst [vmem:[#allocation2 + $0xe0] sm:$0xf] %v1022_v29  ;;  %v1149_v38 = vpack.c.bf16 %v1129_v37, %v1127_v36  ;;  %v1130_v4 = vld [vmem:[#allocation2 + $0x28] sm:$0xff] }
 0x29b   : > { %1025 = vst [vmem:[#allocation2 + $0x60] sm:$0xf] %v1023_v32  ;;  %v1150_v19 = vpack.c.bf16 %v1130_v4, %v1128_v10  ;;  %v1108_v10 = vld [vmem:[#allocation2 + $0x110] sm:$0xff] }
 0x29c   : > { %927 = vst [vmem:[#allocation2 + $0x48] sm:$0xf] %v925_v33  ;;  %1167 = vmatpush.bf16.msra.mxu2 %v1149_v38 }
 0x29d   : > { %v1005_v46 = vpop.permute.xlu0 %1004  ;;  %1160 = vst [vmem:[#allocation1] ss:$4 sm:$0xff] %v1098_v23 }
 0x29e   : > { %v1089_v47 = vpop.permute.xlu1 %1088  ;;  %v1006_v44 = vsel %vm723_vm4, %v1003_v18, %v1005_v46  ;;  %v1007_v15 = vsel %vm723_vm4, %v1005_v46, %v1003_v18  ;;  %v1124_v18 = vld [vmem:[#allocation2 + $0x88] sm:$0xff] }
 0x29f   : > { %v1092_v53 = vsel %vm742_vm2, %v1089_v47, %v1091_v39  ;;  %v1093_v54 = vsel %vm742_vm2, %v1091_v39, %v1089_v47  ;;  %v1008_v55 = vmul.f32 %v1007_v15, %v2878_v49  ;;  %914 = vrot.lane.b32.xlu2 %v913_v14, %s2504_s23  ;;  %v1009_v57 = vmul.f32 %v1006_v44, %v2881_v52 }
 0x2a0   : > { %v1094_v56 = vmul.f32 %v2807_v42, %v1092_v53  ;;  %v1095_v13 = vmul.f32 %v2809_v43, %v1093_v54  ;;  %1168 = vmatpush.bf16.msra.mxu2 %v1147_v48  ;;  %940 = vrot.lane.b32.xlu1 %v2915_v45, %s2504_s23  ;;  %v1148_v17 = vpack.c.bf16 %v1126_v16, %v1124_v18 }
 0x2a1   : > { %1010 = vst [vmem:[#allocation2 + $0x90] sm:$0xf] %v1008_v55  ;;  %916 = vrot.lane.b32.xlu0 %v912_v20, %s2504_s23  ;;  %v1121_v12 = vld [vmem:[#allocation2 + $0xe0] sm:$0xff]  ;;  %v1120_v20 = vld [vmem:[#allocation2 + $0x58] sm:$0xff] }
 0x2a2   : > { %1096 = vst [vmem:[#allocation2 + $0x40] sm:$0xf] %v1094_v56  ;;  %v1145_v59 = vpack.c.bf16 %v1121_v12, %v1119_v58  ;;  %v1122_v14 = vld [vmem:[#allocation2 + $0x60] sm:$0xff] }
 0x2a3   : > { %1097 = vst [vmem:[#allocation2 + $0xe8] sm:$0xf] %v1095_v13  ;;  %v1146_v21 = vpack.c.bf16 %v1122_v14, %v1120_v20 }
 0x2a4   : > { %1011 = vst [vmem:[#allocation2 + $0xa0] sm:$0xf] %v1009_v57  ;;  %1169 = vmatpush.bf16.msra.mxu2 %v1145_v59  ;;  %v1162_v28 = vld.sshfl [vmem:[#allocation1 + $0x8] sm:$0xff pattern:$0x73625140] }
 0x2a5   : > { %v953_v25 = vpop.permute.xlu0 %952 }
 0x2a6   : > { %v954_v61 = vsel %vm742_vm2, %v951_v24, %v953_v25  ;;  %v955_v45 = vsel %vm742_vm2, %v953_v25, %v951_v24 }
 0x2a7   : > { %v956_v63 = vmul.f32 %v954_v61, %v2818_v50  ;;  %v957_v3 = vmul.f32 %v955_v45, %v2821_v51  ;;  %v1113_v61 = vld [vmem:[#allocation2 + $0x8] sm:$0xff] }
 0x2a8   : > { %1156 = vperm.xlu1 %2292, %v1153_v60   ;;  %v1117_v48 = vld [vmem:[#allocation2 + $0x90] sm:$0xff] }
 0x2a9   : > { %958 = vst [vmem:[#allocation2 + $0x118] sm:$0xf] %v956_v63  ;;  %v1133_v6 = vld [vmem:[#allocation2 + $0x40] sm:$0xff] }
 0x2aa   : > { %959 = vst [vmem:[#allocation2 + $0x98] sm:$0xf] %v957_v3  ;;  %v1151_v7 = vpack.c.bf16 %v1133_v6, %v1131_v5  ;;  %v1134_v9 = vld [vmem:[#allocation2 + $0xe8] sm:$0xff]  ;;  %v1114_v3 = vld [vmem:[#allocation2 + $0x78] sm:$0xff] }
 0x2ab   : > { %v1152_v11 = vpack.c.bf16 %v1134_v9, %v1132_v8  ;;  %v1118_v55 = vld [vmem:[#allocation2 + $0xa0] sm:$0xff] }
 0x2ac   : > { %1187 = vmatpush.bf16.msra.mxu3 %v1151_v7  ;;  %v1107_v7 = vld [vmem:[#allocation2 + $0x80] sm:$0xff] }
 0x2ad   : > { %1213 = vmatpush.bf16.msrb.mxu0 %v1152_v11 }
 0x2af   : > { %2193 = vmatmul.msk.bf16.vlgmr.msra.gmra.mxu3 %vm1164_vm6, %v1162_v28 }
 0x2b0   : > { %1193 = vmatpush.bf16.msrb.mxu3 %v1150_v19  ;;  %2194 = vmatmul.msk.bf16.vlgmr.msrb.gmra.mxu0 %vm1164_vm6, %v1162_v28  ;;  %v1109_v5 = vld [vmem:[#allocation2 + $0x118] sm:$0xff] }
 0x2b1   : > { %v1110_v6 = vld [vmem:[#allocation2 + $0x98] sm:$0xff]  ;;  %v1139_v9 = vpack.c.bf16 %v1109_v5, %v1107_v7 }
 0x2b4   : > { %1194 = vmatpush.bf16.msrb.mxu3 %v1148_v17  ;;  %v1140_v17 = vpack.c.bf16 %v1110_v6, %v1108_v10 }
 0x2b8   : > { %1195 = vmatpush.bf16.msrb.mxu3 %v1146_v21 }
 0x2f1   : > { %v931_v13 = vpop.permute.xlu2 %930 }
 0x2f9   : > { %v915_v11 = vpop.permute.xlu2 %914 }
 0x2fa   : > { %v983_v29 = vpop.permute.xlu1 %982  ;;  %v981_v32 = vpop.permute.xlu0 %980 }
 0x2fb   : > { %v984_v33 = vsel %vm742_vm2, %v981_v32, %v983_v29  ;;  %v985_v36 = vsel %vm742_vm2, %v983_v29, %v981_v32 }
 0x2fc   : > { %v986_v37 = vmul.f32 %v2807_v42, %v984_v33  ;;  %v987_v38 = vmul.f32 %v2809_v43, %v985_v36 }
 0x2fe   : > { %988 = vst [vmem:[#allocation2 + $0x20] sm:$0xf] %v986_v37 }
 0x2ff   : > { %989 = vst [vmem:[#allocation2 + $0xc8] sm:$0xf] %v987_v38 }
 0x302   : > { %v969_v39 = vpop.permute.xlu1 %968  ;;  %v967_v40 = vpop.permute.xlu0 %966 }
 0x303   : > { %v970_v41 = vsel %vm723_vm4, %v967_v40, %v969_v39  ;;  %v971_v46 = vsel %vm723_vm4, %v969_v39, %v967_v40 }
 0x304   : > { %v972_v47 = vmul.f32 %v971_v46, %v2831_v62  ;;  %v973_v44 = vmul.f32 %v970_v41, %v2841_v2  ;;  %v1101_v46 = vld [vmem:[#allocation2 + $0x10] sm:$0xff] }
 0x305   : > { %v1115_v15 = vld [vmem:[#allocation2 + $0x20] sm:$0xff] }
 0x306   : > { %974 = vst [vmem:[#allocation2 + $0xf8] sm:$0xf] %v972_v47  ;;  %v1143_v53 = vpack.c.bf16 %v1117_v48, %v1115_v15  ;;  %v1116_v54 = vld [vmem:[#allocation2 + $0xc8] sm:$0xff]  ;;  %v1161_v48 = vld.sshfl [vmem:[#allocation1] sm:$0xff pattern:$0x73625140] }
 0x307   : > { %975 = vst [vmem:[#allocation2 + $0x38] sm:$0xf] %v973_v44  ;;  %v1144_v56 = vpack.c.bf16 %v1118_v55, %v1116_v54  ;;  %v1102_v44 = vld [vmem:[#allocation2 + $0x48] sm:$0xff] }
 0x308   : > { %1170 = vmatpush.bf16.msra.mxu2 %v1143_v53 }
 0x309   : > { %1196 = vmatpush.bf16.msrb.mxu3 %v1144_v56 }
 0x30a   : > { %v929_v57 = vpop.permute.xlu1 %928  ;;  %v939_v58 = vpop.permute.xlu0 %938 }
 0x30b   : > { %v932_v12 = vsel %vm742_vm2, %v929_v57, %v931_v13  ;;  %v933_v59 = vsel %vm742_vm2, %v931_v13, %v929_v57 }
 0x30c   : > { %v934_v24 = vmul.f32 %v932_v12, %v2835_v0  ;;  %v935_v25 = vmul.f32 %v933_v59, %v2838_v1 }
 0x30d   : > { %v1111_v60 = vld [vmem:[#allocation2 + $0xf8] sm:$0xff] }
 0x30e   : > { %936 = vst [vmem:[#allocation2 + $0x108] sm:$0xf] %v934_v24  ;;  %v1141_v45 = vpack.c.bf16 %v1113_v61, %v1111_v60  ;;  %v1112_v63 = vld [vmem:[#allocation2 + $0x38] sm:$0xff] }
 0x30f   : > { %937 = vst [vmem:[#allocation2 + $0x68] sm:$0xf] %v935_v25  ;;  %v1142_v4 = vpack.c.bf16 %v1114_v3, %v1112_v63 }
 0x310   : > { %1171 = vmatpush.bf16.msra.mxu2 %v1141_v45 }
 0x311   : > { %1197 = vmatpush.bf16.msrb.mxu3 %v1142_v4 }
 0x312   : > { %v941_v8 = vpop.permute.xlu1 %940 }
 0x313   : > { %v942_v19 = vsel %vm723_vm4, %v939_v58, %v941_v8  ;;  %v943_v18 = vsel %vm723_vm4, %v941_v8, %v939_v58  ;;  %v917_v16 = vpop.permute.xlu0 %916 }
 0x314   : > { %v944_v14 = vmul.f32 %v943_v18, %v2862_v30  ;;  %v945_v20 = vmul.f32 %v942_v19, %v2865_v31  ;;  %v918_v21 = vsel %vm723_vm4, %v915_v11, %v917_v16  ;;  %v919_v23 = vsel %vm723_vm4, %v917_v16, %v915_v11  ;;  %1172 = vmatpush.bf16.msra.mxu2 %v1139_v9 }
 0x315   : > { %v920_v28 = vmul.f32 %v919_v23, %v2878_v49  ;;  %v921_v29 = vmul.f32 %v918_v21, %v2881_v52  ;;  %1198 = vmatpush.bf16.msrb.mxu3 %v1140_v17  ;;  %v1103_v32 = vld [vmem:[#allocation2 + $0x108] sm:$0xff] }
 0x316   : > { %946 = vst [vmem:[#allocation2 + $0x30] sm:$0xf] %v944_v14  ;;  %v1104_v37 = vld [vmem:[#allocation2 + $0x68] sm:$0xff] }
 0x317   : > { %947 = vst [vmem:[#allocation2 + $0x18] sm:$0xf] %v945_v20 }
 0x318   : > { %922 = vst [vmem:[#allocation2 + $0xb0] sm:$0xf] %v920_v28 }
 0x319   : > { %923 = vst [vmem:[#allocation2 + $0xd0] sm:$0xf] %v921_v29 }
 0x31a   : > { %v1157_v13 = vpop.permute.xlu1 %1156 }
 0x31d   : > { %v1105_v33 = vld [vmem:[#allocation2 + $0x30] sm:$0xff] }
 0x31e   : > { %v1137_v36 = vpack.c.bf16 %v1105_v33, %v1103_v32  ;;  %v1106_v38 = vld [vmem:[#allocation2 + $0x18] sm:$0xff] }
 0x31f   : > { %v1138_v39 = vpack.c.bf16 %v1106_v38, %v1104_v37  ;;  %v1099_v40 = vld [vmem:[#allocation2 + $0xb0] sm:$0xff] }
 0x320   : > { %1173 = vmatpush.bf16.msra.mxu2 %v1137_v36  ;;  %v1100_v41 = vld [vmem:[#allocation2 + $0xd0] sm:$0xff]  ;;  %v1135_v47 = vpack.c.bf16 %v1101_v46, %v1099_v40 }
 0x321   : > { %1199 = vmatpush.bf16.msrb.mxu3 %v1138_v39  ;;  %v1136_v15 = vpack.c.bf16 %v1102_v44, %v1100_v41 }
 0x324   : > { %1174 = vmatpush.bf16.msra.mxu2 %v1135_v47 }
 0x325   : > { %1200 = vmatpush.bf16.msrb.mxu3 %v1136_v15 }
 0x327   : > { %1175 = vmatmul.bf16.vlgmr.msra.gmra.mxu2 %v1161_v48 }
 0x328   : > { %1201 = vmatmul.bf16.vlgmr.msrb.gmra.mxu3 %v1161_v48 }
 0x32d   : > { %v1215_v53 = vpop.f32.mrf.mxu0 }
 0x332   : > { %v1189_v54 = vpop.f32.mrf.mxu3 }
 0x335   : > { %v1217_v55 = vpop.f32.mrf.mxu0 }
 0x336   : > { %v1332_v55 = vld [vmem:[%s3511_s8] sm:$0xf] }
 0x33a   : > { %v1191_v56 = vpop.f32.mrf.mxu3 }
 0x3aa   : > { %v1176_v57 = vpop.f32.mrf.mxu2 }
 0x3ab   : > { %v1177_v58 = vadd.f32 %v1176_v57, %v1157_v13  ;;  %v1202_v12 = vpop.f32.mrf.mxu3 }
 0x3ac   : > { %v1203_v59 = vadd.f32 %v1202_v12, %v1157_v13 }
 0x3ad   : > { %v1190_v24 = vadd.f32 %v1189_v54, %v1177_v58 }
 0x3ae   : > { %v1216_v25 = vadd.f32 %v1215_v53, %v1203_v59 }
 0x3af   : > { %v3042_v60 = vmax.f32 %v1190_v24, 0.0 }
 0x3b0   : > { %v3044_v61 = vmax.f32 %v1216_v25, 0.0 }
 0x3b1   : > { %1261 = vst [vmem:[#allocation2 + $0x80] sm:$0xf] %v3042_v60  ;;  %1221 = vrot.lane.b32.xlu1 %v3042_v60, %s2500_s26  ;;  %1273 = vrot.lane.b32.xlu2 %v3042_v60, %s2501_s20 }
 0x3b2   : > { %1262 = vst [vmem:[#allocation2 + $0x110] sm:$0xf] %v3044_v61  ;;  %1275 = vrot.lane.b32.xlu0 %v3044_v61, %s2501_s20  ;;  %v1178_v45 = vpop.f32.mrf.mxu2 }
 0x3b3   : > { %v1204_v63 = vpop.f32.mrf.mxu3 }
 0x3b9   : > { %1223 = vrot.lane.b32.xlu2 %v3044_v61, %s2500_s26 }
 0x3c1   : > { %1265 = vrot.lane.b32.xlu2 %v3044_v61, %s2502_s2 }
 0x40b   : > { %v1274_v3 = vpop.permute.xlu2 %1273 }
 0x413   : > { %v1224_v4 = vpop.permute.xlu2 %1223 }
 0x41b   : > { %v1266_v17 = vpop.permute.xlu2 %1265 }
 0x423   : > { %v1222_v5 = vpop.permute.xlu1 %1221 }
 0x424   : > { %v1276_v6 = vpop.permute.xlu0 %1275  ;;  %v1226_v7 = vsel %vm716_vm0, %v1224_v4, %v1222_v5  ;;  %v1225_v8 = vsel %vm716_vm0, %v1222_v5, %v1224_v4 }
 0x425   : > { %v1278_v9 = vsel %vm801_vm1, %v1276_v6, %v1274_v3  ;;  %v1277_v10 = vsel %vm801_vm1, %v1274_v3, %v1276_v6  ;;  %v1237_v11 = vmul.f32 %v1226_v7, %v2768_v26  ;;  %v1238_v16 = vmul.f32 %v1225_v8, %v2771_v27 }
 0x426   : > { %1295 = vrot.lane.b32.xlu1 %v1278_v9, %s2502_s2  ;;  %v1290_v19 = vmul.f32 %v1278_v9, %v2782_v34  ;;  %1279 = vrot.lane.b32.xlu2 %v1277_v10, %s2504_s23  ;;  %v1289_v18 = vmul.f32 %v1277_v10, %v2785_v35 }
 0x427   : > { %1293 = vrot.lane.b32.xlu0 %v1277_v10, %s2502_s2  ;;  %1239 = vst [vmem:[#allocation2 + $0x10] sm:$0xf] %v1237_v11 }
 0x428   : > { %1292 = vst [vmem:[#allocation2 + $0x78] sm:$0xf] %v1290_v19 }
 0x429   : > { %1291 = vst [vmem:[#allocation2 + $0x8] sm:$0xf] %v1289_v18  ;;  %v1312_v18 = vld [vmem:[#allocation2 + $0x80] sm:$0xff] }
 0x42a   : > { %1240 = vst [vmem:[#allocation2 + $0x48] sm:$0xf] %v1238_v16 }
 0x42e   : > { %1263 = vrot.lane.b32.xlu1 %v3042_v60, %s2502_s2  ;;  %1251 = vrot.lane.b32.xlu2 %v3042_v60, %s2504_s23 }
 0x42f   : > { %1281 = vrot.lane.b32.xlu0 %v1278_v9, %s2504_s23  ;;  %v1319_v4 = vld [vmem:[#allocation2 + $0x78] sm:$0xff] }
 0x430   : > { %v1318_v45 = vld [vmem:[#allocation2 + $0x8] sm:$0xff] }
 0x436   : > { %1229 = vrot.lane.b32.xlu2 %v1225_v8, %s2504_s23  ;;  %1243 = vrot.lane.b32.xlu1 %v1225_v8, %s2502_s2 }
 0x437   : > { %1241 = vrot.lane.b32.xlu0 %v1226_v7, %s2502_s2 }
 0x43e   : > { %1227 = vrot.lane.b32.xlu1 %v1226_v7, %s2504_s23 }
 0x43f   : > { %1253 = vrot.lane.b32.xlu0 %v3044_v61, %s2504_s23 }
 0x447   : > { %1335 = vperm.xlu0 %2293, %v1332_v55  }
 0x480   : > { %v1280_v32 = vpop.permute.xlu2 %1279 }
 0x488   : > { %v1252_v48 = vpop.permute.xlu2 %1251 }
 0x490   : > { %v1230_v7 = vpop.permute.xlu2 %1229 }
 0x498   : > { %v1296_v14 = vpop.permute.xlu1 %1295 }
 0x499   : > { %v1294_v20 = vpop.permute.xlu0 %1293 }
 0x49a   : > { %v1297_v21 = vsel %vm742_vm2, %v1294_v20, %v1296_v14  ;;  %v1298_v23 = vsel %vm742_vm2, %v1296_v14, %v1294_v20 }
 0x49b   : > { %v1299_v28 = vmul.f32 %v2807_v42, %v1297_v21  ;;  %v1300_v29 = vmul.f32 %v2809_v43, %v1298_v23  ;;  %v1313_v21 = vld [vmem:[#allocation2 + $0x110] sm:$0xff] }
 0x49d   : > { %1301 = vst [vmem:[#allocation2 + $0x20] sm:$0xf] %v1299_v28 }
 0x49e   : > { %1302 = vst [vmem:[#allocation2 + $0xc8] sm:$0xf] %v1300_v29 }
 0x4a0   : > { %v1264_v33 = vpop.permute.xlu1 %1263 }
 0x4a1   : > { %v1267_v36 = vsel %vm742_vm2, %v1264_v33, %v1266_v17  ;;  %v1268_v37 = vsel %vm742_vm2, %v1266_v17, %v1264_v33  ;;  %v1282_v38 = vpop.permute.xlu0 %1281 }
 0x4a2   : > { %v1269_v39 = vmul.f32 %v1267_v36, %v2818_v50  ;;  %v1270_v40 = vmul.f32 %v1268_v37, %v2821_v51  ;;  %v1283_v42 = vsel %vm723_vm4, %v1280_v32, %v1282_v38  ;;  %v1284_v43 = vsel %vm723_vm4, %v1282_v38, %v1280_v32 }
 0x4a3   : > { %v1285_v41 = vmul.f32 %v1284_v43, %v2831_v62  ;;  %v1286_v46 = vmul.f32 %v1283_v42, %v2841_v2 }
 0x4a4   : > { %1271 = vst [vmem:[#allocation2 + $0x118] sm:$0xf] %v1269_v39  ;;  %v1320_v47 = vld [vmem:[#allocation2 + $0x20] sm:$0xff] }
 0x4a5   : > { %1272 = vst [vmem:[#allocation2 + $0x98] sm:$0xf] %v1270_v40  ;;  %v1330_v44 = vpack.c.bf16 %v1320_v47, %v1320_v47  ;;  %v1321_v15 = vld [vmem:[#allocation2 + $0xc8] sm:$0xff] }
 0x4a6   : > { %1287 = vst [vmem:[#allocation2 + $0xf8] sm:$0xf] %v1285_v41  ;;  %v1331_v53 = vpack.c.bf16 %v1321_v15, %v1321_v15  ;;  %v1306_v41 = vld [vmem:[#allocation2 + $0x10] sm:$0xff]  ;;  %v1307_v47 = vld [vmem:[#allocation2 + $0x48] sm:$0xff]  ;;  %v1303_v15 = vld [vmem:[%s3510_s7] sm:$0x3] }
 0x4a7   : > { %1288 = vst [vmem:[#allocation2 + $0x38] sm:$0xf] %v1286_v46  ;;  %v1342_v54 = vsel %vm873_vm3, %v1330_v44, 0 }
 0x4a8   : > { %1350 = vmatpush.bf16.msrb.mxu1 %v1342_v54  ;;  %v1345_v56 = vsel %vm873_vm3, %v1331_v53, 0  ;;  %v1244_v13 = vpop.permute.xlu1 %1243 }
 0x4a9   : > { %1363 = vmatpush.bf16.msrb.mxu2 %v1345_v56  ;;  %v1242_v57 = vpop.permute.xlu0 %1241 }
 0x4aa   : > { %v1245_v58 = vsel %vm742_vm2, %v1242_v57, %v1244_v13  ;;  %v1246_v12 = vsel %vm742_vm2, %v1244_v13, %v1242_v57 }
 0x4ab   : > { %v1247_v59 = vmul.f32 %v1245_v58, %v2835_v0  ;;  %v1248_v24 = vmul.f32 %v1246_v12, %v2838_v1  ;;  %v1314_v6 = vld [vmem:[#allocation2 + $0x118] sm:$0xff] }
 0x4ac   : > { %v1315_v9 = vld [vmem:[#allocation2 + $0x98] sm:$0xff]  ;;  %v1326_v20 = vpack.c.bf16 %v1314_v6, %v1312_v18 }
 0x4ad   : > { %1249 = vst [vmem:[#allocation2 + $0x108] sm:$0xf] %v1247_v59  ;;  %v1316_v25 = vld [vmem:[#allocation2 + $0xf8] sm:$0xff]  ;;  %v1327_v32 = vpack.c.bf16 %v1315_v9, %v1313_v21 }
 0x4ae   : > { %1250 = vst [vmem:[#allocation2 + $0x68] sm:$0xf] %v1248_v24  ;;  %v1328_v63 = vpack.c.bf16 %v1318_v45, %v1316_v25  ;;  %v1317_v3 = vld [vmem:[#allocation2 + $0x38] sm:$0xff] }
 0x4af   : > { %v1329_v5 = vpack.c.bf16 %v1319_v4, %v1317_v3  ;;  %v3168_v21 = vld [vmem:[#allocation8 + $0x18] ss:$0 sm:$0xff] }
 0x4b0   : > { %1351 = vmatpush.bf16.msrb.mxu1 %v1328_v63  ;;  %v1228_v8 = vpop.permute.xlu1 %1227 }
 0x4b1   : > { %1364 = vmatpush.bf16.msrb.mxu2 %v1329_v5  ;;  %v1254_v10 = vpop.permute.xlu0 %1253  ;;  %v1231_v11 = vsel %vm723_vm4, %v1228_v8, %v1230_v7  ;;  %v1232_v19 = vsel %vm723_vm4, %v1230_v7, %v1228_v8 }
 0x4b2   : > { %v1255_v16 = vsel %vm723_vm4, %v1252_v48, %v1254_v10  ;;  %v1256_v17 = vsel %vm723_vm4, %v1254_v10, %v1252_v48  ;;  %v1233_v14 = vmul.f32 %v1232_v19, %v2878_v49  ;;  %v1234_v29 = vmul.f32 %v1231_v11, %v2881_v52  ;;  %v1486_v10 = vld [vmem:[%s3513_s10] sm:$0xf] }
 0x4b3   : > { %v1257_v23 = vmul.f32 %v1256_v17, %v2862_v30  ;;  %v1258_v28 = vmul.f32 %v1255_v16, %v2865_v31 }
 0x4b4   : > { %1235 = vst [vmem:[#allocation2 + $0xb0] sm:$0xf] %v1233_v14  ;;  %1352 = vmatpush.bf16.msrb.mxu1 %v1326_v20  ;;  %v1308_v33 = vld [vmem:[#allocation2 + $0x108] sm:$0xff]  ;;  %v3165_v14 = vld [vmem:[#allocation8 + $0x10] ss:$0 sm:$0xff] }
 0x4b5   : > { %1259 = vst [vmem:[#allocation2 + $0x30] sm:$0xf] %v1257_v23  ;;  %1365 = vmatpush.bf16.msrb.mxu2 %v1327_v32  ;;  %v1309_v38 = vld [vmem:[#allocation2 + $0x68] sm:$0xff] }
 0x4b6   : > { %1260 = vst [vmem:[#allocation2 + $0x18] sm:$0xf] %v1258_v28 }
 0x4b7   : > { %1236 = vst [vmem:[#allocation2 + $0xd0] sm:$0xf] %v1234_v29 }
 0x4b9   : > { %v1336_v48 = vpop.permute.xlu0 %1335 }
 0x4bb   : > { %v1304_v42 = vld [vmem:[#allocation2 + $0xb0] sm:$0xff] }
 0x4bc   : > { %v1310_v36 = vld [vmem:[#allocation2 + $0x30] sm:$0xff]  ;;  %v1322_v46 = vpack.c.bf16 %v1306_v41, %v1304_v42 }
 0x4bd   : > { %v1324_v37 = vpack.c.bf16 %v1310_v36, %v1308_v33  ;;  %v1311_v39 = vld [vmem:[#allocation2 + $0x18] sm:$0xff] }
 0x4be   : > { %v1325_v40 = vpack.c.bf16 %v1311_v39, %v1309_v38  ;;  %v1305_v43 = vld [vmem:[#allocation2 + $0xd0] sm:$0xff] }
 0x4bf   : > { %1353 = vmatpush.bf16.msrb.mxu1 %v1324_v37  ;;  %v1323_v44 = vpack.c.bf16 %v1307_v47, %v1305_v43 }
 0x4c0   : > { %1366 = vmatpush.bf16.msrb.mxu2 %v1325_v40 }
 0x4c3   : > { %1354 = vmatpush.bf16.msrb.mxu1 %v1322_v46 }
 0x4c4   : > { %1367 = vmatpush.bf16.msrb.mxu2 %v1323_v44 }
 0x4c6   : > { %2195 = vmatmul.msk.bf16.vlgmr.msrb.gmra.mxu1 %vm869_vm5, %v1303_v15 }
 0x4c7   : > { %2196 = vmatmul.msk.bf16.vlgmr.msrb.gmra.mxu2 %vm869_vm5, %v1303_v15 }
 0x543   : > { %v1356_v53 = vpop.f32.mrf.mxu1 }
 0x544   : > { %v1357_v54 = vadd.f32 %v1356_v53, %v1336_v48 }
 0x546   : > { %v1373_v55 = vmax.f32 %v1357_v54, 0.0 }
 0x548   : > { %1415 = vst [vmem:[#allocation2 + $0x80] sm:$0xf] %v1373_v55  ;;  %1427 = vrot.lane.b32.xlu1 %v1373_v55, %s2501_s20 }
 0x54a   : > { %v1369_v56 = vpop.f32.mrf.mxu2 }
 0x54b   : > { %v1370_v13 = vadd.f32 %v1369_v56, %v1336_v48  ;;  %v1358_v57 = vpop.f32.mrf.mxu1 }
 0x54d   : > { %v1374_v58 = vmax.f32 %v1370_v13, 0.0 }
 0x54f   : > { %1416 = vst [vmem:[#allocation2 + $0x110] sm:$0xf] %v1374_v58  ;;  %1429 = vrot.lane.b32.xlu2 %v1374_v58, %s2501_s20 }
 0x550   : > { %1375 = vrot.lane.b32.xlu1 %v1373_v55, %s2500_s26 }
 0x552   : > { %v1371_v12 = vpop.f32.mrf.mxu2 }
 0x557   : > { %1377 = vrot.lane.b32.xlu2 %v1374_v58, %s2500_s26 }
 0x55f   : > { %1419 = vrot.lane.b32.xlu2 %v1374_v58, %s2502_s2 }
 0x5a9   : > { %v1430_v59 = vpop.permute.xlu2 %1429 }
 0x5b1   : > { %v1378_v4 = vpop.permute.xlu2 %1377 }
 0x5b9   : > { %v1420_v11 = vpop.permute.xlu2 %1419 }
 0x5ba   : > { %v1428_v24 = vpop.permute.xlu1 %1427 }
 0x5bb   : > { %v1432_v25 = vsel %vm801_vm1, %v1430_v59, %v1428_v24  ;;  %v1431_v45 = vsel %vm801_vm1, %v1428_v24, %v1430_v59 }
 0x5bc   : > { %1449 = vrot.lane.b32.xlu1 %v1432_v25, %s2502_s2  ;;  %v1444_v63 = vmul.f32 %v1432_v25, %v2782_v34  ;;  %1433 = vrot.lane.b32.xlu2 %v1431_v45, %s2504_s23  ;;  %v1443_v3 = vmul.f32 %v1431_v45, %v2785_v35 }
 0x5bd   : > { %1447 = vrot.lane.b32.xlu0 %v1431_v45, %s2502_s2 }
 0x5be   : > { %1446 = vst [vmem:[#allocation2 + $0x78] sm:$0xf] %v1444_v63 }
 0x5bf   : > { %1445 = vst [vmem:[#allocation2 + $0x8] sm:$0xf] %v1443_v3 }
 0x5c2   : > { %v1376_v5 = vpop.permute.xlu1 %1375 }
 0x5c3   : > { %v1380_v6 = vsel %vm716_vm0, %v1378_v4, %v1376_v5  ;;  %v1379_v7 = vsel %vm716_vm0, %v1376_v5, %v1378_v4 }
 0x5c4   : > { %1417 = vrot.lane.b32.xlu1 %v1373_v55, %s2502_s2  ;;  %1405 = vrot.lane.b32.xlu2 %v1373_v55, %s2504_s23  ;;  %v1391_v8 = vmul.f32 %v1380_v6, %v2768_v26  ;;  %v1392_v9 = vmul.f32 %v1379_v7, %v2771_v27 }
 0x5c5   : > { %1435 = vrot.lane.b32.xlu0 %v1432_v25, %s2504_s23  ;;  %v1473_v45 = vld [vmem:[#allocation2 + $0x78] sm:$0xff] }
 0x5c6   : > { %1393 = vst [vmem:[#allocation2 + $0x10] sm:$0xf] %v1391_v8  ;;  %v1472_v59 = vld [vmem:[#allocation2 + $0x8] sm:$0xff] }
 0x5c7   : > { %1394 = vst [vmem:[#allocation2 + $0x48] sm:$0xf] %v1392_v9 }
 0x5cc   : > { %1383 = vrot.lane.b32.xlu2 %v1379_v7, %s2504_s23  ;;  %1397 = vrot.lane.b32.xlu1 %v1379_v7, %s2502_s2  ;;  %v1466_v7 = vld [vmem:[#allocation2 + $0x80] sm:$0xff] }
 0x5cd   : > { %1395 = vrot.lane.b32.xlu0 %v1380_v6, %s2502_s2 }
 0x5d4   : > { %1381 = vrot.lane.b32.xlu1 %v1380_v6, %s2504_s23 }
 0x5d5   : > { %1407 = vrot.lane.b32.xlu0 %v1374_v58, %s2504_s23 }
 0x5dd   : > { %1489 = vperm.xlu0 %2293, %v1486_v10  }
 0x616   : > { %v1434_v28 = vpop.permute.xlu2 %1433 }
 0x61e   : > { %v1406_v44 = vpop.permute.xlu2 %1405 }
 0x626   : > { %v1384_v5 = vpop.permute.xlu2 %1383 }
 0x62e   : > { %v1450_v19 = vpop.permute.xlu1 %1449 }
 0x62f   : > { %v1448_v18 = vpop.permute.xlu0 %1447 }
 0x630   : > { %v1451_v16 = vsel %vm742_vm2, %v1448_v18, %v1450_v19  ;;  %v1452_v17 = vsel %vm742_vm2, %v1450_v19, %v1448_v18  ;;  %v1467_v19 = vld [vmem:[#allocation2 + $0x110] sm:$0xff] }
 0x631   : > { %v1453_v20 = vmul.f32 %v3165_v14, %v1451_v16  ;;  %v1454_v23 = vmul.f32 %v3168_v21, %v1452_v17 }
 0x633   : > { %1455 = vst [vmem:[#allocation2 + $0x20] sm:$0xf] %v1453_v20 }
 0x634   : > { %1456 = vst [vmem:[#allocation2 + $0xc8] sm:$0xf] %v1454_v23 }
 0x636   : > { %v1418_v29 = vpop.permute.xlu1 %1417 }
 0x637   : > { %v1436_v32 = vpop.permute.xlu0 %1435  ;;  %v1421_v33 = vsel %vm742_vm2, %v1418_v29, %v1420_v11  ;;  %v1422_v36 = vsel %vm742_vm2, %v1420_v11, %v1418_v29 }
 0x638   : > { %v1437_v37 = vsel %vm723_vm4, %v1434_v28, %v1436_v32  ;;  %v1438_v38 = vsel %vm723_vm4, %v1436_v32, %v1434_v28  ;;  %v1423_v39 = vmul.f32 %v1421_v33, %v2818_v50  ;;  %v1424_v43 = vmul.f32 %v1422_v36, %v2821_v51 }
 0x639   : > { %v1439_v40 = vmul.f32 %v1438_v38, %v2831_v62  ;;  %v1440_v42 = vmul.f32 %v1437_v37, %v2841_v2 }
 0x63a   : > { %1425 = vst [vmem:[#allocation2 + $0x118] sm:$0xf] %v1423_v39  ;;  %v1474_v41 = vld [vmem:[#allocation2 + $0x20] sm:$0xff] }
 0x63b   : > { %1441 = vst [vmem:[#allocation2 + $0xf8] sm:$0xf] %v1439_v40  ;;  %v1484_v46 = vpack.c.bf16 %v1474_v41, %v1474_v41  ;;  %v1475_v47 = vld [vmem:[#allocation2 + $0xc8] sm:$0xff] }
 0x63c   : > { %1442 = vst [vmem:[#allocation2 + $0x38] sm:$0xf] %v1440_v42  ;;  %v1485_v15 = vpack.c.bf16 %v1475_v47, %v1475_v47 }
 0x63d   : > { %1426 = vst [vmem:[#allocation2 + $0x98] sm:$0xf] %v1424_v43  ;;  %v1496_v48 = vsel %vm873_vm3, %v1484_v46, 0  ;;  %v1460_v43 = vld [vmem:[#allocation2 + $0x10] sm:$0xff]  ;;  %v1461_v46 = vld [vmem:[#allocation2 + $0x48] sm:$0xff] }
 0x63e   : > { %1504 = vmatpush.bf16.msra.mxu0 %v1496_v48  ;;  %v1499_v53 = vsel %vm873_vm3, %v1485_v15, 0  ;;  %v1398_v54 = vpop.permute.xlu1 %1397 }
 0x63f   : > { %1517 = vmatpush.bf16.msra.mxu3 %v1499_v53  ;;  %v1396_v55 = vpop.permute.xlu0 %1395 }
 0x640   : > { %v1399_v56 = vsel %vm742_vm2, %v1396_v55, %v1398_v54  ;;  %v1400_v13 = vsel %vm742_vm2, %v1398_v54, %v1396_v55 }
 0x641   : > { %v1401_v57 = vmul.f32 %v1399_v56, %v2835_v0  ;;  %v1402_v58 = vmul.f32 %v1400_v13, %v2838_v1  ;;  %v1468_v3 = vld [vmem:[#allocation2 + $0x118] sm:$0xff] }
 0x642   : > { %v1470_v12 = vld [vmem:[#allocation2 + $0xf8] sm:$0xff]  ;;  %v1480_v11 = vpack.c.bf16 %v1468_v3, %v1466_v7 }
 0x643   : > { %1403 = vst [vmem:[#allocation2 + $0x108] sm:$0xf] %v1401_v57  ;;  %v1482_v24 = vpack.c.bf16 %v1472_v59, %v1470_v12  ;;  %v1471_v25 = vld [vmem:[#allocation2 + $0x38] sm:$0xff] }
 0x644   : > { %1404 = vst [vmem:[#allocation2 + $0x68] sm:$0xf] %v1402_v58  ;;  %v1483_v63 = vpack.c.bf16 %v1473_v45, %v1471_v25  ;;  %v1469_v4 = vld [vmem:[#allocation2 + $0x98] sm:$0xff] }
 0x645   : > { %1505 = vmatpush.bf16.msra.mxu0 %v1482_v24  ;;  %v1481_v20 = vpack.c.bf16 %v1469_v4, %v1467_v19 }
 0x646   : > { %1518 = vmatpush.bf16.msra.mxu3 %v1483_v63  ;;  %v1382_v6 = vpop.permute.xlu1 %1381 }
 0x647   : > { %v1408_v8 = vpop.permute.xlu0 %1407  ;;  %v1385_v9 = vsel %vm723_vm4, %v1382_v6, %v1384_v5  ;;  %v1386_v10 = vsel %vm723_vm4, %v1384_v5, %v1382_v6 }
 0x648   : > { %v1409_v18 = vsel %vm723_vm4, %v1406_v44, %v1408_v8  ;;  %v1410_v16 = vsel %vm723_vm4, %v1408_v8, %v1406_v44  ;;  %v1387_v17 = vmul.f32 %v1386_v10, %v2878_v49  ;;  %v1388_v29 = vmul.f32 %v1385_v9, %v2881_v52  ;;  %v1457_v44 = vld [vmem:[%s3563_s13] sm:$0x3]  ;;  %s3568_s13 = sld [smem:[#allocation33_spill]] }
 0x649   : > { %v1411_v23 = vmul.f32 %v1410_v16, %v2862_v30  ;;  %v1412_v28 = vmul.f32 %v1409_v18, %v2865_v31  ;;  %1506 = vmatpush.bf16.msra.mxu0 %v1480_v11 }
 0x64a   : > { %1389 = vst [vmem:[#allocation2 + $0xb0] sm:$0xf] %v1387_v17  ;;  %1519 = vmatpush.bf16.msra.mxu3 %v1481_v20  ;;  %v1462_v32 = vld [vmem:[#allocation2 + $0x108] sm:$0xff] }
 0x64b   : > { %1413 = vst [vmem:[#allocation2 + $0x30] sm:$0xf] %v1411_v23  ;;  %v1463_v37 = vld [vmem:[#allocation2 + $0x68] sm:$0xff] }
 0x64c   : > { %1414 = vst [vmem:[#allocation2 + $0x18] sm:$0xf] %v1412_v28 }
 0x64d   : > { %1390 = vst [vmem:[#allocation2 + $0xd0] sm:$0xf] %v1388_v29 }
 0x64f   : > { %v1490_v15 = vpop.permute.xlu0 %1489 }
 0x651   : > { %v1458_v40 = vld [vmem:[#allocation2 + $0xb0] sm:$0xff] }
 0x652   : > { %v1464_v33 = vld [vmem:[#allocation2 + $0x30] sm:$0xff]  ;;  %v1476_v41 = vpack.c.bf16 %v1460_v43, %v1458_v40 }
 0x653   : > { %v1478_v36 = vpack.c.bf16 %v1464_v33, %v1462_v32  ;;  %v1465_v38 = vld [vmem:[#allocation2 + $0x18] sm:$0xff] }
 0x654   : > { %v1479_v39 = vpack.c.bf16 %v1465_v38, %v1463_v37  ;;  %v1459_v42 = vld [vmem:[#allocation2 + $0xd0] sm:$0xff] }
 0x655   : > { %1507 = vmatpush.bf16.msra.mxu0 %v1478_v36  ;;  %v1477_v47 = vpack.c.bf16 %v1461_v46, %v1459_v42 }
 0x656   : > { %1520 = vmatpush.bf16.msra.mxu3 %v1479_v39 }
 0x659   : > { %1508 = vmatpush.bf16.msra.mxu0 %v1476_v41 }
 0x65a   : > { %1521 = vmatpush.bf16.msra.mxu3 %v1477_v47  ;;  %v1640_v47 = vld [vmem:[%s3564_s15] sm:$0xf]  ;;  %s2215_s15 = sshll.u32 %s2625_s21, 3 }
 0x65c   : > { %2197 = vmatmul.msk.bf16.vlgmr.msra.gmra.mxu0 %vm869_vm5, %v1457_v44 }
 0x65d   : > { %2198 = vmatmul.msk.bf16.vlgmr.msra.gmra.mxu3 %vm869_vm5, %v1457_v44 }
 0x6d9   : > { %v1510_v48 = vpop.f32.mrf.mxu0 }
 0x6da   : > { %v1511_v53 = vadd.f32 %v1510_v48, %v1490_v15 }
 0x6dc   : > { %v3209_v54 = vadd.f32 %v1511_v53, %v3042_v60 }
 0x6de   : > { %1569 = vst [vmem:[#allocation2 + $0x80] sm:$0xf] %v3209_v54  ;;  %1529 = vrot.lane.b32.xlu0 %v3209_v54, %s2500_s26  ;;  %1581 = vrot.lane.b32.xlu1 %v3209_v54, %s2501_s20 }
 0x6e0   : > { %v1523_v55 = vpop.f32.mrf.mxu3 }
 0x6e1   : > { %v1524_v56 = vadd.f32 %v1523_v55, %v1490_v15  ;;  %v1512_v13 = vpop.f32.mrf.mxu0 }
 0x6e3   : > { %v3217_v57 = vadd.f32 %v1524_v56, %v3044_v61 }
 0x6e5   : > { %1570 = vst [vmem:[#allocation2 + $0x110] sm:$0xf] %v3217_v57  ;;  %1583 = vrot.lane.b32.xlu2 %v3217_v57, %s2501_s20 }
 0x6e6   : > { %1531 = vrot.lane.b32.xlu1 %v3217_v57, %s2500_s26 }
 0x6e8   : > { %v1525_v60 = vpop.f32.mrf.mxu3 }
 0x6ee   : > { %1573 = vrot.lane.b32.xlu1 %v3217_v57, %s2502_s2 }
 0x73f   : > { %v1584_v58 = vpop.permute.xlu2 %1583 }
 0x750   : > { %v1582_v12 = vpop.permute.xlu1 %1581  ;;  %v1530_v45 = vpop.permute.xlu0 %1529 }
 0x751   : > { %v1586_v59 = vsel %vm801_vm1, %v1584_v58, %v1582_v12  ;;  %v1585_v61 = vsel %vm801_vm1, %v1582_v12, %v1584_v58 }
 0x752   : > { %1603 = vrot.lane.b32.xlu0 %v1586_v59, %s2502_s2  ;;  %v1598_v24 = vmul.f32 %v1586_v59, %v2782_v34  ;;  %1587 = vrot.lane.b32.xlu1 %v1585_v61, %s2504_s23  ;;  %v1597_v25 = vmul.f32 %v1585_v61, %v2785_v35 }
 0x753   : > { %1601 = vrot.lane.b32.xlu2 %v1585_v61, %s2502_s2 }
 0x754   : > { %1600 = vst [vmem:[#allocation2 + $0x78] sm:$0xf] %v1598_v24 }
 0x755   : > { %1599 = vst [vmem:[#allocation2 + $0x8] sm:$0xf] %v1597_v25 }
 0x758   : > { %v1532_v63 = vpop.permute.xlu1 %1531 }
 0x759   : > { %v1534_v3 = vsel %vm716_vm0, %v1532_v63, %v1530_v45  ;;  %v1533_v4 = vsel %vm716_vm0, %v1530_v45, %v1532_v63 }
 0x75a   : > { %1571 = vrot.lane.b32.xlu0 %v3209_v54, %s2502_s2  ;;  %1559 = vrot.lane.b32.xlu1 %v3209_v54, %s2504_s23  ;;  %v1545_v5 = vmul.f32 %v1534_v3, %v2768_v26  ;;  %v1546_v6 = vmul.f32 %v1533_v4, %v2771_v27 }
 0x75b   : > { %1589 = vrot.lane.b32.xlu2 %v1586_v59, %s2504_s23  ;;  %v1627_v45 = vld [vmem:[#allocation2 + $0x78] sm:$0xff] }
 0x75c   : > { %1547 = vst [vmem:[#allocation2 + $0x10] sm:$0xf] %v1545_v5  ;;  %v1626_v59 = vld [vmem:[#allocation2 + $0x8] sm:$0xff]  ;;  %v1620_v5 = vld [vmem:[#allocation2 + $0x80] sm:$0xff] }
 0x75d   : > { %1548 = vst [vmem:[#allocation2 + $0x48] sm:$0xf] %v1546_v6 }
 0x760   : > { %v1574_v9 = vpop.permute.xlu1 %1573 }
 0x762   : > { %1537 = vrot.lane.b32.xlu1 %v1533_v4, %s2504_s23  ;;  %1551 = vrot.lane.b32.xlu0 %v1533_v4, %s2502_s2 }
 0x763   : > { %1549 = vrot.lane.b32.xlu2 %v1534_v3, %s2502_s2 }
 0x76a   : > { %1535 = vrot.lane.b32.xlu0 %v1534_v3, %s2504_s23 }
 0x76b   : > { %1561 = vrot.lane.b32.xlu2 %v3217_v57, %s2504_s23 }
 0x773   : > { %1643 = vperm.xlu2 %2294, %v1640_v47  }
 0x7ad   : > { %v1602_v7 = vpop.permute.xlu2 %1601 }
 0x7b5   : > { %v1590_v8 = vpop.permute.xlu2 %1589 }
 0x7bd   : > { %v1550_v10 = vpop.permute.xlu2 %1549 }
 0x7c4   : > { %v1604_v11 = vpop.permute.xlu0 %1603  ;;  %v1588_v19 = vpop.permute.xlu1 %1587 }
 0x7c5   : > { %v1605_v18 = vsel %vm742_vm2, %v1602_v7, %v1604_v11  ;;  %v1606_v16 = vsel %vm742_vm2, %v1604_v11, %v1602_v7  ;;  %v1591_v17 = vsel %vm723_vm4, %v1588_v19, %v1590_v8  ;;  %v1592_v20 = vsel %vm723_vm4, %v1590_v8, %v1588_v19  ;;  %v1562_v33 = vpop.permute.xlu2 %1561  ;;  %v1621_v8 = vld [vmem:[#allocation2 + $0x110] sm:$0xff] }
 0x7c6   : > { %v1607_v23 = vmul.f32 %v3165_v14, %v1605_v18  ;;  %v1608_v28 = vmul.f32 %v3168_v21, %v1606_v16  ;;  %v1593_v29 = vmul.f32 %v1592_v20, %v2831_v62  ;;  %v1594_v32 = vmul.f32 %v1591_v17, %v2841_v2 }
 0x7c8   : > { %1609 = vst [vmem:[#allocation2 + $0x20] sm:$0xf] %v1607_v23 }
 0x7c9   : > { %1610 = vst [vmem:[#allocation2 + $0xc8] sm:$0xf] %v1608_v28 }
 0x7ca   : > { %1595 = vst [vmem:[#allocation2 + $0xf8] sm:$0xf] %v1593_v29 }
 0x7cb   : > { %1596 = vst [vmem:[#allocation2 + $0x38] sm:$0xf] %v1594_v32 }
 0x7cc   : > { %v1572_v36 = vpop.permute.xlu0 %1571  ;;  %v1560_v37 = vpop.permute.xlu1 %1559 }
 0x7cd   : > { %v1575_v38 = vsel %vm742_vm2, %v1572_v36, %v1574_v9  ;;  %v1576_v39 = vsel %vm742_vm2, %v1574_v9, %v1572_v36  ;;  %v1563_v40 = vsel %vm723_vm4, %v1560_v37, %v1562_v33  ;;  %v1564_v42 = vsel %vm723_vm4, %v1562_v33, %v1560_v37 }
 0x7ce   : > { %v1577_v43 = vmul.f32 %v1575_v38, %v2818_v50  ;;  %v1578_v41 = vmul.f32 %v1576_v39, %v2821_v51  ;;  %v1565_v46 = vmul.f32 %v1564_v42, %v2862_v30  ;;  %v1566_v44 = vmul.f32 %v1563_v40, %v2865_v31  ;;  %v1614_v38 = vld [vmem:[#allocation2 + $0x10] sm:$0xff]  ;;  %v1615_v42 = vld [vmem:[#allocation2 + $0x48] sm:$0xff] }
 0x7cf   : > { %v1628_v15 = vld [vmem:[#allocation2 + $0x20] sm:$0xff] }
 0x7d0   : > { %1579 = vst [vmem:[#allocation2 + $0x118] sm:$0xf] %v1577_v43  ;;  %v1638_v48 = vpack.c.bf16 %v1628_v15, %v1628_v15  ;;  %v1629_v53 = vld [vmem:[#allocation2 + $0xc8] sm:$0xff] }
 0x7d1   : > { %1580 = vst [vmem:[#allocation2 + $0x98] sm:$0xf] %v1578_v41  ;;  %v1639_v55 = vpack.c.bf16 %v1629_v53, %v1629_v53  ;;  %v1624_v13 = vld [vmem:[#allocation2 + $0xf8] sm:$0xff] }
 0x7d2   : > { %1567 = vst [vmem:[#allocation2 + $0x30] sm:$0xf] %v1565_v46  ;;  %v1650_v56 = vsel %vm873_vm3, %v1638_v48, 0  ;;  %v1625_v58 = vld [vmem:[#allocation2 + $0x38] sm:$0xff]  ;;  %v1636_v25 = vpack.c.bf16 %v1626_v59, %v1624_v13  ;;  %v1644_v46 = vpop.permute.xlu2 %1643 }
 0x7d3   : > { %1568 = vst [vmem:[#allocation2 + $0x18] sm:$0xf] %v1566_v44  ;;  %1658 = vmatpush.bf16.msra.mxu1 %v1650_v56  ;;  %v1653_v60 = vsel %vm873_vm3, %v1639_v55, 0  ;;  %v1637_v4 = vpack.c.bf16 %v1627_v45, %v1625_v58  ;;  %v1611_v41 = vld [vmem:[%s3565_s9] sm:$0x3]  ;;  %s3571_s9 = sld [smem:[#allocation34_spill]] }
 0x7d4   : > { %1671 = vmatpush.bf16.msra.mxu2 %v1653_v60  ;;  %v1552_v12 = vpop.permute.xlu0 %1551  ;;  %v1538_v19 = vpop.permute.xlu1 %1537 }
 0x7d5   : > { %v1553_v61 = vsel %vm742_vm2, %v1550_v10, %v1552_v12  ;;  %v1554_v24 = vsel %vm742_vm2, %v1552_v12, %v1550_v10 }
 0x7d6   : > { %v1555_v63 = vmul.f32 %v1553_v61, %v2835_v0  ;;  %v1556_v3 = vmul.f32 %v1554_v24, %v2838_v1 }
 0x7d7   : > { %1659 = vmatpush.bf16.msra.mxu1 %v1636_v25  ;;  %v1622_v6 = vld [vmem:[#allocation2 + $0x118] sm:$0xff] }
 0x7d8   : > { %1557 = vst [vmem:[#allocation2 + $0x108] sm:$0xf] %v1555_v63  ;;  %1672 = vmatpush.bf16.msra.mxu2 %v1637_v4  ;;  %v1634_v7 = vpack.c.bf16 %v1622_v6, %v1620_v5  ;;  %v1623_v9 = vld [vmem:[#allocation2 + $0x98] sm:$0xff] }
 0x7d9   : > { %1558 = vst [vmem:[#allocation2 + $0x68] sm:$0xf] %v1556_v3  ;;  %v1635_v11 = vpack.c.bf16 %v1623_v9, %v1621_v8  ;;  %v1618_v28 = vld [vmem:[#allocation2 + $0x30] sm:$0xff]  ;;  %v1794_v6 = vld [vmem:[%s3566_s30] sm:$0xf]  ;;  %s2020_s16 = scalar_lea.hbm %s3571_s9, %s2215_s15  ;;  %s2409_s21 = scalar_lea.hbm %s3571_s9, 16 }
 0x7da   : > { %v1619_v33 = vld [vmem:[#allocation2 + $0x18] sm:$0xff]  ;;  %s2024_s30 = sshll.u32 %s2020_s16, 4  ;;  %s2025_s30 = int_to_ptr.hbm [resolvable:$true] %s2024_s30 }
 0x7db   : > { %1660 = vmatpush.bf16.msra.mxu1 %v1634_v7  ;;  %s2403_s19 = sshra.s32 %s2025_s30, 4  ;;  %s2404_s19 = int_to_ptr.hbm [resolvable:$true] %s2403_s19 }
 0x7dc   : > { %1673 = vmatpush.bf16.msra.mxu2 %v1635_v11  ;;  %v1536_v10 = vpop.permute.xlu0 %1535  ;;  %p2410_p7 = scmp.lt.s32.totalorder %s2404_s19, %s3571_s9 }
 0x7dd   : > { %v1539_v18 = vsel %vm723_vm4, %v1536_v10, %v1538_v19  ;;  %v1540_v16 = vsel %vm723_vm4, %v1538_v19, %v1536_v10 }
 0x7de   : > { %v1541_v17 = vmul.f32 %v1540_v16, %v2878_v49  ;;  %v1542_v20 = vmul.f32 %v1539_v18, %v2881_v52 }
 0x7df   : > { %v1616_v23 = vld [vmem:[#allocation2 + $0x108] sm:$0xff] }
 0x7e0   : > { %1543 = vst [vmem:[#allocation2 + $0xb0] sm:$0xf] %v1541_v17  ;;  %v1632_v29 = vpack.c.bf16 %v1618_v28, %v1616_v23  ;;  %v1617_v32 = vld [vmem:[#allocation2 + $0x68] sm:$0xff] }
 0x7e1   : > { %1544 = vst [vmem:[#allocation2 + $0xd0] sm:$0xf] %v1542_v20  ;;  %v1633_v36 = vpack.c.bf16 %v1619_v33, %v1617_v32 }
 0x7e2   : > { %1661 = vmatpush.bf16.msra.mxu1 %v1632_v29 }
 0x7e3   : > { %1674 = vmatpush.bf16.msra.mxu2 %v1633_v36 }
 0x7e7   : > { %v1612_v37 = vld [vmem:[#allocation2 + $0xb0] sm:$0xff] }
 0x7e8   : > { %v1630_v39 = vpack.c.bf16 %v1614_v38, %v1612_v37  ;;  %v1613_v40 = vld [vmem:[#allocation2 + $0xd0] sm:$0xff] }
 0x7e9   : > { %v1631_v43 = vpack.c.bf16 %v1615_v42, %v1613_v40 }
 0x7ea   : > { %1662 = vmatpush.bf16.msra.mxu1 %v1630_v39 }
 0x7eb   : > { %1675 = vmatpush.bf16.msra.mxu2 %v1631_v43 }
 0x7ed   : > { %2199 = vmatmul.msk.bf16.vlgmr.msra.gmra.mxu1 %vm869_vm5, %v1611_v41 }
 0x7ee   : > { %2200 = vmatmul.msk.bf16.vlgmr.msra.gmra.mxu2 %vm869_vm5, %v1611_v41 }
 0x86a   : > { %v1664_v47 = vpop.f32.mrf.mxu1 }
 0x86b   : > { %v1665_v44 = vadd.f32 %v1664_v47, %v1644_v46 }
 0x86d   : > { %v1681_v15 = vmax.f32 %v1665_v44, 0.0 }
 0x86f   : > { %1723 = vst [vmem:[#allocation2 + $0x80] sm:$0xf] %v1681_v15  ;;  %1735 = vrot.lane.b32.xlu0 %v1681_v15, %s2501_s20  ;;  %1683 = vrot.lane.b32.xlu2 %v1681_v15, %s2500_s26 }
 0x871   : > { %v1677_v48 = vpop.f32.mrf.mxu2 }
 0x872   : > { %v1678_v53 = vadd.f32 %v1677_v48, %v1644_v46  ;;  %v1666_v55 = vpop.f32.mrf.mxu1 }
 0x874   : > { %v1682_v56 = vmax.f32 %v1678_v53, 0.0 }
 0x876   : > { %1724 = vst [vmem:[#allocation2 + $0x110] sm:$0xf] %v1682_v56  ;;  %1737 = vrot.lane.b32.xlu1 %v1682_v56, %s2501_s20 }
 0x877   : > { %1685 = vrot.lane.b32.xlu0 %v1682_v56, %s2500_s26 }
 0x879   : > { %v1679_v13 = vpop.f32.mrf.mxu2 }
 0x87f   : > { %1727 = vrot.lane.b32.xlu0 %v1682_v56, %s2502_s2 }
 0x8c9   : > { %v1684_v12 = vpop.permute.xlu2 %1683 }
 0x8e1   : > { %v1736_v60 = vpop.permute.xlu0 %1735 }
 0x8e8   : > { %v1738_v58 = vpop.permute.xlu1 %1737 }
 0x8e9   : > { %v1740_v59 = vsel %vm801_vm1, %v1738_v58, %v1736_v60  ;;  %v1739_v61 = vsel %vm801_vm1, %v1736_v60, %v1738_v58  ;;  %v1686_v24 = vpop.permute.xlu0 %1685 }
 0x8ea   : > { %1757 = vrot.lane.b32.xlu2 %v1740_v59, %s2502_s2  ;;  %v1752_v25 = vmul.f32 %v1740_v59, %v2782_v34  ;;  %1741 = vrot.lane.b32.xlu0 %v1739_v61, %s2504_s23  ;;  %v1751_v45 = vmul.f32 %v1739_v61, %v2785_v35  ;;  %v1688_v63 = vsel %vm716_vm0, %v1686_v24, %v1684_v12 }
 0x8eb   : > { %1755 = vrot.lane.b32.xlu1 %v1739_v61, %s2502_s2  ;;  %v1699_v3 = vmul.f32 %v1688_v63, %v2768_v26  ;;  %v1687_v4 = vsel %vm716_vm0, %v1684_v12, %v1686_v24 }
 0x8ec   : > { %1754 = vst [vmem:[#allocation2 + $0x78] sm:$0xf] %v1752_v25  ;;  %v1700_v5 = vmul.f32 %v1687_v4, %v2771_v27 }
 0x8ed   : > { %1753 = vst [vmem:[#allocation2 + $0x8] sm:$0xf] %v1751_v45 }
 0x8ee   : > { %1701 = vst [vmem:[#allocation2 + $0x10] sm:$0xf] %v1699_v3 }
 0x8ef   : > { %1702 = vst [vmem:[#allocation2 + $0x48] sm:$0xf] %v1700_v5 }
 0x8f1   : > { %v1728_v8 = vpop.permute.xlu0 %1727 }
 0x8f2   : > { %1725 = vrot.lane.b32.xlu2 %v1681_v15, %s2502_s2  ;;  %1713 = vrot.lane.b32.xlu0 %v1681_v15, %s2504_s23 }
 0x8f3   : > { %1743 = vrot.lane.b32.xlu1 %v1740_v59, %s2504_s23  ;;  %v1781_v3 = vld [vmem:[#allocation2 + $0x78] sm:$0xff] }
 0x8f4   : > { %v1780_v25 = vld [vmem:[#allocation2 + $0x8] sm:$0xff] }
 0x8fa   : > { %1691 = vrot.lane.b32.xlu0 %v1687_v4, %s2504_s23  ;;  %1705 = vrot.lane.b32.xlu2 %v1687_v4, %s2502_s2 }
 0x8fb   : > { %1703 = vrot.lane.b32.xlu1 %v1688_v63, %s2502_s2 }
 0x902   : > { %1689 = vrot.lane.b32.xlu2 %v1688_v63, %s2504_s23 }
 0x903   : > { %1715 = vrot.lane.b32.xlu1 %v1682_v56, %s2504_s23 }
 0x90b   : > { %1797 = vperm.xlu1 %2292, %v1794_v6  }
 0x944   : > { %v1758_v7 = vpop.permute.xlu2 %1757 }
 0x94c   : > { %v1726_v9 = vpop.permute.xlu2 %1725 }
 0x94d   : > { %v1729_v11 = vsel %vm742_vm2, %v1726_v9, %v1728_v8  ;;  %v1730_v19 = vsel %vm742_vm2, %v1728_v8, %v1726_v9 }
 0x94e   : > { %v1731_v10 = vmul.f32 %v1729_v11, %v2818_v50  ;;  %v1732_v18 = vmul.f32 %v1730_v19, %v2821_v51  ;;  %v1775_v11 = vld [vmem:[#allocation2 + $0x110] sm:$0xff] }
 0x950   : > { %1733 = vst [vmem:[#allocation2 + $0x118] sm:$0xf] %v1731_v10 }
 0x951   : > { %1734 = vst [vmem:[#allocation2 + $0x98] sm:$0xf] %v1732_v18 }
 0x954   : > { %v1706_v32 = vpop.permute.xlu2 %1705 }
 0x957   : > { %v1776_v5 = vld [vmem:[#allocation2 + $0x118] sm:$0xff] }
 0x958   : > { %v1777_v6 = vld [vmem:[#allocation2 + $0x98] sm:$0xff] }
 0x959   : > { %v1789_v18 = vpack.c.bf16 %v1777_v6, %v1775_v11 }
 0x95c   : > { %v1742_v16 = vpop.permute.xlu0 %1741  ;;  %v1690_v44 = vpop.permute.xlu2 %1689 }
 0x95d   : > { %v1756_v17 = vpop.permute.xlu1 %1755 }
 0x95e   : > { %v1759_v20 = vsel %vm742_vm2, %v1756_v17, %v1758_v7  ;;  %v1760_v23 = vsel %vm742_vm2, %v1758_v7, %v1756_v17  ;;  %v1774_v7 = vld [vmem:[#allocation2 + $0x80] sm:$0xff] }
 0x95f   : > { %v1761_v28 = vmul.f32 %v3165_v14, %v1759_v20  ;;  %v1762_v29 = vmul.f32 %v3168_v21, %v1760_v23  ;;  %v1788_v9 = vpack.c.bf16 %v1776_v5, %v1774_v7 }
 0x961   : > { %1763 = vst [vmem:[#allocation2 + $0x20] sm:$0xf] %v1761_v28 }
 0x962   : > { %1764 = vst [vmem:[#allocation2 + $0xc8] sm:$0xf] %v1762_v29 }
 0x964   : > { %v1714_v33 = vpop.permute.xlu0 %1713 }
 0x965   : > { %v1744_v36 = vpop.permute.xlu1 %1743 }
 0x966   : > { %v1745_v37 = vsel %vm723_vm4, %v1742_v16, %v1744_v36  ;;  %v1746_v38 = vsel %vm723_vm4, %v1744_v36, %v1742_v16 }
 0x967   : > { %v1747_v39 = vmul.f32 %v1746_v38, %v2831_v62  ;;  %v1748_v40 = vmul.f32 %v1745_v37, %v2841_v2 }
 0x968   : > { %v1782_v42 = vld [vmem:[#allocation2 + $0x20] sm:$0xff] }
 0x969   : > { %1749 = vst [vmem:[#allocation2 + $0xf8] sm:$0xf] %v1747_v39  ;;  %v1792_v43 = vpack.c.bf16 %v1782_v42, %v1782_v42  ;;  %v1783_v41 = vld [vmem:[#allocation2 + $0xc8] sm:$0xff] }
 0x96a   : > { %1750 = vst [vmem:[#allocation2 + $0x38] sm:$0xf] %v1748_v40  ;;  %v1793_v46 = vpack.c.bf16 %v1783_v41, %v1783_v41  ;;  %v1769_v40 = vld [vmem:[#allocation2 + $0x48] sm:$0xff] }
 0x96b   : > { %v1804_v47 = vsel %vm873_vm3, %v1792_v43, 0  ;;  %v1765_v43 = vld [vmem:[%s3567_s24] sm:$0x3]  ;;  %s2405_s24 = scalar_lea.hbm %s2404_s19, 8 }
 0x96c   : > { %1812 = vmatpush.bf16.msrb.mxu0 %v1804_v47  ;;  %v1807_v15 = vsel %vm873_vm3, %v1793_v46, 0  ;;  %v1692_v48 = vpop.permute.xlu0 %1691  ;;  %p2406_p1 = scmp.ne.s32.totalorder %s2404_s19, %s2405_s24  ;;  %p2411_p9 = scmp.lt.s32.totalorder %s2409_s21, %s2405_s24 }
 0x96d   : > { %1825 = vmatpush.bf16.msrb.mxu3 %v1807_v15  ;;  %v1704_v53 = vpop.permute.xlu1 %1703  ;;  %v1693_v55 = vsel %vm723_vm4, %v1690_v44, %v1692_v48  ;;  %v1694_v56 = vsel %vm723_vm4, %v1692_v48, %v1690_v44 }
 0x96e   : > { %v1707_v13 = vsel %vm742_vm2, %v1704_v53, %v1706_v32  ;;  %v1708_v60 = vsel %vm742_vm2, %v1706_v32, %v1704_v53  ;;  %v1695_v58 = vmul.f32 %v1694_v56, %v2878_v49  ;;  %v1696_v61 = vmul.f32 %v1693_v55, %v2881_v52  ;;  %p2407_p3 = pnand %p2406_p1, %p2665_p0  ;;  %p2412_p8 = por %p2411_p9, %p2410_p7 }
 0x96f   : > { %v1709_v12 = vmul.f32 %v1707_v13, %v2835_v0  ;;  %v1710_v59 = vmul.f32 %v1708_v60, %v2838_v1 }
 0x970   : > { %1697 = vst [vmem:[#allocation2 + $0xb0] sm:$0xf] %v1695_v58  ;;  %v1778_v24 = vld [vmem:[#allocation2 + $0xf8] sm:$0xff]  ;;  %p2408_p13 = pneg %p2407_p3 }
 0x971   : > { %1711 = vst [vmem:[#allocation2 + $0x108] sm:$0xf] %v1709_v12  ;;  %v1790_v45 = vpack.c.bf16 %v1780_v25, %v1778_v24  ;;  %v1779_v63 = vld [vmem:[#allocation2 + $0x38] sm:$0xff] }
 0x972   : > { %1712 = vst [vmem:[#allocation2 + $0x68] sm:$0xf] %v1710_v59  ;;  %v1791_v4 = vpack.c.bf16 %v1781_v3, %v1779_v63  ;;  %p2413_p10 = pnand %p2412_p8, %p2408_p13 }
 0x973   : > { %1698 = vst [vmem:[#allocation2 + $0xd0] sm:$0xf] %v1696_v61  ;;  %1813 = vmatpush.bf16.msrb.mxu0 %v1790_v45 }
 0x974   : > { %1826 = vmatpush.bf16.msrb.mxu3 %v1791_v4 }
 0x975   : > { %v1716_v8 = vpop.permute.xlu1 %1715 }
 0x976   : > { %v1717_v19 = vsel %vm723_vm4, %v1714_v33, %v1716_v8  ;;  %v1718_v10 = vsel %vm723_vm4, %v1716_v8, %v1714_v33  ;;  %v1768_v33 = vld [vmem:[#allocation2 + $0x10] sm:$0xff] }
 0x977   : > { %v1719_v16 = vmul.f32 %v1718_v10, %v2862_v30  ;;  %v1720_v17 = vmul.f32 %v1717_v19, %v2865_v31  ;;  %1814 = vmatpush.bf16.msrb.mxu0 %v1788_v9  ;;  %v1766_v37 = vld [vmem:[#allocation2 + $0xb0] sm:$0xff] }
 0x978   : > { %1827 = vmatpush.bf16.msrb.mxu3 %v1789_v18  ;;  %v1770_v20 = vld [vmem:[#allocation2 + $0x108] sm:$0xff]  ;;  %v1784_v39 = vpack.c.bf16 %v1768_v33, %v1766_v37 }
 0x979   : > { %1721 = vst [vmem:[#allocation2 + $0x30] sm:$0xf] %v1719_v16  ;;  %v1771_v29 = vld [vmem:[#allocation2 + $0x68] sm:$0xff] }
 0x97a   : > { %1722 = vst [vmem:[#allocation2 + $0x18] sm:$0xf] %v1720_v17  ;;  %v1767_v38 = vld [vmem:[#allocation2 + $0xd0] sm:$0xff] }
 0x97b   : > { %v1785_v42 = vpack.c.bf16 %v1769_v40, %v1767_v38 }
 0x97d   : > { %v1798_v41 = vpop.permute.xlu1 %1797 }
 0x980   : > { %v1772_v23 = vld [vmem:[#allocation2 + $0x30] sm:$0xff] }
 0x981   : > { %v1786_v28 = vpack.c.bf16 %v1772_v23, %v1770_v20  ;;  %v1773_v32 = vld [vmem:[#allocation2 + $0x18] sm:$0xff] }
 0x982   : > { %v1787_v36 = vpack.c.bf16 %v1773_v32, %v1771_v29 }
 0x983   : > { %1815 = vmatpush.bf16.msrb.mxu0 %v1786_v28 }
 0x984   : > { %1828 = vmatpush.bf16.msrb.mxu3 %v1787_v36 }
 0x987   : > { %1816 = vmatpush.bf16.msrb.mxu0 %v1784_v39 }
 0x988   : > { %1829 = vmatpush.bf16.msrb.mxu3 %v1785_v42 }
 0x98a   : > { %2201 = vmatmul.msk.bf16.vlgmr.msrb.gmra.mxu0 %vm869_vm5, %v1765_v43 }
 0x98b   : > { %2202 = vmatmul.msk.bf16.vlgmr.msrb.gmra.mxu3 %vm869_vm5, %v1765_v43 }
 0xa07   : > { %v1818_v46 = vpop.f32.mrf.mxu0 }
 0xa08   : > { %v1819_v47 = vadd.f32 %v1818_v46, %v1798_v41 }
 0xa0a   : > { %v1835_v44 = vadd.f32 %v1819_v47, %v3209_v54 }
 0xa0c   : > { %1877 = vst [vmem:[#allocation2 + $0x80] sm:$0xf] %v1835_v44  ;;  %1837 = vrot.lane.b32.xlu1 %v1835_v44, %s2500_s26  ;;  %1889 = vrot.lane.b32.xlu2 %v1835_v44, %s2501_s20 }
 0xa0e   : > { %v1831_v15 = vpop.f32.mrf.mxu3 }
 0xa0f   : > { %v1832_v48 = vadd.f32 %v1831_v15, %v1798_v41  ;;  %v1820_v53 = vpop.f32.mrf.mxu0 }
 0xa11   : > { %v1836_v55 = vadd.f32 %v1832_v48, %v3217_v57 }
 0xa13   : > { %1878 = vst [vmem:[#allocation2 + $0x110] sm:$0xf] %v1836_v55  ;;  %1891 = vrot.lane.b32.xlu0 %v1836_v55, %s2501_s20  ;;  %v1993_v56 = vrot.slane %v1836_v55, 4 }
 0xa14   : > { %1839 = vrot.lane.b32.xlu2 %v1836_v55, %s2500_s26 }
 0xa15   : > { %v1994_v13 = vsel %vm873_vm3, %v1835_v44, %v1993_v56 }
 0xa16   : > { %v1833_v60 = vpop.f32.mrf.mxu3  ;;  %1996 = vst [vmem:[%s653_s1] sm:$0xff] %v1994_v13  ;;  %v1928_v13 = vld [vmem:[#allocation2 + $0x80] sm:$0xff] }
 0xa1c   : > { %1881 = vrot.lane.b32.xlu2 %v1836_v55, %s2502_s2 }
 0xa66   : > { %v1890_v54 = vpop.permute.xlu2 %1889 }
 0xa6e   : > { %v1840_v58 = vpop.permute.xlu2 %1839 }
 0xa7e   : > { %v1838_v12 = vpop.permute.xlu1 %1837 }
 0xa7f   : > { %v1842_v57 = vsel %vm716_vm0, %v1840_v58, %v1838_v12  ;;  %v1841_v59 = vsel %vm716_vm0, %v1838_v12, %v1840_v58 }
 0xa80   : > { %v1853_v61 = vmul.f32 %v1842_v57, %v2768_v26  ;;  %v1854_v24 = vmul.f32 %v1841_v59, %v2771_v27  ;;  %v1948_v26 = vld [vmem:[%s3568_s13] sm:$0xf]  ;;  %v1882_v27 = vpop.permute.xlu2 %1881 }
 0xa82   : > { %1855 = vst [vmem:[#allocation2 + $0x10] sm:$0xf] %v1853_v61 }
 0xa83   : > { %1856 = vst [vmem:[#allocation2 + $0x48] sm:$0xf] %v1854_v24 }
 0xa85   : > { %v1892_v25 = vpop.permute.xlu0 %1891 }
 0xa86   : > { %v1894_v45 = vsel %vm801_vm1, %v1892_v25, %v1890_v54  ;;  %v1893_v63 = vsel %vm801_vm1, %v1890_v54, %v1892_v25 }
 0xa87   : > { %1911 = vrot.lane.b32.xlu1 %v1894_v45, %s2502_s2  ;;  %v1906_v3 = vmul.f32 %v1894_v45, %v2782_v34  ;;  %1895 = vrot.lane.b32.xlu2 %v1893_v63, %s2504_s23  ;;  %v1905_v4 = vmul.f32 %v1893_v63, %v2785_v35 }
 0xa88   : > { %1909 = vrot.lane.b32.xlu0 %v1893_v63, %s2502_s2 }
 0xa89   : > { %1908 = vst [vmem:[#allocation2 + $0x78] sm:$0xf] %v1906_v3 }
 0xa8a   : > { %1907 = vst [vmem:[#allocation2 + $0x8] sm:$0xf] %v1905_v4 }
 0xa8f   : > { %1879 = vrot.lane.b32.xlu1 %v1835_v44, %s2502_s2  ;;  %1867 = vrot.lane.b32.xlu2 %v1835_v44, %s2504_s23 }
 0xa90   : > { %1897 = vrot.lane.b32.xlu0 %v1894_v45, %s2504_s23  ;;  %v1935_v47 = vld [vmem:[#allocation2 + $0x78] sm:$0xff] }
 0xa91   : > { %v1934_v43 = vld [vmem:[#allocation2 + $0x8] sm:$0xff] }
 0xa97   : > { %1845 = vrot.lane.b32.xlu2 %v1841_v59, %s2504_s23  ;;  %1859 = vrot.lane.b32.xlu1 %v1841_v59, %s2502_s2 }
 0xa98   : > { %1857 = vrot.lane.b32.xlu0 %v1842_v57, %s2502_s2 }
 0xa9f   : > { %1843 = vrot.lane.b32.xlu1 %v1842_v57, %s2504_s23  ;;  %v1929_v57 = vld [vmem:[#allocation2 + $0x110] sm:$0xff] }
 0xaa0   : > { %1869 = vrot.lane.b32.xlu0 %v1836_v55, %s2504_s23 }
 0xaa8   : > { %1951 = vperm.xlu0 %2293, %v1948_v26  }
 0xae1   : > { %v1896_v9 = vpop.permute.xlu2 %1895 }
 0xae9   : > { %v1868_v36 = vpop.permute.xlu2 %1867 }
 0xaf1   : > { %v1846_v48 = vpop.permute.xlu2 %1845 }
 0xaf9   : > { %v1912_v34 = vpop.permute.xlu1 %1911 }
 0xafa   : > { %v1910_v35 = vpop.permute.xlu0 %1909 }
 0xafb   : > { %v1913_v5 = vsel %vm742_vm2, %v1910_v35, %v1912_v34  ;;  %v1914_v6 = vsel %vm742_vm2, %v1912_v34, %v1910_v35  ;;  %v1919_v35 = vld [vmem:[%s3569_s18] sm:$0x3] }
 0xafc   : > { %v1915_v7 = vmul.f32 %v3165_v14, %v1913_v5  ;;  %v1916_v8 = vmul.f32 %v3168_v21, %v1914_v6 }
 0xafe   : > { %1917 = vst [vmem:[#allocation2 + $0x20] sm:$0xf] %v1915_v7 }
 0xaff   : > { %1918 = vst [vmem:[#allocation2 + $0xc8] sm:$0xf] %v1916_v8 }
 0xb01   : > { %v1880_v11 = vpop.permute.xlu1 %1879 }
 0xb02   : > { %v1883_v19 = vsel %vm742_vm2, %v1880_v11, %v1882_v27  ;;  %v1884_v10 = vsel %vm742_vm2, %v1882_v27, %v1880_v11  ;;  %v1898_v18 = vpop.permute.xlu0 %1897  ;;  %v1923_v27 = vld [vmem:[#allocation2 + $0x48] sm:$0xff] }
 0xb03   : > { %v1885_v16 = vmul.f32 %v1883_v19, %v2818_v50  ;;  %v1886_v17 = vmul.f32 %v1884_v10, %v2821_v51  ;;  %v1899_v14 = vsel %vm723_vm4, %v1896_v9, %v1898_v18  ;;  %v1900_v21 = vsel %vm723_vm4, %v1898_v18, %v1896_v9 }
 0xb04   : > { %v1901_v20 = vmul.f32 %v1900_v21, %v2831_v62  ;;  %v1902_v23 = vmul.f32 %v1899_v14, %v2841_v2 }
 0xb05   : > { %1887 = vst [vmem:[#allocation2 + $0x118] sm:$0xf] %v1885_v16  ;;  %v1936_v28 = vld [vmem:[#allocation2 + $0x20] sm:$0xff] }
 0xb06   : > { %1888 = vst [vmem:[#allocation2 + $0x98] sm:$0xf] %v1886_v17  ;;  %v1946_v29 = vpack.c.bf16 %v1936_v28, %v1936_v28  ;;  %v1937_v32 = vld [vmem:[#allocation2 + $0xc8] sm:$0xff] }
 0xb07   : > { %1903 = vst [vmem:[#allocation2 + $0xf8] sm:$0xf] %v1901_v20  ;;  %v1947_v50 = vpack.c.bf16 %v1937_v32, %v1937_v32 }
 0xb08   : > { %1904 = vst [vmem:[#allocation2 + $0x38] sm:$0xf] %v1902_v23  ;;  %v1958_v51 = vsel %vm873_vm3, %v1946_v29, 0 }
 0xb09   : > { %1966 = vmatpush.bf16.msrb.mxu1 %v1958_v51  ;;  %v1961_v37 = vsel %vm873_vm3, %v1947_v50, 0  ;;  %v1860_v38 = vpop.permute.xlu1 %1859 }
 0xb0a   : > { %1979 = vmatpush.bf16.msrb.mxu2 %v1961_v37  ;;  %v1858_v33 = vpop.permute.xlu0 %1857 }
 0xb0b   : > { %v1861_v62 = vsel %vm742_vm2, %v1858_v33, %v1860_v38  ;;  %v1862_v2 = vsel %vm742_vm2, %v1860_v38, %v1858_v33 }
 0xb0c   : > { %v1863_v39 = vmul.f32 %v1861_v62, %v2835_v0  ;;  %v1864_v40 = vmul.f32 %v1862_v2, %v2838_v1  ;;  %v1930_v15 = vld [vmem:[#allocation2 + $0x118] sm:$0xff] }
 0xb0d   : > { %v1931_v55 = vld [vmem:[#allocation2 + $0x98] sm:$0xff]  ;;  %v1942_v12 = vpack.c.bf16 %v1930_v15, %v1928_v13 }
 0xb0e   : > { %1865 = vst [vmem:[#allocation2 + $0x108] sm:$0xf] %v1863_v39  ;;  %v1932_v42 = vld [vmem:[#allocation2 + $0xf8] sm:$0xff]  ;;  %v1943_v25 = vpack.c.bf16 %v1931_v55, %v1929_v57 }
 0xb0f   : > { %1866 = vst [vmem:[#allocation2 + $0x68] sm:$0xf] %v1864_v40  ;;  %v1944_v41 = vpack.c.bf16 %v1934_v43, %v1932_v42  ;;  %v1933_v46 = vld [vmem:[#allocation2 + $0x38] sm:$0xff] }
 0xb10   : > { %v1945_v44 = vpack.c.bf16 %v1935_v47, %v1933_v46 }
 0xb11   : > { %1967 = vmatpush.bf16.msrb.mxu1 %v1944_v41  ;;  %v1844_v53 = vpop.permute.xlu1 %1843 }
 0xb12   : > { %1980 = vmatpush.bf16.msrb.mxu2 %v1945_v44  ;;  %v1870_v56 = vpop.permute.xlu0 %1869  ;;  %v1847_v0 = vsel %vm723_vm4, %v1844_v53, %v1846_v48  ;;  %v1848_v1 = vsel %vm723_vm4, %v1846_v48, %v1844_v53 }
 0xb13   : > { %v1871_v60 = vsel %vm723_vm4, %v1868_v36, %v1870_v56  ;;  %v1872_v54 = vsel %vm723_vm4, %v1870_v56, %v1868_v36  ;;  %v1849_v58 = vmul.f32 %v1848_v1, %v2878_v49  ;;  %v1850_v24 = vmul.f32 %v1847_v0, %v2881_v52  ;;  %v1922_v52 = vld [vmem:[#allocation2 + $0x10] sm:$0xff] }
 0xb14   : > { %v1873_v59 = vmul.f32 %v1872_v54, %v2862_v30  ;;  %v1874_v61 = vmul.f32 %v1871_v60, %v2865_v31 }
 0xb15   : > { %1851 = vst [vmem:[#allocation2 + $0xb0] sm:$0xf] %v1849_v58  ;;  %1968 = vmatpush.bf16.msrb.mxu1 %v1942_v12  ;;  %v1924_v45 = vld [vmem:[#allocation2 + $0x108] sm:$0xff] }
 0xb16   : > { %1875 = vst [vmem:[#allocation2 + $0x30] sm:$0xf] %v1873_v59  ;;  %1981 = vmatpush.bf16.msrb.mxu2 %v1943_v25  ;;  %v1925_v3 = vld [vmem:[#allocation2 + $0x68] sm:$0xff] }
 0xb17   : > { %1876 = vst [vmem:[#allocation2 + $0x18] sm:$0xf] %v1874_v61 }
 0xb18   : > { %1852 = vst [vmem:[#allocation2 + $0xd0] sm:$0xf] %v1850_v24 }
 0xb1c   : > { %v1920_v30 = vld [vmem:[#allocation2 + $0xb0] sm:$0xff] }
 0xb1d   : > { %v1926_v22 = vld [vmem:[#allocation2 + $0x30] sm:$0xff]  ;;  %v1938_v26 = vpack.c.bf16 %v1922_v52, %v1920_v30 }
 0xb1e   : > { %v1940_v63 = vpack.c.bf16 %v1926_v22, %v1924_v45  ;;  %v1927_v49 = vld [vmem:[#allocation2 + $0x18] sm:$0xff] }
 0xb1f   : > { %v1941_v4 = vpack.c.bf16 %v1927_v49, %v1925_v3  ;;  %v1921_v31 = vld [vmem:[#allocation2 + $0xd0] sm:$0xff] }
 0xb20   : > { %1969 = vmatpush.bf16.msrb.mxu1 %v1940_v63  ;;  %v1939_v34 = vpack.c.bf16 %v1923_v27, %v1921_v31 }
 0xb21   : > { %1982 = vmatpush.bf16.msrb.mxu2 %v1941_v4 }
 0xb24   : > { %1970 = vmatpush.bf16.msrb.mxu1 %v1938_v26 }
 0xb25   : > { %1983 = vmatpush.bf16.msrb.mxu2 %v1939_v34 }
 0xb27   : > { %2203 = vmatmul.msk.bf16.vlgmr.msrb.gmra.mxu1 %vm869_vm5, %v1919_v35 }
 0xb28   : > { %2204 = vmatmul.msk.bf16.vlgmr.msrb.gmra.mxu2 %vm869_vm5, %v1919_v35 }
 0xb29   : > { %2416 = shalt.err (!%p2413_p10)
}
 0xb2a   : > { %2225 = dma.vmem_to_hbm [thread:$0]  (%p2665_p0), %s2023_s25, 128, %s2025_s30, %s2004_s22   ;;  %v1952_v6 = vpop.permute.xlu0 %1951 }
 0xb2b   : > { %s3572_s18 = sld [smem:[#allocation35_spill]]  ;;  %s660_s29 = scalar_lea.vmem [#allocation10], %s2719_s14 }
 0xb2c   : > { %s2037_s16 = sshll.u32 %s660_s29, 4  ;;  %s2009_s25 = scalar_lea.sflag [#allocation11], %s2716_s12  ;;  %s2038_s16 = int_to_ptr.vmem [resolvable:$true] %s2037_s16 }
 0xb31   : > { %s2035_s27 = scalar_lea.hbm %s3572_s18, %s2215_s15  ;;  %s2437_s24 = scalar_lea.hbm %s3572_s18, 16 }
 0xb32   : > { %s2039_s19 = sshll.u32 %s2035_s27, 4  ;;  %s2040_s19 = int_to_ptr.hbm [resolvable:$true] %s2039_s19 }
 0xb33   : > { %s2431_s30 = sshra.s32 %s2040_s19, 4  ;;  %s2432_s30 = int_to_ptr.hbm [resolvable:$true] %s2431_s30 }
 0xb34   : > { %s2433_s15 = scalar_lea.hbm %s2432_s30, 8  ;;  %p2438_p2 = scmp.lt.s32.totalorder %s2432_s30, %s3572_s18 }
 0xb35   : > { %p2434_p12 = scmp.ne.s32.totalorder %s2432_s30, %s2433_s15  ;;  %p2439_p4 = scmp.lt.s32.totalorder %s2437_s24, %s2433_s15 }
 0xb37   : > { %p2435_p5 = pnand %p2434_p12, %p2665_p0  ;;  %p2440_p1 = por %p2439_p4, %p2438_p2 }
 0xb39   : > { %p2436_p11 = pneg %p2435_p5 }
 0xb3b   : > { %p2441_p3 = pnand %p2440_p1, %p2436_p11 }
 0xba4   : > { %v1972_v5 = vpop.f32.mrf.mxu1 }
 0xba5   : > { %v1973_v8 = vadd.f32 %v1972_v5, %v1952_v6 }
 0xba7   : > { %v1989_v10 = vmax.f32 %v1973_v8, 0.0 }
 0xbab   : > { %v1985_v7 = vpop.f32.mrf.mxu2 }
 0xbac   : > { %v1986_v9 = vadd.f32 %v1985_v7, %v1952_v6  ;;  %v1974_v11 = vpop.f32.mrf.mxu1 }
 0xbae   : > { %v1990_v19 = vmax.f32 %v1986_v9, 0.0 }
 0xbb0   : > { %v1999_v18 = vrot.slane %v1990_v19, 4 }
 0xbb2   : > { %v2000_v16 = vsel %vm873_vm3, %v1989_v10, %v1999_v18 }
 0xbb3   : > { %v1987_v17 = vpop.f32.mrf.mxu2  ;;  %2002 = vst [vmem:[%s660_s29] sm:$0xff] %v2000_v16 }
 0xbb4   : > { %2444 = shalt.err (!%p2441_p3)
}
 0xbb5   : > { %2226 = dma.vmem_to_hbm [thread:$0]  (%p2665_p0), %s2038_s16, 128, %s2040_s19, %s2009_s25  }
 0xbb6 PF: > { %s3573_s12 = sld [smem:[#allocation17_spill]] }
 0xbb7   : > { %s3575_s13 = sld [smem:[#allocation19_spill]] }
 0xbbc   : > { %s2051_s2 = sand.u32 1, %s3573_s12  }
 0xbbd   : > { %p3576_p13 = scmp.ge.s32.totalorder %s3575_s13, 2  ;;  %s2052_s1 = scalar_lea.sflag [#allocation5], %s2051_s2 }
 0xbbf   : > { %p2241_p7 = pnand %p3576_p13, %p2671_p6 }
 0xbc1   : > { %p2242_p9 = pneg %p2241_p7 }
 0xbc3   : > { %2474 = dma.done.wait (%p2242_p9), %s2052_s1, 128  }
 0xbc4   : > { %2476 = vsyncadd (%p2242_p9), %s2052_s1, 4294967168  ;;  %s2062_s23 = scalar_lea.sflag [#allocation11], %s2051_s2 }
 0xbc5   : > { %2478 = dma.done.wait (%p2242_p9), %s2062_s23, 128  }
 0xbc6   : > { %2480 = vsyncadd (%p2242_p9), %s2062_s23, 4294967168  ;;  %s3577_s30 = sld [smem:[#allocation20_spill]]  ;;  %s3580_s27 = smov %s2487_s28 }
 0xbc7   : > { %s3578_s29 = sld [smem:[#allocation18_spill]] }
 0xbc8   : > { %s3579_s0 = sld [smem:[#allocation21_spill]] }
 0xbcc   : > { %p38_p0 = scmp.ge.s32.totalorder %s3577_s30, 4  }
 0xbcd   : > { %s3581_s28 = smov %s3578_s29 }
 0xbce   : > { %s3582_s29 = smov %s3579_s0  ;;  %40 = sbr.rel (!%p38_p0) target bundleno = 22 (0x16), region = 167 }
 0xbd3   :  { %2068 = vsyncpa [#allocation4], 1 }
 0xbd4   :  { %2070 = vsyncpa [#allocation4 + $0x1], 1 }
 0xbd5   :  { %2071 = vsyncpa [#allocation7], 1 }
 0xbd6   :  { %2073 = vsyncpa [#allocation7 + $0x1], 1 }
 0xbd7   :  { %2074 = vsyncpa [#allocation5], 1 }
 0xbd8   :  { %2076 = vsyncpa [#allocation5 + $0x1], 1 }
 0xbd9   :  { %2077 = vsyncpa [#allocation11], 1 }
 0xbda   :  { %2079 = vsyncpa [#allocation11 + $0x1], 1 }

// kernel: tpu_custom_call.1
= control target key start
LH: loop header
LB: loop body
LE: loop exit
PB: predicated region body
PF: predicated region fallthrough
CT: control target
= control target key end

     0   :  { %s3503_s0 = inlined_call_operand.hbm [shape: f32[2,4,256], index: 0, kind: input, shape index: {}]   ;;  %s3504_s1 = inlined_call_operand.hbm [shape: f32[2,4,256], index: 1, kind: input, shape index: {}]   ;;  %s3505_s2 = inlined_call_operand.hbm [shape: f32[9,256], index: 2, kind: input, shape index: {}]   ;;  %s3506_s3 = inlined_call_operand.vmem [shape: bf16[4,72], index: 3, kind: input, shape index: {}]   ;;  %s3507_s4 = inlined_call_operand.vmem [shape: f32[4,1], index: 4, kind: input, shape index: {}]   ;;  %s3508_s5 = inlined_call_operand.vmem [shape: bf16[4,144], index: 5, kind: input, shape index: {}]   ;;  %s3509_s6 = inlined_call_operand.vmem [shape: f32[4,1], index: 6, kind: input, shape index: {}]   ;;  %s3510_s7 = inlined_call_operand.vmem [shape: bf16[4,72], index: 7, kind: input, shape index: {}]   ;;  %s3511_s8 = inlined_call_operand.vmem [shape: f32[4,1], index: 8, kind: input, shape index: {}]   ;;  %s3512_s9 = inlined_call_operand.vmem [shape: bf16[4,72], index: 9, kind: input, shape index: {}]   ;;  %s3513_s10 = inlined_call_operand.vmem [shape: f32[4,1], index: 10, kind: input, shape index: {}]   ;;  %s3514_s11 = inlined_call_operand.vmem [shape: bf16[4,72], index: 11, kind: input, shape index: {}]   ;;  %s3515_s12 = inlined_call_operand.vmem [shape: f32[4,1], index: 12, kind: input, shape index: {}]   ;;  %s3516_s13 = inlined_call_operand.vmem [shape: bf16[4,72], index: 13, kind: input, shape index: {}]   ;;  %s3517_s14 = inlined_call_operand.vmem [shape: f32[4,1], index: 14, kind: input, shape index: {}]   ;;  %s3518_s15 = inlined_call_operand.vmem [shape: bf16[4,72], index: 15, kind: input, shape index: {}]   ;;  %s3519_s16 = inlined_call_operand.vmem [shape: f32[4,1], index: 16, kind: input, shape index: {}]   ;;  %s3520_s17 = inlined_call_operand.hbm [shape: f32[2,4,256], index: 17, kind: output, shape index: {0}]   ;;  %s3521_s18 = inlined_call_operand.hbm [shape: f32[2,4,256], index: 18, kind: output, shape index: {1}]  }
   0x1   :  { %3534 = sst [smem:[#allocation24_spill]] %s3503_s0 }
   0x2   :  { %3535 = sst [smem:[#allocation25_spill]] %s3504_s1 }
   0x3   :  { %3536 = sst [smem:[#allocation26_spill]] %s3505_s2 }
   0x4   :  { %3537 = sst [smem:[#allocation27_spill]] %s3512_s9 }
   0x5   :  { %3538 = sst [smem:[#allocation28_spill]] %s3514_s11 }
   0x6   :  { %3539 = sst [smem:[#allocation29_spill]] %s3515_s12 }
   0x7   :  { %3540 = sst [smem:[#allocation30_spill]] %s3516_s13 }
   0x8   :  { %3541 = sst [smem:[#allocation31_spill]] %s3517_s14 }
   0x9   :  { %3542 = sst [smem:[#allocation32_spill]] %s3518_s15 }
   0xa   :  { %3543 = sst [smem:[#allocation33_spill]] %s3519_s16 }
   0xb   :  { %3544 = sst [smem:[#allocation34_spill]] %s3520_s17 }
   0xc   :  { %3545 = sst [smem:[#allocation35_spill]] %s3521_s18 }
   0xd   :  { %24 = vsyncpa [#allocation4], 0 }
   0xe   :  { %26 = vsyncpa [#allocation4 + $0x1], 0 }
   0xf   :  { %27 = vsyncpa [#allocation7], 0 }
  0x10   :  { %29 = vsyncpa [#allocation7 + $0x1], 0 }
  0x11   :  { %30 = vsyncpa [#allocation5], 0 }
  0x12   :  { %32 = vsyncpa [#allocation5 + $0x1], 0 }
  0x13   :  { %33 = vsyncpa [#allocation11], 0 }
  0x14   :  { %35 = vsyncpa [#allocation11 + $0x1], 0  ;;  %s2601_s27 = smov 0   ;;  %s2603_s28 = smov 0  }
  0x15   :  { %s2605_s29 = smov 0   ;;  %s2607_s30 = smov 0  }
  0x16 LB: > { %3546 = sst [smem:[#allocation17_spill]] %s2483_s27  ;;  %s2625_s21 = sadd.s32 4294967295, %s2495_s30   ;;  %s2495_s30 = sphi %s2607_s30, %s3577_s30   ;;  %s2491_s29 = sphi %s2605_s29, %s3582_s29   ;;  %s2487_s28 = sphi %s2603_s28, %s3581_s28   ;;  %s2483_s27 = sphi %s2601_s27, %s3580_s27  }
  0x17   : > { %3547 = sst [smem:[#allocation18_spill]] %s2491_s29  ;;  %p2176_p0 = scmp.ge.s32.totalorder %s2495_s30, 1 }
  0x18   : > { %3548 = sst [smem:[#allocation19_spill]] %s2495_s30  ;;  %p62_p1 = scmp.eq.s32.totalorder %s2625_s21, 0 }
  0x19   : > { %s3549_s1 = sld [smem:[#allocation26_spill]]  ;;  %p465_p2 = scmp.lt.s32.totalorder %s2495_s30, 3 }
  0x1a   : > { %s2497_s2 = smov [#allocation8]   ;;  %s2498_s24 = smov 256  }
  0x1b   : > { %p2630_p3 = pnand %p2176_p0, %p465_p2  ;;  %s478_s23 = sshll.u32 %s2497_s2, 4  ;;  %s479_s23 = int_to_ptr.vmem [resolvable:$true] %s478_s23 }
  0x1c   : > { %s2499_s25 = smov 16   ;;  %s2175_s26 = sadd.s32 4294967294, %s2495_s30  }
  0x1d   : > { %p2229_p4 = pneg %p2630_p3  ;;  %s2641_s0 = sadd.s32 1, %s2495_s30  }
  0x1e   : > { %3551 = sst [smem:[#allocation20_spill]] %s2641_s0  ;;  %s48_s19 = sadd.s32 1, %s2491_s29 }
  0x1f   : > { %s476_s20 = sshll.u32 %s3549_s1, 4  ;;  %p2230_p6 = pnand %p2229_p4, %p62_p1  ;;  %s477_s20 = int_to_ptr.hbm [resolvable:$true] %s476_s20 }
  0x20   : > { %s45_s1 = ssub.s32 %s2495_s30, %s2641_s0  ;;  %p55_p7 = scmp.ne.s32.totalorder %s2491_s29, %s2487_s28 }
  0x21   : > { %2232 = dma.hbm_to_vmem [thread:$0]  (!%p2230_p6), %s477_s20, 512, %s479_s23, [#allocation7], %s2498_s24, %s2498_s24, %s2499_s25  }
  0x22   : > { %p46_p8 = scmp.eq.s32.totalorder %s45_s1, 0  ;;  %p56_p9 = scmp.eq.s32.totalorder %s2495_s30, 0 }
  0x23   : > { %p61_p10 = scmp.ne.s32.totalorder %s2487_s28, %s2483_s27  ;;  %p426_p11 = scmp.eq.s32.totalorder %s2625_s21, 1 }
  0x24   : > { %s2653_s2 = scalar_select %p46_p8, %s2491_s29, %s48_s19  }
  0x25   : > { %p2655_p12 = por %p56_p9, %p55_p7  ;;  %p2661_p13 = por %p62_p1, %p61_p10 }
  0x26   : > { %3552 = sst [smem:[#allocation21_spill]] %s2653_s2  ;;  %p2665_p0 = por %p426_p11, %p55_p7 }
  0x27   : > { %p432_p2 = scmp.eq.s32.totalorder %s2175_s26, 1  ;;  %p2248_p4 = scmp.lt.s32.totalorder %s2495_s30, 2 }
  0x28   : > { %s3555_s23 = scalar_select %p2665_p0, 1, 0 }
  0x29   : > { %s534_s24 = sand.u32 1, %s2491_s29   ;;  %p2671_p6 = por %p432_p2, %p61_p10 }
  0x2a   : > { %3556 = sst [smem:[#allocation22_spill]] %s3555_s23  ;;  %s2179_s19 = sshll.u32 %s534_s24, 3 }
  0x2b   : > { %s3557_s25 = scalar_select %p2671_p6, 1, 0 }
  0x2c   : > { %s2213_s1 = sshll.u32 %s2495_s30, 3  ;;  %s3559_s27 = sld [smem:[#allocation24_spill]] }
  0x2d   : > { %3558 = sst [smem:[#allocation23_spill]] %s3557_s25  ;;  %s538_s13 = scalar_lea.vmem [#allocation3], %s2179_s19 }
  0x2e   : > { %s547_s14 = sshll.u32 %s538_s13, 4  ;;  %p2681_p7 = pnand %p2248_p4, %p2655_p12  ;;  %s548_s14 = int_to_ptr.vmem [resolvable:$true] %s547_s14 }
  0x2f   : > { %s3562_s11 = sld [smem:[#allocation25_spill]]  ;;  %s554_s12 = sand.u32 1, %s2495_s30  }
  0x30   : > { %s535_s9 = scalar_lea.sflag [#allocation4], %s534_s24  ;;  %p2333_p9 = pneg %p2681_p7 }
  0x32   : > { %s3560_s17 = smov %s3559_s27  ;;  %s543_s15 = scalar_lea.hbm %s3559_s27, %s2213_s1 }
  0x33   : > { %s545_s16 = sshll.u32 %s543_s15, 4  ;;  %s2336_s27 = scalar_lea.hbm %s3560_s17, 16  ;;  %s546_s16 = int_to_ptr.hbm [resolvable:$true] %s545_s16 }
  0x34   : > { %s2329_s0 = sshra.s32 %s546_s16, 4  ;;  %s2330_s0 = int_to_ptr.hbm [resolvable:$true] %s2329_s0 }
  0x35   : > { %s563_s25 = scalar_lea.hbm %s3562_s11, %s2213_s1  ;;  %s2331_s15 = scalar_lea.hbm %s2330_s0, 8 }
  0x36   : > { %p2332_p8 = scmp.ne.s32.totalorder %s2330_s0, %s2331_s15  ;;  %p2337_p12 = scmp.lt.s32.totalorder %s2330_s0, %s3560_s17 }
  0x37   : > { %p2338_p2 = scmp.lt.s32.totalorder %s2336_s27, %s2331_s15 }
  0x38   : > { %p2334_p10 = pnand %p2333_p9, %p2332_p8 }
  0x39   : > { %p2339_p4 = por %p2338_p2, %p2337_p12 }
  0x3a   : > { %p2335_p11 = pneg %p2334_p10 }
  0x3c   : > { %p2340_p5 = pnand %p2339_p4, %p2335_p11 }
  0x3e   : > { %2343 = shalt.err (!%p2340_p5)
}
  0x3f   : > { %2236 = dma.hbm_to_vmem [thread:$0]  (!%p2681_p7), %s546_s16, 128, %s548_s14, %s535_s9  }
  0x40   : > { %s565_s23 = sshll.u32 %s563_s25, 4  ;;  %s558_s24 = scalar_lea.vmem [#allocation6], %s2179_s19  ;;  %s566_s23 = int_to_ptr.hbm [resolvable:$true] %s565_s23 }
  0x41   : > { %s567_s1 = sshll.u32 %s558_s24, 4  ;;  %s555_s30 = scalar_lea.sflag [#allocation7], %s554_s12  ;;  %s568_s1 = int_to_ptr.vmem [resolvable:$true] %s567_s1 }
  0x42   : > { %s2359_s13 = sshra.s32 %s566_s23, 4  ;;  %s2366_s27 = scalar_lea.hbm %s3562_s11, 16  ;;  %s2360_s13 = int_to_ptr.hbm [resolvable:$true] %s2359_s13 }
  0x43   : > { %s2361_s18 = scalar_lea.hbm %s2360_s13, 8  ;;  %p2367_p5 = scmp.lt.s32.totalorder %s2360_s13, %s3562_s11 }
  0x44   : > { %p2362_p8 = scmp.ne.s32.totalorder %s2360_s13, %s2361_s18  ;;  %p2368_p11 = scmp.lt.s32.totalorder %s2366_s27, %s2361_s18 }
  0x46   : > { %p2364_p10 = pnand %p2362_p8, %p2333_p9  ;;  %p2369_p2 = por %p2368_p11, %p2367_p5 }
  0x48   : > { %p2365_p12 = pneg %p2364_p10 }
  0x4a   : > { %p2370_p4 = pnand %p2369_p2, %p2365_p12 }
  0x4c   : > { %2373 = shalt.err (!%p2370_p4)
}
  0x4d   : > { %2239 = dma.hbm_to_vmem [thread:$0]  (!%p2681_p7), %s566_s23, 128, %s568_s1, %s555_s30  }
  0x4e   : > { %576 = sbr.rel (%p2630_p3) target bundleno = 2998 (0xbb6), region = 88  ;;  %s2716_s12 = sand.u32 (!%p2630_p3), 1, %s2487_s28  }
  0x4f   : > { %s2719_s14 = sshll.u32 (!%p2630_p3), %s2716_s12, 3  ;;  %s579_s16 = scalar_lea.sflag (!%p2630_p3), [#allocation4], %s2716_s12 }
  0x50   : > { %s582_s25 = scalar_lea.vmem (!%p2630_p3), [#allocation3], %s2719_s14 }
  0x53   : > { %2462 = dma.done.wait (%p2661_p13), %s579_s16, 128  }
  0x54   : > { %2464 = vsyncadd (%p2661_p13), %s579_s16, 4294967168  ;;  %s588_s30 = sand.u32 1, %s2625_s21   ;;  %s592_s19 = scalar_lea.vmem [#allocation6], %s2719_s14 }
  0x55   : > { %s589_s22 = scalar_lea.sflag [#allocation7], %s588_s30 }
  0x56   : > { %2466 = dma.done.wait (%p2661_p13), %s589_s22, 128  }
  0x57   : > { %2468 = vsyncadd (%p2661_p13), %s589_s22, 4294967168 }
  0x58   : > { %2470 = dma.done.wait (%p62_p1), [#allocation7], 512  }
  0x59   : > { %2472 = vsyncadd (%p62_p1), [#allocation7], 4294966784  ;;  %v702_v0 = vld [vmem:[%s582_s25] sm:$0xff]  ;;  %s2500_s26 = smov 16   ;;  %v703_v9 = vld [vmem:[%s592_s19] sm:$0xff]  ;;  %s2501_s20 = smov 112   ;;  %v714_v20 = vlaneseq }
  0x5a   : > { %705 = vst [vmem:[#allocation1] ss:$2 sm:$0xff] %v702_v0  ;;  %s2502_s2 = smov 127   ;;  %v2503_v23 = vmov 0.0   ;;  %v2762_v24 = vld [vmem:[#allocation8] sm:$0xff]  ;;  %v2764_v25 = vld [vmem:[#allocation8 + $0x8] sm:$0xff] }
  0x5b   : > { %v2760_v22 = vand.u32 127, %v714_v20  ;;  %682 = vst [vmem:[#allocation2 + $0x20] sm:$0xf0] %v2503_v23  ;;  %v2768_v26 = vperm.slane %v2762_v24, 1  ;;  %v2771_v27 = vperm.slane %v2764_v25, 1  ;;  %v2782_v34 = vperm.slane %v2764_v25, 7 }
  0x5c   : > { %666 = vst [vmem:[#allocation2 + $0xb0] sm:$0xf0] %v2503_v23  ;;  %v2785_v35 = vperm.slane %v2762_v24, 7  ;;  %s2504_s23 = smov 1   ;;  %v2807_v42 = vld [vmem:[#allocation8 + $0x10] ss:$0 sm:$0xff] }
  0x5d   : > { %667 = vst [vmem:[#allocation2 + $0xd0] sm:$0xf0] %v2503_v23  ;;  %vm716_vm0 = vcmp.lt.s32.totalorder %v2760_v22, 16  ;;  %vm801_vm1 = vcmp.lt.s32.totalorder %v2760_v22, 112  ;;  %vm742_vm2 = vcmp.lt.s32.totalorder %v2760_v22, 127  ;;  %v2818_v50 = vperm.slane %v2762_v24, 5 }
  0x5e   : > { %668 = vst [vmem:[#allocation2 + $0x10] sm:$0xf0] %v2503_v23  ;;  %v2809_v43 = vld [vmem:[#allocation8 + $0x18] ss:$0 sm:$0xff]  ;;  %v2821_v51 = vperm.slane %v2764_v25, 5  ;;  %vm873_vm3 = vcmask 1043456  }
  0x5f   : > { %669 = vst [vmem:[#allocation2 + $0x48] sm:$0xf0] %v2503_v23  ;;  %vm723_vm4 = vcmp.lt.s32.totalorder %v2760_v22, 1  ;;  %v2831_v62 = vperm.slane %v2762_v24, 6  ;;  %vm869_vm5 = vcmask 588800   ;;  %vm1164_vm6 = vcmask 130048  }
  0x60   : > { %670 = vst [vmem:[#allocation2 + $0x108] sm:$0xf0] %v2503_v23  ;;  %s3563_s13 = sld [smem:[#allocation27_spill]]  ;;  %s653_s1 = scalar_lea.vmem [#allocation9], %s2719_s14 }
  0x61   : > { %v706_v1 = vld.sshfl [vmem:[#allocation1] sm:$0xff pattern:$0x75316420]  ;;  %v707_v2 = vld.sshfl [vmem:[#allocation1 + $0x8] sm:$0xff pattern:$0x75316420] }
  0x62   : > { %710 = vrot.lane.b32.xlu1 %v706_v1, %s2500_s26  ;;  %751 = vst [vmem:[#allocation1] ss:$2 sm:$0xff] %v702_v0  ;;  %v2838_v1 = vperm.slane %v2764_v25, 2  ;;  %s3564_s15 = sld [smem:[#allocation29_spill]]  ;;  %s2022_s25 = sshll.u32 %s653_s1, 4  ;;  %s2023_s25 = int_to_ptr.vmem [resolvable:$true] %s2022_s25 }
  0x63   : > { %671 = vst [vmem:[#allocation2 + $0x68] sm:$0xf0] %v2503_v23  ;;  %s3565_s9 = sld [smem:[#allocation28_spill]]  ;;  %s2004_s22 = scalar_lea.sflag [#allocation5], %s2716_s12 }
  0x64   : > { %672 = vst [vmem:[#allocation2 + $0x30] sm:$0xf0] %v2503_v23  ;;  %s3566_s30 = sld [smem:[#allocation31_spill]] }
  0x65   : > { %673 = vst [vmem:[#allocation2 + $0x18] sm:$0xf0] %v2503_v23  ;;  %s3567_s24 = sld [smem:[#allocation30_spill]] }
  0x66   : > { %674 = vst [vmem:[#allocation2 + $0x80] sm:$0xf0] %v2503_v23  ;;  %s3569_s18 = sld [smem:[#allocation32_spill]] }
  0x67   : > { %675 = vst [vmem:[#allocation2 + $0x110] sm:$0xf0] %v2503_v23 }
  0x68   : > { %676 = vst [vmem:[#allocation2 + $0x118] sm:$0xf0] %v2503_v23 }
  0x69   : > { %v2738_v3 = vld.sshfl [vmem:[#allocation1] sm:$0xff pattern:$0x75316420]  ;;  %v2740_v4 = vld.sshfl [vmem:[#allocation1 + $0x8] sm:$0xff pattern:$0x75316420] }
  0x6a   : > { %712 = vrot.lane.b32.xlu1 %v707_v2, %s2500_s26  ;;  %768 = vst [vmem:[#allocation1] ss:$2 sm:$0xff] %v702_v0  ;;  %v2841_v2 = vperm.slane %v2764_v25, 6 }
  0x6b   : > { %677 = vst [vmem:[#allocation2 + $0x98] sm:$0xf0] %v2503_v23 }
  0x6c   : > { %678 = vst [vmem:[#allocation2 + $0xf8] sm:$0xf0] %v2503_v23 }
  0x6d   : > { %679 = vst [vmem:[#allocation2 + $0x38] sm:$0xf0] %v2503_v23 }
  0x6e   : > { %680 = vst [vmem:[#allocation2 + $0x8] sm:$0xf0] %v2503_v23 }
  0x6f   : > { %681 = vst [vmem:[#allocation2 + $0x78] sm:$0xf0] %v2503_v23 }
  0x70   : > { %683 = vst [vmem:[#allocation2 + $0xc8] sm:$0xf0] %v2503_v23 }
  0x71   : > { %v769_v5 = vld.sshfl [vmem:[#allocation1] sm:$0xff pattern:$0x75316420]  ;;  %v770_v6 = vld.sshfl [vmem:[#allocation1 + $0x8] sm:$0xff pattern:$0x75316420] }
  0x72   : > { %775 = vst [vmem:[#allocation1] ss:$2 sm:$0xff] %v702_v0 }
  0x73   : > { %773 = vst [vmem:[#allocation2 + $0x80] sm:$0xf] %v769_v5 }
  0x74   : > { %774 = vst [vmem:[#allocation2 + $0x110] sm:$0xf] %v770_v6 }
  0x75   : > { %684 = vst [vmem:[#allocation2 + $0x90] sm:$0xf0] %v2503_v23 }
  0x76   : > { %685 = vst [vmem:[#allocation2 + $0xa0] sm:$0xf0] %v2503_v23 }
  0x77   : > { %686 = vst [vmem:[#allocation2 + $0x70] sm:$0xf0] %v2503_v23 }
  0x78   : > { %687 = vst [vmem:[#allocation2 + $0x58] sm:$0xf0] %v2503_v23 }
  0x79   : > { %v2743_v7 = vld.sshfl [vmem:[#allocation1] sm:$0xff pattern:$0x75316420]  ;;  %v777_v8 = vld.sshfl [vmem:[#allocation1 + $0x8] sm:$0xff pattern:$0x75316420] }
  0x7a   : > { %792 = vst [vmem:[#allocation1] ss:$2 sm:$0xff] %v702_v0  ;;  %v2835_v0 = vperm.slane %v2762_v24, 2 }
  0x7b   : > { %688 = vst [vmem:[#allocation2 + $0xe0] sm:$0xf0] %v2503_v23 }
  0x7c   : > { %689 = vst [vmem:[#allocation2 + $0x60] sm:$0xf0] %v2503_v23 }
  0x7d   : > { %690 = vst [vmem:[#allocation2 + $0xa8] sm:$0xf0] %v2503_v23 }
  0x7e   : > { %691 = vst [vmem:[#allocation2 + $0x88] sm:$0xf0] %v2503_v23 }
  0x7f   : > { %692 = vst [vmem:[#allocation2 + $0xd8] sm:$0xf0] %v2503_v23 }
  0x80   : > { %693 = vst [vmem:[#allocation2 + $0xc0] sm:$0xf0] %v2503_v23 }
  0x81   : > { %v793_v10 = vld.sshfl [vmem:[#allocation1] sm:$0xff pattern:$0x75316420]  ;;  %v794_v11 = vld.sshfl [vmem:[#allocation1 + $0x8] sm:$0xff pattern:$0x75316420] }
  0x82   : > { %797 = vrot.lane.b32.xlu0 %v793_v10, %s2501_s20  ;;  %991 = vst [vmem:[#allocation1] ss:$2 sm:$0xff] %v703_v9 }
  0x83   : > { %694 = vst [vmem:[#allocation2 + $0x50] sm:$0xf0] %v2503_v23 }
  0x84   : > { %695 = vst [vmem:[#allocation2 + $0xf0] sm:$0xf0] %v2503_v23 }
  0x85   : > { %696 = vst [vmem:[#allocation2 + $0xb8] sm:$0xf0] %v2503_v23 }
  0x86   : > { %697 = vst [vmem:[#allocation2 + $0x28] sm:$0xf0] %v2503_v23 }
  0x87   : > { %698 = vst [vmem:[#allocation2 + $0x100] sm:$0xf0] %v2503_v23 }
  0x88   : > { %699 = vst [vmem:[#allocation2] sm:$0xf0] %v2503_v23 }
  0x89   : > { %v2746_v12 = vld.sshfl [vmem:[#allocation1] sm:$0xff pattern:$0x75316420]  ;;  %v2748_v13 = vld.sshfl [vmem:[#allocation1 + $0x8] sm:$0xff pattern:$0x75316420] }
  0x8a   : > { %799 = vrot.lane.b32.xlu0 %v794_v11, %s2501_s20  ;;  %1026 = vst [vmem:[#allocation1] ss:$2 sm:$0xff] %v703_v9 }
  0x8b   : > { %700 = vst [vmem:[#allocation2 + $0x40] sm:$0xf0] %v2503_v23 }
  0x8c   : > { %701 = vst [vmem:[#allocation2 + $0xe8] sm:$0xf0] %v2503_v23 }
  0x91   : > { %v2751_v14 = vld.sshfl [vmem:[#allocation1] sm:$0xff pattern:$0x75316420]  ;;  %v2753_v15 = vld.sshfl [vmem:[#allocation1 + $0x8] sm:$0xff pattern:$0x75316420] }
  0x92   : > { %1041 = vst [vmem:[#allocation1] ss:$2 sm:$0xff] %v703_v9  ;;  %782 = vrot.lane.b32.xlu0 %v777_v8, %s2502_s2 }
  0x99   : > { %v1042_v16 = vld.sshfl [vmem:[#allocation1] sm:$0xff pattern:$0x75316420]  ;;  %v1043_v17 = vld.sshfl [vmem:[#allocation1 + $0x8] sm:$0xff pattern:$0x75316420] }
  0x9a   : > { %1048 = vst [vmem:[#allocation1] ss:$2 sm:$0xff] %v703_v9 }
  0x9b   : > { %1046 = vst [vmem:[#allocation2 + $0xd8] sm:$0xf] %v1042_v16 }
  0x9c   : > { %1047 = vst [vmem:[#allocation2 + $0xc0] sm:$0xf] %v1043_v17  ;;  %v863_v17 = vld [vmem:[%s3507_s4] sm:$0xf] }
  0xa1   : > { %v2756_v18 = vld.sshfl [vmem:[#allocation1] sm:$0xff pattern:$0x75316420]  ;;  %v2758_v19 = vld.sshfl [vmem:[#allocation1 + $0x8] sm:$0xff pattern:$0x75316420] }
  0xa2   : > { %1063 = vst [vmem:[#allocation1] ss:$2 sm:$0xff] %v703_v9 }
  0xa9   : > { %v1065_v16 = vld.sshfl [vmem:[#allocation1 + $0x8] sm:$0xff pattern:$0x75316420] }
  0xd4   : > { %v711_v21 = vpop.permute.xlu1 %710 }
  0xdc   : > { %v713_v28 = vpop.permute.xlu1 %712 }
  0xdd   : > { %v718_v29 = vsel %vm716_vm0, %v713_v28, %v711_v21  ;;  %v717_v30 = vsel %vm716_vm0, %v711_v21, %v713_v28  ;;  %v1064_v28 = vld.sshfl [vmem:[#allocation1] sm:$0xff pattern:$0x75316420] }
  0xde   : > { %738 = vrot.lane.b32.xlu1 %v718_v29, %s2502_s2  ;;  %v734_v31 = vmul.f32 %v2768_v26, %v718_v29  ;;  %v735_v32 = vmul.f32 %v2771_v27, %v717_v30 }
  0xe0   : > { %736 = vst [vmem:[#allocation2 + $0x10] sm:$0xf] %v734_v31  ;;  %v2865_v31 = vperm.slane %v2764_v25, 3 }
  0xe1   : > { %737 = vst [vmem:[#allocation2 + $0x48] sm:$0xf] %v735_v32 }
  0xf4   : > { %v798_v33 = vpop.permute.xlu0 %797 }
  0xfc   : > { %v800_v36 = vpop.permute.xlu0 %799 }
  0xfd   : > { %v803_v37 = vsel %vm801_vm1, %v800_v36, %v798_v33  ;;  %v802_v38 = vsel %vm801_vm1, %v798_v33, %v800_v36 }
  0xfe   : > { %806 = vrot.lane.b32.xlu1 %v803_v37, %s2504_s23  ;;  %v819_v39 = vmul.f32 %v2782_v34, %v803_v37  ;;  %804 = vrot.lane.b32.xlu0 %v802_v38, %s2504_s23  ;;  %v818_v40 = vmul.f32 %v2785_v35, %v802_v38 }
  0xff   : > { %822 = vrot.lane.b32.xlu2 %v802_v38, %s2502_s2 }
 0x100   : > { %821 = vst [vmem:[#allocation2 + $0x78] sm:$0xf] %v819_v39 }
 0x101   : > { %820 = vst [vmem:[#allocation2 + $0x8] sm:$0xf] %v818_v40 }
 0x104   : > { %v783_v49 = vpop.permute.xlu0 %782 }
 0x106   : > { %758 = vrot.lane.b32.xlu1 %v2740_v4, %s2504_s23  ;;  %756 = vrot.lane.b32.xlu0 %v2738_v3, %s2504_s23 }
 0x107   : > { %824 = vrot.lane.b32.xlu2 %v803_v37, %s2502_s2 }
 0x10e   : > { %721 = vrot.lane.b32.xlu0 %v717_v30, %s2504_s23 }
 0x10f   : > { %780 = vrot.lane.b32.xlu2 %v2743_v7, %s2502_s2 }
 0x116   : > { %1070 = vrot.lane.b32.xlu0 %v1065_v16, %s2501_s20 }
 0x117   : > { %740 = vrot.lane.b32.xlu2 %v717_v30, %s2502_s2  ;;  %v2862_v30 = vperm.slane %v2762_v24, 3 }
 0x11f   : > { %719 = vrot.lane.b32.xlu2 %v718_v29, %s2504_s23  ;;  %v2505_v29 = vmov 0  }
 0x120   : > { %2292 = vset.pattern.permute.xlu1 %v2505_v29  ;;  %2293 = vset.pattern.permute.xlu0 %v2505_v29 }
 0x121   : > { %866 = vperm.xlu1 %2292, %v863_v17   ;;  %2294 = vset.pattern.permute.xlu2 %v2505_v29 }
 0x127   : > { %1068 = vrot.lane.b32.xlu2 %v1064_v28, %s2501_s20 }
 0x129   : > { %996 = vrot.lane.b32.xlu1 %v2746_v12, %s2500_s26 }
 0x12f   : > { %998 = vrot.lane.b32.xlu2 %v2748_v13, %s2500_s26  ;;  %v844_v13 = vld [vmem:[#allocation2 + $0x110] sm:$0xff] }
 0x131   : > { %1053 = vrot.lane.b32.xlu1 %v2756_v18, %s2502_s2 }
 0x137   : > { %1055 = vrot.lane.b32.xlu2 %v2758_v19, %s2502_s2  ;;  %v834_v19 = vld [vmem:[%s3506_s3] sm:$0x3] }
 0x13f   : > { %1031 = vrot.lane.b32.xlu2 %v2751_v14, %s2504_s23 }
 0x150   : > { %v739_v52 = vpop.permute.xlu1 %738 }
 0x159   : > { %v823_v41 = vpop.permute.xlu2 %822 }
 0x161   : > { %v825_v44 = vpop.permute.xlu2 %824 }
 0x162   : > { %v826_v45 = vsel %vm742_vm2, %v823_v41, %v825_v44  ;;  %v827_v46 = vsel %vm742_vm2, %v825_v44, %v823_v41  ;;  %v849_v41 = vld [vmem:[#allocation2 + $0x8] sm:$0xff] }
 0x163   : > { %v830_v47 = vmul.f32 %v2807_v42, %v826_v45  ;;  %v831_v48 = vmul.f32 %v2809_v43, %v827_v46  ;;  %v843_v45 = vld [vmem:[#allocation2 + $0x80] sm:$0xff] }
 0x165   : > { %832 = vst [vmem:[#allocation2 + $0x20] sm:$0xf] %v830_v47 }
 0x166   : > { %833 = vst [vmem:[#allocation2 + $0xc8] sm:$0xf] %v831_v48  ;;  %v850_v48 = vld [vmem:[#allocation2 + $0x78] sm:$0xff] }
 0x169   : > { %v781_v53 = vpop.permute.xlu2 %780 }
 0x16a   : > { %v784_v54 = vsel %vm742_vm2, %v781_v53, %v783_v49  ;;  %v785_v55 = vsel %vm742_vm2, %v783_v49, %v781_v53  ;;  %v2878_v49 = vperm.slane %v2762_v24, 0 }
 0x16b   : > { %v788_v56 = vmul.f32 %v2818_v50, %v784_v54  ;;  %v789_v57 = vmul.f32 %v2821_v51, %v785_v55 }
 0x16c   : > { %v851_v58 = vld [vmem:[#allocation2 + $0x20] sm:$0xff] }
 0x16d   : > { %790 = vst [vmem:[#allocation2 + $0x118] sm:$0xf] %v788_v56  ;;  %v861_v59 = vpack.c.bf16 %v851_v58, %v851_v58  ;;  %v852_v60 = vld [vmem:[#allocation2 + $0xc8] sm:$0xff] }
 0x16e   : > { %791 = vst [vmem:[#allocation2 + $0x98] sm:$0xf] %v789_v57  ;;  %v862_v61 = vpack.c.bf16 %v852_v60, %v852_v60 }
 0x16f   : > { %v875_v63 = vsel %vm873_vm3, %v861_v59, 0 }
 0x170   : > { %883 = vmatpush.bf16.msra.mxu0 %v875_v63  ;;  %v878_v3 = vsel %vm873_vm3, %v862_v61, 0  ;;  %v807_v4 = vpop.permute.xlu1 %806  ;;  %v805_v5 = vpop.permute.xlu0 %804 }
 0x171   : > { %896 = vmatpush.bf16.msra.mxu1 %v878_v3  ;;  %v741_v6 = vpop.permute.xlu2 %740  ;;  %v808_v7 = vsel %vm723_vm4, %v805_v5, %v807_v4  ;;  %v809_v8 = vsel %vm723_vm4, %v807_v4, %v805_v5 }
 0x172   : > { %v743_v9 = vsel %vm742_vm2, %v739_v52, %v741_v6  ;;  %v744_v10 = vsel %vm742_vm2, %v741_v6, %v739_v52  ;;  %v812_v11 = vmul.f32 %v2831_v62, %v809_v8  ;;  %v813_v23 = vmul.f32 %v2841_v2, %v808_v7  ;;  %v837_v7 = vld [vmem:[#allocation2 + $0x10] sm:$0xff] }
 0x173   : > { %v747_v20 = vmul.f32 %v2835_v0, %v743_v9  ;;  %v748_v21 = vmul.f32 %v2838_v1, %v744_v10  ;;  %v2881_v52 = vperm.slane %v2764_v25, 0  ;;  %v838_v10 = vld [vmem:[#allocation2 + $0x48] sm:$0xff] }
 0x174   : > { %814 = vst [vmem:[#allocation2 + $0xf8] sm:$0xf] %v812_v11  ;;  %v845_v46 = vld [vmem:[#allocation2 + $0x118] sm:$0xff] }
 0x175   : > { %749 = vst [vmem:[#allocation2 + $0x108] sm:$0xf] %v747_v20  ;;  %v857_v56 = vpack.c.bf16 %v845_v46, %v843_v45  ;;  %v846_v57 = vld [vmem:[#allocation2 + $0x98] sm:$0xff] }
 0x176   : > { %750 = vst [vmem:[#allocation2 + $0x68] sm:$0xf] %v748_v21  ;;  %v858_v25 = vpack.c.bf16 %v846_v57, %v844_v13 }
 0x177   : > { %815 = vst [vmem:[#allocation2 + $0x38] sm:$0xf] %v813_v23 }
 0x178   : > { %v759_v32 = vpop.permute.xlu1 %758  ;;  %v757_v33 = vpop.permute.xlu0 %756 }
 0x179   : > { %v760_v36 = vsel %vm723_vm4, %v757_v33, %v759_v32  ;;  %v761_v37 = vsel %vm723_vm4, %v759_v32, %v757_v33  ;;  %v720_v54 = vpop.permute.xlu2 %719 }
 0x17a   : > { %v764_v38 = vmul.f32 %v2862_v30, %v761_v37  ;;  %v765_v39 = vmul.f32 %v2865_v31, %v760_v36 }
 0x17b   : > { %v847_v40 = vld [vmem:[#allocation2 + $0xf8] sm:$0xff] }
 0x17c   : > { %766 = vst [vmem:[#allocation2 + $0x30] sm:$0xf] %v764_v38  ;;  %v859_v44 = vpack.c.bf16 %v849_v41, %v847_v40  ;;  %v839_v60 = vld [vmem:[#allocation2 + $0x108] sm:$0xff] }
 0x17d   : > { %767 = vst [vmem:[#allocation2 + $0x18] sm:$0xf] %v765_v39  ;;  %v840_v3 = vld [vmem:[#allocation2 + $0x68] sm:$0xff] }
 0x17e   : > { %884 = vmatpush.bf16.msra.mxu0 %v859_v44  ;;  %v848_v47 = vld [vmem:[#allocation2 + $0x38] sm:$0xff] }
 0x17f   : > { %v860_v53 = vpack.c.bf16 %v850_v48, %v848_v47 }
 0x180   : > { %v722_v55 = vpop.permute.xlu0 %721 }
 0x181   : > { %897 = vmatpush.bf16.msra.mxu1 %v860_v53  ;;  %v724_v58 = vsel %vm723_vm4, %v720_v54, %v722_v55  ;;  %v725_v12 = vsel %vm723_vm4, %v722_v55, %v720_v54  ;;  %v1069_v18 = vpop.permute.xlu2 %1068 }
 0x182   : > { %v728_v59 = vmul.f32 %v2878_v49, %v725_v12  ;;  %v729_v24 = vmul.f32 %v2881_v52, %v724_v58  ;;  %885 = vmatpush.bf16.msra.mxu0 %v857_v56 }
 0x183   : > { %v841_v61 = vld [vmem:[#allocation2 + $0x30] sm:$0xff] }
 0x184   : > { %730 = vst [vmem:[#allocation2 + $0xb0] sm:$0xf] %v728_v59  ;;  %v855_v63 = vpack.c.bf16 %v841_v61, %v839_v60  ;;  %v842_v4 = vld [vmem:[#allocation2 + $0x18] sm:$0xff] }
 0x185   : > { %731 = vst [vmem:[#allocation2 + $0xd0] sm:$0xf] %v729_v24  ;;  %898 = vmatpush.bf16.msra.mxu1 %v858_v25  ;;  %v856_v5 = vpack.c.bf16 %v842_v4, %v840_v3 }
 0x186   : > { %886 = vmatpush.bf16.msra.mxu0 %v855_v63 }
 0x188   : > { %v1071_v16 = vpop.permute.xlu0 %1070 }
 0x189   : > { %899 = vmatpush.bf16.msra.mxu1 %v856_v5  ;;  %v1072_v17 = vsel %vm801_vm1, %v1069_v18, %v1071_v16  ;;  %v1073_v20 = vsel %vm801_vm1, %v1071_v16, %v1069_v18  ;;  %v999_v29 = vpop.permute.xlu2 %998 }
 0x18a   : > { %1074 = vrot.lane.b32.xlu0 %v1072_v17, %s2504_s23  ;;  %v1084_v14 = vmul.f32 %v1072_v17, %v2785_v35  ;;  %v1085_v21 = vmul.f32 %v1073_v20, %v2782_v34 }
 0x18b   : > { %v835_v6 = vld [vmem:[#allocation2 + $0xb0] sm:$0xff] }
 0x18c   : > { %v853_v8 = vpack.c.bf16 %v837_v7, %v835_v6  ;;  %v836_v9 = vld [vmem:[#allocation2 + $0xd0] sm:$0xff]  ;;  %1086 = vst [vmem:[#allocation2 + $0x100] sm:$0xf] %v1084_v14 }
 0x18d   : > { %v854_v11 = vpack.c.bf16 %v838_v10, %v836_v9  ;;  %1087 = vst [vmem:[#allocation2] sm:$0xf] %v1085_v21 }
 0x18e   : > { %887 = vmatpush.bf16.msra.mxu0 %v853_v8 }
 0x18f   : > { %900 = vmatpush.bf16.msra.mxu1 %v854_v11 }
 0x191   : > { %2191 = vmatmul.msk.bf16.vlgmr.msra.gmra.mxu0 %vm869_vm5, %v834_v19 }
 0x192   : > { %2192 = vmatmul.msk.bf16.vlgmr.msra.gmra.mxu1 %vm869_vm5, %v834_v19 }
 0x193   : > { %v867_v23 = vpop.permute.xlu1 %866 }
 0x19b   : > { %v997_v28 = vpop.permute.xlu1 %996 }
 0x19c   : > { %v1000_v32 = vsel %vm716_vm0, %v997_v28, %v999_v29  ;;  %v1001_v36 = vsel %vm716_vm0, %v999_v29, %v997_v28 }
 0x19d   : > { %v1013_v33 = vmul.f32 %v1000_v32, %v2771_v27  ;;  %v1012_v37 = vmul.f32 %v1001_v36, %v2768_v26 }
 0x19f   : > { %1015 = vst [vmem:[#allocation2 + $0x58] sm:$0xf] %v1013_v33 }
 0x1a0   : > { %1014 = vst [vmem:[#allocation2 + $0x70] sm:$0xf] %v1012_v37 }
 0x1a3   : > { %v1054_v48 = vpop.permute.xlu1 %1053 }
 0x1fc   : > { %v1075_v57 = vpop.permute.xlu0 %1074 }
 0x20e   : > { %v889_v38 = vpop.f32.mrf.mxu0 }
 0x20f   : > { %v890_v39 = vadd.f32 %v889_v38, %v867_v23  ;;  %v902_v40 = vpop.f32.mrf.mxu1 }
 0x210   : > { %v903_v41 = vadd.f32 %v902_v40, %v867_v23 }
 0x211   : > { %v2913_v44 = vmax.f32 %v890_v39, 0.0 }
 0x212   : > { %v2915_v45 = vmax.f32 %v903_v41, 0.0  ;;  %v1125_v41 = vld [vmem:[#allocation2 + $0xd8] sm:$0xff] }
 0x213   : > { %948 = vst [vmem:[#allocation2 + $0x80] sm:$0xf] %v2913_v44  ;;  %908 = vrot.lane.b32.xlu2 %v2913_v44, %s2500_s26  ;;  %960 = vrot.lane.b32.xlu0 %v2913_v44, %s2501_s20 }
 0x214   : > { %949 = vst [vmem:[#allocation2 + $0x110] sm:$0xf] %v2915_v45  ;;  %962 = vrot.lane.b32.xlu1 %v2915_v45, %s2501_s20 }
 0x216   : > { %v891_v46 = vpop.f32.mrf.mxu0 }
 0x217   : > { %v904_v47 = vpop.f32.mrf.mxu1 }
 0x21b   : > { %1018 = vrot.lane.b32.xlu2 %v1000_v32, %s2502_s2  ;;  %1033 = vrot.lane.b32.xlu0 %v2753_v15, %s2504_s23  ;;  %v1056_v15 = vpop.permute.xlu2 %1055 }
 0x21c   : > { %1076 = vrot.lane.b32.xlu1 %v1073_v20, %s2504_s23  ;;  %v1057_v53 = vsel %vm742_vm2, %v1054_v48, %v1056_v15  ;;  %v1058_v54 = vsel %vm742_vm2, %v1056_v15, %v1054_v48 }
 0x21d   : > { %v1059_v55 = vmul.f32 %v1057_v53, %v2818_v50  ;;  %v1060_v56 = vmul.f32 %v1058_v54, %v2821_v51 }
 0x21f   : > { %1061 = vst [vmem:[#allocation2 + $0x50] sm:$0xf] %v1059_v55 }
 0x220   : > { %1062 = vst [vmem:[#allocation2 + $0xf0] sm:$0xf] %v1060_v56 }
 0x223   : > { %1002 = vrot.lane.b32.xlu2 %v1001_v36, %s2504_s23  ;;  %910 = vrot.lane.b32.xlu0 %v2915_v45, %s2500_s26  ;;  %v1032_v13 = vpop.permute.xlu2 %1031 }
 0x224   : > { %1016 = vrot.lane.b32.xlu1 %v1001_v36, %s2502_s2 }
 0x226   : > { %v1127_v36 = vld [vmem:[#allocation2 + $0x50] sm:$0xff] }
 0x22b   : > { %1090 = vrot.lane.b32.xlu2 %v1073_v20, %s2502_s2  ;;  %1004 = vrot.lane.b32.xlu0 %v1000_v32, %s2504_s23 }
 0x22c   : > { %1088 = vrot.lane.b32.xlu1 %v1072_v17, %s2502_s2 }
 0x233   : > { %950 = vrot.lane.b32.xlu2 %v2913_v44, %s2502_s2  ;;  %952 = vrot.lane.b32.xlu0 %v2915_v45, %s2502_s2 }
 0x26d   : > { %v909_v58 = vpop.permute.xlu2 %908 }
 0x275   : > { %v1019_v24 = vpop.permute.xlu2 %1018 }
 0x27d   : > { %v1003_v18 = vpop.permute.xlu2 %1002 }
 0x285   : > { %v961_v12 = vpop.permute.xlu0 %960  ;;  %v1091_v39 = vpop.permute.xlu2 %1090 }
 0x286   : > { %v963_v59 = vpop.permute.xlu1 %962 }
 0x287   : > { %v965_v25 = vsel %vm801_vm1, %v963_v59, %v961_v12  ;;  %v964_v60 = vsel %vm801_vm1, %v961_v12, %v963_v59 }
 0x288   : > { %982 = vrot.lane.b32.xlu1 %v965_v25, %s2502_s2  ;;  %v977_v61 = vmul.f32 %v965_v25, %v2782_v34  ;;  %980 = vrot.lane.b32.xlu0 %v964_v60, %s2502_s2  ;;  %v976_v63 = vmul.f32 %v964_v60, %v2785_v35 }
 0x28a   : > { %979 = vst [vmem:[#allocation2 + $0x78] sm:$0xf] %v977_v61 }
 0x28b   : > { %978 = vst [vmem:[#allocation2 + $0x8] sm:$0xf] %v976_v63 }
 0x28d   : > { %v1034_v3 = vpop.permute.xlu0 %1033 }
 0x28e   : > { %v1077_v4 = vpop.permute.xlu1 %1076  ;;  %v1035_v5 = vsel %vm723_vm4, %v1032_v13, %v1034_v3  ;;  %v1036_v6 = vsel %vm723_vm4, %v1034_v3, %v1032_v13 }
 0x28f   : > { %v1078_v7 = vsel %vm723_vm4, %v1075_v57, %v1077_v4  ;;  %v1079_v8 = vsel %vm723_vm4, %v1077_v4, %v1075_v57  ;;  %v1037_v9 = vmul.f32 %v1036_v6, %v2862_v30  ;;  %v1038_v19 = vmul.f32 %v1035_v5, %v2865_v31  ;;  %v1131_v5 = vld [vmem:[#allocation2 + $0x100] sm:$0xff] }
 0x290   : > { %v1080_v10 = vmul.f32 %v1079_v8, %v2831_v62  ;;  %v1081_v11 = vmul.f32 %v1078_v7, %v2841_v2  ;;  %968 = vrot.lane.b32.xlu1 %v965_v25, %s2504_s23  ;;  %966 = vrot.lane.b32.xlu0 %v964_v60, %s2504_s23  ;;  %v1153_v60 = vld [vmem:[%s3509_s6] sm:$0xf]  ;;  %v1132_v8 = vld [vmem:[#allocation2] sm:$0xff] }
 0x291   : > { %1039 = vst [vmem:[#allocation2 + $0xa8] sm:$0xf] %v1037_v9 }
 0x292   : > { %1082 = vst [vmem:[#allocation2 + $0xb8] sm:$0xf] %v1080_v10  ;;  %v1128_v10 = vld [vmem:[#allocation2 + $0xf0] sm:$0xff] }
 0x293   : > { %1083 = vst [vmem:[#allocation2 + $0x28] sm:$0xf] %v1081_v11 }
 0x294   : > { %1040 = vst [vmem:[#allocation2 + $0x88] sm:$0xf] %v1038_v19 }
 0x295   : > { %v911_v16 = vpop.permute.xlu0 %910 }
 0x296   : > { %v1017_v17 = vpop.permute.xlu1 %1016  ;;  %v913_v14 = vsel %vm716_vm0, %v911_v16, %v909_v58  ;;  %v912_v20 = vsel %vm716_vm0, %v909_v58, %v911_v16  ;;  %v1119_v58 = vld [vmem:[#allocation2 + $0x70] sm:$0xff]  ;;  %v1126_v16 = vld [vmem:[#allocation2 + $0xc0] sm:$0xff] }
 0x297   : > { %v1020_v21 = vsel %vm742_vm2, %v1017_v17, %v1019_v24  ;;  %v1021_v23 = vsel %vm742_vm2, %v1019_v24, %v1017_v17  ;;  %v924_v28 = vmul.f32 %v913_v14, %v2768_v26  ;;  %930 = vrot.lane.b32.xlu2 %v912_v20, %s2502_s2  ;;  %v925_v33 = vmul.f32 %v912_v20, %v2771_v27  ;;  %v951_v24 = vpop.permute.xlu2 %950 }
 0x298   : > { %v1022_v29 = vmul.f32 %v1020_v21, %v2835_v0  ;;  %v1023_v32 = vmul.f32 %v1021_v23, %v2838_v1  ;;  %938 = vrot.lane.b32.xlu0 %v2913_v44, %s2504_s23  ;;  %928 = vrot.lane.b32.xlu1 %v913_v14, %s2502_s2  ;;  %v1123_v40 = vld [vmem:[#allocation2 + $0xa8] sm:$0xff]  ;;  %v1098_v23 = vld [vmem:[%s3508_s5] sm:$0xf] }
 0x299   : > { %926 = vst [vmem:[#allocation2 + $0x10] sm:$0xf] %v924_v28  ;;  %v1129_v37 = vld [vmem:[#allocation2 + $0xb8] sm:$0xff]  ;;  %v1147_v48 = vpack.c.bf16 %v1125_v41, %v1123_v40 }
 0x29a   : > { %1024 = vst [vmem:[#allocation2 + $0xe0] sm:$0xf] %v1022_v29  ;;  %v1149_v38 = vpack.c.bf16 %v1129_v37, %v1127_v36  ;;  %v1130_v4 = vld [vmem:[#allocation2 + $0x28] sm:$0xff] }
 0x29b   : > { %1025 = vst [vmem:[#allocation2 + $0x60] sm:$0xf] %v1023_v32  ;;  %v1150_v19 = vpack.c.bf16 %v1130_v4, %v1128_v10  ;;  %v1108_v10 = vld [vmem:[#allocation2 + $0x110] sm:$0xff] }
 0x29c   : > { %927 = vst [vmem:[#allocation2 + $0x48] sm:$0xf] %v925_v33  ;;  %1167 = vmatpush.bf16.msra.mxu2 %v1149_v38 }
 0x29d   : > { %v1005_v46 = vpop.permute.xlu0 %1004  ;;  %1160 = vst [vmem:[#allocation1] ss:$4 sm:$0xff] %v1098_v23 }
 0x29e   : > { %v1089_v47 = vpop.permute.xlu1 %1088  ;;  %v1006_v44 = vsel %vm723_vm4, %v1003_v18, %v1005_v46  ;;  %v1007_v15 = vsel %vm723_vm4, %v1005_v46, %v1003_v18  ;;  %v1124_v18 = vld [vmem:[#allocation2 + $0x88] sm:$0xff] }
 0x29f   : > { %v1092_v53 = vsel %vm742_vm2, %v1089_v47, %v1091_v39  ;;  %v1093_v54 = vsel %vm742_vm2, %v1091_v39, %v1089_v47  ;;  %v1008_v55 = vmul.f32 %v1007_v15, %v2878_v49  ;;  %914 = vrot.lane.b32.xlu2 %v913_v14, %s2504_s23  ;;  %v1009_v57 = vmul.f32 %v1006_v44, %v2881_v52 }
 0x2a0   : > { %v1094_v56 = vmul.f32 %v2807_v42, %v1092_v53  ;;  %v1095_v13 = vmul.f32 %v2809_v43, %v1093_v54  ;;  %1168 = vmatpush.bf16.msra.mxu2 %v1147_v48  ;;  %940 = vrot.lane.b32.xlu1 %v2915_v45, %s2504_s23  ;;  %v1148_v17 = vpack.c.bf16 %v1126_v16, %v1124_v18 }
 0x2a1   : > { %1010 = vst [vmem:[#allocation2 + $0x90] sm:$0xf] %v1008_v55  ;;  %916 = vrot.lane.b32.xlu0 %v912_v20, %s2504_s23  ;;  %v1121_v12 = vld [vmem:[#allocation2 + $0xe0] sm:$0xff]  ;;  %v1120_v20 = vld [vmem:[#allocation2 + $0x58] sm:$0xff] }
 0x2a2   : > { %1096 = vst [vmem:[#allocation2 + $0x40] sm:$0xf] %v1094_v56  ;;  %v1145_v59 = vpack.c.bf16 %v1121_v12, %v1119_v58  ;;  %v1122_v14 = vld [vmem:[#allocation2 + $0x60] sm:$0xff] }
 0x2a3   : > { %1097 = vst [vmem:[#allocation2 + $0xe8] sm:$0xf] %v1095_v13  ;;  %v1146_v21 = vpack.c.bf16 %v1122_v14, %v1120_v20 }
 0x2a4   : > { %1011 = vst [vmem:[#allocation2 + $0xa0] sm:$0xf] %v1009_v57  ;;  %1169 = vmatpush.bf16.msra.mxu2 %v1145_v59  ;;  %v1162_v28 = vld.sshfl [vmem:[#allocation1 + $0x8] sm:$0xff pattern:$0x73625140] }
 0x2a5   : > { %v953_v25 = vpop.permute.xlu0 %952 }
 0x2a6   : > { %v954_v61 = vsel %vm742_vm2, %v951_v24, %v953_v25  ;;  %v955_v45 = vsel %vm742_vm2, %v953_v25, %v951_v24 }
 0x2a7   : > { %v956_v63 = vmul.f32 %v954_v61, %v2818_v50  ;;  %v957_v3 = vmul.f32 %v955_v45, %v2821_v51  ;;  %v1113_v61 = vld [vmem:[#allocation2 + $0x8] sm:$0xff] }
 0x2a8   : > { %1156 = vperm.xlu1 %2292, %v1153_v60   ;;  %v1117_v48 = vld [vmem:[#allocation2 + $0x90] sm:$0xff] }
 0x2a9   : > { %958 = vst [vmem:[#allocation2 + $0x118] sm:$0xf] %v956_v63  ;;  %v1133_v6 = vld [vmem:[#allocation2 + $0x40] sm:$0xff] }
 0x2aa   : > { %959 = vst [vmem:[#allocation2 + $0x98] sm:$0xf] %v957_v3  ;;  %v1151_v7 = vpack.c.bf16 %v1133_v6, %v1131_v5  ;;  %v1134_v9 = vld [vmem:[#allocation2 + $0xe8] sm:$0xff]  ;;  %v1114_v3 = vld [vmem:[#allocation2 + $0x78] sm:$0xff] }
 0x2ab   : > { %v1152_v11 = vpack.c.bf16 %v1134_v9, %v1132_v8  ;;  %v1118_v55 = vld [vmem:[#allocation2 + $0xa0] sm:$0xff] }
 0x2ac   : > { %1187 = vmatpush.bf16.msra.mxu3 %v1151_v7  ;;  %v1107_v7 = vld [vmem:[#allocation2 + $0x80] sm:$0xff] }
 0x2ad   : > { %1213 = vmatpush.bf16.msrb.mxu0 %v1152_v11 }
 0x2af   : > { %2193 = vmatmul.msk.bf16.vlgmr.msra.gmra.mxu3 %vm1164_vm6, %v1162_v28 }
 0x2b0   : > { %1193 = vmatpush.bf16.msrb.mxu3 %v1150_v19  ;;  %2194 = vmatmul.msk.bf16.vlgmr.msrb.gmra.mxu0 %vm1164_vm6, %v1162_v28  ;;  %v1109_v5 = vld [vmem:[#allocation2 + $0x118] sm:$0xff] }
 0x2b1   : > { %v1110_v6 = vld [vmem:[#allocation2 + $0x98] sm:$0xff]  ;;  %v1139_v9 = vpack.c.bf16 %v1109_v5, %v1107_v7 }
 0x2b4   : > { %1194 = vmatpush.bf16.msrb.mxu3 %v1148_v17  ;;  %v1140_v17 = vpack.c.bf16 %v1110_v6, %v1108_v10 }
 0x2b8   : > { %1195 = vmatpush.bf16.msrb.mxu3 %v1146_v21 }
 0x2f1   : > { %v931_v13 = vpop.permute.xlu2 %930 }
 0x2f9   : > { %v915_v11 = vpop.permute.xlu2 %914 }
 0x2fa   : > { %v983_v29 = vpop.permute.xlu1 %982  ;;  %v981_v32 = vpop.permute.xlu0 %980 }
 0x2fb   : > { %v984_v33 = vsel %vm742_vm2, %v981_v32, %v983_v29  ;;  %v985_v36 = vsel %vm742_vm2, %v983_v29, %v981_v32 }
 0x2fc   : > { %v986_v37 = vmul.f32 %v2807_v42, %v984_v33  ;;  %v987_v38 = vmul.f32 %v2809_v43, %v985_v36 }
 0x2fe   : > { %988 = vst [vmem:[#allocation2 + $0x20] sm:$0xf] %v986_v37 }
 0x2ff   : > { %989 = vst [vmem:[#allocation2 + $0xc8] sm:$0xf] %v987_v38 }
 0x302   : > { %v969_v39 = vpop.permute.xlu1 %968  ;;  %v967_v40 = vpop.permute.xlu0 %966 }
 0x303   : > { %v970_v41 = vsel %vm723_vm4, %v967_v40, %v969_v39  ;;  %v971_v46 = vsel %vm723_vm4, %v969_v39, %v967_v40 }
 0x304   : > { %v972_v47 = vmul.f32 %v971_v46, %v2831_v62  ;;  %v973_v44 = vmul.f32 %v970_v41, %v2841_v2  ;;  %v1101_v46 = vld [vmem:[#allocation2 + $0x10] sm:$0xff] }
 0x305   : > { %v1115_v15 = vld [vmem:[#allocation2 + $0x20] sm:$0xff] }
 0x306   : > { %974 = vst [vmem:[#allocation2 + $0xf8] sm:$0xf] %v972_v47  ;;  %v1143_v53 = vpack.c.bf16 %v1117_v48, %v1115_v15  ;;  %v1116_v54 = vld [vmem:[#allocation2 + $0xc8] sm:$0xff]  ;;  %v1161_v48 = vld.sshfl [vmem:[#allocation1] sm:$0xff pattern:$0x73625140] }
 0x307   : > { %975 = vst [vmem:[#allocation2 + $0x38] sm:$0xf] %v973_v44  ;;  %v1144_v56 = vpack.c.bf16 %v1118_v55, %v1116_v54  ;;  %v1102_v44 = vld [vmem:[#allocation2 + $0x48] sm:$0xff] }
 0x308   : > { %1170 = vmatpush.bf16.msra.mxu2 %v1143_v53 }
 0x309   : > { %1196 = vmatpush.bf16.msrb.mxu3 %v1144_v56 }
 0x30a   : > { %v929_v57 = vpop.permute.xlu1 %928  ;;  %v939_v58 = vpop.permute.xlu0 %938 }
 0x30b   : > { %v932_v12 = vsel %vm742_vm2, %v929_v57, %v931_v13  ;;  %v933_v59 = vsel %vm742_vm2, %v931_v13, %v929_v57 }
 0x30c   : > { %v934_v24 = vmul.f32 %v932_v12, %v2835_v0  ;;  %v935_v25 = vmul.f32 %v933_v59, %v2838_v1 }
 0x30d   : > { %v1111_v60 = vld [vmem:[#allocation2 + $0xf8] sm:$0xff] }
 0x30e   : > { %936 = vst [vmem:[#allocation2 + $0x108] sm:$0xf] %v934_v24  ;;  %v1141_v45 = vpack.c.bf16 %v1113_v61, %v1111_v60  ;;  %v1112_v63 = vld [vmem:[#allocation2 + $0x38] sm:$0xff] }
 0x30f   : > { %937 = vst [vmem:[#allocation2 + $0x68] sm:$0xf] %v935_v25  ;;  %v1142_v4 = vpack.c.bf16 %v1114_v3, %v1112_v63 }
 0x310   : > { %1171 = vmatpush.bf16.msra.mxu2 %v1141_v45 }
 0x311   : > { %1197 = vmatpush.bf16.msrb.mxu3 %v1142_v4 }
 0x312   : > { %v941_v8 = vpop.permute.xlu1 %940 }
 0x313   : > { %v942_v19 = vsel %vm723_vm4, %v939_v58, %v941_v8  ;;  %v943_v18 = vsel %vm723_vm4, %v941_v8, %v939_v58  ;;  %v917_v16 = vpop.permute.xlu0 %916 }
 0x314   : > { %v944_v14 = vmul.f32 %v943_v18, %v2862_v30  ;;  %v945_v20 = vmul.f32 %v942_v19, %v2865_v31  ;;  %v918_v21 = vsel %vm723_vm4, %v915_v11, %v917_v16  ;;  %v919_v23 = vsel %vm723_vm4, %v917_v16, %v915_v11  ;;  %1172 = vmatpush.bf16.msra.mxu2 %v1139_v9 }
 0x315   : > { %v920_v28 = vmul.f32 %v919_v23, %v2878_v49  ;;  %v921_v29 = vmul.f32 %v918_v21, %v2881_v52  ;;  %1198 = vmatpush.bf16.msrb.mxu3 %v1140_v17  ;;  %v1103_v32 = vld [vmem:[#allocation2 + $0x108] sm:$0xff] }
 0x316   : > { %946 = vst [vmem:[#allocation2 + $0x30] sm:$0xf] %v944_v14  ;;  %v1104_v37 = vld [vmem:[#allocation2 + $0x68] sm:$0xff] }
 0x317   : > { %947 = vst [vmem:[#allocation2 + $0x18] sm:$0xf] %v945_v20 }
 0x318   : > { %922 = vst [vmem:[#allocation2 + $0xb0] sm:$0xf] %v920_v28 }
 0x319   : > { %923 = vst [vmem:[#allocation2 + $0xd0] sm:$0xf] %v921_v29 }
 0x31a   : > { %v1157_v13 = vpop.permute.xlu1 %1156 }
 0x31d   : > { %v1105_v33 = vld [vmem:[#allocation2 + $0x30] sm:$0xff] }
 0x31e   : > { %v1137_v36 = vpack.c.bf16 %v1105_v33, %v1103_v32  ;;  %v1106_v38 = vld [vmem:[#allocation2 + $0x18] sm:$0xff] }
 0x31f   : > { %v1138_v39 = vpack.c.bf16 %v1106_v38, %v1104_v37  ;;  %v1099_v40 = vld [vmem:[#allocation2 + $0xb0] sm:$0xff] }
 0x320   : > { %1173 = vmatpush.bf16.msra.mxu2 %v1137_v36  ;;  %v1100_v41 = vld [vmem:[#allocation2 + $0xd0] sm:$0xff]  ;;  %v1135_v47 = vpack.c.bf16 %v1101_v46, %v1099_v40 }
 0x321   : > { %1199 = vmatpush.bf16.msrb.mxu3 %v1138_v39  ;;  %v1136_v15 = vpack.c.bf16 %v1102_v44, %v1100_v41 }
 0x324   : > { %1174 = vmatpush.bf16.msra.mxu2 %v1135_v47 }
 0x325   : > { %1200 = vmatpush.bf16.msrb.mxu3 %v1136_v15 }
 0x327   : > { %1175 = vmatmul.bf16.vlgmr.msra.gmra.mxu2 %v1161_v48 }
 0x328   : > { %1201 = vmatmul.bf16.vlgmr.msrb.gmra.mxu3 %v1161_v48 }
 0x32d   : > { %v1215_v53 = vpop.f32.mrf.mxu0 }
 0x332   : > { %v1189_v54 = vpop.f32.mrf.mxu3 }
 0x335   : > { %v1217_v55 = vpop.f32.mrf.mxu0 }
 0x336   : > { %v1332_v55 = vld [vmem:[%s3511_s8] sm:$0xf] }
 0x33a   : > { %v1191_v56 = vpop.f32.mrf.mxu3 }
 0x3aa   : > { %v1176_v57 = vpop.f32.mrf.mxu2 }
 0x3ab   : > { %v1177_v58 = vadd.f32 %v1176_v57, %v1157_v13  ;;  %v1202_v12 = vpop.f32.mrf.mxu3 }
 0x3ac   : > { %v1203_v59 = vadd.f32 %v1202_v12, %v1157_v13 }
 0x3ad   : > { %v1190_v24 = vadd.f32 %v1189_v54, %v1177_v58 }
 0x3ae   : > { %v1216_v25 = vadd.f32 %v1215_v53, %v1203_v59 }
 0x3af   : > { %v3042_v60 = vmax.f32 %v1190_v24, 0.0 }
 0x3b0   : > { %v3044_v61 = vmax.f32 %v1216_v25, 0.0 }
 0x3b1   : > { %1261 = vst [vmem:[#allocation2 + $0x80] sm:$0xf] %v3042_v60  ;;  %1221 = vrot.lane.b32.xlu1 %v3042_v60, %s2500_s26  ;;  %1273 = vrot.lane.b32.xlu2 %v3042_v60, %s2501_s20 }
 0x3b2   : > { %1262 = vst [vmem:[#allocation2 + $0x110] sm:$0xf] %v3044_v61  ;;  %1275 = vrot.lane.b32.xlu0 %v3044_v61, %s2501_s20  ;;  %v1178_v45 = vpop.f32.mrf.mxu2 }
 0x3b3   : > { %v1204_v63 = vpop.f32.mrf.mxu3 }
 0x3b9   : > { %1223 = vrot.lane.b32.xlu2 %v3044_v61, %s2500_s26 }
 0x3c1   : > { %1265 = vrot.lane.b32.xlu2 %v3044_v61, %s2502_s2 }
 0x40b   : > { %v1274_v3 = vpop.permute.xlu2 %1273 }
 0x413   : > { %v1224_v4 = vpop.permute.xlu2 %1223 }
 0x41b   : > { %v1266_v17 = vpop.permute.xlu2 %1265 }
 0x423   : > { %v1222_v5 = vpop.permute.xlu1 %1221 }
 0x424   : > { %v1276_v6 = vpop.permute.xlu0 %1275  ;;  %v1226_v7 = vsel %vm716_vm0, %v1224_v4, %v1222_v5  ;;  %v1225_v8 = vsel %vm716_vm0, %v1222_v5, %v1224_v4 }
 0x425   : > { %v1278_v9 = vsel %vm801_vm1, %v1276_v6, %v1274_v3  ;;  %v1277_v10 = vsel %vm801_vm1, %v1274_v3, %v1276_v6  ;;  %v1237_v11 = vmul.f32 %v1226_v7, %v2768_v26  ;;  %v1238_v16 = vmul.f32 %v1225_v8, %v2771_v27 }
 0x426   : > { %1295 = vrot.lane.b32.xlu1 %v1278_v9, %s2502_s2  ;;  %v1290_v19 = vmul.f32 %v1278_v9, %v2782_v34  ;;  %1279 = vrot.lane.b32.xlu2 %v1277_v10, %s2504_s23  ;;  %v1289_v18 = vmul.f32 %v1277_v10, %v2785_v35 }
 0x427   : > { %1293 = vrot.lane.b32.xlu0 %v1277_v10, %s2502_s2  ;;  %1239 = vst [vmem:[#allocation2 + $0x10] sm:$0xf] %v1237_v11 }
 0x428   : > { %1292 = vst [vmem:[#allocation2 + $0x78] sm:$0xf] %v1290_v19 }
 0x429   : > { %1291 = vst [vmem:[#allocation2 + $0x8] sm:$0xf] %v1289_v18  ;;  %v1312_v18 = vld [vmem:[#allocation2 + $0x80] sm:$0xff] }
 0x42a   : > { %1240 = vst [vmem:[#allocation2 + $0x48] sm:$0xf] %v1238_v16 }
 0x42e   : > { %1263 = vrot.lane.b32.xlu1 %v3042_v60, %s2502_s2  ;;  %1251 = vrot.lane.b32.xlu2 %v3042_v60, %s2504_s23 }
 0x42f   : > { %1281 = vrot.lane.b32.xlu0 %v1278_v9, %s2504_s23  ;;  %v1319_v4 = vld [vmem:[#allocation2 + $0x78] sm:$0xff] }
 0x430   : > { %v1318_v45 = vld [vmem:[#allocation2 + $0x8] sm:$0xff] }
 0x436   : > { %1229 = vrot.lane.b32.xlu2 %v1225_v8, %s2504_s23  ;;  %1243 = vrot.lane.b32.xlu1 %v1225_v8, %s2502_s2 }
 0x437   : > { %1241 = vrot.lane.b32.xlu0 %v1226_v7, %s2502_s2 }
 0x43e   : > { %1227 = vrot.lane.b32.xlu1 %v1226_v7, %s2504_s23 }
 0x43f   : > { %1253 = vrot.lane.b32.xlu0 %v3044_v61, %s2504_s23 }
 0x447   : > { %1335 = vperm.xlu0 %2293, %v1332_v55  }
 0x480   : > { %v1280_v32 = vpop.permute.xlu2 %1279 }
 0x488   : > { %v1252_v48 = vpop.permute.xlu2 %1251 }
 0x490   : > { %v1230_v7 = vpop.permute.xlu2 %1229 }
 0x498   : > { %v1296_v14 = vpop.permute.xlu1 %1295 }
 0x499   : > { %v1294_v20 = vpop.permute.xlu0 %1293 }
 0x49a   : > { %v1297_v21 = vsel %vm742_vm2, %v1294_v20, %v1296_v14  ;;  %v1298_v23 = vsel %vm742_vm2, %v1296_v14, %v1294_v20 }
 0x49b   : > { %v1299_v28 = vmul.f32 %v2807_v42, %v1297_v21  ;;  %v1300_v29 = vmul.f32 %v2809_v43, %v1298_v23  ;;  %v1313_v21 = vld [vmem:[#allocation2 + $0x110] sm:$0xff] }
 0x49d   : > { %1301 = vst [vmem:[#allocation2 + $0x20] sm:$0xf] %v1299_v28 }
 0x49e   : > { %1302 = vst [vmem:[#allocation2 + $0xc8] sm:$0xf] %v1300_v29 }
 0x4a0   : > { %v1264_v33 = vpop.permute.xlu1 %1263 }
 0x4a1   : > { %v1267_v36 = vsel %vm742_vm2, %v1264_v33, %v1266_v17  ;;  %v1268_v37 = vsel %vm742_vm2, %v1266_v17, %v1264_v33  ;;  %v1282_v38 = vpop.permute.xlu0 %1281 }
 0x4a2   : > { %v1269_v39 = vmul.f32 %v1267_v36, %v2818_v50  ;;  %v1270_v40 = vmul.f32 %v1268_v37, %v2821_v51  ;;  %v1283_v42 = vsel %vm723_vm4, %v1280_v32, %v1282_v38  ;;  %v1284_v43 = vsel %vm723_vm4, %v1282_v38, %v1280_v32 }
 0x4a3   : > { %v1285_v41 = vmul.f32 %v1284_v43, %v2831_v62  ;;  %v1286_v46 = vmul.f32 %v1283_v42, %v2841_v2 }
 0x4a4   : > { %1271 = vst [vmem:[#allocation2 + $0x118] sm:$0xf] %v1269_v39  ;;  %v1320_v47 = vld [vmem:[#allocation2 + $0x20] sm:$0xff] }
 0x4a5   : > { %1272 = vst [vmem:[#allocation2 + $0x98] sm:$0xf] %v1270_v40  ;;  %v1330_v44 = vpack.c.bf16 %v1320_v47, %v1320_v47  ;;  %v1321_v15 = vld [vmem:[#allocation2 + $0xc8] sm:$0xff] }
 0x4a6   : > { %1287 = vst [vmem:[#allocation2 + $0xf8] sm:$0xf] %v1285_v41  ;;  %v1331_v53 = vpack.c.bf16 %v1321_v15, %v1321_v15  ;;  %v1306_v41 = vld [vmem:[#allocation2 + $0x10] sm:$0xff]  ;;  %v1307_v47 = vld [vmem:[#allocation2 + $0x48] sm:$0xff]  ;;  %v1303_v15 = vld [vmem:[%s3510_s7] sm:$0x3] }
 0x4a7   : > { %1288 = vst [vmem:[#allocation2 + $0x38] sm:$0xf] %v1286_v46  ;;  %v1342_v54 = vsel %vm873_vm3, %v1330_v44, 0 }
 0x4a8   : > { %1350 = vmatpush.bf16.msrb.mxu1 %v1342_v54  ;;  %v1345_v56 = vsel %vm873_vm3, %v1331_v53, 0  ;;  %v1244_v13 = vpop.permute.xlu1 %1243 }
 0x4a9   : > { %1363 = vmatpush.bf16.msrb.mxu2 %v1345_v56  ;;  %v1242_v57 = vpop.permute.xlu0 %1241 }
 0x4aa   : > { %v1245_v58 = vsel %vm742_vm2, %v1242_v57, %v1244_v13  ;;  %v1246_v12 = vsel %vm742_vm2, %v1244_v13, %v1242_v57 }
 0x4ab   : > { %v1247_v59 = vmul.f32 %v1245_v58, %v2835_v0  ;;  %v1248_v24 = vmul.f32 %v1246_v12, %v2838_v1  ;;  %v1314_v6 = vld [vmem:[#allocation2 + $0x118] sm:$0xff] }
 0x4ac   : > { %v1315_v9 = vld [vmem:[#allocation2 + $0x98] sm:$0xff]  ;;  %v1326_v20 = vpack.c.bf16 %v1314_v6, %v1312_v18 }
 0x4ad   : > { %1249 = vst [vmem:[#allocation2 + $0x108] sm:$0xf] %v1247_v59  ;;  %v1316_v25 = vld [vmem:[#allocation2 + $0xf8] sm:$0xff]  ;;  %v1327_v32 = vpack.c.bf16 %v1315_v9, %v1313_v21 }
 0x4ae   : > { %1250 = vst [vmem:[#allocation2 + $0x68] sm:$0xf] %v1248_v24  ;;  %v1328_v63 = vpack.c.bf16 %v1318_v45, %v1316_v25  ;;  %v1317_v3 = vld [vmem:[#allocation2 + $0x38] sm:$0xff] }
 0x4af   : > { %v1329_v5 = vpack.c.bf16 %v1319_v4, %v1317_v3  ;;  %v3168_v21 = vld [vmem:[#allocation8 + $0x18] ss:$0 sm:$0xff] }
 0x4b0   : > { %1351 = vmatpush.bf16.msrb.mxu1 %v1328_v63  ;;  %v1228_v8 = vpop.permute.xlu1 %1227 }
 0x4b1   : > { %1364 = vmatpush.bf16.msrb.mxu2 %v1329_v5  ;;  %v1254_v10 = vpop.permute.xlu0 %1253  ;;  %v1231_v11 = vsel %vm723_vm4, %v1228_v8, %v1230_v7  ;;  %v1232_v19 = vsel %vm723_vm4, %v1230_v7, %v1228_v8 }
 0x4b2   : > { %v1255_v16 = vsel %vm723_vm4, %v1252_v48, %v1254_v10  ;;  %v1256_v17 = vsel %vm723_vm4, %v1254_v10, %v1252_v48  ;;  %v1233_v14 = vmul.f32 %v1232_v19, %v2878_v49  ;;  %v1234_v29 = vmul.f32 %v1231_v11, %v2881_v52  ;;  %v1486_v10 = vld [vmem:[%s3513_s10] sm:$0xf] }
 0x4b3   : > { %v1257_v23 = vmul.f32 %v1256_v17, %v2862_v30  ;;  %v1258_v28 = vmul.f32 %v1255_v16, %v2865_v31 }
 0x4b4   : > { %1235 = vst [vmem:[#allocation2 + $0xb0] sm:$0xf] %v1233_v14  ;;  %1352 = vmatpush.bf16.msrb.mxu1 %v1326_v20  ;;  %v1308_v33 = vld [vmem:[#allocation2 + $0x108] sm:$0xff]  ;;  %v3165_v14 = vld [vmem:[#allocation8 + $0x10] ss:$0 sm:$0xff] }
 0x4b5   : > { %1259 = vst [vmem:[#allocation2 + $0x30] sm:$0xf] %v1257_v23  ;;  %1365 = vmatpush.bf16.msrb.mxu2 %v1327_v32  ;;  %v1309_v38 = vld [vmem:[#allocation2 + $0x68] sm:$0xff] }
 0x4b6   : > { %1260 = vst [vmem:[#allocation2 + $0x18] sm:$0xf] %v1258_v28 }
 0x4b7   : > { %1236 = vst [vmem:[#allocation2 + $0xd0] sm:$0xf] %v1234_v29 }
 0x4b9   : > { %v1336_v48 = vpop.permute.xlu0 %1335 }
 0x4bb   : > { %v1304_v42 = vld [vmem:[#allocation2 + $0xb0] sm:$0xff] }
 0x4bc   : > { %v1310_v36 = vld [vmem:[#allocation2 + $0x30] sm:$0xff]  ;;  %v1322_v46 = vpack.c.bf16 %v1306_v41, %v1304_v42 }
 0x4bd   : > { %v1324_v37 = vpack.c.bf16 %v1310_v36, %v1308_v33  ;;  %v1311_v39 = vld [vmem:[#allocation2 + $0x18] sm:$0xff] }
 0x4be   : > { %v1325_v40 = vpack.c.bf16 %v1311_v39, %v1309_v38  ;;  %v1305_v43 = vld [vmem:[#allocation2 + $0xd0] sm:$0xff] }
 0x4bf   : > { %1353 = vmatpush.bf16.msrb.mxu1 %v1324_v37  ;;  %v1323_v44 = vpack.c.bf16 %v1307_v47, %v1305_v43 }
 0x4c0   : > { %1366 = vmatpush.bf16.msrb.mxu2 %v1325_v40 }
 0x4c3   : > { %1354 = vmatpush.bf16.msrb.mxu1 %v1322_v46 }
 0x4c4   : > { %1367 = vmatpush.bf16.msrb.mxu2 %v1323_v44 }
 0x4c6   : > { %2195 = vmatmul.msk.bf16.vlgmr.msrb.gmra.mxu1 %vm869_vm5, %v1303_v15 }
 0x4c7   : > { %2196 = vmatmul.msk.bf16.vlgmr.msrb.gmra.mxu2 %vm869_vm5, %v1303_v15 }
 0x543   : > { %v1356_v53 = vpop.f32.mrf.mxu1 }
 0x544   : > { %v1357_v54 = vadd.f32 %v1356_v53, %v1336_v48 }
 0x546   : > { %v1373_v55 = vmax.f32 %v1357_v54, 0.0 }
 0x548   : > { %1415 = vst [vmem:[#allocation2 + $0x80] sm:$0xf] %v1373_v55  ;;  %1427 = vrot.lane.b32.xlu1 %v1373_v55, %s2501_s20 }
 0x54a   : > { %v1369_v56 = vpop.f32.mrf.mxu2 }
 0x54b   : > { %v1370_v13 = vadd.f32 %v1369_v56, %v1336_v48  ;;  %v1358_v57 = vpop.f32.mrf.mxu1 }
 0x54d   : > { %v1374_v58 = vmax.f32 %v1370_v13, 0.0 }
 0x54f   : > { %1416 = vst [vmem:[#allocation2 + $0x110] sm:$0xf] %v1374_v58  ;;  %1429 = vrot.lane.b32.xlu2 %v1374_v58, %s2501_s20 }
 0x550   : > { %1375 = vrot.lane.b32.xlu1 %v1373_v55, %s2500_s26 }
 0x552   : > { %v1371_v12 = vpop.f32.mrf.mxu2 }
 0x557   : > { %1377 = vrot.lane.b32.xlu2 %v1374_v58, %s2500_s26 }
 0x55f   : > { %1419 = vrot.lane.b32.xlu2 %v1374_v58, %s2502_s2 }
 0x5a9   : > { %v1430_v59 = vpop.permute.xlu2 %1429 }
 0x5b1   : > { %v1378_v4 = vpop.permute.xlu2 %1377 }
 0x5b9   : > { %v1420_v11 = vpop.permute.xlu2 %1419 }
 0x5ba   : > { %v1428_v24 = vpop.permute.xlu1 %1427 }
 0x5bb   : > { %v1432_v25 = vsel %vm801_vm1, %v1430_v59, %v1428_v24  ;;  %v1431_v45 = vsel %vm801_vm1, %v1428_v24, %v1430_v59 }
 0x5bc   : > { %1449 = vrot.lane.b32.xlu1 %v1432_v25, %s2502_s2  ;;  %v1444_v63 = vmul.f32 %v1432_v25, %v2782_v34  ;;  %1433 = vrot.lane.b32.xlu2 %v1431_v45, %s2504_s23  ;;  %v1443_v3 = vmul.f32 %v1431_v45, %v2785_v35 }
 0x5bd   : > { %1447 = vrot.lane.b32.xlu0 %v1431_v45, %s2502_s2 }
 0x5be   : > { %1446 = vst [vmem:[#allocation2 + $0x78] sm:$0xf] %v1444_v63 }
 0x5bf   : > { %1445 = vst [vmem:[#allocation2 + $0x8] sm:$0xf] %v1443_v3 }
 0x5c2   : > { %v1376_v5 = vpop.permute.xlu1 %1375 }
 0x5c3   : > { %v1380_v6 = vsel %vm716_vm0, %v1378_v4, %v1376_v5  ;;  %v1379_v7 = vsel %vm716_vm0, %v1376_v5, %v1378_v4 }
 0x5c4   : > { %1417 = vrot.lane.b32.xlu1 %v1373_v55, %s2502_s2  ;;  %1405 = vrot.lane.b32.xlu2 %v1373_v55, %s2504_s23  ;;  %v1391_v8 = vmul.f32 %v1380_v6, %v2768_v26  ;;  %v1392_v9 = vmul.f32 %v1379_v7, %v2771_v27 }
 0x5c5   : > { %1435 = vrot.lane.b32.xlu0 %v1432_v25, %s2504_s23  ;;  %v1473_v45 = vld [vmem:[#allocation2 + $0x78] sm:$0xff] }
 0x5c6   : > { %1393 = vst [vmem:[#allocation2 + $0x10] sm:$0xf] %v1391_v8  ;;  %v1472_v59 = vld [vmem:[#allocation2 + $0x8] sm:$0xff] }
 0x5c7   : > { %1394 = vst [vmem:[#allocation2 + $0x48] sm:$0xf] %v1392_v9 }
 0x5cc   : > { %1383 = vrot.lane.b32.xlu2 %v1379_v7, %s2504_s23  ;;  %1397 = vrot.lane.b32.xlu1 %v1379_v7, %s2502_s2  ;;  %v1466_v7 = vld [vmem:[#allocation2 + $0x80] sm:$0xff] }
 0x5cd   : > { %1395 = vrot.lane.b32.xlu0 %v1380_v6, %s2502_s2 }
 0x5d4   : > { %1381 = vrot.lane.b32.xlu1 %v1380_v6, %s2504_s23 }
 0x5d5   : > { %1407 = vrot.lane.b32.xlu0 %v1374_v58, %s2504_s23 }
 0x5dd   : > { %1489 = vperm.xlu0 %2293, %v1486_v10  }
 0x616   : > { %v1434_v28 = vpop.permute.xlu2 %1433 }
 0x61e   : > { %v1406_v44 = vpop.permute.xlu2 %1405 }
 0x626   : > { %v1384_v5 = vpop.permute.xlu2 %1383 }
 0x62e   : > { %v1450_v19 = vpop.permute.xlu1 %1449 }
 0x62f   : > { %v1448_v18 = vpop.permute.xlu0 %1447 }
 0x630   : > { %v1451_v16 = vsel %vm742_vm2, %v1448_v18, %v1450_v19  ;;  %v1452_v17 = vsel %vm742_vm2, %v1450_v19, %v1448_v18  ;;  %v1467_v19 = vld [vmem:[#allocation2 + $0x110] sm:$0xff] }
 0x631   : > { %v1453_v20 = vmul.f32 %v3165_v14, %v1451_v16  ;;  %v1454_v23 = vmul.f32 %v3168_v21, %v1452_v17 }
 0x633   : > { %1455 = vst [vmem:[#allocation2 + $0x20] sm:$0xf] %v1453_v20 }
 0x634   : > { %1456 = vst [vmem:[#allocation2 + $0xc8] sm:$0xf] %v1454_v23 }
 0x636   : > { %v1418_v29 = vpop.permute.xlu1 %1417 }
 0x637   : > { %v1436_v32 = vpop.permute.xlu0 %1435  ;;  %v1421_v33 = vsel %vm742_vm2, %v1418_v29, %v1420_v11  ;;  %v1422_v36 = vsel %vm742_vm2, %v1420_v11, %v1418_v29 }
 0x638   : > { %v1437_v37 = vsel %vm723_vm4, %v1434_v28, %v1436_v32  ;;  %v1438_v38 = vsel %vm723_vm4, %v1436_v32, %v1434_v28  ;;  %v1423_v39 = vmul.f32 %v1421_v33, %v2818_v50  ;;  %v1424_v43 = vmul.f32 %v1422_v36, %v2821_v51 }
 0x639   : > { %v1439_v40 = vmul.f32 %v1438_v38, %v2831_v62  ;;  %v1440_v42 = vmul.f32 %v1437_v37, %v2841_v2 }
 0x63a   : > { %1425 = vst [vmem:[#allocation2 + $0x118] sm:$0xf] %v1423_v39  ;;  %v1474_v41 = vld [vmem:[#allocation2 + $0x20] sm:$0xff] }
 0x63b   : > { %1441 = vst [vmem:[#allocation2 + $0xf8] sm:$0xf] %v1439_v40  ;;  %v1484_v46 = vpack.c.bf16 %v1474_v41, %v1474_v41  ;;  %v1475_v47 = vld [vmem:[#allocation2 + $0xc8] sm:$0xff] }
 0x63c   : > { %1442 = vst [vmem:[#allocation2 + $0x38] sm:$0xf] %v1440_v42  ;;  %v1485_v15 = vpack.c.bf16 %v1475_v47, %v1475_v47 }
 0x63d   : > { %1426 = vst [vmem:[#allocation2 + $0x98] sm:$0xf] %v1424_v43  ;;  %v1496_v48 = vsel %vm873_vm3, %v1484_v46, 0  ;;  %v1460_v43 = vld [vmem:[#allocation2 + $0x10] sm:$0xff]  ;;  %v1461_v46 = vld [vmem:[#allocation2 + $0x48] sm:$0xff] }
 0x63e   : > { %1504 = vmatpush.bf16.msra.mxu0 %v1496_v48  ;;  %v1499_v53 = vsel %vm873_vm3, %v1485_v15, 0  ;;  %v1398_v54 = vpop.permute.xlu1 %1397 }
 0x63f   : > { %1517 = vmatpush.bf16.msra.mxu3 %v1499_v53  ;;  %v1396_v55 = vpop.permute.xlu0 %1395 }
 0x640   : > { %v1399_v56 = vsel %vm742_vm2, %v1396_v55, %v1398_v54  ;;  %v1400_v13 = vsel %vm742_vm2, %v1398_v54, %v1396_v55 }
 0x641   : > { %v1401_v57 = vmul.f32 %v1399_v56, %v2835_v0  ;;  %v1402_v58 = vmul.f32 %v1400_v13, %v2838_v1  ;;  %v1468_v3 = vld [vmem:[#allocation2 + $0x118] sm:$0xff] }
 0x642   : > { %v1470_v12 = vld [vmem:[#allocation2 + $0xf8] sm:$0xff]  ;;  %v1480_v11 = vpack.c.bf16 %v1468_v3, %v1466_v7 }
 0x643   : > { %1403 = vst [vmem:[#allocation2 + $0x108] sm:$0xf] %v1401_v57  ;;  %v1482_v24 = vpack.c.bf16 %v1472_v59, %v1470_v12  ;;  %v1471_v25 = vld [vmem:[#allocation2 + $0x38] sm:$0xff] }
 0x644   : > { %1404 = vst [vmem:[#allocation2 + $0x68] sm:$0xf] %v1402_v58  ;;  %v1483_v63 = vpack.c.bf16 %v1473_v45, %v1471_v25  ;;  %v1469_v4 = vld [vmem:[#allocation2 + $0x98] sm:$0xff] }
 0x645   : > { %1505 = vmatpush.bf16.msra.mxu0 %v1482_v24  ;;  %v1481_v20 = vpack.c.bf16 %v1469_v4, %v1467_v19 }
 0x646   : > { %1518 = vmatpush.bf16.msra.mxu3 %v1483_v63  ;;  %v1382_v6 = vpop.permute.xlu1 %1381 }
 0x647   : > { %v1408_v8 = vpop.permute.xlu0 %1407  ;;  %v1385_v9 = vsel %vm723_vm4, %v1382_v6, %v1384_v5  ;;  %v1386_v10 = vsel %vm723_vm4, %v1384_v5, %v1382_v6 }
 0x648   : > { %v1409_v18 = vsel %vm723_vm4, %v1406_v44, %v1408_v8  ;;  %v1410_v16 = vsel %vm723_vm4, %v1408_v8, %v1406_v44  ;;  %v1387_v17 = vmul.f32 %v1386_v10, %v2878_v49  ;;  %v1388_v29 = vmul.f32 %v1385_v9, %v2881_v52  ;;  %v1457_v44 = vld [vmem:[%s3563_s13] sm:$0x3]  ;;  %s3568_s13 = sld [smem:[#allocation33_spill]] }
 0x649   : > { %v1411_v23 = vmul.f32 %v1410_v16, %v2862_v30  ;;  %v1412_v28 = vmul.f32 %v1409_v18, %v2865_v31  ;;  %1506 = vmatpush.bf16.msra.mxu0 %v1480_v11 }
 0x64a   : > { %1389 = vst [vmem:[#allocation2 + $0xb0] sm:$0xf] %v1387_v17  ;;  %1519 = vmatpush.bf16.msra.mxu3 %v1481_v20  ;;  %v1462_v32 = vld [vmem:[#allocation2 + $0x108] sm:$0xff] }
 0x64b   : > { %1413 = vst [vmem:[#allocation2 + $0x30] sm:$0xf] %v1411_v23  ;;  %v1463_v37 = vld [vmem:[#allocation2 + $0x68] sm:$0xff] }
 0x64c   : > { %1414 = vst [vmem:[#allocation2 + $0x18] sm:$0xf] %v1412_v28 }
 0x64d   : > { %1390 = vst [vmem:[#allocation2 + $0xd0] sm:$0xf] %v1388_v29 }
 0x64f   : > { %v1490_v15 = vpop.permute.xlu0 %1489 }
 0x651   : > { %v1458_v40 = vld [vmem:[#allocation2 + $0xb0] sm:$0xff] }
 0x652   : > { %v1464_v33 = vld [vmem:[#allocation2 + $0x30] sm:$0xff]  ;;  %v1476_v41 = vpack.c.bf16 %v1460_v43, %v1458_v40 }
 0x653   : > { %v1478_v36 = vpack.c.bf16 %v1464_v33, %v1462_v32  ;;  %v1465_v38 = vld [vmem:[#allocation2 + $0x18] sm:$0xff] }
 0x654   : > { %v1479_v39 = vpack.c.bf16 %v1465_v38, %v1463_v37  ;;  %v1459_v42 = vld [vmem:[#allocation2 + $0xd0] sm:$0xff] }
 0x655   : > { %1507 = vmatpush.bf16.msra.mxu0 %v1478_v36  ;;  %v1477_v47 = vpack.c.bf16 %v1461_v46, %v1459_v42 }
 0x656   : > { %1520 = vmatpush.bf16.msra.mxu3 %v1479_v39 }
 0x659   : > { %1508 = vmatpush.bf16.msra.mxu0 %v1476_v41 }
 0x65a   : > { %1521 = vmatpush.bf16.msra.mxu3 %v1477_v47  ;;  %v1640_v47 = vld [vmem:[%s3564_s15] sm:$0xf]  ;;  %s2215_s15 = sshll.u32 %s2625_s21, 3 }
 0x65c   : > { %2197 = vmatmul.msk.bf16.vlgmr.msra.gmra.mxu0 %vm869_vm5, %v1457_v44 }
 0x65d   : > { %2198 = vmatmul.msk.bf16.vlgmr.msra.gmra.mxu3 %vm869_vm5, %v1457_v44 }
 0x6d9   : > { %v1510_v48 = vpop.f32.mrf.mxu0 }
 0x6da   : > { %v1511_v53 = vadd.f32 %v1510_v48, %v1490_v15 }
 0x6dc   : > { %v3209_v54 = vadd.f32 %v1511_v53, %v3042_v60 }
 0x6de   : > { %1569 = vst [vmem:[#allocation2 + $0x80] sm:$0xf] %v3209_v54  ;;  %1529 = vrot.lane.b32.xlu0 %v3209_v54, %s2500_s26  ;;  %1581 = vrot.lane.b32.xlu1 %v3209_v54, %s2501_s20 }
 0x6e0   : > { %v1523_v55 = vpop.f32.mrf.mxu3 }
 0x6e1   : > { %v1524_v56 = vadd.f32 %v1523_v55, %v1490_v15  ;;  %v1512_v13 = vpop.f32.mrf.mxu0 }
 0x6e3   : > { %v3217_v57 = vadd.f32 %v1524_v56, %v3044_v61 }
 0x6e5   : > { %1570 = vst [vmem:[#allocation2 + $0x110] sm:$0xf] %v3217_v57  ;;  %1583 = vrot.lane.b32.xlu2 %v3217_v57, %s2501_s20 }
 0x6e6   : > { %1531 = vrot.lane.b32.xlu1 %v3217_v57, %s2500_s26 }
 0x6e8   : > { %v1525_v60 = vpop.f32.mrf.mxu3 }
 0x6ee   : > { %1573 = vrot.lane.b32.xlu1 %v3217_v57, %s2502_s2 }
 0x73f   : > { %v1584_v58 = vpop.permute.xlu2 %1583 }
 0x750   : > { %v1582_v12 = vpop.permute.xlu1 %1581  ;;  %v1530_v45 = vpop.permute.xlu0 %1529 }
 0x751   : > { %v1586_v59 = vsel %vm801_vm1, %v1584_v58, %v1582_v12  ;;  %v1585_v61 = vsel %vm801_vm1, %v1582_v12, %v1584_v58 }
 0x752   : > { %1603 = vrot.lane.b32.xlu0 %v1586_v59, %s2502_s2  ;;  %v1598_v24 = vmul.f32 %v1586_v59, %v2782_v34  ;;  %1587 = vrot.lane.b32.xlu1 %v1585_v61, %s2504_s23  ;;  %v1597_v25 = vmul.f32 %v1585_v61, %v2785_v35 }
 0x753   : > { %1601 = vrot.lane.b32.xlu2 %v1585_v61, %s2502_s2 }
 0x754   : > { %1600 = vst [vmem:[#allocation2 + $0x78] sm:$0xf] %v1598_v24 }
 0x755   : > { %1599 = vst [vmem:[#allocation2 + $0x8] sm:$0xf] %v1597_v25 }
 0x758   : > { %v1532_v63 = vpop.permute.xlu1 %1531 }
 0x759   : > { %v1534_v3 = vsel %vm716_vm0, %v1532_v63, %v1530_v45  ;;  %v1533_v4 = vsel %vm716_vm0, %v1530_v45, %v1532_v63 }
 0x75a   : > { %1571 = vrot.lane.b32.xlu0 %v3209_v54, %s2502_s2  ;;  %1559 = vrot.lane.b32.xlu1 %v3209_v54, %s2504_s23  ;;  %v1545_v5 = vmul.f32 %v1534_v3, %v2768_v26  ;;  %v1546_v6 = vmul.f32 %v1533_v4, %v2771_v27 }
 0x75b   : > { %1589 = vrot.lane.b32.xlu2 %v1586_v59, %s2504_s23  ;;  %v1627_v45 = vld [vmem:[#allocation2 + $0x78] sm:$0xff] }
 0x75c   : > { %1547 = vst [vmem:[#allocation2 + $0x10] sm:$0xf] %v1545_v5  ;;  %v1626_v59 = vld [vmem:[#allocation2 + $0x8] sm:$0xff]  ;;  %v1620_v5 = vld [vmem:[#allocation2 + $0x80] sm:$0xff] }
 0x75d   : > { %1548 = vst [vmem:[#allocation2 + $0x48] sm:$0xf] %v1546_v6 }
 0x760   : > { %v1574_v9 = vpop.permute.xlu1 %1573 }
 0x762   : > { %1537 = vrot.lane.b32.xlu1 %v1533_v4, %s2504_s23  ;;  %1551 = vrot.lane.b32.xlu0 %v1533_v4, %s2502_s2 }
 0x763   : > { %1549 = vrot.lane.b32.xlu2 %v1534_v3, %s2502_s2 }
 0x76a   : > { %1535 = vrot.lane.b32.xlu0 %v1534_v3, %s2504_s23 }
 0x76b   : > { %1561 = vrot.lane.b32.xlu2 %v3217_v57, %s2504_s23 }
 0x773   : > { %1643 = vperm.xlu2 %2294, %v1640_v47  }
 0x7ad   : > { %v1602_v7 = vpop.permute.xlu2 %1601 }
 0x7b5   : > { %v1590_v8 = vpop.permute.xlu2 %1589 }
 0x7bd   : > { %v1550_v10 = vpop.permute.xlu2 %1549 }
 0x7c4   : > { %v1604_v11 = vpop.permute.xlu0 %1603  ;;  %v1588_v19 = vpop.permute.xlu1 %1587 }
 0x7c5   : > { %v1605_v18 = vsel %vm742_vm2, %v1602_v7, %v1604_v11  ;;  %v1606_v16 = vsel %vm742_vm2, %v1604_v11, %v1602_v7  ;;  %v1591_v17 = vsel %vm723_vm4, %v1588_v19, %v1590_v8  ;;  %v1592_v20 = vsel %vm723_vm4, %v1590_v8, %v1588_v19  ;;  %v1562_v33 = vpop.permute.xlu2 %1561  ;;  %v1621_v8 = vld [vmem:[#allocation2 + $0x110] sm:$0xff] }
 0x7c6   : > { %v1607_v23 = vmul.f32 %v3165_v14, %v1605_v18  ;;  %v1608_v28 = vmul.f32 %v3168_v21, %v1606_v16  ;;  %v1593_v29 = vmul.f32 %v1592_v20, %v2831_v62  ;;  %v1594_v32 = vmul.f32 %v1591_v17, %v2841_v2 }
 0x7c8   : > { %1609 = vst [vmem:[#allocation2 + $0x20] sm:$0xf] %v1607_v23 }
 0x7c9   : > { %1610 = vst [vmem:[#allocation2 + $0xc8] sm:$0xf] %v1608_v28 }
 0x7ca   : > { %1595 = vst [vmem:[#allocation2 + $0xf8] sm:$0xf] %v1593_v29 }
 0x7cb   : > { %1596 = vst [vmem:[#allocation2 + $0x38] sm:$0xf] %v1594_v32 }
 0x7cc   : > { %v1572_v36 = vpop.permute.xlu0 %1571  ;;  %v1560_v37 = vpop.permute.xlu1 %1559 }
 0x7cd   : > { %v1575_v38 = vsel %vm742_vm2, %v1572_v36, %v1574_v9  ;;  %v1576_v39 = vsel %vm742_vm2, %v1574_v9, %v1572_v36  ;;  %v1563_v40 = vsel %vm723_vm4, %v1560_v37, %v1562_v33  ;;  %v1564_v42 = vsel %vm723_vm4, %v1562_v33, %v1560_v37 }
 0x7ce   : > { %v1577_v43 = vmul.f32 %v1575_v38, %v2818_v50  ;;  %v1578_v41 = vmul.f32 %v1576_v39, %v2821_v51  ;;  %v1565_v46 = vmul.f32 %v1564_v42, %v2862_v30  ;;  %v1566_v44 = vmul.f32 %v1563_v40, %v2865_v31  ;;  %v1614_v38 = vld [vmem:[#allocation2 + $0x10] sm:$0xff]  ;;  %v1615_v42 = vld [vmem:[#allocation2 + $0x48] sm:$0xff] }
 0x7cf   : > { %v1628_v15 = vld [vmem:[#allocation2 + $0x20] sm:$0xff] }
 0x7d0   : > { %1579 = vst [vmem:[#allocation2 + $0x118] sm:$0xf] %v1577_v43  ;;  %v1638_v48 = vpack.c.bf16 %v1628_v15, %v1628_v15  ;;  %v1629_v53 = vld [vmem:[#allocation2 + $0xc8] sm:$0xff] }
 0x7d1   : > { %1580 = vst [vmem:[#allocation2 + $0x98] sm:$0xf] %v1578_v41  ;;  %v1639_v55 = vpack.c.bf16 %v1629_v53, %v1629_v53  ;;  %v1624_v13 = vld [vmem:[#allocation2 + $0xf8] sm:$0xff] }
 0x7d2   : > { %1567 = vst [vmem:[#allocation2 + $0x30] sm:$0xf] %v1565_v46  ;;  %v1650_v56 = vsel %vm873_vm3, %v1638_v48, 0  ;;  %v1625_v58 = vld [vmem:[#allocation2 + $0x38] sm:$0xff]  ;;  %v1636_v25 = vpack.c.bf16 %v1626_v59, %v1624_v13  ;;  %v1644_v46 = vpop.permute.xlu2 %1643 }
 0x7d3   : > { %1568 = vst [vmem:[#allocation2 + $0x18] sm:$0xf] %v1566_v44  ;;  %1658 = vmatpush.bf16.msra.mxu1 %v1650_v56  ;;  %v1653_v60 = vsel %vm873_vm3, %v1639_v55, 0  ;;  %v1637_v4 = vpack.c.bf16 %v1627_v45, %v1625_v58  ;;  %v1611_v41 = vld [vmem:[%s3565_s9] sm:$0x3]  ;;  %s3571_s9 = sld [smem:[#allocation34_spill]] }
 0x7d4   : > { %1671 = vmatpush.bf16.msra.mxu2 %v1653_v60  ;;  %v1552_v12 = vpop.permute.xlu0 %1551  ;;  %v1538_v19 = vpop.permute.xlu1 %1537 }
 0x7d5   : > { %v1553_v61 = vsel %vm742_vm2, %v1550_v10, %v1552_v12  ;;  %v1554_v24 = vsel %vm742_vm2, %v1552_v12, %v1550_v10 }
 0x7d6   : > { %v1555_v63 = vmul.f32 %v1553_v61, %v2835_v0  ;;  %v1556_v3 = vmul.f32 %v1554_v24, %v2838_v1 }
 0x7d7   : > { %1659 = vmatpush.bf16.msra.mxu1 %v1636_v25  ;;  %v1622_v6 = vld [vmem:[#allocation2 + $0x118] sm:$0xff] }
 0x7d8   : > { %1557 = vst [vmem:[#allocation2 + $0x108] sm:$0xf] %v1555_v63  ;;  %1672 = vmatpush.bf16.msra.mxu2 %v1637_v4  ;;  %v1634_v7 = vpack.c.bf16 %v1622_v6, %v1620_v5  ;;  %v1623_v9 = vld [vmem:[#allocation2 + $0x98] sm:$0xff] }
 0x7d9   : > { %1558 = vst [vmem:[#allocation2 + $0x68] sm:$0xf] %v1556_v3  ;;  %v1635_v11 = vpack.c.bf16 %v1623_v9, %v1621_v8  ;;  %v1618_v28 = vld [vmem:[#allocation2 + $0x30] sm:$0xff]  ;;  %v1794_v6 = vld [vmem:[%s3566_s30] sm:$0xf]  ;;  %s2020_s16 = scalar_lea.hbm %s3571_s9, %s2215_s15  ;;  %s2409_s21 = scalar_lea.hbm %s3571_s9, 16 }
 0x7da   : > { %v1619_v33 = vld [vmem:[#allocation2 + $0x18] sm:$0xff]  ;;  %s2024_s30 = sshll.u32 %s2020_s16, 4  ;;  %s2025_s30 = int_to_ptr.hbm [resolvable:$true] %s2024_s30 }
 0x7db   : > { %1660 = vmatpush.bf16.msra.mxu1 %v1634_v7  ;;  %s2403_s19 = sshra.s32 %s2025_s30, 4  ;;  %s2404_s19 = int_to_ptr.hbm [resolvable:$true] %s2403_s19 }
 0x7dc   : > { %1673 = vmatpush.bf16.msra.mxu2 %v1635_v11  ;;  %v1536_v10 = vpop.permute.xlu0 %1535  ;;  %p2410_p7 = scmp.lt.s32.totalorder %s2404_s19, %s3571_s9 }
 0x7dd   : > { %v1539_v18 = vsel %vm723_vm4, %v1536_v10, %v1538_v19  ;;  %v1540_v16 = vsel %vm723_vm4, %v1538_v19, %v1536_v10 }
 0x7de   : > { %v1541_v17 = vmul.f32 %v1540_v16, %v2878_v49  ;;  %v1542_v20 = vmul.f32 %v1539_v18, %v2881_v52 }
 0x7df   : > { %v1616_v23 = vld [vmem:[#allocation2 + $0x108] sm:$0xff] }
 0x7e0   : > { %1543 = vst [vmem:[#allocation2 + $0xb0] sm:$0xf] %v1541_v17  ;;  %v1632_v29 = vpack.c.bf16 %v1618_v28, %v1616_v23  ;;  %v1617_v32 = vld [vmem:[#allocation2 + $0x68] sm:$0xff] }
 0x7e1   : > { %1544 = vst [vmem:[#allocation2 + $0xd0] sm:$0xf] %v1542_v20  ;;  %v1633_v36 = vpack.c.bf16 %v1619_v33, %v1617_v32 }
 0x7e2   : > { %1661 = vmatpush.bf16.msra.mxu1 %v1632_v29 }
 0x7e3   : > { %1674 = vmatpush.bf16.msra.mxu2 %v1633_v36 }
 0x7e7   : > { %v1612_v37 = vld [vmem:[#allocation2 + $0xb0] sm:$0xff] }
 0x7e8   : > { %v1630_v39 = vpack.c.bf16 %v1614_v38, %v1612_v37  ;;  %v1613_v40 = vld [vmem:[#allocation2 + $0xd0] sm:$0xff] }
 0x7e9   : > { %v1631_v43 = vpack.c.bf16 %v1615_v42, %v1613_v40 }
 0x7ea   : > { %1662 = vmatpush.bf16.msra.mxu1 %v1630_v39 }
 0x7eb   : > { %1675 = vmatpush.bf16.msra.mxu2 %v1631_v43 }
 0x7ed   : > { %2199 = vmatmul.msk.bf16.vlgmr.msra.gmra.mxu1 %vm869_vm5, %v1611_v41 }
 0x7ee   : > { %2200 = vmatmul.msk.bf16.vlgmr.msra.gmra.mxu2 %vm869_vm5, %v1611_v41 }
 0x86a   : > { %v1664_v47 = vpop.f32.mrf.mxu1 }
 0x86b   : > { %v1665_v44 = vadd.f32 %v1664_v47, %v1644_v46 }
 0x86d   : > { %v1681_v15 = vmax.f32 %v1665_v44, 0.0 }
 0x86f   : > { %1723 = vst [vmem:[#allocation2 + $0x80] sm:$0xf] %v1681_v15  ;;  %1735 = vrot.lane.b32.xlu0 %v1681_v15, %s2501_s20  ;;  %1683 = vrot.lane.b32.xlu2 %v1681_v15, %s2500_s26 }
 0x871   : > { %v1677_v48 = vpop.f32.mrf.mxu2 }
 0x872   : > { %v1678_v53 = vadd.f32 %v1677_v48, %v1644_v46  ;;  %v1666_v55 = vpop.f32.mrf.mxu1 }
 0x874   : > { %v1682_v56 = vmax.f32 %v1678_v53, 0.0 }
 0x876   : > { %1724 = vst [vmem:[#allocation2 + $0x110] sm:$0xf] %v1682_v56  ;;  %1737 = vrot.lane.b32.xlu1 %v1682_v56, %s2501_s20 }
 0x877   : > { %1685 = vrot.lane.b32.xlu0 %v1682_v56, %s2500_s26 }
 0x879   : > { %v1679_v13 = vpop.f32.mrf.mxu2 }
 0x87f   : > { %1727 = vrot.lane.b32.xlu0 %v1682_v56, %s2502_s2 }
 0x8c9   : > { %v1684_v12 = vpop.permute.xlu2 %1683 }
 0x8e1   : > { %v1736_v60 = vpop.permute.xlu0 %1735 }
 0x8e8   : > { %v1738_v58 = vpop.permute.xlu1 %1737 }
 0x8e9   : > { %v1740_v59 = vsel %vm801_vm1, %v1738_v58, %v1736_v60  ;;  %v1739_v61 = vsel %vm801_vm1, %v1736_v60, %v1738_v58  ;;  %v1686_v24 = vpop.permute.xlu0 %1685 }
 0x8ea   : > { %1757 = vrot.lane.b32.xlu2 %v1740_v59, %s2502_s2  ;;  %v1752_v25 = vmul.f32 %v1740_v59, %v2782_v34  ;;  %1741 = vrot.lane.b32.xlu0 %v1739_v61, %s2504_s23  ;;  %v1751_v45 = vmul.f32 %v1739_v61, %v2785_v35  ;;  %v1688_v63 = vsel %vm716_vm0, %v1686_v24, %v1684_v12 }
 0x8eb   : > { %1755 = vrot.lane.b32.xlu1 %v1739_v61, %s2502_s2  ;;  %v1699_v3 = vmul.f32 %v1688_v63, %v2768_v26  ;;  %v1687_v4 = vsel %vm716_vm0, %v1684_v12, %v1686_v24 }
 0x8ec   : > { %1754 = vst [vmem:[#allocation2 + $0x78] sm:$0xf] %v1752_v25  ;;  %v1700_v5 = vmul.f32 %v1687_v4, %v2771_v27 }
 0x8ed   : > { %1753 = vst [vmem:[#allocation2 + $0x8] sm:$0xf] %v1751_v45 }
 0x8ee   : > { %1701 = vst [vmem:[#allocation2 + $0x10] sm:$0xf] %v1699_v3 }
 0x8ef   : > { %1702 = vst [vmem:[#allocation2 + $0x48] sm:$0xf] %v1700_v5 }
 0x8f1   : > { %v1728_v8 = vpop.permute.xlu0 %1727 }
 0x8f2   : > { %1725 = vrot.lane.b32.xlu2 %v1681_v15, %s2502_s2  ;;  %1713 = vrot.lane.b32.xlu0 %v1681_v15, %s2504_s23 }
 0x8f3   : > { %1743 = vrot.lane.b32.xlu1 %v1740_v59, %s2504_s23  ;;  %v1781_v3 = vld [vmem:[#allocation2 + $0x78] sm:$0xff] }
 0x8f4   : > { %v1780_v25 = vld [vmem:[#allocation2 + $0x8] sm:$0xff] }
 0x8fa   : > { %1691 = vrot.lane.b32.xlu0 %v1687_v4, %s2504_s23  ;;  %1705 = vrot.lane.b32.xlu2 %v1687_v4, %s2502_s2 }
 0x8fb   : > { %1703 = vrot.lane.b32.xlu1 %v1688_v63, %s2502_s2 }
 0x902   : > { %1689 = vrot.lane.b32.xlu2 %v1688_v63, %s2504_s23 }
 0x903   : > { %1715 = vrot.lane.b32.xlu1 %v1682_v56, %s2504_s23 }
 0x90b   : > { %1797 = vperm.xlu1 %2292, %v1794_v6  }
 0x944   : > { %v1758_v7 = vpop.permute.xlu2 %1757 }
 0x94c   : > { %v1726_v9 = vpop.permute.xlu2 %1725 }
 0x94d   : > { %v1729_v11 = vsel %vm742_vm2, %v1726_v9, %v1728_v8  ;;  %v1730_v19 = vsel %vm742_vm2, %v1728_v8, %v1726_v9 }
 0x94e   : > { %v1731_v10 = vmul.f32 %v1729_v11, %v2818_v50  ;;  %v1732_v18 = vmul.f32 %v1730_v19, %v2821_v51  ;;  %v1775_v11 = vld [vmem:[#allocation2 + $0x110] sm:$0xff] }
 0x950   : > { %1733 = vst [vmem:[#allocation2 + $0x118] sm:$0xf] %v1731_v10 }
 0x951   : > { %1734 = vst [vmem:[#allocation2 + $0x98] sm:$0xf] %v1732_v18 }
 0x954   : > { %v1706_v32 = vpop.permute.xlu2 %1705 }
 0x957   : > { %v1776_v5 = vld [vmem:[#allocation2 + $0x118] sm:$0xff] }
 0x958   : > { %v1777_v6 = vld [vmem:[#allocation2 + $0x98] sm:$0xff] }
 0x959   : > { %v1789_v18 = vpack.c.bf16 %v1777_v6, %v1775_v11 }
 0x95c   : > { %v1742_v16 = vpop.permute.xlu0 %1741  ;;  %v1690_v44 = vpop.permute.xlu2 %1689 }
 0x95d   : > { %v1756_v17 = vpop.permute.xlu1 %1755 }
 0x95e   : > { %v1759_v20 = vsel %vm742_vm2, %v1756_v17, %v1758_v7  ;;  %v1760_v23 = vsel %vm742_vm2, %v1758_v7, %v1756_v17  ;;  %v1774_v7 = vld [vmem:[#allocation2 + $0x80] sm:$0xff] }
 0x95f   : > { %v1761_v28 = vmul.f32 %v3165_v14, %v1759_v20  ;;  %v1762_v29 = vmul.f32 %v3168_v21, %v1760_v23  ;;  %v1788_v9 = vpack.c.bf16 %v1776_v5, %v1774_v7 }
 0x961   : > { %1763 = vst [vmem:[#allocation2 + $0x20] sm:$0xf] %v1761_v28 }
 0x962   : > { %1764 = vst [vmem:[#allocation2 + $0xc8] sm:$0xf] %v1762_v29 }
 0x964   : > { %v1714_v33 = vpop.permute.xlu0 %1713 }
 0x965   : > { %v1744_v36 = vpop.permute.xlu1 %1743 }
 0x966   : > { %v1745_v37 = vsel %vm723_vm4, %v1742_v16, %v1744_v36  ;;  %v1746_v38 = vsel %vm723_vm4, %v1744_v36, %v1742_v16 }
 0x967   : > { %v1747_v39 = vmul.f32 %v1746_v38, %v2831_v62  ;;  %v1748_v40 = vmul.f32 %v1745_v37, %v2841_v2 }
 0x968   : > { %v1782_v42 = vld [vmem:[#allocation2 + $0x20] sm:$0xff] }
 0x969   : > { %1749 = vst [vmem:[#allocation2 + $0xf8] sm:$0xf] %v1747_v39  ;;  %v1792_v43 = vpack.c.bf16 %v1782_v42, %v1782_v42  ;;  %v1783_v41 = vld [vmem:[#allocation2 + $0xc8] sm:$0xff] }
 0x96a   : > { %1750 = vst [vmem:[#allocation2 + $0x38] sm:$0xf] %v1748_v40  ;;  %v1793_v46 = vpack.c.bf16 %v1783_v41, %v1783_v41  ;;  %v1769_v40 = vld [vmem:[#allocation2 + $0x48] sm:$0xff] }
 0x96b   : > { %v1804_v47 = vsel %vm873_vm3, %v1792_v43, 0  ;;  %v1765_v43 = vld [vmem:[%s3567_s24] sm:$0x3]  ;;  %s2405_s24 = scalar_lea.hbm %s2404_s19, 8 }
 0x96c   : > { %1812 = vmatpush.bf16.msrb.mxu0 %v1804_v47  ;;  %v1807_v15 = vsel %vm873_vm3, %v1793_v46, 0  ;;  %v1692_v48 = vpop.permute.xlu0 %1691  ;;  %p2406_p1 = scmp.ne.s32.totalorder %s2404_s19, %s2405_s24  ;;  %p2411_p9 = scmp.lt.s32.totalorder %s2409_s21, %s2405_s24 }
 0x96d   : > { %1825 = vmatpush.bf16.msrb.mxu3 %v1807_v15  ;;  %v1704_v53 = vpop.permute.xlu1 %1703  ;;  %v1693_v55 = vsel %vm723_vm4, %v1690_v44, %v1692_v48  ;;  %v1694_v56 = vsel %vm723_vm4, %v1692_v48, %v1690_v44 }
 0x96e   : > { %v1707_v13 = vsel %vm742_vm2, %v1704_v53, %v1706_v32  ;;  %v1708_v60 = vsel %vm742_vm2, %v1706_v32, %v1704_v53  ;;  %v1695_v58 = vmul.f32 %v1694_v56, %v2878_v49  ;;  %v1696_v61 = vmul.f32 %v1693_v55, %v2881_v52  ;;  %p2407_p3 = pnand %p2406_p1, %p2665_p0  ;;  %p2412_p8 = por %p2411_p9, %p2410_p7 }
 0x96f   : > { %v1709_v12 = vmul.f32 %v1707_v13, %v2835_v0  ;;  %v1710_v59 = vmul.f32 %v1708_v60, %v2838_v1 }
 0x970   : > { %1697 = vst [vmem:[#allocation2 + $0xb0] sm:$0xf] %v1695_v58  ;;  %v1778_v24 = vld [vmem:[#allocation2 + $0xf8] sm:$0xff]  ;;  %p2408_p13 = pneg %p2407_p3 }
 0x971   : > { %1711 = vst [vmem:[#allocation2 + $0x108] sm:$0xf] %v1709_v12  ;;  %v1790_v45 = vpack.c.bf16 %v1780_v25, %v1778_v24  ;;  %v1779_v63 = vld [vmem:[#allocation2 + $0x38] sm:$0xff] }
 0x972   : > { %1712 = vst [vmem:[#allocation2 + $0x68] sm:$0xf] %v1710_v59  ;;  %v1791_v4 = vpack.c.bf16 %v1781_v3, %v1779_v63  ;;  %p2413_p10 = pnand %p2412_p8, %p2408_p13 }
 0x973   : > { %1698 = vst [vmem:[#allocation2 + $0xd0] sm:$0xf] %v1696_v61  ;;  %1813 = vmatpush.bf16.msrb.mxu0 %v1790_v45 }
 0x974   : > { %1826 = vmatpush.bf16.msrb.mxu3 %v1791_v4 }
 0x975   : > { %v1716_v8 = vpop.permute.xlu1 %1715 }
 0x976   : > { %v1717_v19 = vsel %vm723_vm4, %v1714_v33, %v1716_v8  ;;  %v1718_v10 = vsel %vm723_vm4, %v1716_v8, %v1714_v33  ;;  %v1768_v33 = vld [vmem:[#allocation2 + $0x10] sm:$0xff] }
 0x977   : > { %v1719_v16 = vmul.f32 %v1718_v10, %v2862_v30  ;;  %v1720_v17 = vmul.f32 %v1717_v19, %v2865_v31  ;;  %1814 = vmatpush.bf16.msrb.mxu0 %v1788_v9  ;;  %v1766_v37 = vld [vmem:[#allocation2 + $0xb0] sm:$0xff] }
 0x978   : > { %1827 = vmatpush.bf16.msrb.mxu3 %v1789_v18  ;;  %v1770_v20 = vld [vmem:[#allocation2 + $0x108] sm:$0xff]  ;;  %v1784_v39 = vpack.c.bf16 %v1768_v33, %v1766_v37 }
 0x979   : > { %1721 = vst [vmem:[#allocation2 + $0x30] sm:$0xf] %v1719_v16  ;;  %v1771_v29 = vld [vmem:[#allocation2 + $0x68] sm:$0xff] }
 0x97a   : > { %1722 = vst [vmem:[#allocation2 + $0x18] sm:$0xf] %v1720_v17  ;;  %v1767_v38 = vld [vmem:[#allocation2 + $0xd0] sm:$0xff] }
 0x97b   : > { %v1785_v42 = vpack.c.bf16 %v1769_v40, %v1767_v38 }
 0x97d   : > { %v1798_v41 = vpop.permute.xlu1 %1797 }
 0x980   : > { %v1772_v23 = vld [vmem:[#allocation2 + $0x30] sm:$0xff] }
 0x981   : > { %v1786_v28 = vpack.c.bf16 %v1772_v23, %v1770_v20  ;;  %v1773_v32 = vld [vmem:[#allocation2 + $0x18] sm:$0xff] }
 0x982   : > { %v1787_v36 = vpack.c.bf16 %v1773_v32, %v1771_v29 }
 0x983   : > { %1815 = vmatpush.bf16.msrb.mxu0 %v1786_v28 }
 0x984   : > { %1828 = vmatpush.bf16.msrb.mxu3 %v1787_v36 }
 0x987   : > { %1816 = vmatpush.bf16.msrb.mxu0 %v1784_v39 }
 0x988   : > { %1829 = vmatpush.bf16.msrb.mxu3 %v1785_v42 }
 0x98a   : > { %2201 = vmatmul.msk.bf16.vlgmr.msrb.gmra.mxu0 %vm869_vm5, %v1765_v43 }
 0x98b   : > { %2202 = vmatmul.msk.bf16.vlgmr.msrb.gmra.mxu3 %vm869_vm5, %v1765_v43 }
 0xa07   : > { %v1818_v46 = vpop.f32.mrf.mxu0 }
 0xa08   : > { %v1819_v47 = vadd.f32 %v1818_v46, %v1798_v41 }
 0xa0a   : > { %v1835_v44 = vadd.f32 %v1819_v47, %v3209_v54 }
 0xa0c   : > { %1877 = vst [vmem:[#allocation2 + $0x80] sm:$0xf] %v1835_v44  ;;  %1837 = vrot.lane.b32.xlu1 %v1835_v44, %s2500_s26  ;;  %1889 = vrot.lane.b32.xlu2 %v1835_v44, %s2501_s20 }
 0xa0e   : > { %v1831_v15 = vpop.f32.mrf.mxu3 }
 0xa0f   : > { %v1832_v48 = vadd.f32 %v1831_v15, %v1798_v41  ;;  %v1820_v53 = vpop.f32.mrf.mxu0 }
 0xa11   : > { %v1836_v55 = vadd.f32 %v1832_v48, %v3217_v57 }
 0xa13   : > { %1878 = vst [vmem:[#allocation2 + $0x110] sm:$0xf] %v1836_v55  ;;  %1891 = vrot.lane.b32.xlu0 %v1836_v55, %s2501_s20  ;;  %v1993_v56 = vrot.slane %v1836_v55, 4 }
 0xa14   : > { %1839 = vrot.lane.b32.xlu2 %v1836_v55, %s2500_s26 }
 0xa15   : > { %v1994_v13 = vsel %vm873_vm3, %v1835_v44, %v1993_v56 }
 0xa16   : > { %v1833_v60 = vpop.f32.mrf.mxu3  ;;  %1996 = vst [vmem:[%s653_s1] sm:$0xff] %v1994_v13  ;;  %v1928_v13 = vld [vmem:[#allocation2 + $0x80] sm:$0xff] }
 0xa1c   : > { %1881 = vrot.lane.b32.xlu2 %v1836_v55, %s2502_s2 }
 0xa66   : > { %v1890_v54 = vpop.permute.xlu2 %1889 }
 0xa6e   : > { %v1840_v58 = vpop.permute.xlu2 %1839 }
 0xa7e   : > { %v1838_v12 = vpop.permute.xlu1 %1837 }
 0xa7f   : > { %v1842_v57 = vsel %vm716_vm0, %v1840_v58, %v1838_v12  ;;  %v1841_v59 = vsel %vm716_vm0, %v1838_v12, %v1840_v58 }
 0xa80   : > { %v1853_v61 = vmul.f32 %v1842_v57, %v2768_v26  ;;  %v1854_v24 = vmul.f32 %v1841_v59, %v2771_v27  ;;  %v1948_v26 = vld [vmem:[%s3568_s13] sm:$0xf]  ;;  %v1882_v27 = vpop.permute.xlu2 %1881 }
 0xa82   : > { %1855 = vst [vmem:[#allocation2 + $0x10] sm:$0xf] %v1853_v61 }
 0xa83   : > { %1856 = vst [vmem:[#allocation2 + $0x48] sm:$0xf] %v1854_v24 }
 0xa85   : > { %v1892_v25 = vpop.permute.xlu0 %1891 }
 0xa86   : > { %v1894_v45 = vsel %vm801_vm1, %v1892_v25, %v1890_v54  ;;  %v1893_v63 = vsel %vm801_vm1, %v1890_v54, %v1892_v25 }
 0xa87   : > { %1911 = vrot.lane.b32.xlu1 %v1894_v45, %s2502_s2  ;;  %v1906_v3 = vmul.f32 %v1894_v45, %v2782_v34  ;;  %1895 = vrot.lane.b32.xlu2 %v1893_v63, %s2504_s23  ;;  %v1905_v4 = vmul.f32 %v1893_v63, %v2785_v35 }
 0xa88   : > { %1909 = vrot.lane.b32.xlu0 %v1893_v63, %s2502_s2 }
 0xa89   : > { %1908 = vst [vmem:[#allocation2 + $0x78] sm:$0xf] %v1906_v3 }
 0xa8a   : > { %1907 = vst [vmem:[#allocation2 + $0x8] sm:$0xf] %v1905_v4 }
 0xa8f   : > { %1879 = vrot.lane.b32.xlu1 %v1835_v44, %s2502_s2  ;;  %1867 = vrot.lane.b32.xlu2 %v1835_v44, %s2504_s23 }
 0xa90   : > { %1897 = vrot.lane.b32.xlu0 %v1894_v45, %s2504_s23  ;;  %v1935_v47 = vld [vmem:[#allocation2 + $0x78] sm:$0xff] }
 0xa91   : > { %v1934_v43 = vld [vmem:[#allocation2 + $0x8] sm:$0xff] }
 0xa97   : > { %1845 = vrot.lane.b32.xlu2 %v1841_v59, %s2504_s23  ;;  %1859 = vrot.lane.b32.xlu1 %v1841_v59, %s2502_s2 }
 0xa98   : > { %1857 = vrot.lane.b32.xlu0 %v1842_v57, %s2502_s2 }
 0xa9f   : > { %1843 = vrot.lane.b32.xlu1 %v1842_v57, %s2504_s23  ;;  %v1929_v57 = vld [vmem:[#allocation2 + $0x110] sm:$0xff] }
 0xaa0   : > { %1869 = vrot.lane.b32.xlu0 %v1836_v55, %s2504_s23 }
 0xaa8   : > { %1951 = vperm.xlu0 %2293, %v1948_v26  }
 0xae1   : > { %v1896_v9 = vpop.permute.xlu2 %1895 }
 0xae9   : > { %v1868_v36 = vpop.permute.xlu2 %1867 }
 0xaf1   : > { %v1846_v48 = vpop.permute.xlu2 %1845 }
 0xaf9   : > { %v1912_v34 = vpop.permute.xlu1 %1911 }
 0xafa   : > { %v1910_v35 = vpop.permute.xlu0 %1909 }
 0xafb   : > { %v1913_v5 = vsel %vm742_vm2, %v1910_v35, %v1912_v34  ;;  %v1914_v6 = vsel %vm742_vm2, %v1912_v34, %v1910_v35  ;;  %v1919_v35 = vld [vmem:[%s3569_s18] sm:$0x3] }
 0xafc   : > { %v1915_v7 = vmul.f32 %v3165_v14, %v1913_v5  ;;  %v1916_v8 = vmul.f32 %v3168_v21, %v1914_v6 }
 0xafe   : > { %1917 = vst [vmem:[#allocation2 + $0x20] sm:$0xf] %v1915_v7 }
 0xaff   : > { %1918 = vst [vmem:[#allocation2 + $0xc8] sm:$0xf] %v1916_v8 }
 0xb01   : > { %v1880_v11 = vpop.permute.xlu1 %1879 }
 0xb02   : > { %v1883_v19 = vsel %vm742_vm2, %v1880_v11, %v1882_v27  ;;  %v1884_v10 = vsel %vm742_vm2, %v1882_v27, %v1880_v11  ;;  %v1898_v18 = vpop.permute.xlu0 %1897  ;;  %v1923_v27 = vld [vmem:[#allocation2 + $0x48] sm:$0xff] }
 0xb03   : > { %v1885_v16 = vmul.f32 %v1883_v19, %v2818_v50  ;;  %v1886_v17 = vmul.f32 %v1884_v10, %v2821_v51  ;;  %v1899_v14 = vsel %vm723_vm4, %v1896_v9, %v1898_v18  ;;  %v1900_v21 = vsel %vm723_vm4, %v1898_v18, %v1896_v9 }
 0xb04   : > { %v1901_v20 = vmul.f32 %v1900_v21, %v2831_v62  ;;  %v1902_v23 = vmul.f32 %v1899_v14, %v2841_v2 }
 0xb05   : > { %1887 = vst [vmem:[#allocation2 + $0x118] sm:$0xf] %v1885_v16  ;;  %v1936_v28 = vld [vmem:[#allocation2 + $0x20] sm:$0xff] }
 0xb06   : > { %1888 = vst [vmem:[#allocation2 + $0x98] sm:$0xf] %v1886_v17  ;;  %v1946_v29 = vpack.c.bf16 %v1936_v28, %v1936_v28  ;;  %v1937_v32 = vld [vmem:[#allocation2 + $0xc8] sm:$0xff] }
 0xb07   : > { %1903 = vst [vmem:[#allocation2 + $0xf8] sm:$0xf] %v1901_v20  ;;  %v1947_v50 = vpack.c.bf16 %v1937_v32, %v1937_v32 }
 0xb08   : > { %1904 = vst [vmem:[#allocation2 + $0x38] sm:$0xf] %v1902_v23  ;;  %v1958_v51 = vsel %vm873_vm3, %v1946_v29, 0 }
 0xb09   : > { %1966 = vmatpush.bf16.msrb.mxu1 %v1958_v51  ;;  %v1961_v37 = vsel %vm873_vm3, %v1947_v50, 0  ;;  %v1860_v38 = vpop.permute.xlu1 %1859 }
 0xb0a   : > { %1979 = vmatpush.bf16.msrb.mxu2 %v1961_v37  ;;  %v1858_v33 = vpop.permute.xlu0 %1857 }
 0xb0b   : > { %v1861_v62 = vsel %vm742_vm2, %v1858_v33, %v1860_v38  ;;  %v1862_v2 = vsel %vm742_vm2, %v1860_v38, %v1858_v33 }
 0xb0c   : > { %v1863_v39 = vmul.f32 %v1861_v62, %v2835_v0  ;;  %v1864_v40 = vmul.f32 %v1862_v2, %v2838_v1  ;;  %v1930_v15 = vld [vmem:[#allocation2 + $0x118] sm:$0xff] }
 0xb0d   : > { %v1931_v55 = vld [vmem:[#allocation2 + $0x98] sm:$0xff]  ;;  %v1942_v12 = vpack.c.bf16 %v1930_v15, %v1928_v13 }
 0xb0e   : > { %1865 = vst [vmem:[#allocation2 + $0x108] sm:$0xf] %v1863_v39  ;;  %v1932_v42 = vld [vmem:[#allocation2 + $0xf8] sm:$0xff]  ;;  %v1943_v25 = vpack.c.bf16 %v1931_v55, %v1929_v57 }
 0xb0f   : > { %1866 = vst [vmem:[#allocation2 + $0x68] sm:$0xf] %v1864_v40  ;;  %v1944_v41 = vpack.c.bf16 %v1934_v43, %v1932_v42  ;;  %v1933_v46 = vld [vmem:[#allocation2 + $0x38] sm:$0xff] }
 0xb10   : > { %v1945_v44 = vpack.c.bf16 %v1935_v47, %v1933_v46 }
 0xb11   : > { %1967 = vmatpush.bf16.msrb.mxu1 %v1944_v41  ;;  %v1844_v53 = vpop.permute.xlu1 %1843 }
 0xb12   : > { %1980 = vmatpush.bf16.msrb.mxu2 %v1945_v44  ;;  %v1870_v56 = vpop.permute.xlu0 %1869  ;;  %v1847_v0 = vsel %vm723_vm4, %v1844_v53, %v1846_v48  ;;  %v1848_v1 = vsel %vm723_vm4, %v1846_v48, %v1844_v53 }
 0xb13   : > { %v1871_v60 = vsel %vm723_vm4, %v1868_v36, %v1870_v56  ;;  %v1872_v54 = vsel %vm723_vm4, %v1870_v56, %v1868_v36  ;;  %v1849_v58 = vmul.f32 %v1848_v1, %v2878_v49  ;;  %v1850_v24 = vmul.f32 %v1847_v0, %v2881_v52  ;;  %v1922_v52 = vld [vmem:[#allocation2 + $0x10] sm:$0xff] }
 0xb14   : > { %v1873_v59 = vmul.f32 %v1872_v54, %v2862_v30  ;;  %v1874_v61 = vmul.f32 %v1871_v60, %v2865_v31 }
 0xb15   : > { %1851 = vst [vmem:[#allocation2 + $0xb0] sm:$0xf] %v1849_v58  ;;  %1968 = vmatpush.bf16.msrb.mxu1 %v1942_v12  ;;  %v1924_v45 = vld [vmem:[#allocation2 + $0x108] sm:$0xff] }
 0xb16   : > { %1875 = vst [vmem:[#allocation2 + $0x30] sm:$0xf] %v1873_v59  ;;  %1981 = vmatpush.bf16.msrb.mxu2 %v1943_v25  ;;  %v1925_v3 = vld [vmem:[#allocation2 + $0x68] sm:$0xff] }
 0xb17   : > { %1876 = vst [vmem:[#allocation2 + $0x18] sm:$0xf] %v1874_v61 }
 0xb18   : > { %1852 = vst [vmem:[#allocation2 + $0xd0] sm:$0xf] %v1850_v24 }
 0xb1c   : > { %v1920_v30 = vld [vmem:[#allocation2 + $0xb0] sm:$0xff] }
 0xb1d   : > { %v1926_v22 = vld [vmem:[#allocation2 + $0x30] sm:$0xff]  ;;  %v1938_v26 = vpack.c.bf16 %v1922_v52, %v1920_v30 }
 0xb1e   : > { %v1940_v63 = vpack.c.bf16 %v1926_v22, %v1924_v45  ;;  %v1927_v49 = vld [vmem:[#allocation2 + $0x18] sm:$0xff] }
 0xb1f   : > { %v1941_v4 = vpack.c.bf16 %v1927_v49, %v1925_v3  ;;  %v1921_v31 = vld [vmem:[#allocation2 + $0xd0] sm:$0xff] }
 0xb20   : > { %1969 = vmatpush.bf16.msrb.mxu1 %v1940_v63  ;;  %v1939_v34 = vpack.c.bf16 %v1923_v27, %v1921_v31 }
 0xb21   : > { %1982 = vmatpush.bf16.msrb.mxu2 %v1941_v4 }
 0xb24   : > { %1970 = vmatpush.bf16.msrb.mxu1 %v1938_v26 }
 0xb25   : > { %1983 = vmatpush.bf16.msrb.mxu2 %v1939_v34 }
 0xb27   : > { %2203 = vmatmul.msk.bf16.vlgmr.msrb.gmra.mxu1 %vm869_vm5, %v1919_v35 }
 0xb28   : > { %2204 = vmatmul.msk.bf16.vlgmr.msrb.gmra.mxu2 %vm869_vm5, %v1919_v35 }
 0xb29   : > { %2416 = shalt.err (!%p2413_p10)
}
 0xb2a   : > { %2225 = dma.vmem_to_hbm [thread:$0]  (%p2665_p0), %s2023_s25, 128, %s2025_s30, %s2004_s22   ;;  %v1952_v6 = vpop.permute.xlu0 %1951 }
 0xb2b   : > { %s3572_s18 = sld [smem:[#allocation35_spill]]  ;;  %s660_s29 = scalar_lea.vmem [#allocation10], %s2719_s14 }
 0xb2c   : > { %s2037_s16 = sshll.u32 %s660_s29, 4  ;;  %s2009_s25 = scalar_lea.sflag [#allocation11], %s2716_s12  ;;  %s2038_s16 = int_to_ptr.vmem [resolvable:$true] %s2037_s16 }
 0xb31   : > { %s2035_s27 = scalar_lea.hbm %s3572_s18, %s2215_s15  ;;  %s2437_s24 = scalar_lea.hbm %s3572_s18, 16 }
 0xb32   : > { %s2039_s19 = sshll.u32 %s2035_s27, 4  ;;  %s2040_s19 = int_to_ptr.hbm [resolvable:$true] %s2039_s19 }
 0xb33   : > { %s2431_s30 = sshra.s32 %s2040_s19, 4  ;;  %s2432_s30 = int_to_ptr.hbm [resolvable:$true] %s2431_s30 }
 0xb34   : > { %s2433_s15 = scalar_lea.hbm %s2432_s30, 8  ;;  %p2438_p2 = scmp.lt.s32.totalorder %s2432_s30, %s3572_s18 }
 0xb35   : > { %p2434_p12 = scmp.ne.s32.totalorder %s2432_s30, %s2433_s15  ;;  %p2439_p4 = scmp.lt.s32.totalorder %s2437_s24, %s2433_s15 }
 0xb37   : > { %p2435_p5 = pnand %p2434_p12, %p2665_p0  ;;  %p2440_p1 = por %p2439_p4, %p2438_p2 }
 0xb39   : > { %p2436_p11 = pneg %p2435_p5 }
 0xb3b   : > { %p2441_p3 = pnand %p2440_p1, %p2436_p11 }
 0xba4   : > { %v1972_v5 = vpop.f32.mrf.mxu1 }
 0xba5   : > { %v1973_v8 = vadd.f32 %v1972_v5, %v1952_v6 }
 0xba7   : > { %v1989_v10 = vmax.f32 %v1973_v8, 0.0 }
 0xbab   : > { %v1985_v7 = vpop.f32.mrf.mxu2 }
 0xbac   : > { %v1986_v9 = vadd.f32 %v1985_v7, %v1952_v6  ;;  %v1974_v11 = vpop.f32.mrf.mxu1 }
 0xbae   : > { %v1990_v19 = vmax.f32 %v1986_v9, 0.0 }
 0xbb0   : > { %v1999_v18 = vrot.slane %v1990_v19, 4 }
 0xbb2   : > { %v2000_v16 = vsel %vm873_vm3, %v1989_v10, %v1999_v18 }
 0xbb3   : > { %v1987_v17 = vpop.f32.mrf.mxu2  ;;  %2002 = vst [vmem:[%s660_s29] sm:$0xff] %v2000_v16 }
 0xbb4   : > { %2444 = shalt.err (!%p2441_p3)
}
 0xbb5   : > { %2226 = dma.vmem_to_hbm [thread:$0]  (%p2665_p0), %s2038_s16, 128, %s2040_s19, %s2009_s25  }
 0xbb6 PF: > { %s3573_s12 = sld [smem:[#allocation17_spill]] }
 0xbb7   : > { %s3575_s13 = sld [smem:[#allocation19_spill]] }
 0xbbc   : > { %s2051_s2 = sand.u32 1, %s3573_s12  }
 0xbbd   : > { %p3576_p13 = scmp.ge.s32.totalorder %s3575_s13, 2  ;;  %s2052_s1 = scalar_lea.sflag [#allocation5], %s2051_s2 }
 0xbbf   : > { %p2241_p7 = pnand %p3576_p13, %p2671_p6 }
 0xbc1   : > { %p2242_p9 = pneg %p2241_p7 }
 0xbc3   : > { %2474 = dma.done.wait (%p2242_p9), %s2052_s1, 128  }
 0xbc4   : > { %2476 = vsyncadd (%p2242_p9), %s2052_s1, 4294967168  ;;  %s2062_s23 = scalar_lea.sflag [#allocation11], %s2051_s2 }
 0xbc5   : > { %2478 = dma.done.wait (%p2242_p9), %s2062_s23, 128  }
 0xbc6   : > { %2480 = vsyncadd (%p2242_p9), %s2062_s23, 4294967168  ;;  %s3577_s30 = sld [smem:[#allocation20_spill]]  ;;  %s3580_s27 = smov %s2487_s28 }
 0xbc7   : > { %s3578_s29 = sld [smem:[#allocation18_spill]] }
 0xbc8   : > { %s3579_s0 = sld [smem:[#allocation21_spill]] }
 0xbcc   : > { %p38_p0 = scmp.ge.s32.totalorder %s3577_s30, 4  }
 0xbcd   : > { %s3581_s28 = smov %s3578_s29 }
 0xbce   : > { %s3582_s29 = smov %s3579_s0  ;;  %40 = sbr.rel (!%p38_p0) target bundleno = 22 (0x16), region = 167 }
 0xbd3   :  { %2068 = vsyncpa [#allocation4], 1 }
 0xbd4   :  { %2070 = vsyncpa [#allocation4 + $0x1], 1 }
 0xbd5   :  { %2071 = vsyncpa [#allocation7], 1 }
 0xbd6   :  { %2073 = vsyncpa [#allocation7 + $0x1], 1 }
 0xbd7   :  { %2074 = vsyncpa [#allocation5], 1 }
 0xbd8   :  { %2076 = vsyncpa [#allocation5 + $0x1], 1 }
 0xbd9   :  { %2077 = vsyncpa [#allocation11], 1 }
 0xbda   :  { %2079 = vsyncpa [#allocation11 + $0x1], 1 }

</bundles_post_ra>
